<compile_context>
chip_gen: v5e
topology: v5e:2x2
jax: 0.10.0
libtpu: 0.0.40
codegen_flags: <defaults>
</compile_context>

<pallas_src>
import jax
import jax.numpy as jnp
from jax import lax
from jax.experimental import pallas as pl
from jax.experimental.pallas import tpu as pltpu

NEG_SLOPE = 0.01   # nn.LeakyReLU default negative_slope
IN_EPS = 1e-5      # nn.InstanceNorm2d default eps

# ---- model hyper-parameters (consistent with the module's __init__) ----
INPUT_CHANNELS = 4
N_STAGES = 3
FEATURES = [8, 16, 32]
KERNEL_SIZES = [3, 3, 3]
STRIDES = [1, 2, 2]
NUM_CLASSES = 2

_VMEM_LIMIT_CACHE = []


def _vmem_limit_bytes():
    """Per-generation VMEM budget: ~3/4 of physical VMEM (v5e/v6e 128 MiB, v7x 64 MiB)."""
    if not _VMEM_LIMIT_CACHE:
        try:
            cap = int(pltpu.get_tpu_info().vmem_capacity_bytes)
            lim = min(cap * 3 // 4, 96 * 1024 * 1024)
        except Exception:
            lim = 32 * 1024 * 1024      # conservative known-good fallback
        _VMEM_LIMIT_CACHE.append(int(lim))
    return _VMEM_LIMIT_CACHE[0]


# ---------------------------- fused Pallas kernel ----------------------------

def _make_fused_kernel(tap_offsets, k_per_tap, cols, use_norm, use_mask, act,
                       has_res, has_bias, inv_count):
    """Fused conv layer, spatial-on-lanes layout.

    y(Cout, cols) = sum_t W_t(Cout,k) @ X[:, off_t:off_t+cols]   (bf16 MXU, f32 accumulate)
    then [+bias] -> [InstanceNorm(+affine), stats masked to valid columns] -> [+residual]
    -> [LeakyReLU] -> store (bf16 or f32).
    """
    bias_col = 2 if use_norm else 0

    def kernel(*refs):
        it = iter(refs)
        x_ref = next(it)                                  # (1, Cin_or_K, Lp) bf16
        w_ref = next(it)                                  # (Cout, n_taps*k) bf16
        c_ref = next(it) if (use_norm or has_bias) else None   # (Cout, nc) f32
        m_ref = next(it) if use_mask else None            # (1, cols) f32 validity mask
        r_ref = next(it) if has_res else None             # (1, Cout, cols) bf16 residual
        o_ref = next(it)                                  # (1, Cout, cols)

        x = x_ref[0]                                      # (Cin, Lp)
        w = w_ref[...]                                    # (Cout, n_taps*k)

        y = None
        for t, off in enumerate(tap_offsets):             # unrolled tap accumulation
            wt = w[:, t * k_per_tap:(t + 1) * k_per_tap]
            xt = x[:, off:off + cols]
            part = jnp.dot(wt, xt, preferred_element_type=jnp.float32)
            y = part if y is None else y + part

        if has_bias:
            y = y + c_ref[:, bias_col:bias_col + 1]
        if use_norm:
            # InstanceNorm2d: per (image, channel) biased stats over valid spatial columns.
            if use_mask:
                msk = m_ref[...]                                        # (1, cols)
                mean = jnp.sum(y * msk, axis=1, keepdims=True) * inv_count
                yc = y - mean
                var = jnp.sum(yc * yc * msk, axis=1, keepdims=True) * inv_count
            else:
                mean = jnp.mean(y, axis=1, keepdims=True)
                yc = y - mean
                var = jnp.mean(yc * yc, axis=1, keepdims=True)
            y = yc * lax.rsqrt(var + IN_EPS)
            y = y * c_ref[:, 0:1] + c_ref[:, 1:2]                       # affine
        if has_res:
            y = y + r_ref[0].astype(jnp.float32)
        if act:
            y = jnp.where(y >= 0, y, y * NEG_SLOPE)
        o_ref[0] = y.astype(o_ref.dtype)

    return kernel


def _fused_conv_call(x, w, *, cols, tap_offsets=(0,), k_per_tap=None,
                     gamma=None, beta=None, bias=None, mask=None, norm_count=None,
                     residual=None, act=True, out_dtype=jnp.bfloat16):
    """x: (N, Cin_or_K, Lp) bf16;  w: (Cout, n_taps*k) bf16;  returns (N, Cout, cols).

    Grid over the batch dimension ("parallel" -> both v7x TensorCores); one image per step.
    All blocks span the full last-two dims, so no (8,128) divisibility constraints apply.
    """
    N = x.shape[0]
    Cout = w.shape[0]
    use_norm = gamma is not None
    has_bias = bias is not None
    has_res = residual is not None
    use_mask = mask is not None
    if k_per_tap is None:
        k_per_tap = w.shape[1] // len(tap_offsets)
    inv_count = 1.0 / float(norm_count) if use_mask else 1.0

    in_specs = [pl.BlockSpec((1,) + x.shape[1:], lambda n: (n, 0, 0)),
                pl.BlockSpec(w.shape, lambda n: (0, 0))]
    args = [x, w]

    if use_norm or has_bias:
        cols_list = []
        if use_norm:
            cols_list += [gamma, beta]
        if has_bias:
            cols_list += [bias]
        consts = jnp.stack([c.reshape(Cout).astype(jnp.float32) for c in cols_list], axis=1)
        in_specs.append(pl.BlockSpec(consts.shape, lambda n: (0, 0)))
        args.append(consts)
    if use_mask:
        in_specs.append(pl.BlockSpec((1, cols), lambda n: (0, 0)))
        args.append(mask.reshape(1, cols).astype(jnp.float32))
    if has_res:
        in_specs.append(pl.BlockSpec((1, Cout, cols), lambda n: (n, 0, 0)))
        args.append(residual.astype(jnp.bfloat16))

    kern = _make_fused_kernel(tuple(tap_offsets), k_per_tap, cols, use_norm, use_mask,
                              act, has_res, has_bias, inv_count)
    return pl.pallas_call(
        kern,
        out_shape=jax.ShapeDtypeStruct((N, Cout, cols), out_dtype),
        grid=(N,),
        in_specs=in_specs,
        out_specs=pl.BlockSpec((1, Cout, cols), lambda n: (n, 0, 0)),
        compiler_params=pltpu.CompilerParams(
            dimension_semantics=("parallel",),
            vmem_limit_bytes=_vmem_limit_bytes()),
    )(*args)


# ---------------------------- conv wrappers ----------------------------

def conv3x3_s1(x, w_pt, gamma, beta, *, residual=None, act=True):
    """3x3 stride-1 conv (pad 1) + InstanceNorm [+residual] [+LeakyReLU], NCHW.

    No im2col: the zero-padded image is passed once as a flat (Cin, Hp*Wp) block and the
    kernel accumulates 9 shifted-slice matmuls (spatial on lanes).  Columns whose w-index
    falls in the pad region are garbage and are excluded from the IN statistics via a mask,
    then sliced off outside."""
    N, Cin, H, W = x.shape
    Cout = w_pt.shape[0]
    Hp, Wp = H + 2, W + 2
    cols = H * Wp
    xp = jnp.pad(x, ((0, 0), (0, 0), (1, 1), (1, 1))).reshape(N, Cin, Hp * Wp)
    xp = jnp.pad(xp, ((0, 0), (0, 0), (0, 2)))               # room for the last tap shift
    xp = xp.astype(jnp.bfloat16)
    wmat = jnp.transpose(w_pt, (0, 2, 3, 1)).reshape(Cout, 9 * Cin).astype(jnp.bfloat16)
    tap_offsets = tuple(dy * Wp + dx for dy in range(3) for dx in range(3))
    colidx = jnp.arange(cols)
    mask = ((colidx % Wp) < W).astype(jnp.float32).reshape(1, cols)   # constant-folded by XLA
    res = None
    if residual is not None:
        res = jnp.pad(residual, ((0, 0), (0, 0), (0, 0), (0, Wp - W))).reshape(N, Cout, cols)
    out = _fused_conv_call(xp, wmat, cols=cols, tap_offsets=tap_offsets, k_per_tap=Cin,
                           gamma=gamma, beta=beta, mask=mask, norm_count=H * W,
                           residual=res, act=act)
    return out.reshape(N, Cout, H, Wp)[:, :, :, :W]


def conv_im2col(x, w_pt, stride, *, gamma=None, beta=None, bias=None, act=True,
                out_dtype=jnp.bfloat16):
    """General conv (stride-2 encoder convs, 1x1 heads): XLA patch extraction into a
    (K, Ho*Wo) matrix (spatial on lanes) + one fused matmul/epilogue Pallas call."""
    N, Cin, H, W = x.shape
    Cout, _, kh, kw = w_pt.shape
    pad = (kh - 1) // 2
    Ho = (H + 2 * pad - kh) // stride + 1
    Wo = (W + 2 * pad - kw) // stride + 1
    xpad = jnp.pad(x, ((0, 0), (0, 0), (pad, pad), (pad, pad)))
    taps = []
    for dy in range(kh):
        for dx in range(kw):
            taps.append(xpad[:, :, dy:dy + stride * (Ho - 1) + 1:stride,
                             dx:dx + stride * (Wo - 1) + 1:stride])
    pmat = jnp.concatenate(taps, axis=1).reshape(N, kh * kw * Cin, Ho * Wo).astype(jnp.bfloat16)
    wmat = jnp.transpose(w_pt, (0, 2, 3, 1)).reshape(Cout, kh * kw * Cin).astype(jnp.bfloat16)
    out = _fused_conv_call(pmat, wmat, cols=Ho * Wo, gamma=gamma, beta=beta, bias=bias,
                           act=act, out_dtype=out_dtype)
    return out.reshape(N, Cout, Ho, Wo)


def skip_pool_proj(x, w1x1_pt, gamma, beta):
    """BasicBlockD skip path: AvgPool2d(2,2) + 1x1 conv + InstanceNorm folded into ONE fused
    call.  pool + 1x1 conv == a 2x2/stride-2 conv whose 4 taps all carry W1x1 * 0.25."""
    # NOTE: only valid for pool kernel == stride == 2 (this config's strides are [1,2,2]).
    N, Cin, H, W = x.shape
    Cout = w1x1_pt.shape[0]
    Ho, Wo = H // 2, W // 2
    taps = []
    for dy in range(2):
        for dx in range(2):
            taps.append(x[:, :, dy::2, dx::2])
    pmat = jnp.concatenate(taps, axis=1).reshape(N, 4 * Cin, Ho * Wo).astype(jnp.bfloat16)
    w1 = w1x1_pt.reshape(Cout, Cin)
    wmat = jnp.tile(w1 * 0.25, (1, 4)).astype(jnp.bfloat16)
    out = _fused_conv_call(pmat, wmat, cols=Ho * Wo, gamma=gamma, beta=beta, act=False)
    return out.reshape(N, Cout, Ho, Wo)


def conv_transpose(x, w_pt, stride):
    """ConvTranspose2d with kernel == stride (non-overlapping), bias=False.
    One fused Pallas matmul + XLA pixel-shuffle glue.  w_pt layout (Cin, Cout, kh, kw)."""
    # TODO(synk): fold the pixel-shuffle interleave into the kernel / output index_map.
    N, Cin, H, W = x.shape
    _, Cout, kh, kw = w_pt.shape
    xm = x.reshape(N, Cin, H * W).astype(jnp.bfloat16)
    wmat = jnp.transpose(w_pt, (2, 3, 1, 0)).reshape(kh * kw * Cout, Cin).astype(jnp.bfloat16)
    out = _fused_conv_call(xm, wmat, cols=H * W, act=False)          # (N, kh*kw*Cout, H*W)
    out = out.reshape(N, kh, kw, Cout, H, W)
    out = out.transpose(0, 3, 4, 1, 5, 2).reshape(N, Cout, H * kh, W * kw)
    return out


# ---------------------------- network building blocks ----------------------------

def basic_block_d(x, p, stride):
    """BasicBlockD: conv1(+norm+act) -> conv2(+norm) -> + skip -> LeakyReLU.
    conv2 / norm / residual-add / activation run in ONE fused pallas_call."""
    # TODO(synk): fuse the whole block into one pallas_call once h is kept VMEM-resident.
    in_c = x.shape[1]
    out_c = p['conv1']['w'].shape[0]
    if stride == 1:
        h = conv3x3_s1(x, p['conv1']['w'], p['conv1']['g'], p['conv1']['b'], act=True)
    else:
        h = conv_im2col(x, p['conv1']['w'], stride, gamma=p['conv1']['g'],
                        beta=p['conv1']['b'], act=True)
    if stride != 1 or in_c != out_c:
        if stride != 1:
            res = skip_pool_proj(x, p['skip']['w'], p['skip']['g'], p['skip']['b'])
        else:
            res = conv_im2col(x, p['skip']['w'], 1, gamma=p['skip']['g'],
                              beta=p['skip']['b'], act=False)
    else:
        res = x
    return conv3x3_s1(h, p['conv2']['w'], p['conv2']['g'], p['conv2']['b'],
                      residual=res, act=True)


def residual_encoder_unet_forward(x_nchw, params):
    x = x_nchw.astype(jnp.float32)      # stays NCHW end-to-end (spatial lives on TPU lanes)

    # ---- ResidualEncoder ----
    x = conv3x3_s1(x, params['stem']['w'], params['stem']['g'], params['stem']['b'],
                   act=True)                                   # stem: StackedConvBlocks(1)
    skips = []
    for s in range(N_STAGES):
        x = basic_block_d(x, params['stages'][s], STRIDES[s])
        skips.append(x)

    # ---- UNetDecoder (deep_supervision=False -> only final seg layer) ----
    lres = skips[-1]
    for s, d in enumerate(params['decoder']):
        up = conv_transpose(lres, d['transp_w'], STRIDES[-(s + 1)])
        xcat = jnp.concatenate([up, skips[-(s + 2)]], axis=1)  # channel concat: XLA glue
        lres = conv3x3_s1(xcat, d['conv']['w'], d['conv']['g'], d['conv']['b'], act=True)
    seg = params['seg']
    out = conv_im2col(lres, seg['w'], 1, bias=seg['b'], act=False,
                      out_dtype=jnp.float32)                   # 1x1 seg conv, bias=True
    return out                                                 # already NCHW


# ---------------------------- deterministic parameter init ----------------------------

def init_params(key):
    ks = iter(jax.random.split(key, 128))

    def conv_w(shape):  # (Cout, Cin, kh, kw), He-style scale
        fan_in = shape[1] * shape[2] * shape[3]
        return jax.random.normal(next(ks), shape, jnp.float32) * (2.0 / fan_in) ** 0.5

    def norm(c):
        return {'g': 1.0 + 0.05 * jax.random.normal(next(ks), (c,), jnp.float32),
                'b': 0.05 * jax.random.normal(next(ks), (c,), jnp.float32)}

    def cna(cout, cin, k):
        d = {'w': conv_w((cout, cin, k, k))}
        d.update(norm(cout))
        return d

    params = {'stem': cna(FEATURES[0], INPUT_CHANNELS, KERNEL_SIZES[0])}

    stages = []
    in_c = FEATURES[0]
    for s in range(N_STAGES):
        out_c = FEATURES[s]
        blk = {'conv1': cna(out_c, in_c, KERNEL_SIZES[s]),
               'conv2': cna(out_c, out_c, KERNEL_SIZES[s])}
        if STRIDES[s] != 1 or in_c != out_c:
            blk['skip'] = cna(out_c, in_c, 1)
        stages.append(blk)
        in_c = out_c
    params['stages'] = stages

    decoder = []
    for s in range(1, N_STAGES):
        feat_below = FEATURES[-s]
        feat_skip = FEATURES[-(s + 1)]
        st = STRIDES[-s]
        tw = jax.random.normal(next(ks), (feat_below, feat_skip, st, st), jnp.float32) \
             * (2.0 / (feat_below * st * st)) ** 0.5
        decoder.append({'transp_w': tw,
                        'conv': cna(feat_skip, 2 * feat_skip, KERNEL_SIZES[-(s + 1)])})
    params['decoder'] = decoder

    params['seg'] = {'w': conv_w((NUM_CLASSES, FEATURES[0], 1, 1)),
                     'b': 0.01 * jax.random.normal(next(ks), (NUM_CLASSES,), jnp.float32)}
    return params


if __name__ == "__main__":
    key = jax.random.PRNGKey(0)
    kx, kp = jax.random.split(key)
    x = jax.random.normal(kx, (2, INPUT_CHANNELS, 16, 16), jnp.float32)   # NCHW like PyTorch
    params = init_params(kp)

    fwd = jax.jit(residual_encoder_unet_forward)
    out = fwd(x, params)
    out = jax.block_until_ready(out)

    assert out.shape == (2, NUM_CLASSES, 16, 16), out.shape
    assert jnp.all(jnp.isfinite(out))
    print("KERNEL_OK")
</pallas_src>

<mosaic_0001>
module attributes {stable_mosaic.version = 11 : i64} {
  func.func @kernel(%arg0: i32, %arg1: memref<1x4x326xbf16, #tpu.memory_space<vmem>>, %arg2: memref<8x36xbf16, #tpu.memory_space<vmem>>, %arg3: memref<8x2xf32, #tpu.memory_space<vmem>>, %arg4: memref<1x288xf32, #tpu.memory_space<vmem>>, %arg5: memref<1x8x288xbf16, #tpu.memory_space<vmem>>) attributes {dimension_semantics = [#tpu.dimension_semantics<parallel>], iteration_bounds = array<i64: 2>, scalar_prefetch = 0 : i64, scratch_operands = 0 : i64, tpu.core_type = #tpu.core_type<tc>, window_params = [{transform_indices = @transform_0, window_bounds = array<i64: 1, 4, 326>}, {pipeline_mode = #tpu.pipeline_mode<synchronous>, transform_indices = @transform_1, window_bounds = array<i64: 8, 36>}, {pipeline_mode = #tpu.pipeline_mode<synchronous>, transform_indices = @transform_2, window_bounds = array<i64: 8, 2>}, {pipeline_mode = #tpu.pipeline_mode<synchronous>, transform_indices = @transform_3, window_bounds = array<i64: 1, 288>}, {transform_indices = @transform_4, window_bounds = array<i64: 1, 8, 288>}]} {
    %c0 = arith.constant 0 : index
    %c0_0 = arith.constant 0 : index
    %c0_1 = arith.constant 0 : index
    %0 = vector.load %arg1[%c0, %c0_0, %c0_1] : memref<1x4x326xbf16, #tpu.memory_space<vmem>>, vector<1x4x326xbf16>
    %1 = vector.shape_cast %0 : vector<1x4x326xbf16> to vector<4x326xbf16>
    %c0_2 = arith.constant 0 : index
    %c0_3 = arith.constant 0 : index
    %2 = vector.load %arg2[%c0_2, %c0_3] : memref<8x36xbf16, #tpu.memory_space<vmem>>, vector<8x36xbf16>
    %3 = vector.extract_strided_slice %2 {offsets = [0, 0], sizes = [8, 4], strides = [1, 1]} : vector<8x36xbf16> to vector<8x4xbf16>
    %4 = vector.extract_strided_slice %1 {offsets = [0, 0], sizes = [4, 288], strides = [1, 1]} : vector<4x326xbf16> to vector<4x288xbf16>
    %cst = arith.constant dense<0.000000e+00> : vector<8x288xf32>
    %5 = tpu.matmul %3, %4, %cst {dimension_numbers = #tpu.dot_dimension_numbers<[1], [0], [0], [1], [0, 0, 1, 1], [], []>} : vector<8x4xbf16>, vector<4x288xbf16>, vector<8x288xf32> -> vector<8x288xf32>
    %6 = vector.extract_strided_slice %2 {offsets = [0, 4], sizes = [8, 4], strides = [1, 1]} : vector<8x36xbf16> to vector<8x4xbf16>
    %7 = vector.extract_strided_slice %1 {offsets = [0, 1], sizes = [4, 288], strides = [1, 1]} : vector<4x326xbf16> to vector<4x288xbf16>
    %cst_4 = arith.constant dense<0.000000e+00> : vector<8x288xf32>
    %8 = tpu.matmul %6, %7, %cst_4 {dimension_numbers = #tpu.dot_dimension_numbers<[1], [0], [0], [1], [0, 0, 1, 1], [], []>} : vector<8x4xbf16>, vector<4x288xbf16>, vector<8x288xf32> -> vector<8x288xf32>
    %9 = arith.addf %5, %8 : vector<8x288xf32>
    %10 = vector.extract_strided_slice %2 {offsets = [0, 8], sizes = [8, 4], strides = [1, 1]} : vector<8x36xbf16> to vector<8x4xbf16>
    %11 = vector.extract_strided_slice %1 {offsets = [0, 2], sizes = [4, 288], strides = [1, 1]} : vector<4x326xbf16> to vector<4x288xbf16>
    %cst_5 = arith.constant dense<0.000000e+00> : vector<8x288xf32>
    %12 = tpu.matmul %10, %11, %cst_5 {dimension_numbers = #tpu.dot_dimension_numbers<[1], [0], [0], [1], [0, 0, 1, 1], [], []>} : vector<8x4xbf16>, vector<4x288xbf16>, vector<8x288xf32> -> vector<8x288xf32>
    %13 = arith.addf %9, %12 : vector<8x288xf32>
    %14 = vector.extract_strided_slice %2 {offsets = [0, 12], sizes = [8, 4], strides = [1, 1]} : vector<8x36xbf16> to vector<8x4xbf16>
    %15 = vector.extract_strided_slice %1 {offsets = [0, 18], sizes = [4, 288], strides = [1, 1]} : vector<4x326xbf16> to vector<4x288xbf16>
    %cst_6 = arith.constant dense<0.000000e+00> : vector<8x288xf32>
    %16 = tpu.matmul %14, %15, %cst_6 {dimension_numbers = #tpu.dot_dimension_numbers<[1], [0], [0], [1], [0, 0, 1, 1], [], []>} : vector<8x4xbf16>, vector<4x288xbf16>, vector<8x288xf32> -> vector<8x288xf32>
    %17 = arith.addf %13, %16 : vector<8x288xf32>
    %18 = vector.extract_strided_slice %2 {offsets = [0, 16], sizes = [8, 4], strides = [1, 1]} : vector<8x36xbf16> to vector<8x4xbf16>
    %19 = vector.extract_strided_slice %1 {offsets = [0, 19], sizes = [4, 288], strides = [1, 1]} : vector<4x326xbf16> to vector<4x288xbf16>
    %cst_7 = arith.constant dense<0.000000e+00> : vector<8x288xf32>
    %20 = tpu.matmul %18, %19, %cst_7 {dimension_numbers = #tpu.dot_dimension_numbers<[1], [0], [0], [1], [0, 0, 1, 1], [], []>} : vector<8x4xbf16>, vector<4x288xbf16>, vector<8x288xf32> -> vector<8x288xf32>
    %21 = arith.addf %17, %20 : vector<8x288xf32>
    %22 = vector.extract_strided_slice %2 {offsets = [0, 20], sizes = [8, 4], strides = [1, 1]} : vector<8x36xbf16> to vector<8x4xbf16>
    %23 = vector.extract_strided_slice %1 {offsets = [0, 20], sizes = [4, 288], strides = [1, 1]} : vector<4x326xbf16> to vector<4x288xbf16>
    %cst_8 = arith.constant dense<0.000000e+00> : vector<8x288xf32>
    %24 = tpu.matmul %22, %23, %cst_8 {dimension_numbers = #tpu.dot_dimension_numbers<[1], [0], [0], [1], [0, 0, 1, 1], [], []>} : vector<8x4xbf16>, vector<4x288xbf16>, vector<8x288xf32> -> vector<8x288xf32>
    %25 = arith.addf %21, %24 : vector<8x288xf32>
    %26 = vector.extract_strided_slice %2 {offsets = [0, 24], sizes = [8, 4], strides = [1, 1]} : vector<8x36xbf16> to vector<8x4xbf16>
    %27 = vector.extract_strided_slice %1 {offsets = [0, 36], sizes = [4, 288], strides = [1, 1]} : vector<4x326xbf16> to vector<4x288xbf16>
    %cst_9 = arith.constant dense<0.000000e+00> : vector<8x288xf32>
    %28 = tpu.matmul %26, %27, %cst_9 {dimension_numbers = #tpu.dot_dimension_numbers<[1], [0], [0], [1], [0, 0, 1, 1], [], []>} : vector<8x4xbf16>, vector<4x288xbf16>, vector<8x288xf32> -> vector<8x288xf32>
    %29 = arith.addf %25, %28 : vector<8x288xf32>
    %30 = vector.extract_strided_slice %2 {offsets = [0, 28], sizes = [8, 4], strides = [1, 1]} : vector<8x36xbf16> to vector<8x4xbf16>
    %31 = vector.extract_strided_slice %1 {offsets = [0, 37], sizes = [4, 288], strides = [1, 1]} : vector<4x326xbf16> to vector<4x288xbf16>
    %cst_10 = arith.constant dense<0.000000e+00> : vector<8x288xf32>
    %32 = tpu.matmul %30, %31, %cst_10 {dimension_numbers = #tpu.dot_dimension_numbers<[1], [0], [0], [1], [0, 0, 1, 1], [], []>} : vector<8x4xbf16>, vector<4x288xbf16>, vector<8x288xf32> -> vector<8x288xf32>
    %33 = arith.addf %29, %32 : vector<8x288xf32>
    %34 = vector.extract_strided_slice %2 {offsets = [0, 32], sizes = [8, 4], strides = [1, 1]} : vector<8x36xbf16> to vector<8x4xbf16>
    %35 = vector.extract_strided_slice %1 {offsets = [0, 38], sizes = [4, 288], strides = [1, 1]} : vector<4x326xbf16> to vector<4x288xbf16>
    %cst_11 = arith.constant dense<0.000000e+00> : vector<8x288xf32>
    %36 = tpu.matmul %34, %35, %cst_11 {dimension_numbers = #tpu.dot_dimension_numbers<[1], [0], [0], [1], [0, 0, 1, 1], [], []>} : vector<8x4xbf16>, vector<4x288xbf16>, vector<8x288xf32> -> vector<8x288xf32>
    %37 = arith.addf %33, %36 : vector<8x288xf32>
    %c0_12 = arith.constant 0 : index
    %c0_13 = arith.constant 0 : index
    %38 = vector.load %arg4[%c0_12, %c0_13] : memref<1x288xf32, #tpu.memory_space<vmem>>, vector<1x288xf32>
    %39 = vector.broadcast %38 : vector<1x288xf32> to vector<8x288xf32>
    %40 = arith.mulf %37, %39 : vector<8x288xf32>
    %cst_14 = arith.constant dense<0.000000e+00> : vector<8xf32>
    %41 = vector.multi_reduction <add>, %40, %cst_14 [1] : vector<8x288xf32> to vector<8xf32>
    %42 = vector.shape_cast %41 : vector<8xf32> to vector<8x1xf32>
    %cst_15 = arith.constant 3.906250e-03 : f32
    %43 = vector.broadcast %cst_15 : f32 to vector<8x1xf32>
    %44 = arith.mulf %42, %43 : vector<8x1xf32>
    %45 = vector.broadcast %44 : vector<8x1xf32> to vector<8x288xf32>
    %46 = arith.subf %37, %45 : vector<8x288xf32>
    %47 = arith.mulf %46, %46 : vector<8x288xf32>
    %48 = vector.broadcast %38 : vector<1x288xf32> to vector<8x288xf32>
    %49 = arith.mulf %47, %48 : vector<8x288xf32>
    %cst_16 = arith.constant dense<0.000000e+00> : vector<8xf32>
    %50 = vector.multi_reduction <add>, %49, %cst_16 [1] : vector<8x288xf32> to vector<8xf32>
    %51 = vector.shape_cast %50 : vector<8xf32> to vector<8x1xf32>
    %cst_17 = arith.constant 3.906250e-03 : f32
    %52 = vector.broadcast %cst_17 : f32 to vector<8x1xf32>
    %53 = arith.mulf %51, %52 : vector<8x1xf32>
    %cst_18 = arith.constant 9.99999974E-6 : f32
    %54 = vector.broadcast %cst_18 : f32 to vector<8x1xf32>
    %55 = arith.addf %53, %54 : vector<8x1xf32>
    %56 = math.rsqrt %55 : vector<8x1xf32>
    %57 = vector.broadcast %56 : vector<8x1xf32> to vector<8x288xf32>
    %58 = arith.mulf %46, %57 : vector<8x288xf32>
    %c0_19 = arith.constant 0 : index
    %c0_20 = arith.constant 0 : index
    %59 = vector.load %arg3[%c0_19, %c0_20] : memref<8x2xf32, #tpu.memory_space<vmem>>, vector<8x1xf32>
    %60 = vector.broadcast %59 : vector<8x1xf32> to vector<8x288xf32>
    %61 = arith.mulf %58, %60 : vector<8x288xf32>
    %c0_21 = arith.constant 0 : index
    %c1 = arith.constant 1 : index
    %62 = vector.load %arg3[%c0_21, %c1] : memref<8x2xf32, #tpu.memory_space<vmem>>, vector<8x1xf32>
    %63 = vector.broadcast %62 : vector<8x1xf32> to vector<8x288xf32>
    %64 = arith.addf %61, %63 : vector<8x288xf32>
    %cst_22 = arith.constant 0.000000e+00 : f32
    %65 = vector.broadcast %cst_22 : f32 to vector<8x288xf32>
    %66 = arith.cmpf oge, %64, %65 : vector<8x288xf32>
    %cst_23 = arith.constant 0.00999999977 : f32
    %67 = vector.broadcast %cst_23 : f32 to vector<8x288xf32>
    %68 = arith.mulf %64, %67 : vector<8x288xf32>
    %69 = arith.select %66, %64, %68 : vector<8x288xi1>, vector<8x288xf32>
    %70 = arith.truncf %69 : vector<8x288xf32> to vector<8x288xbf16>
    %c0_24 = arith.constant 0 : index
    %c0_25 = arith.constant 0 : index
    %c0_26 = arith.constant 0 : index
    %71 = vector.load %arg5[%c0_24, %c0_25, %c0_26] : memref<1x8x288xbf16, #tpu.memory_space<vmem>>, vector<1x8x288xbf16>
    %72 = vector.shape_cast %71 : vector<1x8x288xbf16> to vector<8x288xbf16>
    %73 = vector.shape_cast %70 : vector<8x288xbf16> to vector<1x8x288xbf16>
    tpu.vector_store %arg5[%c0_24, %c0_25, %c0_26], %73 {strides = array<i32>} : memref<1x8x288xbf16, #tpu.memory_space<vmem>>, vector<1x8x288xbf16>,
    return
  }
  func.func @transform_0(%arg0: i32) -> (i32, i32, i32) {
    %c0_i32 = arith.constant 0 : i32
    %c0_i32_0 = arith.constant 0 : i32
    %c0_i32_1 = arith.constant 0 : i32
    return %arg0, %c0_i32, %c0_i32_0 : i32, i32, i32
  }
  func.func @transform_1(%arg0: i32) -> (i32, i32) {
    %c0_i32 = arith.constant 0 : i32
    %c0_i32_0 = arith.constant 0 : i32
    %c0_i32_1 = arith.constant 0 : i32
    return %c0_i32, %c0_i32_0 : i32, i32
  }
  func.func @transform_2(%arg0: i32) -> (i32, i32) {
    %c0_i32 = arith.constant 0 : i32
    %c0_i32_0 = arith.constant 0 : i32
    %c0_i32_1 = arith.constant 0 : i32
    return %c0_i32, %c0_i32_0 : i32, i32
  }
  func.func @transform_3(%arg0: i32) -> (i32, i32) {
    %c0_i32 = arith.constant 0 : i32
    %c0_i32_0 = arith.constant 0 : i32
    %c0_i32_1 = arith.constant 0 : i32
    return %c0_i32, %c0_i32_0 : i32, i32
  }
  func.func @transform_4(%arg0: i32) -> (i32, i32, i32) {
    %c0_i32 = arith.constant 0 : i32
    %c0_i32_0 = arith.constant 0 : i32
    %c0_i32_1 = arith.constant 0 : i32
    return %arg0, %c0_i32, %c0_i32_0 : i32, i32, i32
  }
}

module attributes {stable_mosaic.version = 11 : i64} {
  func.func @kernel(%arg0: i32, %arg1: memref<1x8x326xbf16, #tpu.memory_space<vmem>>, %arg2: memref<8x72xbf16, #tpu.memory_space<vmem>>, %arg3: memref<8x2xf32, #tpu.memory_space<vmem>>, %arg4: memref<1x288xf32, #tpu.memory_space<vmem>>, %arg5: memref<1x8x288xbf16, #tpu.memory_space<vmem>>) attributes {dimension_semantics = [#tpu.dimension_semantics<parallel>], iteration_bounds = array<i64: 2>, scalar_prefetch = 0 : i64, scratch_operands = 0 : i64, tpu.core_type = #tpu.core_type<tc>, window_params = [{transform_indices = @transform_0, window_bounds = array<i64: 1, 8, 326>}, {pipeline_mode = #tpu.pipeline_mode<synchronous>, transform_indices = @transform_1, window_bounds = array<i64: 8, 72>}, {pipeline_mode = #tpu.pipeline_mode<synchronous>, transform_indices = @transform_2, window_bounds = array<i64: 8, 2>}, {pipeline_mode = #tpu.pipeline_mode<synchronous>, transform_indices = @transform_3, window_bounds = array<i64: 1, 288>}, {transform_indices = @transform_4, window_bounds = array<i64: 1, 8, 288>}]} {
    %c0 = arith.constant 0 : index
    %c0_0 = arith.constant 0 : index
    %c0_1 = arith.constant 0 : index
    %0 = vector.load %arg1[%c0, %c0_0, %c0_1] : memref<1x8x326xbf16, #tpu.memory_space<vmem>>, vector<1x8x326xbf16>
    %1 = vector.shape_cast %0 : vector<1x8x326xbf16> to vector<8x326xbf16>
    %c0_2 = arith.constant 0 : index
    %c0_3 = arith.constant 0 : index
    %2 = vector.load %arg2[%c0_2, %c0_3] : memref<8x72xbf16, #tpu.memory_space<vmem>>, vector<8x72xbf16>
    %3 = vector.extract_strided_slice %2 {offsets = [0, 0], sizes = [8, 8], strides = [1, 1]} : vector<8x72xbf16> to vector<8x8xbf16>
    %4 = vector.extract_strided_slice %1 {offsets = [0, 0], sizes = [8, 288], strides = [1, 1]} : vector<8x326xbf16> to vector<8x288xbf16>
    %cst = arith.constant dense<0.000000e+00> : vector<8x288xf32>
    %5 = tpu.matmul %3, %4, %cst {dimension_numbers = #tpu.dot_dimension_numbers<[1], [0], [0], [1], [0, 0, 1, 1], [], []>} : vector<8x8xbf16>, vector<8x288xbf16>, vector<8x288xf32> -> vector<8x288xf32>
    %6 = vector.extract_strided_slice %2 {offsets = [0, 8], sizes = [8, 8], strides = [1, 1]} : vector<8x72xbf16> to vector<8x8xbf16>
    %7 = vector.extract_strided_slice %1 {offsets = [0, 1], sizes = [8, 288], strides = [1, 1]} : vector<8x326xbf16> to vector<8x288xbf16>
    %cst_4 = arith.constant dense<0.000000e+00> : vector<8x288xf32>
    %8 = tpu.matmul %6, %7, %cst_4 {dimension_numbers = #tpu.dot_dimension_numbers<[1], [0], [0], [1], [0, 0, 1, 1], [], []>} : vector<8x8xbf16>, vector<8x288xbf16>, vector<8x288xf32> -> vector<8x288xf32>
    %9 = arith.addf %5, %8 : vector<8x288xf32>
    %10 = vector.extract_strided_slice %2 {offsets = [0, 16], sizes = [8, 8], strides = [1, 1]} : vector<8x72xbf16> to vector<8x8xbf16>
    %11 = vector.extract_strided_slice %1 {offsets = [0, 2], sizes = [8, 288], strides = [1, 1]} : vector<8x326xbf16> to vector<8x288xbf16>
    %cst_5 = arith.constant dense<0.000000e+00> : vector<8x288xf32>
    %12 = tpu.matmul %10, %11, %cst_5 {dimension_numbers = #tpu.dot_dimension_numbers<[1], [0], [0], [1], [0, 0, 1, 1], [], []>} : vector<8x8xbf16>, vector<8x288xbf16>, vector<8x288xf32> -> vector<8x288xf32>
    %13 = arith.addf %9, %12 : vector<8x288xf32>
    %14 = vector.extract_strided_slice %2 {offsets = [0, 24], sizes = [8, 8], strides = [1, 1]} : vector<8x72xbf16> to vector<8x8xbf16>
    %15 = vector.extract_strided_slice %1 {offsets = [0, 18], sizes = [8, 288], strides = [1, 1]} : vector<8x326xbf16> to vector<8x288xbf16>
    %cst_6 = arith.constant dense<0.000000e+00> : vector<8x288xf32>
    %16 = tpu.matmul %14, %15, %cst_6 {dimension_numbers = #tpu.dot_dimension_numbers<[1], [0], [0], [1], [0, 0, 1, 1], [], []>} : vector<8x8xbf16>, vector<8x288xbf16>, vector<8x288xf32> -> vector<8x288xf32>
    %17 = arith.addf %13, %16 : vector<8x288xf32>
    %18 = vector.extract_strided_slice %2 {offsets = [0, 32], sizes = [8, 8], strides = [1, 1]} : vector<8x72xbf16> to vector<8x8xbf16>
    %19 = vector.extract_strided_slice %1 {offsets = [0, 19], sizes = [8, 288], strides = [1, 1]} : vector<8x326xbf16> to vector<8x288xbf16>
    %cst_7 = arith.constant dense<0.000000e+00> : vector<8x288xf32>
    %20 = tpu.matmul %18, %19, %cst_7 {dimension_numbers = #tpu.dot_dimension_numbers<[1], [0], [0], [1], [0, 0, 1, 1], [], []>} : vector<8x8xbf16>, vector<8x288xbf16>, vector<8x288xf32> -> vector<8x288xf32>
    %21 = arith.addf %17, %20 : vector<8x288xf32>
    %22 = vector.extract_strided_slice %2 {offsets = [0, 40], sizes = [8, 8], strides = [1, 1]} : vector<8x72xbf16> to vector<8x8xbf16>
    %23 = vector.extract_strided_slice %1 {offsets = [0, 20], sizes = [8, 288], strides = [1, 1]} : vector<8x326xbf16> to vector<8x288xbf16>
    %cst_8 = arith.constant dense<0.000000e+00> : vector<8x288xf32>
    %24 = tpu.matmul %22, %23, %cst_8 {dimension_numbers = #tpu.dot_dimension_numbers<[1], [0], [0], [1], [0, 0, 1, 1], [], []>} : vector<8x8xbf16>, vector<8x288xbf16>, vector<8x288xf32> -> vector<8x288xf32>
    %25 = arith.addf %21, %24 : vector<8x288xf32>
    %26 = vector.extract_strided_slice %2 {offsets = [0, 48], sizes = [8, 8], strides = [1, 1]} : vector<8x72xbf16> to vector<8x8xbf16>
    %27 = vector.extract_strided_slice %1 {offsets = [0, 36], sizes = [8, 288], strides = [1, 1]} : vector<8x326xbf16> to vector<8x288xbf16>
    %cst_9 = arith.constant dense<0.000000e+00> : vector<8x288xf32>
    %28 = tpu.matmul %26, %27, %cst_9 {dimension_numbers = #tpu.dot_dimension_numbers<[1], [0], [0], [1], [0, 0, 1, 1], [], []>} : vector<8x8xbf16>, vector<8x288xbf16>, vector<8x288xf32> -> vector<8x288xf32>
    %29 = arith.addf %25, %28 : vector<8x288xf32>
    %30 = vector.extract_strided_slice %2 {offsets = [0, 56], sizes = [8, 8], strides = [1, 1]} : vector<8x72xbf16> to vector<8x8xbf16>
    %31 = vector.extract_strided_slice %1 {offsets = [0, 37], sizes = [8, 288], strides = [1, 1]} : vector<8x326xbf16> to vector<8x288xbf16>
    %cst_10 = arith.constant dense<0.000000e+00> : vector<8x288xf32>
    %32 = tpu.matmul %30, %31, %cst_10 {dimension_numbers = #tpu.dot_dimension_numbers<[1], [0], [0], [1], [0, 0, 1, 1], [], []>} : vector<8x8xbf16>, vector<8x288xbf16>, vector<8x288xf32> -> vector<8x288xf32>
    %33 = arith.addf %29, %32 : vector<8x288xf32>
    %34 = vector.extract_strided_slice %2 {offsets = [0, 64], sizes = [8, 8], strides = [1, 1]} : vector<8x72xbf16> to vector<8x8xbf16>
    %35 = vector.extract_strided_slice %1 {offsets = [0, 38], sizes = [8, 288], strides = [1, 1]} : vector<8x326xbf16> to vector<8x288xbf16>
    %cst_11 = arith.constant dense<0.000000e+00> : vector<8x288xf32>
    %36 = tpu.matmul %34, %35, %cst_11 {dimension_numbers = #tpu.dot_dimension_numbers<[1], [0], [0], [1], [0, 0, 1, 1], [], []>} : vector<8x8xbf16>, vector<8x288xbf16>, vector<8x288xf32> -> vector<8x288xf32>
    %37 = arith.addf %33, %36 : vector<8x288xf32>
    %c0_12 = arith.constant 0 : index
    %c0_13 = arith.constant 0 : index
    %38 = vector.load %arg4[%c0_12, %c0_13] : memref<1x288xf32, #tpu.memory_space<vmem>>, vector<1x288xf32>
    %39 = vector.broadcast %38 : vector<1x288xf32> to vector<8x288xf32>
    %40 = arith.mulf %37, %39 : vector<8x288xf32>
    %cst_14 = arith.constant dense<0.000000e+00> : vector<8xf32>
    %41 = vector.multi_reduction <add>, %40, %cst_14 [1] : vector<8x288xf32> to vector<8xf32>
    %42 = vector.shape_cast %41 : vector<8xf32> to vector<8x1xf32>
    %cst_15 = arith.constant 3.906250e-03 : f32
    %43 = vector.broadcast %cst_15 : f32 to vector<8x1xf32>
    %44 = arith.mulf %42, %43 : vector<8x1xf32>
    %45 = vector.broadcast %44 : vector<8x1xf32> to vector<8x288xf32>
    %46 = arith.subf %37, %45 : vector<8x288xf32>
    %47 = arith.mulf %46, %46 : vector<8x288xf32>
    %48 = vector.broadcast %38 : vector<1x288xf32> to vector<8x288xf32>
    %49 = arith.mulf %47, %48 : vector<8x288xf32>
    %cst_16 = arith.constant dense<0.000000e+00> : vector<8xf32>
    %50 = vector.multi_reduction <add>, %49, %cst_16 [1] : vector<8x288xf32> to vector<8xf32>
    %51 = vector.shape_cast %50 : vector<8xf32> to vector<8x1xf32>
    %cst_17 = arith.constant 3.906250e-03 : f32
    %52 = vector.broadcast %cst_17 : f32 to vector<8x1xf32>
    %53 = arith.mulf %51, %52 : vector<8x1xf32>
    %cst_18 = arith.constant 9.99999974E-6 : f32
    %54 = vector.broadcast %cst_18 : f32 to vector<8x1xf32>
    %55 = arith.addf %53, %54 : vector<8x1xf32>
    %56 = math.rsqrt %55 : vector<8x1xf32>
    %57 = vector.broadcast %56 : vector<8x1xf32> to vector<8x288xf32>
    %58 = arith.mulf %46, %57 : vector<8x288xf32>
    %c0_19 = arith.constant 0 : index
    %c0_20 = arith.constant 0 : index
    %59 = vector.load %arg3[%c0_19, %c0_20] : memref<8x2xf32, #tpu.memory_space<vmem>>, vector<8x1xf32>
    %60 = vector.broadcast %59 : vector<8x1xf32> to vector<8x288xf32>
    %61 = arith.mulf %58, %60 : vector<8x288xf32>
    %c0_21 = arith.constant 0 : index
    %c1 = arith.constant 1 : index
    %62 = vector.load %arg3[%c0_21, %c1] : memref<8x2xf32, #tpu.memory_space<vmem>>, vector<8x1xf32>
    %63 = vector.broadcast %62 : vector<8x1xf32> to vector<8x288xf32>
    %64 = arith.addf %61, %63 : vector<8x288xf32>
    %cst_22 = arith.constant 0.000000e+00 : f32
    %65 = vector.broadcast %cst_22 : f32 to vector<8x288xf32>
    %66 = arith.cmpf oge, %64, %65 : vector<8x288xf32>
    %cst_23 = arith.constant 0.00999999977 : f32
    %67 = vector.broadcast %cst_23 : f32 to vector<8x288xf32>
    %68 = arith.mulf %64, %67 : vector<8x288xf32>
    %69 = arith.select %66, %64, %68 : vector<8x288xi1>, vector<8x288xf32>
    %70 = arith.truncf %69 : vector<8x288xf32> to vector<8x288xbf16>
    %c0_24 = arith.constant 0 : index
    %c0_25 = arith.constant 0 : index
    %c0_26 = arith.constant 0 : index
    %71 = vector.load %arg5[%c0_24, %c0_25, %c0_26] : memref<1x8x288xbf16, #tpu.memory_space<vmem>>, vector<1x8x288xbf16>
    %72 = vector.shape_cast %71 : vector<1x8x288xbf16> to vector<8x288xbf16>
    %73 = vector.shape_cast %70 : vector<8x288xbf16> to vector<1x8x288xbf16>
    tpu.vector_store %arg5[%c0_24, %c0_25, %c0_26], %73 {strides = array<i32>} : memref<1x8x288xbf16, #tpu.memory_space<vmem>>, vector<1x8x288xbf16>,
    return
  }
  func.func @transform_0(%arg0: i32) -> (i32, i32, i32) {
    %c0_i32 = arith.constant 0 : i32
    %c0_i32_0 = arith.constant 0 : i32
    %c0_i32_1 = arith.constant 0 : i32
    return %arg0, %c0_i32, %c0_i32_0 : i32, i32, i32
  }
  func.func @transform_1(%arg0: i32) -> (i32, i32) {
    %c0_i32 = arith.constant 0 : i32
    %c0_i32_0 = arith.constant 0 : i32
    %c0_i32_1 = arith.constant 0 : i32
    return %c0_i32, %c0_i32_0 : i32, i32
  }
  func.func @transform_2(%arg0: i32) -> (i32, i32) {
    %c0_i32 = arith.constant 0 : i32
    %c0_i32_0 = arith.constant 0 : i32
    %c0_i32_1 = arith.constant 0 : i32
    return %c0_i32, %c0_i32_0 : i32, i32
  }
  func.func @transform_3(%arg0: i32) -> (i32, i32) {
    %c0_i32 = arith.constant 0 : i32
    %c0_i32_0 = arith.constant 0 : i32
    %c0_i32_1 = arith.constant 0 : i32
    return %c0_i32, %c0_i32_0 : i32, i32
  }
  func.func @transform_4(%arg0: i32) -> (i32, i32, i32) {
    %c0_i32 = arith.constant 0 : i32
    %c0_i32_0 = arith.constant 0 : i32
    %c0_i32_1 = arith.constant 0 : i32
    return %arg0, %c0_i32, %c0_i32_0 : i32, i32, i32
  }
}

module attributes {stable_mosaic.version = 11 : i64} {
  func.func @kernel(%arg0: i32, %arg1: memref<1x8x326xbf16, #tpu.memory_space<vmem>>, %arg2: memref<8x72xbf16, #tpu.memory_space<vmem>>, %arg3: memref<8x2xf32, #tpu.memory_space<vmem>>, %arg4: memref<1x288xf32, #tpu.memory_space<vmem>>, %arg5: memref<1x8x288xbf16, #tpu.memory_space<vmem>>, %arg6: memref<1x8x288xbf16, #tpu.memory_space<vmem>>) attributes {dimension_semantics = [#tpu.dimension_semantics<parallel>], iteration_bounds = array<i64: 2>, scalar_prefetch = 0 : i64, scratch_operands = 0 : i64, tpu.core_type = #tpu.core_type<tc>, window_params = [{transform_indices = @transform_0, window_bounds = array<i64: 1, 8, 326>}, {pipeline_mode = #tpu.pipeline_mode<synchronous>, transform_indices = @transform_1, window_bounds = array<i64: 8, 72>}, {pipeline_mode = #tpu.pipeline_mode<synchronous>, transform_indices = @transform_2, window_bounds = array<i64: 8, 2>}, {pipeline_mode = #tpu.pipeline_mode<synchronous>, transform_indices = @transform_3, window_bounds = array<i64: 1, 288>}, {transform_indices = @transform_4, window_bounds = array<i64: 1, 8, 288>}, {transform_indices = @transform_5, window_bounds = array<i64: 1, 8, 288>}]} {
    %c0 = arith.constant 0 : index
    %c0_0 = arith.constant 0 : index
    %c0_1 = arith.constant 0 : index
    %0 = vector.load %arg1[%c0, %c0_0, %c0_1] : memref<1x8x326xbf16, #tpu.memory_space<vmem>>, vector<1x8x326xbf16>
    %1 = vector.shape_cast %0 : vector<1x8x326xbf16> to vector<8x326xbf16>
    %c0_2 = arith.constant 0 : index
    %c0_3 = arith.constant 0 : index
    %2 = vector.load %arg2[%c0_2, %c0_3] : memref<8x72xbf16, #tpu.memory_space<vmem>>, vector<8x72xbf16>
    %3 = vector.extract_strided_slice %2 {offsets = [0, 0], sizes = [8, 8], strides = [1, 1]} : vector<8x72xbf16> to vector<8x8xbf16>
    %4 = vector.extract_strided_slice %1 {offsets = [0, 0], sizes = [8, 288], strides = [1, 1]} : vector<8x326xbf16> to vector<8x288xbf16>
    %cst = arith.constant dense<0.000000e+00> : vector<8x288xf32>
    %5 = tpu.matmul %3, %4, %cst {dimension_numbers = #tpu.dot_dimension_numbers<[1], [0], [0], [1], [0, 0, 1, 1], [], []>} : vector<8x8xbf16>, vector<8x288xbf16>, vector<8x288xf32> -> vector<8x288xf32>
    %6 = vector.extract_strided_slice %2 {offsets = [0, 8], sizes = [8, 8], strides = [1, 1]} : vector<8x72xbf16> to vector<8x8xbf16>
    %7 = vector.extract_strided_slice %1 {offsets = [0, 1], sizes = [8, 288], strides = [1, 1]} : vector<8x326xbf16> to vector<8x288xbf16>
    %cst_4 = arith.constant dense<0.000000e+00> : vector<8x288xf32>
    %8 = tpu.matmul %6, %7, %cst_4 {dimension_numbers = #tpu.dot_dimension_numbers<[1], [0], [0], [1], [0, 0, 1, 1], [], []>} : vector<8x8xbf16>, vector<8x288xbf16>, vector<8x288xf32> -> vector<8x288xf32>
    %9 = arith.addf %5, %8 : vector<8x288xf32>
    %10 = vector.extract_strided_slice %2 {offsets = [0, 16], sizes = [8, 8], strides = [1, 1]} : vector<8x72xbf16> to vector<8x8xbf16>
    %11 = vector.extract_strided_slice %1 {offsets = [0, 2], sizes = [8, 288], strides = [1, 1]} : vector<8x326xbf16> to vector<8x288xbf16>
    %cst_5 = arith.constant dense<0.000000e+00> : vector<8x288xf32>
    %12 = tpu.matmul %10, %11, %cst_5 {dimension_numbers = #tpu.dot_dimension_numbers<[1], [0], [0], [1], [0, 0, 1, 1], [], []>} : vector<8x8xbf16>, vector<8x288xbf16>, vector<8x288xf32> -> vector<8x288xf32>
    %13 = arith.addf %9, %12 : vector<8x288xf32>
    %14 = vector.extract_strided_slice %2 {offsets = [0, 24], sizes = [8, 8], strides = [1, 1]} : vector<8x72xbf16> to vector<8x8xbf16>
    %15 = vector.extract_strided_slice %1 {offsets = [0, 18], sizes = [8, 288], strides = [1, 1]} : vector<8x326xbf16> to vector<8x288xbf16>
    %cst_6 = arith.constant dense<0.000000e+00> : vector<8x288xf32>
    %16 = tpu.matmul %14, %15, %cst_6 {dimension_numbers = #tpu.dot_dimension_numbers<[1], [0], [0], [1], [0, 0, 1, 1], [], []>} : vector<8x8xbf16>, vector<8x288xbf16>, vector<8x288xf32> -> vector<8x288xf32>
    %17 = arith.addf %13, %16 : vector<8x288xf32>
    %18 = vector.extract_strided_slice %2 {offsets = [0, 32], sizes = [8, 8], strides = [1, 1]} : vector<8x72xbf16> to vector<8x8xbf16>
    %19 = vector.extract_strided_slice %1 {offsets = [0, 19], sizes = [8, 288], strides = [1, 1]} : vector<8x326xbf16> to vector<8x288xbf16>
    %cst_7 = arith.constant dense<0.000000e+00> : vector<8x288xf32>
    %20 = tpu.matmul %18, %19, %cst_7 {dimension_numbers = #tpu.dot_dimension_numbers<[1], [0], [0], [1], [0, 0, 1, 1], [], []>} : vector<8x8xbf16>, vector<8x288xbf16>, vector<8x288xf32> -> vector<8x288xf32>
    %21 = arith.addf %17, %20 : vector<8x288xf32>
    %22 = vector.extract_strided_slice %2 {offsets = [0, 40], sizes = [8, 8], strides = [1, 1]} : vector<8x72xbf16> to vector<8x8xbf16>
    %23 = vector.extract_strided_slice %1 {offsets = [0, 20], sizes = [8, 288], strides = [1, 1]} : vector<8x326xbf16> to vector<8x288xbf16>
    %cst_8 = arith.constant dense<0.000000e+00> : vector<8x288xf32>
    %24 = tpu.matmul %22, %23, %cst_8 {dimension_numbers = #tpu.dot_dimension_numbers<[1], [0], [0], [1], [0, 0, 1, 1], [], []>} : vector<8x8xbf16>, vector<8x288xbf16>, vector<8x288xf32> -> vector<8x288xf32>
    %25 = arith.addf %21, %24 : vector<8x288xf32>
    %26 = vector.extract_strided_slice %2 {offsets = [0, 48], sizes = [8, 8], strides = [1, 1]} : vector<8x72xbf16> to vector<8x8xbf16>
    %27 = vector.extract_strided_slice %1 {offsets = [0, 36], sizes = [8, 288], strides = [1, 1]} : vector<8x326xbf16> to vector<8x288xbf16>
    %cst_9 = arith.constant dense<0.000000e+00> : vector<8x288xf32>
    %28 = tpu.matmul %26, %27, %cst_9 {dimension_numbers = #tpu.dot_dimension_numbers<[1], [0], [0], [1], [0, 0, 1, 1], [], []>} : vector<8x8xbf16>, vector<8x288xbf16>, vector<8x288xf32> -> vector<8x288xf32>
    %29 = arith.addf %25, %28 : vector<8x288xf32>
    %30 = vector.extract_strided_slice %2 {offsets = [0, 56], sizes = [8, 8], strides = [1, 1]} : vector<8x72xbf16> to vector<8x8xbf16>
    %31 = vector.extract_strided_slice %1 {offsets = [0, 37], sizes = [8, 288], strides = [1, 1]} : vector<8x326xbf16> to vector<8x288xbf16>
    %cst_10 = arith.constant dense<0.000000e+00> : vector<8x288xf32>
    %32 = tpu.matmul %30, %31, %cst_10 {dimension_numbers = #tpu.dot_dimension_numbers<[1], [0], [0], [1], [0, 0, 1, 1], [], []>} : vector<8x8xbf16>, vector<8x288xbf16>, vector<8x288xf32> -> vector<8x288xf32>
    %33 = arith.addf %29, %32 : vector<8x288xf32>
    %34 = vector.extract_strided_slice %2 {offsets = [0, 64], sizes = [8, 8], strides = [1, 1]} : vector<8x72xbf16> to vector<8x8xbf16>
    %35 = vector.extract_strided_slice %1 {offsets = [0, 38], sizes = [8, 288], strides = [1, 1]} : vector<8x326xbf16> to vector<8x288xbf16>
    %cst_11 = arith.constant dense<0.000000e+00> : vector<8x288xf32>
    %36 = tpu.matmul %34, %35, %cst_11 {dimension_numbers = #tpu.dot_dimension_numbers<[1], [0], [0], [1], [0, 0, 1, 1], [], []>} : vector<8x8xbf16>, vector<8x288xbf16>, vector<8x288xf32> -> vector<8x288xf32>
    %37 = arith.addf %33, %36 : vector<8x288xf32>
    %c0_12 = arith.constant 0 : index
    %c0_13 = arith.constant 0 : index
    %38 = vector.load %arg4[%c0_12, %c0_13] : memref<1x288xf32, #tpu.memory_space<vmem>>, vector<1x288xf32>
    %39 = vector.broadcast %38 : vector<1x288xf32> to vector<8x288xf32>
    %40 = arith.mulf %37, %39 : vector<8x288xf32>
    %cst_14 = arith.constant dense<0.000000e+00> : vector<8xf32>
    %41 = vector.multi_reduction <add>, %40, %cst_14 [1] : vector<8x288xf32> to vector<8xf32>
    %42 = vector.shape_cast %41 : vector<8xf32> to vector<8x1xf32>
    %cst_15 = arith.constant 3.906250e-03 : f32
    %43 = vector.broadcast %cst_15 : f32 to vector<8x1xf32>
    %44 = arith.mulf %42, %43 : vector<8x1xf32>
    %45 = vector.broadcast %44 : vector<8x1xf32> to vector<8x288xf32>
    %46 = arith.subf %37, %45 : vector<8x288xf32>
    %47 = arith.mulf %46, %46 : vector<8x288xf32>
    %48 = vector.broadcast %38 : vector<1x288xf32> to vector<8x288xf32>
    %49 = arith.mulf %47, %48 : vector<8x288xf32>
    %cst_16 = arith.constant dense<0.000000e+00> : vector<8xf32>
    %50 = vector.multi_reduction <add>, %49, %cst_16 [1] : vector<8x288xf32> to vector<8xf32>
    %51 = vector.shape_cast %50 : vector<8xf32> to vector<8x1xf32>
    %cst_17 = arith.constant 3.906250e-03 : f32
    %52 = vector.broadcast %cst_17 : f32 to vector<8x1xf32>
    %53 = arith.mulf %51, %52 : vector<8x1xf32>
    %cst_18 = arith.constant 9.99999974E-6 : f32
    %54 = vector.broadcast %cst_18 : f32 to vector<8x1xf32>
    %55 = arith.addf %53, %54 : vector<8x1xf32>
    %56 = math.rsqrt %55 : vector<8x1xf32>
    %57 = vector.broadcast %56 : vector<8x1xf32> to vector<8x288xf32>
    %58 = arith.mulf %46, %57 : vector<8x288xf32>
    %c0_19 = arith.constant 0 : index
    %c0_20 = arith.constant 0 : index
    %59 = vector.load %arg3[%c0_19, %c0_20] : memref<8x2xf32, #tpu.memory_space<vmem>>, vector<8x1xf32>
    %60 = vector.broadcast %59 : vector<8x1xf32> to vector<8x288xf32>
    %61 = arith.mulf %58, %60 : vector<8x288xf32>
    %c0_21 = arith.constant 0 : index
    %c1 = arith.constant 1 : index
    %62 = vector.load %arg3[%c0_21, %c1] : memref<8x2xf32, #tpu.memory_space<vmem>>, vector<8x1xf32>
    %63 = vector.broadcast %62 : vector<8x1xf32> to vector<8x288xf32>
    %64 = arith.addf %61, %63 : vector<8x288xf32>
    %c0_22 = arith.constant 0 : index
    %c0_23 = arith.constant 0 : index
    %c0_24 = arith.constant 0 : index
    %65 = vector.load %arg5[%c0_22, %c0_23, %c0_24] : memref<1x8x288xbf16, #tpu.memory_space<vmem>>, vector<1x8x288xbf16>
    %66 = vector.shape_cast %65 : vector<1x8x288xbf16> to vector<8x288xbf16>
    %67 = arith.extf %66 : vector<8x288xbf16> to vector<8x288xf32>
    %68 = arith.addf %64, %67 : vector<8x288xf32>
    %cst_25 = arith.constant 0.000000e+00 : f32
    %69 = vector.broadcast %cst_25 : f32 to vector<8x288xf32>
    %70 = arith.cmpf oge, %68, %69 : vector<8x288xf32>
    %cst_26 = arith.constant 0.00999999977 : f32
    %71 = vector.broadcast %cst_26 : f32 to vector<8x288xf32>
    %72 = arith.mulf %68, %71 : vector<8x288xf32>
    %73 = arith.select %70, %68, %72 : vector<8x288xi1>, vector<8x288xf32>
    %74 = arith.truncf %73 : vector<8x288xf32> to vector<8x288xbf16>
    %c0_27 = arith.constant 0 : index
    %c0_28 = arith.constant 0 : index
    %c0_29 = arith.constant 0 : index
    %75 = vector.load %arg6[%c0_27, %c0_28, %c0_29] : memref<1x8x288xbf16, #tpu.memory_space<vmem>>, vector<1x8x288xbf16>
    %76 = vector.shape_cast %75 : vector<1x8x288xbf16> to vector<8x288xbf16>
    %77 = vector.shape_cast %74 : vector<8x288xbf16> to vector<1x8x288xbf16>
    tpu.vector_store %arg6[%c0_27, %c0_28, %c0_29], %77 {strides = array<i32>} : memref<1x8x288xbf16, #tpu.memory_space<vmem>>, vector<1x8x288xbf16>,
    return
  }
  func.func @transform_0(%arg0: i32) -> (i32, i32, i32) {
    %c0_i32 = arith.constant 0 : i32
    %c0_i32_0 = arith.constant 0 : i32
    %c0_i32_1 = arith.constant 0 : i32
    return %arg0, %c0_i32, %c0_i32_0 : i32, i32, i32
  }
  func.func @transform_1(%arg0: i32) -> (i32, i32) {
    %c0_i32 = arith.constant 0 : i32
    %c0_i32_0 = arith.constant 0 : i32
    %c0_i32_1 = arith.constant 0 : i32
    return %c0_i32, %c0_i32_0 : i32, i32
  }
  func.func @transform_2(%arg0: i32) -> (i32, i32) {
    %c0_i32 = arith.constant 0 : i32
    %c0_i32_0 = arith.constant 0 : i32
    %c0_i32_1 = arith.constant 0 : i32
    return %c0_i32, %c0_i32_0 : i32, i32
  }
  func.func @transform_3(%arg0: i32) -> (i32, i32) {
    %c0_i32 = arith.constant 0 : i32
    %c0_i32_0 = arith.constant 0 : i32
    %c0_i32_1 = arith.constant 0 : i32
    return %c0_i32, %c0_i32_0 : i32, i32
  }
  func.func @transform_4(%arg0: i32) -> (i32, i32, i32) {
    %c0_i32 = arith.constant 0 : i32
    %c0_i32_0 = arith.constant 0 : i32
    %c0_i32_1 = arith.constant 0 : i32
    return %arg0, %c0_i32, %c0_i32_0 : i32, i32, i32
  }
  func.func @transform_5(%arg0: i32) -> (i32, i32, i32) {
    %c0_i32 = arith.constant 0 : i32
    %c0_i32_0 = arith.constant 0 : i32
    %c0_i32_1 = arith.constant 0 : i32
    return %arg0, %c0_i32, %c0_i32_0 : i32, i32, i32
  }
}

module attributes {stable_mosaic.version = 11 : i64} {
  func.func @kernel(%arg0: i32, %arg1: memref<1x72x64xbf16, #tpu.memory_space<vmem>>, %arg2: memref<16x72xbf16, #tpu.memory_space<vmem>>, %arg3: memref<16x2xf32, #tpu.memory_space<vmem>>, %arg4: memref<1x16x64xbf16, #tpu.memory_space<vmem>>) attributes {dimension_semantics = [#tpu.dimension_semantics<parallel>], iteration_bounds = array<i64: 2>, scalar_prefetch = 0 : i64, scratch_operands = 0 : i64, tpu.core_type = #tpu.core_type<tc>, window_params = [{transform_indices = @transform_0, window_bounds = array<i64: 1, 72, 64>}, {pipeline_mode = #tpu.pipeline_mode<synchronous>, transform_indices = @transform_1, window_bounds = array<i64: 16, 72>}, {pipeline_mode = #tpu.pipeline_mode<synchronous>, transform_indices = @transform_2, window_bounds = array<i64: 16, 2>}, {transform_indices = @transform_3, window_bounds = array<i64: 1, 16, 64>}]} {
    %c0 = arith.constant 0 : index
    %c0_0 = arith.constant 0 : index
    %c0_1 = arith.constant 0 : index
    %0 = vector.load %arg1[%c0, %c0_0, %c0_1] : memref<1x72x64xbf16, #tpu.memory_space<vmem>>, vector<1x72x64xbf16>
    %1 = vector.shape_cast %0 : vector<1x72x64xbf16> to vector<72x64xbf16>
    %c0_2 = arith.constant 0 : index
    %c0_3 = arith.constant 0 : index
    %2 = vector.load %arg2[%c0_2, %c0_3] : memref<16x72xbf16, #tpu.memory_space<vmem>>, vector<16x72xbf16>
    %cst = arith.constant dense<0.000000e+00> : vector<16x64xf32>
    %3 = tpu.matmul %2, %1, %cst {dimension_numbers = #tpu.dot_dimension_numbers<[1], [0], [0], [1], [0, 0, 1, 1], [], []>} : vector<16x72xbf16>, vector<72x64xbf16>, vector<16x64xf32> -> vector<16x64xf32>
    %cst_4 = arith.constant dense<0.000000e+00> : vector<16xf32>
    %4 = vector.multi_reduction <add>, %3, %cst_4 [1] : vector<16x64xf32> to vector<16xf32>
    %5 = vector.shape_cast %4 : vector<16xf32> to vector<16x1xf32>
    %cst_5 = arith.constant 6.400000e+01 : f32
    %6 = vector.broadcast %cst_5 : f32 to vector<16x1xf32>
    %7 = arith.divf %5, %6 : vector<16x1xf32>
    %8 = vector.broadcast %7 : vector<16x1xf32> to vector<16x64xf32>
    %9 = arith.subf %3, %8 : vector<16x64xf32>
    %10 = arith.mulf %9, %9 : vector<16x64xf32>
    %cst_6 = arith.constant dense<0.000000e+00> : vector<16xf32>
    %11 = vector.multi_reduction <add>, %10, %cst_6 [1] : vector<16x64xf32> to vector<16xf32>
    %12 = vector.shape_cast %11 : vector<16xf32> to vector<16x1xf32>
    %cst_7 = arith.constant 6.400000e+01 : f32
    %13 = vector.broadcast %cst_7 : f32 to vector<16x1xf32>
    %14 = arith.divf %12, %13 : vector<16x1xf32>
    %cst_8 = arith.constant 9.99999974E-6 : f32
    %15 = vector.broadcast %cst_8 : f32 to vector<16x1xf32>
    %16 = arith.addf %14, %15 : vector<16x1xf32>
    %17 = math.rsqrt %16 : vector<16x1xf32>
    %18 = vector.broadcast %17 : vector<16x1xf32> to vector<16x64xf32>
    %19 = arith.mulf %9, %18 : vector<16x64xf32>
    %c0_9 = arith.constant 0 : index
    %c0_10 = arith.constant 0 : index
    %20 = vector.load %arg3[%c0_9, %c0_10] : memref<16x2xf32, #tpu.memory_space<vmem>>, vector<16x1xf32>
    %21 = vector.broadcast %20 : vector<16x1xf32> to vector<16x64xf32>
    %22 = arith.mulf %19, %21 : vector<16x64xf32>
    %c0_11 = arith.constant 0 : index
    %c1 = arith.constant 1 : index
    %23 = vector.load %arg3[%c0_11, %c1] : memref<16x2xf32, #tpu.memory_space<vmem>>, vector<16x1xf32>
    %24 = vector.broadcast %23 : vector<16x1xf32> to vector<16x64xf32>
    %25 = arith.addf %22, %24 : vector<16x64xf32>
    %cst_12 = arith.constant 0.000000e+00 : f32
    %26 = vector.broadcast %cst_12 : f32 to vector<16x64xf32>
    %27 = arith.cmpf oge, %25, %26 : vector<16x64xf32>
    %cst_13 = arith.constant 0.00999999977 : f32
    %28 = vector.broadcast %cst_13 : f32 to vector<16x64xf32>
    %29 = arith.mulf %25, %28 : vector<16x64xf32>
    %30 = arith.select %27, %25, %29 : vector<16x64xi1>, vector<16x64xf32>
    %31 = arith.truncf %30 : vector<16x64xf32> to vector<16x64xbf16>
    %c0_14 = arith.constant 0 : index
    %c0_15 = arith.constant 0 : index
    %c0_16 = arith.constant 0 : index
    %32 = vector.load %arg4[%c0_14, %c0_15, %c0_16] : memref<1x16x64xbf16, #tpu.memory_space<vmem>>, vector<1x16x64xbf16>
    %33 = vector.shape_cast %32 : vector<1x16x64xbf16> to vector<16x64xbf16>
    %34 = vector.shape_cast %31 : vector<16x64xbf16> to vector<1x16x64xbf16>
    tpu.vector_store %arg4[%c0_14, %c0_15, %c0_16], %34 {strides = array<i32>} : memref<1x16x64xbf16, #tpu.memory_space<vmem>>, vector<1x16x64xbf16>,
    return
  }
  func.func @transform_0(%arg0: i32) -> (i32, i32, i32) {
    %c0_i32 = arith.constant 0 : i32
    %c0_i32_0 = arith.constant 0 : i32
    %c0_i32_1 = arith.constant 0 : i32
    return %arg0, %c0_i32, %c0_i32_0 : i32, i32, i32
  }
  func.func @transform_1(%arg0: i32) -> (i32, i32) {
    %c0_i32 = arith.constant 0 : i32
    %c0_i32_0 = arith.constant 0 : i32
    %c0_i32_1 = arith.constant 0 : i32
    return %c0_i32, %c0_i32_0 : i32, i32
  }
  func.func @transform_2(%arg0: i32) -> (i32, i32) {
    %c0_i32 = arith.constant 0 : i32
    %c0_i32_0 = arith.constant 0 : i32
    %c0_i32_1 = arith.constant 0 : i32
    return %c0_i32, %c0_i32_0 : i32, i32
  }
  func.func @transform_3(%arg0: i32) -> (i32, i32, i32) {
    %c0_i32 = arith.constant 0 : i32
    %c0_i32_0 = arith.constant 0 : i32
    %c0_i32_1 = arith.constant 0 : i32
    return %arg0, %c0_i32, %c0_i32_0 : i32, i32, i32
  }
}

module attributes {stable_mosaic.version = 11 : i64} {
  func.func @kernel(%arg0: i32, %arg1: memref<1x32x64xbf16, #tpu.memory_space<vmem>>, %arg2: memref<16x32xbf16, #tpu.memory_space<vmem>>, %arg3: memref<16x2xf32, #tpu.memory_space<vmem>>, %arg4: memref<1x16x64xbf16, #tpu.memory_space<vmem>>) attributes {dimension_semantics = [#tpu.dimension_semantics<parallel>], iteration_bounds = array<i64: 2>, scalar_prefetch = 0 : i64, scratch_operands = 0 : i64, tpu.core_type = #tpu.core_type<tc>, window_params = [{transform_indices = @transform_0, window_bounds = array<i64: 1, 32, 64>}, {pipeline_mode = #tpu.pipeline_mode<synchronous>, transform_indices = @transform_1, window_bounds = array<i64: 16, 32>}, {pipeline_mode = #tpu.pipeline_mode<synchronous>, transform_indices = @transform_2, window_bounds = array<i64: 16, 2>}, {transform_indices = @transform_3, window_bounds = array<i64: 1, 16, 64>}]} {
    %c0 = arith.constant 0 : index
    %c0_0 = arith.constant 0 : index
    %c0_1 = arith.constant 0 : index
    %0 = vector.load %arg1[%c0, %c0_0, %c0_1] : memref<1x32x64xbf16, #tpu.memory_space<vmem>>, vector<1x32x64xbf16>
    %1 = vector.shape_cast %0 : vector<1x32x64xbf16> to vector<32x64xbf16>
    %c0_2 = arith.constant 0 : index
    %c0_3 = arith.constant 0 : index
    %2 = vector.load %arg2[%c0_2, %c0_3] : memref<16x32xbf16, #tpu.memory_space<vmem>>, vector<16x32xbf16>
    %cst = arith.constant dense<0.000000e+00> : vector<16x64xf32>
    %3 = tpu.matmul %2, %1, %cst {dimension_numbers = #tpu.dot_dimension_numbers<[1], [0], [0], [1], [0, 0, 1, 1], [], []>} : vector<16x32xbf16>, vector<32x64xbf16>, vector<16x64xf32> -> vector<16x64xf32>
    %cst_4 = arith.constant dense<0.000000e+00> : vector<16xf32>
    %4 = vector.multi_reduction <add>, %3, %cst_4 [1] : vector<16x64xf32> to vector<16xf32>
    %5 = vector.shape_cast %4 : vector<16xf32> to vector<16x1xf32>
    %cst_5 = arith.constant 6.400000e+01 : f32
    %6 = vector.broadcast %cst_5 : f32 to vector<16x1xf32>
    %7 = arith.divf %5, %6 : vector<16x1xf32>
    %8 = vector.broadcast %7 : vector<16x1xf32> to vector<16x64xf32>
    %9 = arith.subf %3, %8 : vector<16x64xf32>
    %10 = arith.mulf %9, %9 : vector<16x64xf32>
    %cst_6 = arith.constant dense<0.000000e+00> : vector<16xf32>
    %11 = vector.multi_reduction <add>, %10, %cst_6 [1] : vector<16x64xf32> to vector<16xf32>
    %12 = vector.shape_cast %11 : vector<16xf32> to vector<16x1xf32>
    %cst_7 = arith.constant 6.400000e+01 : f32
    %13 = vector.broadcast %cst_7 : f32 to vector<16x1xf32>
    %14 = arith.divf %12, %13 : vector<16x1xf32>
    %cst_8 = arith.constant 9.99999974E-6 : f32
    %15 = vector.broadcast %cst_8 : f32 to vector<16x1xf32>
    %16 = arith.addf %14, %15 : vector<16x1xf32>
    %17 = math.rsqrt %16 : vector<16x1xf32>
    %18 = vector.broadcast %17 : vector<16x1xf32> to vector<16x64xf32>
    %19 = arith.mulf %9, %18 : vector<16x64xf32>
    %c0_9 = arith.constant 0 : index
    %c0_10 = arith.constant 0 : index
    %20 = vector.load %arg3[%c0_9, %c0_10] : memref<16x2xf32, #tpu.memory_space<vmem>>, vector<16x1xf32>
    %21 = vector.broadcast %20 : vector<16x1xf32> to vector<16x64xf32>
    %22 = arith.mulf %19, %21 : vector<16x64xf32>
    %c0_11 = arith.constant 0 : index
    %c1 = arith.constant 1 : index
    %23 = vector.load %arg3[%c0_11, %c1] : memref<16x2xf32, #tpu.memory_space<vmem>>, vector<16x1xf32>
    %24 = vector.broadcast %23 : vector<16x1xf32> to vector<16x64xf32>
    %25 = arith.addf %22, %24 : vector<16x64xf32>
    %26 = arith.truncf %25 : vector<16x64xf32> to vector<16x64xbf16>
    %c0_12 = arith.constant 0 : index
    %c0_13 = arith.constant 0 : index
    %c0_14 = arith.constant 0 : index
    %27 = vector.load %arg4[%c0_12, %c0_13, %c0_14] : memref<1x16x64xbf16, #tpu.memory_space<vmem>>, vector<1x16x64xbf16>
    %28 = vector.shape_cast %27 : vector<1x16x64xbf16> to vector<16x64xbf16>
    %29 = vector.shape_cast %26 : vector<16x64xbf16> to vector<1x16x64xbf16>
    tpu.vector_store %arg4[%c0_12, %c0_13, %c0_14], %29 {strides = array<i32>} : memref<1x16x64xbf16, #tpu.memory_space<vmem>>, vector<1x16x64xbf16>,
    return
  }
  func.func @transform_0(%arg0: i32) -> (i32, i32, i32) {
    %c0_i32 = arith.constant 0 : i32
    %c0_i32_0 = arith.constant 0 : i32
    %c0_i32_1 = arith.constant 0 : i32
    return %arg0, %c0_i32, %c0_i32_0 : i32, i32, i32
  }
  func.func @transform_1(%arg0: i32) -> (i32, i32) {
    %c0_i32 = arith.constant 0 : i32
    %c0_i32_0 = arith.constant 0 : i32
    %c0_i32_1 = arith.constant 0 : i32
    return %c0_i32, %c0_i32_0 : i32, i32
  }
  func.func @transform_2(%arg0: i32) -> (i32, i32) {
    %c0_i32 = arith.constant 0 : i32
    %c0_i32_0 = arith.constant 0 : i32
    %c0_i32_1 = arith.constant 0 : i32
    return %c0_i32, %c0_i32_0 : i32, i32
  }
  func.func @transform_3(%arg0: i32) -> (i32, i32, i32) {
    %c0_i32 = arith.constant 0 : i32
    %c0_i32_0 = arith.constant 0 : i32
    %c0_i32_1 = arith.constant 0 : i32
    return %arg0, %c0_i32, %c0_i32_0 : i32, i32, i32
  }
}

module attributes {stable_mosaic.version = 11 : i64} {
  func.func @kernel(%arg0: i32, %arg1: memref<1x16x102xbf16, #tpu.memory_space<vmem>>, %arg2: memref<16x144xbf16, #tpu.memory_space<vmem>>, %arg3: memref<16x2xf32, #tpu.memory_space<vmem>>, %arg4: memref<1x80xf32, #tpu.memory_space<vmem>>, %arg5: memref<1x16x80xbf16, #tpu.memory_space<vmem>>, %arg6: memref<1x16x80xbf16, #tpu.memory_space<vmem>>) attributes {dimension_semantics = [#tpu.dimension_semantics<parallel>], iteration_bounds = array<i64: 2>, scalar_prefetch = 0 : i64, scratch_operands = 0 : i64, tpu.core_type = #tpu.core_type<tc>, window_params = [{transform_indices = @transform_0, window_bounds = array<i64: 1, 16, 102>}, {pipeline_mode = #tpu.pipeline_mode<synchronous>, transform_indices = @transform_1, window_bounds = array<i64: 16, 144>}, {pipeline_mode = #tpu.pipeline_mode<synchronous>, transform_indices = @transform_2, window_bounds = array<i64: 16, 2>}, {pipeline_mode = #tpu.pipeline_mode<synchronous>, transform_indices = @transform_3, window_bounds = array<i64: 1, 80>}, {transform_indices = @transform_4, window_bounds = array<i64: 1, 16, 80>}, {transform_indices = @transform_5, window_bounds = array<i64: 1, 16, 80>}]} {
    %c0 = arith.constant 0 : index
    %c0_0 = arith.constant 0 : index
    %c0_1 = arith.constant 0 : index
    %0 = vector.load %arg1[%c0, %c0_0, %c0_1] : memref<1x16x102xbf16, #tpu.memory_space<vmem>>, vector<1x16x102xbf16>
    %1 = vector.shape_cast %0 : vector<1x16x102xbf16> to vector<16x102xbf16>
    %c0_2 = arith.constant 0 : index
    %c0_3 = arith.constant 0 : index
    %2 = vector.load %arg2[%c0_2, %c0_3] : memref<16x144xbf16, #tpu.memory_space<vmem>>, vector<16x144xbf16>
    %3 = vector.extract_strided_slice %2 {offsets = [0, 0], sizes = [16, 16], strides = [1, 1]} : vector<16x144xbf16> to vector<16x16xbf16>
    %4 = vector.extract_strided_slice %1 {offsets = [0, 0], sizes = [16, 80], strides = [1, 1]} : vector<16x102xbf16> to vector<16x80xbf16>
    %cst = arith.constant dense<0.000000e+00> : vector<16x80xf32>
    %5 = tpu.matmul %3, %4, %cst {dimension_numbers = #tpu.dot_dimension_numbers<[1], [0], [0], [1], [0, 0, 1, 1], [], []>} : vector<16x16xbf16>, vector<16x80xbf16>, vector<16x80xf32> -> vector<16x80xf32>
    %6 = vector.extract_strided_slice %2 {offsets = [0, 16], sizes = [16, 16], strides = [1, 1]} : vector<16x144xbf16> to vector<16x16xbf16>
    %7 = vector.extract_strided_slice %1 {offsets = [0, 1], sizes = [16, 80], strides = [1, 1]} : vector<16x102xbf16> to vector<16x80xbf16>
    %cst_4 = arith.constant dense<0.000000e+00> : vector<16x80xf32>
    %8 = tpu.matmul %6, %7, %cst_4 {dimension_numbers = #tpu.dot_dimension_numbers<[1], [0], [0], [1], [0, 0, 1, 1], [], []>} : vector<16x16xbf16>, vector<16x80xbf16>, vector<16x80xf32> -> vector<16x80xf32>
    %9 = arith.addf %5, %8 : vector<16x80xf32>
    %10 = vector.extract_strided_slice %2 {offsets = [0, 32], sizes = [16, 16], strides = [1, 1]} : vector<16x144xbf16> to vector<16x16xbf16>
    %11 = vector.extract_strided_slice %1 {offsets = [0, 2], sizes = [16, 80], strides = [1, 1]} : vector<16x102xbf16> to vector<16x80xbf16>
    %cst_5 = arith.constant dense<0.000000e+00> : vector<16x80xf32>
    %12 = tpu.matmul %10, %11, %cst_5 {dimension_numbers = #tpu.dot_dimension_numbers<[1], [0], [0], [1], [0, 0, 1, 1], [], []>} : vector<16x16xbf16>, vector<16x80xbf16>, vector<16x80xf32> -> vector<16x80xf32>
    %13 = arith.addf %9, %12 : vector<16x80xf32>
    %14 = vector.extract_strided_slice %2 {offsets = [0, 48], sizes = [16, 16], strides = [1, 1]} : vector<16x144xbf16> to vector<16x16xbf16>
    %15 = vector.extract_strided_slice %1 {offsets = [0, 10], sizes = [16, 80], strides = [1, 1]} : vector<16x102xbf16> to vector<16x80xbf16>
    %cst_6 = arith.constant dense<0.000000e+00> : vector<16x80xf32>
    %16 = tpu.matmul %14, %15, %cst_6 {dimension_numbers = #tpu.dot_dimension_numbers<[1], [0], [0], [1], [0, 0, 1, 1], [], []>} : vector<16x16xbf16>, vector<16x80xbf16>, vector<16x80xf32> -> vector<16x80xf32>
    %17 = arith.addf %13, %16 : vector<16x80xf32>
    %18 = vector.extract_strided_slice %2 {offsets = [0, 64], sizes = [16, 16], strides = [1, 1]} : vector<16x144xbf16> to vector<16x16xbf16>
    %19 = vector.extract_strided_slice %1 {offsets = [0, 11], sizes = [16, 80], strides = [1, 1]} : vector<16x102xbf16> to vector<16x80xbf16>
    %cst_7 = arith.constant dense<0.000000e+00> : vector<16x80xf32>
    %20 = tpu.matmul %18, %19, %cst_7 {dimension_numbers = #tpu.dot_dimension_numbers<[1], [0], [0], [1], [0, 0, 1, 1], [], []>} : vector<16x16xbf16>, vector<16x80xbf16>, vector<16x80xf32> -> vector<16x80xf32>
    %21 = arith.addf %17, %20 : vector<16x80xf32>
    %22 = vector.extract_strided_slice %2 {offsets = [0, 80], sizes = [16, 16], strides = [1, 1]} : vector<16x144xbf16> to vector<16x16xbf16>
    %23 = vector.extract_strided_slice %1 {offsets = [0, 12], sizes = [16, 80], strides = [1, 1]} : vector<16x102xbf16> to vector<16x80xbf16>
    %cst_8 = arith.constant dense<0.000000e+00> : vector<16x80xf32>
    %24 = tpu.matmul %22, %23, %cst_8 {dimension_numbers = #tpu.dot_dimension_numbers<[1], [0], [0], [1], [0, 0, 1, 1], [], []>} : vector<16x16xbf16>, vector<16x80xbf16>, vector<16x80xf32> -> vector<16x80xf32>
    %25 = arith.addf %21, %24 : vector<16x80xf32>
    %26 = vector.extract_strided_slice %2 {offsets = [0, 96], sizes = [16, 16], strides = [1, 1]} : vector<16x144xbf16> to vector<16x16xbf16>
    %27 = vector.extract_strided_slice %1 {offsets = [0, 20], sizes = [16, 80], strides = [1, 1]} : vector<16x102xbf16> to vector<16x80xbf16>
    %cst_9 = arith.constant dense<0.000000e+00> : vector<16x80xf32>
    %28 = tpu.matmul %26, %27, %cst_9 {dimension_numbers = #tpu.dot_dimension_numbers<[1], [0], [0], [1], [0, 0, 1, 1], [], []>} : vector<16x16xbf16>, vector<16x80xbf16>, vector<16x80xf32> -> vector<16x80xf32>
    %29 = arith.addf %25, %28 : vector<16x80xf32>
    %30 = vector.extract_strided_slice %2 {offsets = [0, 112], sizes = [16, 16], strides = [1, 1]} : vector<16x144xbf16> to vector<16x16xbf16>
    %31 = vector.extract_strided_slice %1 {offsets = [0, 21], sizes = [16, 80], strides = [1, 1]} : vector<16x102xbf16> to vector<16x80xbf16>
    %cst_10 = arith.constant dense<0.000000e+00> : vector<16x80xf32>
    %32 = tpu.matmul %30, %31, %cst_10 {dimension_numbers = #tpu.dot_dimension_numbers<[1], [0], [0], [1], [0, 0, 1, 1], [], []>} : vector<16x16xbf16>, vector<16x80xbf16>, vector<16x80xf32> -> vector<16x80xf32>
    %33 = arith.addf %29, %32 : vector<16x80xf32>
    %34 = vector.extract_strided_slice %2 {offsets = [0, 128], sizes = [16, 16], strides = [1, 1]} : vector<16x144xbf16> to vector<16x16xbf16>
    %35 = vector.extract_strided_slice %1 {offsets = [0, 22], sizes = [16, 80], strides = [1, 1]} : vector<16x102xbf16> to vector<16x80xbf16>
    %cst_11 = arith.constant dense<0.000000e+00> : vector<16x80xf32>
    %36 = tpu.matmul %34, %35, %cst_11 {dimension_numbers = #tpu.dot_dimension_numbers<[1], [0], [0], [1], [0, 0, 1, 1], [], []>} : vector<16x16xbf16>, vector<16x80xbf16>, vector<16x80xf32> -> vector<16x80xf32>
    %37 = arith.addf %33, %36 : vector<16x80xf32>
    %c0_12 = arith.constant 0 : index
    %c0_13 = arith.constant 0 : index
    %38 = vector.load %arg4[%c0_12, %c0_13] : memref<1x80xf32, #tpu.memory_space<vmem>>, vector<1x80xf32>
    %39 = vector.broadcast %38 : vector<1x80xf32> to vector<16x80xf32>
    %40 = arith.mulf %37, %39 : vector<16x80xf32>
    %cst_14 = arith.constant dense<0.000000e+00> : vector<16xf32>
    %41 = vector.multi_reduction <add>, %40, %cst_14 [1] : vector<16x80xf32> to vector<16xf32>
    %42 = vector.shape_cast %41 : vector<16xf32> to vector<16x1xf32>
    %cst_15 = arith.constant 1.562500e-02 : f32
    %43 = vector.broadcast %cst_15 : f32 to vector<16x1xf32>
    %44 = arith.mulf %42, %43 : vector<16x1xf32>
    %45 = vector.broadcast %44 : vector<16x1xf32> to vector<16x80xf32>
    %46 = arith.subf %37, %45 : vector<16x80xf32>
    %47 = arith.mulf %46, %46 : vector<16x80xf32>
    %48 = vector.broadcast %38 : vector<1x80xf32> to vector<16x80xf32>
    %49 = arith.mulf %47, %48 : vector<16x80xf32>
    %cst_16 = arith.constant dense<0.000000e+00> : vector<16xf32>
    %50 = vector.multi_reduction <add>, %49, %cst_16 [1] : vector<16x80xf32> to vector<16xf32>
    %51 = vector.shape_cast %50 : vector<16xf32> to vector<16x1xf32>
    %cst_17 = arith.constant 1.562500e-02 : f32
    %52 = vector.broadcast %cst_17 : f32 to vector<16x1xf32>
    %53 = arith.mulf %51, %52 : vector<16x1xf32>
    %cst_18 = arith.constant 9.99999974E-6 : f32
    %54 = vector.broadcast %cst_18 : f32 to vector<16x1xf32>
    %55 = arith.addf %53, %54 : vector<16x1xf32>
    %56 = math.rsqrt %55 : vector<16x1xf32>
    %57 = vector.broadcast %56 : vector<16x1xf32> to vector<16x80xf32>
    %58 = arith.mulf %46, %57 : vector<16x80xf32>
    %c0_19 = arith.constant 0 : index
    %c0_20 = arith.constant 0 : index
    %59 = vector.load %arg3[%c0_19, %c0_20] : memref<16x2xf32, #tpu.memory_space<vmem>>, vector<16x1xf32>
    %60 = vector.broadcast %59 : vector<16x1xf32> to vector<16x80xf32>
    %61 = arith.mulf %58, %60 : vector<16x80xf32>
    %c0_21 = arith.constant 0 : index
    %c1 = arith.constant 1 : index
    %62 = vector.load %arg3[%c0_21, %c1] : memref<16x2xf32, #tpu.memory_space<vmem>>, vector<16x1xf32>
    %63 = vector.broadcast %62 : vector<16x1xf32> to vector<16x80xf32>
    %64 = arith.addf %61, %63 : vector<16x80xf32>
    %c0_22 = arith.constant 0 : index
    %c0_23 = arith.constant 0 : index
    %c0_24 = arith.constant 0 : index
    %65 = vector.load %arg5[%c0_22, %c0_23, %c0_24] : memref<1x16x80xbf16, #tpu.memory_space<vmem>>, vector<1x16x80xbf16>
    %66 = vector.shape_cast %65 : vector<1x16x80xbf16> to vector<16x80xbf16>
    %67 = arith.extf %66 : vector<16x80xbf16> to vector<16x80xf32>
    %68 = arith.addf %64, %67 : vector<16x80xf32>
    %cst_25 = arith.constant 0.000000e+00 : f32
    %69 = vector.broadcast %cst_25 : f32 to vector<16x80xf32>
    %70 = arith.cmpf oge, %68, %69 : vector<16x80xf32>
    %cst_26 = arith.constant 0.00999999977 : f32
    %71 = vector.broadcast %cst_26 : f32 to vector<16x80xf32>
    %72 = arith.mulf %68, %71 : vector<16x80xf32>
    %73 = arith.select %70, %68, %72 : vector<16x80xi1>, vector<16x80xf32>
    %74 = arith.truncf %73 : vector<16x80xf32> to vector<16x80xbf16>
    %c0_27 = arith.constant 0 : index
    %c0_28 = arith.constant 0 : index
    %c0_29 = arith.constant 0 : index
    %75 = vector.load %arg6[%c0_27, %c0_28, %c0_29] : memref<1x16x80xbf16, #tpu.memory_space<vmem>>, vector<1x16x80xbf16>
    %76 = vector.shape_cast %75 : vector<1x16x80xbf16> to vector<16x80xbf16>
    %77 = vector.shape_cast %74 : vector<16x80xbf16> to vector<1x16x80xbf16>
    tpu.vector_store %arg6[%c0_27, %c0_28, %c0_29], %77 {strides = array<i32>} : memref<1x16x80xbf16, #tpu.memory_space<vmem>>, vector<1x16x80xbf16>,
    return
  }
  func.func @transform_0(%arg0: i32) -> (i32, i32, i32) {
    %c0_i32 = arith.constant 0 : i32
    %c0_i32_0 = arith.constant 0 : i32
    %c0_i32_1 = arith.constant 0 : i32
    return %arg0, %c0_i32, %c0_i32_0 : i32, i32, i32
  }
  func.func @transform_1(%arg0: i32) -> (i32, i32) {
    %c0_i32 = arith.constant 0 : i32
    %c0_i32_0 = arith.constant 0 : i32
    %c0_i32_1 = arith.constant 0 : i32
    return %c0_i32, %c0_i32_0 : i32, i32
  }
  func.func @transform_2(%arg0: i32) -> (i32, i32) {
    %c0_i32 = arith.constant 0 : i32
    %c0_i32_0 = arith.constant 0 : i32
    %c0_i32_1 = arith.constant 0 : i32
    return %c0_i32, %c0_i32_0 : i32, i32
  }
  func.func @transform_3(%arg0: i32) -> (i32, i32) {
    %c0_i32 = arith.constant 0 : i32
    %c0_i32_0 = arith.constant 0 : i32
    %c0_i32_1 = arith.constant 0 : i32
    return %c0_i32, %c0_i32_0 : i32, i32
  }
  func.func @transform_4(%arg0: i32) -> (i32, i32, i32) {
    %c0_i32 = arith.constant 0 : i32
    %c0_i32_0 = arith.constant 0 : i32
    %c0_i32_1 = arith.constant 0 : i32
    return %arg0, %c0_i32, %c0_i32_0 : i32, i32, i32
  }
  func.func @transform_5(%arg0: i32) -> (i32, i32, i32) {
    %c0_i32 = arith.constant 0 : i32
    %c0_i32_0 = arith.constant 0 : i32
    %c0_i32_1 = arith.constant 0 : i32
    return %arg0, %c0_i32, %c0_i32_0 : i32, i32, i32
  }
}

module attributes {stable_mosaic.version = 11 : i64} {
  func.func @kernel(%arg0: i32, %arg1: memref<1x64x16xbf16, #tpu.memory_space<vmem>>, %arg2: memref<32x64xbf16, #tpu.memory_space<vmem>>, %arg3: memref<32x2xf32, #tpu.memory_space<vmem>>, %arg4: memref<1x32x16xbf16, #tpu.memory_space<vmem>>) attributes {dimension_semantics = [#tpu.dimension_semantics<parallel>], iteration_bounds = array<i64: 2>, scalar_prefetch = 0 : i64, scratch_operands = 0 : i64, tpu.core_type = #tpu.core_type<tc>, window_params = [{transform_indices = @transform_0, window_bounds = array<i64: 1, 64, 16>}, {pipeline_mode = #tpu.pipeline_mode<synchronous>, transform_indices = @transform_1, window_bounds = array<i64: 32, 64>}, {pipeline_mode = #tpu.pipeline_mode<synchronous>, transform_indices = @transform_2, window_bounds = array<i64: 32, 2>}, {transform_indices = @transform_3, window_bounds = array<i64: 1, 32, 16>}]} {
    %c0 = arith.constant 0 : index
    %c0_0 = arith.constant 0 : index
    %c0_1 = arith.constant 0 : index
    %0 = vector.load %arg1[%c0, %c0_0, %c0_1] : memref<1x64x16xbf16, #tpu.memory_space<vmem>>, vector<1x64x16xbf16>
    %1 = vector.shape_cast %0 : vector<1x64x16xbf16> to vector<64x16xbf16>
    %c0_2 = arith.constant 0 : index
    %c0_3 = arith.constant 0 : index
    %2 = vector.load %arg2[%c0_2, %c0_3] : memref<32x64xbf16, #tpu.memory_space<vmem>>, vector<32x64xbf16>
    %cst = arith.constant dense<0.000000e+00> : vector<32x16xf32>
    %3 = tpu.matmul %2, %1, %cst {dimension_numbers = #tpu.dot_dimension_numbers<[1], [0], [0], [1], [0, 0, 1, 1], [], []>} : vector<32x64xbf16>, vector<64x16xbf16>, vector<32x16xf32> -> vector<32x16xf32>
    %cst_4 = arith.constant dense<0.000000e+00> : vector<32xf32>
    %4 = vector.multi_reduction <add>, %3, %cst_4 [1] : vector<32x16xf32> to vector<32xf32>
    %5 = vector.shape_cast %4 : vector<32xf32> to vector<32x1xf32>
    %cst_5 = arith.constant 1.600000e+01 : f32
    %6 = vector.broadcast %cst_5 : f32 to vector<32x1xf32>
    %7 = arith.divf %5, %6 : vector<32x1xf32>
    %8 = vector.broadcast %7 : vector<32x1xf32> to vector<32x16xf32>
    %9 = arith.subf %3, %8 : vector<32x16xf32>
    %10 = arith.mulf %9, %9 : vector<32x16xf32>
    %cst_6 = arith.constant dense<0.000000e+00> : vector<32xf32>
    %11 = vector.multi_reduction <add>, %10, %cst_6 [1] : vector<32x16xf32> to vector<32xf32>
    %12 = vector.shape_cast %11 : vector<32xf32> to vector<32x1xf32>
    %cst_7 = arith.constant 1.600000e+01 : f32
    %13 = vector.broadcast %cst_7 : f32 to vector<32x1xf32>
    %14 = arith.divf %12, %13 : vector<32x1xf32>
    %cst_8 = arith.constant 9.99999974E-6 : f32
    %15 = vector.broadcast %cst_8 : f32 to vector<32x1xf32>
    %16 = arith.addf %14, %15 : vector<32x1xf32>
    %17 = math.rsqrt %16 : vector<32x1xf32>
    %18 = vector.broadcast %17 : vector<32x1xf32> to vector<32x16xf32>
    %19 = arith.mulf %9, %18 : vector<32x16xf32>
    %c0_9 = arith.constant 0 : index
    %c0_10 = arith.constant 0 : index
    %20 = vector.load %arg3[%c0_9, %c0_10] : memref<32x2xf32, #tpu.memory_space<vmem>>, vector<32x1xf32>
    %21 = vector.broadcast %20 : vector<32x1xf32> to vector<32x16xf32>
    %22 = arith.mulf %19, %21 : vector<32x16xf32>
    %c0_11 = arith.constant 0 : index
    %c1 = arith.constant 1 : index
    %23 = vector.load %arg3[%c0_11, %c1] : memref<32x2xf32, #tpu.memory_space<vmem>>, vector<32x1xf32>
    %24 = vector.broadcast %23 : vector<32x1xf32> to vector<32x16xf32>
    %25 = arith.addf %22, %24 : vector<32x16xf32>
    %26 = arith.truncf %25 : vector<32x16xf32> to vector<32x16xbf16>
    %c0_12 = arith.constant 0 : index
    %c0_13 = arith.constant 0 : index
    %c0_14 = arith.constant 0 : index
    %27 = vector.load %arg4[%c0_12, %c0_13, %c0_14] : memref<1x32x16xbf16, #tpu.memory_space<vmem>>, vector<1x32x16xbf16>
    %28 = vector.shape_cast %27 : vector<1x32x16xbf16> to vector<32x16xbf16>
    %29 = vector.shape_cast %26 : vector<32x16xbf16> to vector<1x32x16xbf16>
    tpu.vector_store %arg4[%c0_12, %c0_13, %c0_14], %29 {strides = array<i32>} : memref<1x32x16xbf16, #tpu.memory_space<vmem>>, vector<1x32x16xbf16>,
    return
  }
  func.func @transform_0(%arg0: i32) -> (i32, i32, i32) {
    %c0_i32 = arith.constant 0 : i32
    %c0_i32_0 = arith.constant 0 : i32
    %c0_i32_1 = arith.constant 0 : i32
    return %arg0, %c0_i32, %c0_i32_0 : i32, i32, i32
  }
  func.func @transform_1(%arg0: i32) -> (i32, i32) {
    %c0_i32 = arith.constant 0 : i32
    %c0_i32_0 = arith.constant 0 : i32
    %c0_i32_1 = arith.constant 0 : i32
    return %c0_i32, %c0_i32_0 : i32, i32
  }
  func.func @transform_2(%arg0: i32) -> (i32, i32) {
    %c0_i32 = arith.constant 0 : i32
    %c0_i32_0 = arith.constant 0 : i32
    %c0_i32_1 = arith.constant 0 : i32
    return %c0_i32, %c0_i32_0 : i32, i32
  }
  func.func @transform_3(%arg0: i32) -> (i32, i32, i32) {
    %c0_i32 = arith.constant 0 : i32
    %c0_i32_0 = arith.constant 0 : i32
    %c0_i32_1 = arith.constant 0 : i32
    return %arg0, %c0_i32, %c0_i32_0 : i32, i32, i32
  }
}

module attributes {stable_mosaic.version = 11 : i64} {
  func.func @kernel(%arg0: i32, %arg1: memref<1x144x16xbf16, #tpu.memory_space<vmem>>, %arg2: memref<32x144xbf16, #tpu.memory_space<vmem>>, %arg3: memref<32x2xf32, #tpu.memory_space<vmem>>, %arg4: memref<1x32x16xbf16, #tpu.memory_space<vmem>>) attributes {dimension_semantics = [#tpu.dimension_semantics<parallel>], iteration_bounds = array<i64: 2>, scalar_prefetch = 0 : i64, scratch_operands = 0 : i64, tpu.core_type = #tpu.core_type<tc>, window_params = [{transform_indices = @transform_0, window_bounds = array<i64: 1, 144, 16>}, {pipeline_mode = #tpu.pipeline_mode<synchronous>, transform_indices = @transform_1, window_bounds = array<i64: 32, 144>}, {pipeline_mode = #tpu.pipeline_mode<synchronous>, transform_indices = @transform_2, window_bounds = array<i64: 32, 2>}, {transform_indices = @transform_3, window_bounds = array<i64: 1, 32, 16>}]} {
    %c0 = arith.constant 0 : index
    %c0_0 = arith.constant 0 : index
    %c0_1 = arith.constant 0 : index
    %0 = vector.load %arg1[%c0, %c0_0, %c0_1] : memref<1x144x16xbf16, #tpu.memory_space<vmem>>, vector<1x144x16xbf16>
    %1 = vector.shape_cast %0 : vector<1x144x16xbf16> to vector<144x16xbf16>
    %c0_2 = arith.constant 0 : index
    %c0_3 = arith.constant 0 : index
    %2 = vector.load %arg2[%c0_2, %c0_3] : memref<32x144xbf16, #tpu.memory_space<vmem>>, vector<32x144xbf16>
    %cst = arith.constant dense<0.000000e+00> : vector<32x16xf32>
    %3 = tpu.matmul %2, %1, %cst {dimension_numbers = #tpu.dot_dimension_numbers<[1], [0], [0], [1], [0, 0, 1, 1], [], []>} : vector<32x144xbf16>, vector<144x16xbf16>, vector<32x16xf32> -> vector<32x16xf32>
    %cst_4 = arith.constant dense<0.000000e+00> : vector<32xf32>
    %4 = vector.multi_reduction <add>, %3, %cst_4 [1] : vector<32x16xf32> to vector<32xf32>
    %5 = vector.shape_cast %4 : vector<32xf32> to vector<32x1xf32>
    %cst_5 = arith.constant 1.600000e+01 : f32
    %6 = vector.broadcast %cst_5 : f32 to vector<32x1xf32>
    %7 = arith.divf %5, %6 : vector<32x1xf32>
    %8 = vector.broadcast %7 : vector<32x1xf32> to vector<32x16xf32>
    %9 = arith.subf %3, %8 : vector<32x16xf32>
    %10 = arith.mulf %9, %9 : vector<32x16xf32>
    %cst_6 = arith.constant dense<0.000000e+00> : vector<32xf32>
    %11 = vector.multi_reduction <add>, %10, %cst_6 [1] : vector<32x16xf32> to vector<32xf32>
    %12 = vector.shape_cast %11 : vector<32xf32> to vector<32x1xf32>
    %cst_7 = arith.constant 1.600000e+01 : f32
    %13 = vector.broadcast %cst_7 : f32 to vector<32x1xf32>
    %14 = arith.divf %12, %13 : vector<32x1xf32>
    %cst_8 = arith.constant 9.99999974E-6 : f32
    %15 = vector.broadcast %cst_8 : f32 to vector<32x1xf32>
    %16 = arith.addf %14, %15 : vector<32x1xf32>
    %17 = math.rsqrt %16 : vector<32x1xf32>
    %18 = vector.broadcast %17 : vector<32x1xf32> to vector<32x16xf32>
    %19 = arith.mulf %9, %18 : vector<32x16xf32>
    %c0_9 = arith.constant 0 : index
    %c0_10 = arith.constant 0 : index
    %20 = vector.load %arg3[%c0_9, %c0_10] : memref<32x2xf32, #tpu.memory_space<vmem>>, vector<32x1xf32>
    %21 = vector.broadcast %20 : vector<32x1xf32> to vector<32x16xf32>
    %22 = arith.mulf %19, %21 : vector<32x16xf32>
    %c0_11 = arith.constant 0 : index
    %c1 = arith.constant 1 : index
    %23 = vector.load %arg3[%c0_11, %c1] : memref<32x2xf32, #tpu.memory_space<vmem>>, vector<32x1xf32>
    %24 = vector.broadcast %23 : vector<32x1xf32> to vector<32x16xf32>
    %25 = arith.addf %22, %24 : vector<32x16xf32>
    %cst_12 = arith.constant 0.000000e+00 : f32
    %26 = vector.broadcast %cst_12 : f32 to vector<32x16xf32>
    %27 = arith.cmpf oge, %25, %26 : vector<32x16xf32>
    %cst_13 = arith.constant 0.00999999977 : f32
    %28 = vector.broadcast %cst_13 : f32 to vector<32x16xf32>
    %29 = arith.mulf %25, %28 : vector<32x16xf32>
    %30 = arith.select %27, %25, %29 : vector<32x16xi1>, vector<32x16xf32>
    %31 = arith.truncf %30 : vector<32x16xf32> to vector<32x16xbf16>
    %c0_14 = arith.constant 0 : index
    %c0_15 = arith.constant 0 : index
    %c0_16 = arith.constant 0 : index
    %32 = vector.load %arg4[%c0_14, %c0_15, %c0_16] : memref<1x32x16xbf16, #tpu.memory_space<vmem>>, vector<1x32x16xbf16>
    %33 = vector.shape_cast %32 : vector<1x32x16xbf16> to vector<32x16xbf16>
    %34 = vector.shape_cast %31 : vector<32x16xbf16> to vector<1x32x16xbf16>
    tpu.vector_store %arg4[%c0_14, %c0_15, %c0_16], %34 {strides = array<i32>} : memref<1x32x16xbf16, #tpu.memory_space<vmem>>, vector<1x32x16xbf16>,
    return
  }
  func.func @transform_0(%arg0: i32) -> (i32, i32, i32) {
    %c0_i32 = arith.constant 0 : i32
    %c0_i32_0 = arith.constant 0 : i32
    %c0_i32_1 = arith.constant 0 : i32
    return %arg0, %c0_i32, %c0_i32_0 : i32, i32, i32
  }
  func.func @transform_1(%arg0: i32) -> (i32, i32) {
    %c0_i32 = arith.constant 0 : i32
    %c0_i32_0 = arith.constant 0 : i32
    %c0_i32_1 = arith.constant 0 : i32
    return %c0_i32, %c0_i32_0 : i32, i32
  }
  func.func @transform_2(%arg0: i32) -> (i32, i32) {
    %c0_i32 = arith.constant 0 : i32
    %c0_i32_0 = arith.constant 0 : i32
    %c0_i32_1 = arith.constant 0 : i32
    return %c0_i32, %c0_i32_0 : i32, i32
  }
  func.func @transform_3(%arg0: i32) -> (i32, i32, i32) {
    %c0_i32 = arith.constant 0 : i32
    %c0_i32_0 = arith.constant 0 : i32
    %c0_i32_1 = arith.constant 0 : i32
    return %arg0, %c0_i32, %c0_i32_0 : i32, i32, i32
  }
}

module attributes {stable_mosaic.version = 11 : i64} {
  func.func @kernel(%arg0: i32, %arg1: memref<1x32x38xbf16, #tpu.memory_space<vmem>>, %arg2: memref<32x288xbf16, #tpu.memory_space<vmem>>, %arg3: memref<32x2xf32, #tpu.memory_space<vmem>>, %arg4: memref<1x24xf32, #tpu.memory_space<vmem>>, %arg5: memref<1x32x24xbf16, #tpu.memory_space<vmem>>, %arg6: memref<1x32x24xbf16, #tpu.memory_space<vmem>>) attributes {dimension_semantics = [#tpu.dimension_semantics<parallel>], iteration_bounds = array<i64: 2>, scalar_prefetch = 0 : i64, scratch_operands = 0 : i64, tpu.core_type = #tpu.core_type<tc>, window_params = [{transform_indices = @transform_0, window_bounds = array<i64: 1, 32, 38>}, {pipeline_mode = #tpu.pipeline_mode<synchronous>, transform_indices = @transform_1, window_bounds = array<i64: 32, 288>}, {pipeline_mode = #tpu.pipeline_mode<synchronous>, transform_indices = @transform_2, window_bounds = array<i64: 32, 2>}, {pipeline_mode = #tpu.pipeline_mode<synchronous>, transform_indices = @transform_3, window_bounds = array<i64: 1, 24>}, {transform_indices = @transform_4, window_bounds = array<i64: 1, 32, 24>}, {transform_indices = @transform_5, window_bounds = array<i64: 1, 32, 24>}]} {
    %c0 = arith.constant 0 : index
    %c0_0 = arith.constant 0 : index
    %c0_1 = arith.constant 0 : index
    %0 = vector.load %arg1[%c0, %c0_0, %c0_1] : memref<1x32x38xbf16, #tpu.memory_space<vmem>>, vector<1x32x38xbf16>
    %1 = vector.shape_cast %0 : vector<1x32x38xbf16> to vector<32x38xbf16>
    %c0_2 = arith.constant 0 : index
    %c0_3 = arith.constant 0 : index
    %2 = vector.load %arg2[%c0_2, %c0_3] : memref<32x288xbf16, #tpu.memory_space<vmem>>, vector<32x288xbf16>
    %3 = vector.extract_strided_slice %2 {offsets = [0, 0], sizes = [32, 32], strides = [1, 1]} : vector<32x288xbf16> to vector<32x32xbf16>
    %4 = vector.extract_strided_slice %1 {offsets = [0, 0], sizes = [32, 24], strides = [1, 1]} : vector<32x38xbf16> to vector<32x24xbf16>
    %cst = arith.constant dense<0.000000e+00> : vector<32x24xf32>
    %5 = tpu.matmul %3, %4, %cst {dimension_numbers = #tpu.dot_dimension_numbers<[1], [0], [0], [1], [0, 0, 1, 1], [], []>} : vector<32x32xbf16>, vector<32x24xbf16>, vector<32x24xf32> -> vector<32x24xf32>
    %6 = vector.extract_strided_slice %2 {offsets = [0, 32], sizes = [32, 32], strides = [1, 1]} : vector<32x288xbf16> to vector<32x32xbf16>
    %7 = vector.extract_strided_slice %1 {offsets = [0, 1], sizes = [32, 24], strides = [1, 1]} : vector<32x38xbf16> to vector<32x24xbf16>
    %cst_4 = arith.constant dense<0.000000e+00> : vector<32x24xf32>
    %8 = tpu.matmul %6, %7, %cst_4 {dimension_numbers = #tpu.dot_dimension_numbers<[1], [0], [0], [1], [0, 0, 1, 1], [], []>} : vector<32x32xbf16>, vector<32x24xbf16>, vector<32x24xf32> -> vector<32x24xf32>
    %9 = arith.addf %5, %8 : vector<32x24xf32>
    %10 = vector.extract_strided_slice %2 {offsets = [0, 64], sizes = [32, 32], strides = [1, 1]} : vector<32x288xbf16> to vector<32x32xbf16>
    %11 = vector.extract_strided_slice %1 {offsets = [0, 2], sizes = [32, 24], strides = [1, 1]} : vector<32x38xbf16> to vector<32x24xbf16>
    %cst_5 = arith.constant dense<0.000000e+00> : vector<32x24xf32>
    %12 = tpu.matmul %10, %11, %cst_5 {dimension_numbers = #tpu.dot_dimension_numbers<[1], [0], [0], [1], [0, 0, 1, 1], [], []>} : vector<32x32xbf16>, vector<32x24xbf16>, vector<32x24xf32> -> vector<32x24xf32>
    %13 = arith.addf %9, %12 : vector<32x24xf32>
    %14 = vector.extract_strided_slice %2 {offsets = [0, 96], sizes = [32, 32], strides = [1, 1]} : vector<32x288xbf16> to vector<32x32xbf16>
    %15 = vector.extract_strided_slice %1 {offsets = [0, 6], sizes = [32, 24], strides = [1, 1]} : vector<32x38xbf16> to vector<32x24xbf16>
    %cst_6 = arith.constant dense<0.000000e+00> : vector<32x24xf32>
    %16 = tpu.matmul %14, %15, %cst_6 {dimension_numbers = #tpu.dot_dimension_numbers<[1], [0], [0], [1], [0, 0, 1, 1], [], []>} : vector<32x32xbf16>, vector<32x24xbf16>, vector<32x24xf32> -> vector<32x24xf32>
    %17 = arith.addf %13, %16 : vector<32x24xf32>
    %18 = vector.extract_strided_slice %2 {offsets = [0, 128], sizes = [32, 32], strides = [1, 1]} : vector<32x288xbf16> to vector<32x32xbf16>
    %19 = vector.extract_strided_slice %1 {offsets = [0, 7], sizes = [32, 24], strides = [1, 1]} : vector<32x38xbf16> to vector<32x24xbf16>
    %cst_7 = arith.constant dense<0.000000e+00> : vector<32x24xf32>
    %20 = tpu.matmul %18, %19, %cst_7 {dimension_numbers = #tpu.dot_dimension_numbers<[1], [0], [0], [1], [0, 0, 1, 1], [], []>} : vector<32x32xbf16>, vector<32x24xbf16>, vector<32x24xf32> -> vector<32x24xf32>
    %21 = arith.addf %17, %20 : vector<32x24xf32>
    %22 = vector.extract_strided_slice %2 {offsets = [0, 160], sizes = [32, 32], strides = [1, 1]} : vector<32x288xbf16> to vector<32x32xbf16>
    %23 = vector.extract_strided_slice %1 {offsets = [0, 8], sizes = [32, 24], strides = [1, 1]} : vector<32x38xbf16> to vector<32x24xbf16>
    %cst_8 = arith.constant dense<0.000000e+00> : vector<32x24xf32>
    %24 = tpu.matmul %22, %23, %cst_8 {dimension_numbers = #tpu.dot_dimension_numbers<[1], [0], [0], [1], [0, 0, 1, 1], [], []>} : vector<32x32xbf16>, vector<32x24xbf16>, vector<32x24xf32> -> vector<32x24xf32>
    %25 = arith.addf %21, %24 : vector<32x24xf32>
    %26 = vector.extract_strided_slice %2 {offsets = [0, 192], sizes = [32, 32], strides = [1, 1]} : vector<32x288xbf16> to vector<32x32xbf16>
    %27 = vector.extract_strided_slice %1 {offsets = [0, 12], sizes = [32, 24], strides = [1, 1]} : vector<32x38xbf16> to vector<32x24xbf16>
    %cst_9 = arith.constant dense<0.000000e+00> : vector<32x24xf32>
    %28 = tpu.matmul %26, %27, %cst_9 {dimension_numbers = #tpu.dot_dimension_numbers<[1], [0], [0], [1], [0, 0, 1, 1], [], []>} : vector<32x32xbf16>, vector<32x24xbf16>, vector<32x24xf32> -> vector<32x24xf32>
    %29 = arith.addf %25, %28 : vector<32x24xf32>
    %30 = vector.extract_strided_slice %2 {offsets = [0, 224], sizes = [32, 32], strides = [1, 1]} : vector<32x288xbf16> to vector<32x32xbf16>
    %31 = vector.extract_strided_slice %1 {offsets = [0, 13], sizes = [32, 24], strides = [1, 1]} : vector<32x38xbf16> to vector<32x24xbf16>
    %cst_10 = arith.constant dense<0.000000e+00> : vector<32x24xf32>
    %32 = tpu.matmul %30, %31, %cst_10 {dimension_numbers = #tpu.dot_dimension_numbers<[1], [0], [0], [1], [0, 0, 1, 1], [], []>} : vector<32x32xbf16>, vector<32x24xbf16>, vector<32x24xf32> -> vector<32x24xf32>
    %33 = arith.addf %29, %32 : vector<32x24xf32>
    %34 = vector.extract_strided_slice %2 {offsets = [0, 256], sizes = [32, 32], strides = [1, 1]} : vector<32x288xbf16> to vector<32x32xbf16>
    %35 = vector.extract_strided_slice %1 {offsets = [0, 14], sizes = [32, 24], strides = [1, 1]} : vector<32x38xbf16> to vector<32x24xbf16>
    %cst_11 = arith.constant dense<0.000000e+00> : vector<32x24xf32>
    %36 = tpu.matmul %34, %35, %cst_11 {dimension_numbers = #tpu.dot_dimension_numbers<[1], [0], [0], [1], [0, 0, 1, 1], [], []>} : vector<32x32xbf16>, vector<32x24xbf16>, vector<32x24xf32> -> vector<32x24xf32>
    %37 = arith.addf %33, %36 : vector<32x24xf32>
    %c0_12 = arith.constant 0 : index
    %c0_13 = arith.constant 0 : index
    %38 = vector.load %arg4[%c0_12, %c0_13] : memref<1x24xf32, #tpu.memory_space<vmem>>, vector<1x24xf32>
    %39 = vector.broadcast %38 : vector<1x24xf32> to vector<32x24xf32>
    %40 = arith.mulf %37, %39 : vector<32x24xf32>
    %cst_14 = arith.constant dense<0.000000e+00> : vector<32xf32>
    %41 = vector.multi_reduction <add>, %40, %cst_14 [1] : vector<32x24xf32> to vector<32xf32>
    %42 = vector.shape_cast %41 : vector<32xf32> to vector<32x1xf32>
    %cst_15 = arith.constant 6.250000e-02 : f32
    %43 = vector.broadcast %cst_15 : f32 to vector<32x1xf32>
    %44 = arith.mulf %42, %43 : vector<32x1xf32>
    %45 = vector.broadcast %44 : vector<32x1xf32> to vector<32x24xf32>
    %46 = arith.subf %37, %45 : vector<32x24xf32>
    %47 = arith.mulf %46, %46 : vector<32x24xf32>
    %48 = vector.broadcast %38 : vector<1x24xf32> to vector<32x24xf32>
    %49 = arith.mulf %47, %48 : vector<32x24xf32>
    %cst_16 = arith.constant dense<0.000000e+00> : vector<32xf32>
    %50 = vector.multi_reduction <add>, %49, %cst_16 [1] : vector<32x24xf32> to vector<32xf32>
    %51 = vector.shape_cast %50 : vector<32xf32> to vector<32x1xf32>
    %cst_17 = arith.constant 6.250000e-02 : f32
    %52 = vector.broadcast %cst_17 : f32 to vector<32x1xf32>
    %53 = arith.mulf %51, %52 : vector<32x1xf32>
    %cst_18 = arith.constant 9.99999974E-6 : f32
    %54 = vector.broadcast %cst_18 : f32 to vector<32x1xf32>
    %55 = arith.addf %53, %54 : vector<32x1xf32>
    %56 = math.rsqrt %55 : vector<32x1xf32>
    %57 = vector.broadcast %56 : vector<32x1xf32> to vector<32x24xf32>
    %58 = arith.mulf %46, %57 : vector<32x24xf32>
    %c0_19 = arith.constant 0 : index
    %c0_20 = arith.constant 0 : index
    %59 = vector.load %arg3[%c0_19, %c0_20] : memref<32x2xf32, #tpu.memory_space<vmem>>, vector<32x1xf32>
    %60 = vector.broadcast %59 : vector<32x1xf32> to vector<32x24xf32>
    %61 = arith.mulf %58, %60 : vector<32x24xf32>
    %c0_21 = arith.constant 0 : index
    %c1 = arith.constant 1 : index
    %62 = vector.load %arg3[%c0_21, %c1] : memref<32x2xf32, #tpu.memory_space<vmem>>, vector<32x1xf32>
    %63 = vector.broadcast %62 : vector<32x1xf32> to vector<32x24xf32>
    %64 = arith.addf %61, %63 : vector<32x24xf32>
    %c0_22 = arith.constant 0 : index
    %c0_23 = arith.constant 0 : index
    %c0_24 = arith.constant 0 : index
    %65 = vector.load %arg5[%c0_22, %c0_23, %c0_24] : memref<1x32x24xbf16, #tpu.memory_space<vmem>>, vector<1x32x24xbf16>
    %66 = vector.shape_cast %65 : vector<1x32x24xbf16> to vector<32x24xbf16>
    %67 = arith.extf %66 : vector<32x24xbf16> to vector<32x24xf32>
    %68 = arith.addf %64, %67 : vector<32x24xf32>
    %cst_25 = arith.constant 0.000000e+00 : f32
    %69 = vector.broadcast %cst_25 : f32 to vector<32x24xf32>
    %70 = arith.cmpf oge, %68, %69 : vector<32x24xf32>
    %cst_26 = arith.constant 0.00999999977 : f32
    %71 = vector.broadcast %cst_26 : f32 to vector<32x24xf32>
    %72 = arith.mulf %68, %71 : vector<32x24xf32>
    %73 = arith.select %70, %68, %72 : vector<32x24xi1>, vector<32x24xf32>
    %74 = arith.truncf %73 : vector<32x24xf32> to vector<32x24xbf16>
    %c0_27 = arith.constant 0 : index
    %c0_28 = arith.constant 0 : index
    %c0_29 = arith.constant 0 : index
    %75 = vector.load %arg6[%c0_27, %c0_28, %c0_29] : memref<1x32x24xbf16, #tpu.memory_space<vmem>>, vector<1x32x24xbf16>
    %76 = vector.shape_cast %75 : vector<1x32x24xbf16> to vector<32x24xbf16>
    %77 = vector.shape_cast %74 : vector<32x24xbf16> to vector<1x32x24xbf16>
    tpu.vector_store %arg6[%c0_27, %c0_28, %c0_29], %77 {strides = array<i32>} : memref<1x32x24xbf16, #tpu.memory_space<vmem>>, vector<1x32x24xbf16>,
    return
  }
  func.func @transform_0(%arg0: i32) -> (i32, i32, i32) {
    %c0_i32 = arith.constant 0 : i32
    %c0_i32_0 = arith.constant 0 : i32
    %c0_i32_1 = arith.constant 0 : i32
    return %arg0, %c0_i32, %c0_i32_0 : i32, i32, i32
  }
  func.func @transform_1(%arg0: i32) -> (i32, i32) {
    %c0_i32 = arith.constant 0 : i32
    %c0_i32_0 = arith.constant 0 : i32
    %c0_i32_1 = arith.constant 0 : i32
    return %c0_i32, %c0_i32_0 : i32, i32
  }
  func.func @transform_2(%arg0: i32) -> (i32, i32) {
    %c0_i32 = arith.constant 0 : i32
    %c0_i32_0 = arith.constant 0 : i32
    %c0_i32_1 = arith.constant 0 : i32
    return %c0_i32, %c0_i32_0 : i32, i32
  }
  func.func @transform_3(%arg0: i32) -> (i32, i32) {
    %c0_i32 = arith.constant 0 : i32
    %c0_i32_0 = arith.constant 0 : i32
    %c0_i32_1 = arith.constant 0 : i32
    return %c0_i32, %c0_i32_0 : i32, i32
  }
  func.func @transform_4(%arg0: i32) -> (i32, i32, i32) {
    %c0_i32 = arith.constant 0 : i32
    %c0_i32_0 = arith.constant 0 : i32
    %c0_i32_1 = arith.constant 0 : i32
    return %arg0, %c0_i32, %c0_i32_0 : i32, i32, i32
  }
  func.func @transform_5(%arg0: i32) -> (i32, i32, i32) {
    %c0_i32 = arith.constant 0 : i32
    %c0_i32_0 = arith.constant 0 : i32
    %c0_i32_1 = arith.constant 0 : i32
    return %arg0, %c0_i32, %c0_i32_0 : i32, i32, i32
  }
}

module attributes {stable_mosaic.version = 11 : i64} {
  func.func @kernel(%arg0: i32, %arg1: memref<1x32x16xbf16, #tpu.memory_space<vmem>>, %arg2: memref<64x32xbf16, #tpu.memory_space<vmem>>, %arg3: memref<1x64x16xbf16, #tpu.memory_space<vmem>>) attributes {dimension_semantics = [#tpu.dimension_semantics<parallel>], iteration_bounds = array<i64: 2>, scalar_prefetch = 0 : i64, scratch_operands = 0 : i64, tpu.core_type = #tpu.core_type<tc>, window_params = [{transform_indices = @transform_0, window_bounds = array<i64: 1, 32, 16>}, {pipeline_mode = #tpu.pipeline_mode<synchronous>, transform_indices = @transform_1, window_bounds = array<i64: 64, 32>}, {transform_indices = @transform_2, window_bounds = array<i64: 1, 64, 16>}]} {
    %c0 = arith.constant 0 : index
    %c0_0 = arith.constant 0 : index
    %c0_1 = arith.constant 0 : index
    %0 = vector.load %arg1[%c0, %c0_0, %c0_1] : memref<1x32x16xbf16, #tpu.memory_space<vmem>>, vector<1x32x16xbf16>
    %1 = vector.shape_cast %0 : vector<1x32x16xbf16> to vector<32x16xbf16>
    %c0_2 = arith.constant 0 : index
    %c0_3 = arith.constant 0 : index
    %2 = vector.load %arg2[%c0_2, %c0_3] : memref<64x32xbf16, #tpu.memory_space<vmem>>, vector<64x32xbf16>
    %cst = arith.constant dense<0.000000e+00> : vector<64x16xf32>
    %3 = tpu.matmul %2, %1, %cst {dimension_numbers = #tpu.dot_dimension_numbers<[1], [0], [0], [1], [0, 0, 1, 1], [], []>} : vector<64x32xbf16>, vector<32x16xbf16>, vector<64x16xf32> -> vector<64x16xf32>
    %4 = arith.truncf %3 : vector<64x16xf32> to vector<64x16xbf16>
    %c0_4 = arith.constant 0 : index
    %c0_5 = arith.constant 0 : index
    %c0_6 = arith.constant 0 : index
    %5 = vector.load %arg3[%c0_4, %c0_5, %c0_6] : memref<1x64x16xbf16, #tpu.memory_space<vmem>>, vector<1x64x16xbf16>
    %6 = vector.shape_cast %5 : vector<1x64x16xbf16> to vector<64x16xbf16>
    %7 = vector.shape_cast %4 : vector<64x16xbf16> to vector<1x64x16xbf16>
    tpu.vector_store %arg3[%c0_4, %c0_5, %c0_6], %7 {strides = array<i32>} : memref<1x64x16xbf16, #tpu.memory_space<vmem>>, vector<1x64x16xbf16>,
    return
  }
  func.func @transform_0(%arg0: i32) -> (i32, i32, i32) {
    %c0_i32 = arith.constant 0 : i32
    %c0_i32_0 = arith.constant 0 : i32
    %c0_i32_1 = arith.constant 0 : i32
    return %arg0, %c0_i32, %c0_i32_0 : i32, i32, i32
  }
  func.func @transform_1(%arg0: i32) -> (i32, i32) {
    %c0_i32 = arith.constant 0 : i32
    %c0_i32_0 = arith.constant 0 : i32
    %c0_i32_1 = arith.constant 0 : i32
    return %c0_i32, %c0_i32_0 : i32, i32
  }
  func.func @transform_2(%arg0: i32) -> (i32, i32, i32) {
    %c0_i32 = arith.constant 0 : i32
    %c0_i32_0 = arith.constant 0 : i32
    %c0_i32_1 = arith.constant 0 : i32
    return %arg0, %c0_i32, %c0_i32_0 : i32, i32, i32
  }
}

module attributes {stable_mosaic.version = 11 : i64} {
  func.func @kernel(%arg0: i32, %arg1: memref<1x32x102xbf16, #tpu.memory_space<vmem>>, %arg2: memref<16x288xbf16, #tpu.memory_space<vmem>>, %arg3: memref<16x2xf32, #tpu.memory_space<vmem>>, %arg4: memref<1x80xf32, #tpu.memory_space<vmem>>, %arg5: memref<1x16x80xbf16, #tpu.memory_space<vmem>>) attributes {dimension_semantics = [#tpu.dimension_semantics<parallel>], iteration_bounds = array<i64: 2>, scalar_prefetch = 0 : i64, scratch_operands = 0 : i64, tpu.core_type = #tpu.core_type<tc>, window_params = [{transform_indices = @transform_0, window_bounds = array<i64: 1, 32, 102>}, {pipeline_mode = #tpu.pipeline_mode<synchronous>, transform_indices = @transform_1, window_bounds = array<i64: 16, 288>}, {pipeline_mode = #tpu.pipeline_mode<synchronous>, transform_indices = @transform_2, window_bounds = array<i64: 16, 2>}, {pipeline_mode = #tpu.pipeline_mode<synchronous>, transform_indices = @transform_3, window_bounds = array<i64: 1, 80>}, {transform_indices = @transform_4, window_bounds = array<i64: 1, 16, 80>}]} {
    %c0 = arith.constant 0 : index
    %c0_0 = arith.constant 0 : index
    %c0_1 = arith.constant 0 : index
    %0 = vector.load %arg1[%c0, %c0_0, %c0_1] : memref<1x32x102xbf16, #tpu.memory_space<vmem>>, vector<1x32x102xbf16>
    %1 = vector.shape_cast %0 : vector<1x32x102xbf16> to vector<32x102xbf16>
    %c0_2 = arith.constant 0 : index
    %c0_3 = arith.constant 0 : index
    %2 = vector.load %arg2[%c0_2, %c0_3] : memref<16x288xbf16, #tpu.memory_space<vmem>>, vector<16x288xbf16>
    %3 = vector.extract_strided_slice %2 {offsets = [0, 0], sizes = [16, 32], strides = [1, 1]} : vector<16x288xbf16> to vector<16x32xbf16>
    %4 = vector.extract_strided_slice %1 {offsets = [0, 0], sizes = [32, 80], strides = [1, 1]} : vector<32x102xbf16> to vector<32x80xbf16>
    %cst = arith.constant dense<0.000000e+00> : vector<16x80xf32>
    %5 = tpu.matmul %3, %4, %cst {dimension_numbers = #tpu.dot_dimension_numbers<[1], [0], [0], [1], [0, 0, 1, 1], [], []>} : vector<16x32xbf16>, vector<32x80xbf16>, vector<16x80xf32> -> vector<16x80xf32>
    %6 = vector.extract_strided_slice %2 {offsets = [0, 32], sizes = [16, 32], strides = [1, 1]} : vector<16x288xbf16> to vector<16x32xbf16>
    %7 = vector.extract_strided_slice %1 {offsets = [0, 1], sizes = [32, 80], strides = [1, 1]} : vector<32x102xbf16> to vector<32x80xbf16>
    %cst_4 = arith.constant dense<0.000000e+00> : vector<16x80xf32>
    %8 = tpu.matmul %6, %7, %cst_4 {dimension_numbers = #tpu.dot_dimension_numbers<[1], [0], [0], [1], [0, 0, 1, 1], [], []>} : vector<16x32xbf16>, vector<32x80xbf16>, vector<16x80xf32> -> vector<16x80xf32>
    %9 = arith.addf %5, %8 : vector<16x80xf32>
    %10 = vector.extract_strided_slice %2 {offsets = [0, 64], sizes = [16, 32], strides = [1, 1]} : vector<16x288xbf16> to vector<16x32xbf16>
    %11 = vector.extract_strided_slice %1 {offsets = [0, 2], sizes = [32, 80], strides = [1, 1]} : vector<32x102xbf16> to vector<32x80xbf16>
    %cst_5 = arith.constant dense<0.000000e+00> : vector<16x80xf32>
    %12 = tpu.matmul %10, %11, %cst_5 {dimension_numbers = #tpu.dot_dimension_numbers<[1], [0], [0], [1], [0, 0, 1, 1], [], []>} : vector<16x32xbf16>, vector<32x80xbf16>, vector<16x80xf32> -> vector<16x80xf32>
    %13 = arith.addf %9, %12 : vector<16x80xf32>
    %14 = vector.extract_strided_slice %2 {offsets = [0, 96], sizes = [16, 32], strides = [1, 1]} : vector<16x288xbf16> to vector<16x32xbf16>
    %15 = vector.extract_strided_slice %1 {offsets = [0, 10], sizes = [32, 80], strides = [1, 1]} : vector<32x102xbf16> to vector<32x80xbf16>
    %cst_6 = arith.constant dense<0.000000e+00> : vector<16x80xf32>
    %16 = tpu.matmul %14, %15, %cst_6 {dimension_numbers = #tpu.dot_dimension_numbers<[1], [0], [0], [1], [0, 0, 1, 1], [], []>} : vector<16x32xbf16>, vector<32x80xbf16>, vector<16x80xf32> -> vector<16x80xf32>
    %17 = arith.addf %13, %16 : vector<16x80xf32>
    %18 = vector.extract_strided_slice %2 {offsets = [0, 128], sizes = [16, 32], strides = [1, 1]} : vector<16x288xbf16> to vector<16x32xbf16>
    %19 = vector.extract_strided_slice %1 {offsets = [0, 11], sizes = [32, 80], strides = [1, 1]} : vector<32x102xbf16> to vector<32x80xbf16>
    %cst_7 = arith.constant dense<0.000000e+00> : vector<16x80xf32>
    %20 = tpu.matmul %18, %19, %cst_7 {dimension_numbers = #tpu.dot_dimension_numbers<[1], [0], [0], [1], [0, 0, 1, 1], [], []>} : vector<16x32xbf16>, vector<32x80xbf16>, vector<16x80xf32> -> vector<16x80xf32>
    %21 = arith.addf %17, %20 : vector<16x80xf32>
    %22 = vector.extract_strided_slice %2 {offsets = [0, 160], sizes = [16, 32], strides = [1, 1]} : vector<16x288xbf16> to vector<16x32xbf16>
    %23 = vector.extract_strided_slice %1 {offsets = [0, 12], sizes = [32, 80], strides = [1, 1]} : vector<32x102xbf16> to vector<32x80xbf16>
    %cst_8 = arith.constant dense<0.000000e+00> : vector<16x80xf32>
    %24 = tpu.matmul %22, %23, %cst_8 {dimension_numbers = #tpu.dot_dimension_numbers<[1], [0], [0], [1], [0, 0, 1, 1], [], []>} : vector<16x32xbf16>, vector<32x80xbf16>, vector<16x80xf32> -> vector<16x80xf32>
    %25 = arith.addf %21, %24 : vector<16x80xf32>
    %26 = vector.extract_strided_slice %2 {offsets = [0, 192], sizes = [16, 32], strides = [1, 1]} : vector<16x288xbf16> to vector<16x32xbf16>
    %27 = vector.extract_strided_slice %1 {offsets = [0, 20], sizes = [32, 80], strides = [1, 1]} : vector<32x102xbf16> to vector<32x80xbf16>
    %cst_9 = arith.constant dense<0.000000e+00> : vector<16x80xf32>
    %28 = tpu.matmul %26, %27, %cst_9 {dimension_numbers = #tpu.dot_dimension_numbers<[1], [0], [0], [1], [0, 0, 1, 1], [], []>} : vector<16x32xbf16>, vector<32x80xbf16>, vector<16x80xf32> -> vector<16x80xf32>
    %29 = arith.addf %25, %28 : vector<16x80xf32>
    %30 = vector.extract_strided_slice %2 {offsets = [0, 224], sizes = [16, 32], strides = [1, 1]} : vector<16x288xbf16> to vector<16x32xbf16>
    %31 = vector.extract_strided_slice %1 {offsets = [0, 21], sizes = [32, 80], strides = [1, 1]} : vector<32x102xbf16> to vector<32x80xbf16>
    %cst_10 = arith.constant dense<0.000000e+00> : vector<16x80xf32>
    %32 = tpu.matmul %30, %31, %cst_10 {dimension_numbers = #tpu.dot_dimension_numbers<[1], [0], [0], [1], [0, 0, 1, 1], [], []>} : vector<16x32xbf16>, vector<32x80xbf16>, vector<16x80xf32> -> vector<16x80xf32>
    %33 = arith.addf %29, %32 : vector<16x80xf32>
    %34 = vector.extract_strided_slice %2 {offsets = [0, 256], sizes = [16, 32], strides = [1, 1]} : vector<16x288xbf16> to vector<16x32xbf16>
    %35 = vector.extract_strided_slice %1 {offsets = [0, 22], sizes = [32, 80], strides = [1, 1]} : vector<32x102xbf16> to vector<32x80xbf16>
    %cst_11 = arith.constant dense<0.000000e+00> : vector<16x80xf32>
    %36 = tpu.matmul %34, %35, %cst_11 {dimension_numbers = #tpu.dot_dimension_numbers<[1], [0], [0], [1], [0, 0, 1, 1], [], []>} : vector<16x32xbf16>, vector<32x80xbf16>, vector<16x80xf32> -> vector<16x80xf32>
    %37 = arith.addf %33, %36 : vector<16x80xf32>
    %c0_12 = arith.constant 0 : index
    %c0_13 = arith.constant 0 : index
    %38 = vector.load %arg4[%c0_12, %c0_13] : memref<1x80xf32, #tpu.memory_space<vmem>>, vector<1x80xf32>
    %39 = vector.broadcast %38 : vector<1x80xf32> to vector<16x80xf32>
    %40 = arith.mulf %37, %39 : vector<16x80xf32>
    %cst_14 = arith.constant dense<0.000000e+00> : vector<16xf32>
    %41 = vector.multi_reduction <add>, %40, %cst_14 [1] : vector<16x80xf32> to vector<16xf32>
    %42 = vector.shape_cast %41 : vector<16xf32> to vector<16x1xf32>
    %cst_15 = arith.constant 1.562500e-02 : f32
    %43 = vector.broadcast %cst_15 : f32 to vector<16x1xf32>
    %44 = arith.mulf %42, %43 : vector<16x1xf32>
    %45 = vector.broadcast %44 : vector<16x1xf32> to vector<16x80xf32>
    %46 = arith.subf %37, %45 : vector<16x80xf32>
    %47 = arith.mulf %46, %46 : vector<16x80xf32>
    %48 = vector.broadcast %38 : vector<1x80xf32> to vector<16x80xf32>
    %49 = arith.mulf %47, %48 : vector<16x80xf32>
    %cst_16 = arith.constant dense<0.000000e+00> : vector<16xf32>
    %50 = vector.multi_reduction <add>, %49, %cst_16 [1] : vector<16x80xf32> to vector<16xf32>
    %51 = vector.shape_cast %50 : vector<16xf32> to vector<16x1xf32>
    %cst_17 = arith.constant 1.562500e-02 : f32
    %52 = vector.broadcast %cst_17 : f32 to vector<16x1xf32>
    %53 = arith.mulf %51, %52 : vector<16x1xf32>
    %cst_18 = arith.constant 9.99999974E-6 : f32
    %54 = vector.broadcast %cst_18 : f32 to vector<16x1xf32>
    %55 = arith.addf %53, %54 : vector<16x1xf32>
    %56 = math.rsqrt %55 : vector<16x1xf32>
    %57 = vector.broadcast %56 : vector<16x1xf32> to vector<16x80xf32>
    %58 = arith.mulf %46, %57 : vector<16x80xf32>
    %c0_19 = arith.constant 0 : index
    %c0_20 = arith.constant 0 : index
    %59 = vector.load %arg3[%c0_19, %c0_20] : memref<16x2xf32, #tpu.memory_space<vmem>>, vector<16x1xf32>
    %60 = vector.broadcast %59 : vector<16x1xf32> to vector<16x80xf32>
    %61 = arith.mulf %58, %60 : vector<16x80xf32>
    %c0_21 = arith.constant 0 : index
    %c1 = arith.constant 1 : index
    %62 = vector.load %arg3[%c0_21, %c1] : memref<16x2xf32, #tpu.memory_space<vmem>>, vector<16x1xf32>
    %63 = vector.broadcast %62 : vector<16x1xf32> to vector<16x80xf32>
    %64 = arith.addf %61, %63 : vector<16x80xf32>
    %cst_22 = arith.constant 0.000000e+00 : f32
    %65 = vector.broadcast %cst_22 : f32 to vector<16x80xf32>
    %66 = arith.cmpf oge, %64, %65 : vector<16x80xf32>
    %cst_23 = arith.constant 0.00999999977 : f32
    %67 = vector.broadcast %cst_23 : f32 to vector<16x80xf32>
    %68 = arith.mulf %64, %67 : vector<16x80xf32>
    %69 = arith.select %66, %64, %68 : vector<16x80xi1>, vector<16x80xf32>
    %70 = arith.truncf %69 : vector<16x80xf32> to vector<16x80xbf16>
    %c0_24 = arith.constant 0 : index
    %c0_25 = arith.constant 0 : index
    %c0_26 = arith.constant 0 : index
    %71 = vector.load %arg5[%c0_24, %c0_25, %c0_26] : memref<1x16x80xbf16, #tpu.memory_space<vmem>>, vector<1x16x80xbf16>
    %72 = vector.shape_cast %71 : vector<1x16x80xbf16> to vector<16x80xbf16>
    %73 = vector.shape_cast %70 : vector<16x80xbf16> to vector<1x16x80xbf16>
    tpu.vector_store %arg5[%c0_24, %c0_25, %c0_26], %73 {strides = array<i32>} : memref<1x16x80xbf16, #tpu.memory_space<vmem>>, vector<1x16x80xbf16>,
    return
  }
  func.func @transform_0(%arg0: i32) -> (i32, i32, i32) {
    %c0_i32 = arith.constant 0 : i32
    %c0_i32_0 = arith.constant 0 : i32
    %c0_i32_1 = arith.constant 0 : i32
    return %arg0, %c0_i32, %c0_i32_0 : i32, i32, i32
  }
  func.func @transform_1(%arg0: i32) -> (i32, i32) {
    %c0_i32 = arith.constant 0 : i32
    %c0_i32_0 = arith.constant 0 : i32
    %c0_i32_1 = arith.constant 0 : i32
    return %c0_i32, %c0_i32_0 : i32, i32
  }
  func.func @transform_2(%arg0: i32) -> (i32, i32) {
    %c0_i32 = arith.constant 0 : i32
    %c0_i32_0 = arith.constant 0 : i32
    %c0_i32_1 = arith.constant 0 : i32
    return %c0_i32, %c0_i32_0 : i32, i32
  }
  func.func @transform_3(%arg0: i32) -> (i32, i32) {
    %c0_i32 = arith.constant 0 : i32
    %c0_i32_0 = arith.constant 0 : i32
    %c0_i32_1 = arith.constant 0 : i32
    return %c0_i32, %c0_i32_0 : i32, i32
  }
  func.func @transform_4(%arg0: i32) -> (i32, i32, i32) {
    %c0_i32 = arith.constant 0 : i32
    %c0_i32_0 = arith.constant 0 : i32
    %c0_i32_1 = arith.constant 0 : i32
    return %arg0, %c0_i32, %c0_i32_0 : i32, i32, i32
  }
}

module attributes {stable_mosaic.version = 11 : i64} {
  func.func @kernel(%arg0: i32, %arg1: memref<1x16x64xbf16, #tpu.memory_space<vmem>>, %arg2: memref<32x16xbf16, #tpu.memory_space<vmem>>, %arg3: memref<1x32x64xbf16, #tpu.memory_space<vmem>>) attributes {dimension_semantics = [#tpu.dimension_semantics<parallel>], iteration_bounds = array<i64: 2>, scalar_prefetch = 0 : i64, scratch_operands = 0 : i64, tpu.core_type = #tpu.core_type<tc>, window_params = [{transform_indices = @transform_0, window_bounds = array<i64: 1, 16, 64>}, {pipeline_mode = #tpu.pipeline_mode<synchronous>, transform_indices = @transform_1, window_bounds = array<i64: 32, 16>}, {transform_indices = @transform_2, window_bounds = array<i64: 1, 32, 64>}]} {
    %c0 = arith.constant 0 : index
    %c0_0 = arith.constant 0 : index
    %c0_1 = arith.constant 0 : index
    %0 = vector.load %arg1[%c0, %c0_0, %c0_1] : memref<1x16x64xbf16, #tpu.memory_space<vmem>>, vector<1x16x64xbf16>
    %1 = vector.shape_cast %0 : vector<1x16x64xbf16> to vector<16x64xbf16>
    %c0_2 = arith.constant 0 : index
    %c0_3 = arith.constant 0 : index
    %2 = vector.load %arg2[%c0_2, %c0_3] : memref<32x16xbf16, #tpu.memory_space<vmem>>, vector<32x16xbf16>
    %cst = arith.constant dense<0.000000e+00> : vector<32x64xf32>
    %3 = tpu.matmul %2, %1, %cst {dimension_numbers = #tpu.dot_dimension_numbers<[1], [0], [0], [1], [0, 0, 1, 1], [], []>} : vector<32x16xbf16>, vector<16x64xbf16>, vector<32x64xf32> -> vector<32x64xf32>
    %4 = arith.truncf %3 : vector<32x64xf32> to vector<32x64xbf16>
    %c0_4 = arith.constant 0 : index
    %c0_5 = arith.constant 0 : index
    %c0_6 = arith.constant 0 : index
    %5 = vector.load %arg3[%c0_4, %c0_5, %c0_6] : memref<1x32x64xbf16, #tpu.memory_space<vmem>>, vector<1x32x64xbf16>
    %6 = vector.shape_cast %5 : vector<1x32x64xbf16> to vector<32x64xbf16>
    %7 = vector.shape_cast %4 : vector<32x64xbf16> to vector<1x32x64xbf16>
    tpu.vector_store %arg3[%c0_4, %c0_5, %c0_6], %7 {strides = array<i32>} : memref<1x32x64xbf16, #tpu.memory_space<vmem>>, vector<1x32x64xbf16>,
    return
  }
  func.func @transform_0(%arg0: i32) -> (i32, i32, i32) {
    %c0_i32 = arith.constant 0 : i32
    %c0_i32_0 = arith.constant 0 : i32
    %c0_i32_1 = arith.constant 0 : i32
    return %arg0, %c0_i32, %c0_i32_0 : i32, i32, i32
  }
  func.func @transform_1(%arg0: i32) -> (i32, i32) {
    %c0_i32 = arith.constant 0 : i32
    %c0_i32_0 = arith.constant 0 : i32
    %c0_i32_1 = arith.constant 0 : i32
    return %c0_i32, %c0_i32_0 : i32, i32
  }
  func.func @transform_2(%arg0: i32) -> (i32, i32, i32) {
    %c0_i32 = arith.constant 0 : i32
    %c0_i32_0 = arith.constant 0 : i32
    %c0_i32_1 = arith.constant 0 : i32
    return %arg0, %c0_i32, %c0_i32_0 : i32, i32, i32
  }
}

module attributes {stable_mosaic.version = 11 : i64} {
  func.func @kernel(%arg0: i32, %arg1: memref<1x16x326xbf16, #tpu.memory_space<vmem>>, %arg2: memref<8x144xbf16, #tpu.memory_space<vmem>>, %arg3: memref<8x2xf32, #tpu.memory_space<vmem>>, %arg4: memref<1x288xf32, #tpu.memory_space<vmem>>, %arg5: memref<1x8x288xbf16, #tpu.memory_space<vmem>>) attributes {dimension_semantics = [#tpu.dimension_semantics<parallel>], iteration_bounds = array<i64: 2>, scalar_prefetch = 0 : i64, scratch_operands = 0 : i64, tpu.core_type = #tpu.core_type<tc>, window_params = [{transform_indices = @transform_0, window_bounds = array<i64: 1, 16, 326>}, {pipeline_mode = #tpu.pipeline_mode<synchronous>, transform_indices = @transform_1, window_bounds = array<i64: 8, 144>}, {pipeline_mode = #tpu.pipeline_mode<synchronous>, transform_indices = @transform_2, window_bounds = array<i64: 8, 2>}, {pipeline_mode = #tpu.pipeline_mode<synchronous>, transform_indices = @transform_3, window_bounds = array<i64: 1, 288>}, {transform_indices = @transform_4, window_bounds = array<i64: 1, 8, 288>}]} {
    %c0 = arith.constant 0 : index
    %c0_0 = arith.constant 0 : index
    %c0_1 = arith.constant 0 : index
    %0 = vector.load %arg1[%c0, %c0_0, %c0_1] : memref<1x16x326xbf16, #tpu.memory_space<vmem>>, vector<1x16x326xbf16>
    %1 = vector.shape_cast %0 : vector<1x16x326xbf16> to vector<16x326xbf16>
    %c0_2 = arith.constant 0 : index
    %c0_3 = arith.constant 0 : index
    %2 = vector.load %arg2[%c0_2, %c0_3] : memref<8x144xbf16, #tpu.memory_space<vmem>>, vector<8x144xbf16>
    %3 = vector.extract_strided_slice %2 {offsets = [0, 0], sizes = [8, 16], strides = [1, 1]} : vector<8x144xbf16> to vector<8x16xbf16>
    %4 = vector.extract_strided_slice %1 {offsets = [0, 0], sizes = [16, 288], strides = [1, 1]} : vector<16x326xbf16> to vector<16x288xbf16>
    %cst = arith.constant dense<0.000000e+00> : vector<8x288xf32>
    %5 = tpu.matmul %3, %4, %cst {dimension_numbers = #tpu.dot_dimension_numbers<[1], [0], [0], [1], [0, 0, 1, 1], [], []>} : vector<8x16xbf16>, vector<16x288xbf16>, vector<8x288xf32> -> vector<8x288xf32>
    %6 = vector.extract_strided_slice %2 {offsets = [0, 16], sizes = [8, 16], strides = [1, 1]} : vector<8x144xbf16> to vector<8x16xbf16>
    %7 = vector.extract_strided_slice %1 {offsets = [0, 1], sizes = [16, 288], strides = [1, 1]} : vector<16x326xbf16> to vector<16x288xbf16>
    %cst_4 = arith.constant dense<0.000000e+00> : vector<8x288xf32>
    %8 = tpu.matmul %6, %7, %cst_4 {dimension_numbers = #tpu.dot_dimension_numbers<[1], [0], [0], [1], [0, 0, 1, 1], [], []>} : vector<8x16xbf16>, vector<16x288xbf16>, vector<8x288xf32> -> vector<8x288xf32>
    %9 = arith.addf %5, %8 : vector<8x288xf32>
    %10 = vector.extract_strided_slice %2 {offsets = [0, 32], sizes = [8, 16], strides = [1, 1]} : vector<8x144xbf16> to vector<8x16xbf16>
    %11 = vector.extract_strided_slice %1 {offsets = [0, 2], sizes = [16, 288], strides = [1, 1]} : vector<16x326xbf16> to vector<16x288xbf16>
    %cst_5 = arith.constant dense<0.000000e+00> : vector<8x288xf32>
    %12 = tpu.matmul %10, %11, %cst_5 {dimension_numbers = #tpu.dot_dimension_numbers<[1], [0], [0], [1], [0, 0, 1, 1], [], []>} : vector<8x16xbf16>, vector<16x288xbf16>, vector<8x288xf32> -> vector<8x288xf32>
    %13 = arith.addf %9, %12 : vector<8x288xf32>
    %14 = vector.extract_strided_slice %2 {offsets = [0, 48], sizes = [8, 16], strides = [1, 1]} : vector<8x144xbf16> to vector<8x16xbf16>
    %15 = vector.extract_strided_slice %1 {offsets = [0, 18], sizes = [16, 288], strides = [1, 1]} : vector<16x326xbf16> to vector<16x288xbf16>
    %cst_6 = arith.constant dense<0.000000e+00> : vector<8x288xf32>
    %16 = tpu.matmul %14, %15, %cst_6 {dimension_numbers = #tpu.dot_dimension_numbers<[1], [0], [0], [1], [0, 0, 1, 1], [], []>} : vector<8x16xbf16>, vector<16x288xbf16>, vector<8x288xf32> -> vector<8x288xf32>
    %17 = arith.addf %13, %16 : vector<8x288xf32>
    %18 = vector.extract_strided_slice %2 {offsets = [0, 64], sizes = [8, 16], strides = [1, 1]} : vector<8x144xbf16> to vector<8x16xbf16>
    %19 = vector.extract_strided_slice %1 {offsets = [0, 19], sizes = [16, 288], strides = [1, 1]} : vector<16x326xbf16> to vector<16x288xbf16>
    %cst_7 = arith.constant dense<0.000000e+00> : vector<8x288xf32>
    %20 = tpu.matmul %18, %19, %cst_7 {dimension_numbers = #tpu.dot_dimension_numbers<[1], [0], [0], [1], [0, 0, 1, 1], [], []>} : vector<8x16xbf16>, vector<16x288xbf16>, vector<8x288xf32> -> vector<8x288xf32>
    %21 = arith.addf %17, %20 : vector<8x288xf32>
    %22 = vector.extract_strided_slice %2 {offsets = [0, 80], sizes = [8, 16], strides = [1, 1]} : vector<8x144xbf16> to vector<8x16xbf16>
    %23 = vector.extract_strided_slice %1 {offsets = [0, 20], sizes = [16, 288], strides = [1, 1]} : vector<16x326xbf16> to vector<16x288xbf16>
    %cst_8 = arith.constant dense<0.000000e+00> : vector<8x288xf32>
    %24 = tpu.matmul %22, %23, %cst_8 {dimension_numbers = #tpu.dot_dimension_numbers<[1], [0], [0], [1], [0, 0, 1, 1], [], []>} : vector<8x16xbf16>, vector<16x288xbf16>, vector<8x288xf32> -> vector<8x288xf32>
    %25 = arith.addf %21, %24 : vector<8x288xf32>
    %26 = vector.extract_strided_slice %2 {offsets = [0, 96], sizes = [8, 16], strides = [1, 1]} : vector<8x144xbf16> to vector<8x16xbf16>
    %27 = vector.extract_strided_slice %1 {offsets = [0, 36], sizes = [16, 288], strides = [1, 1]} : vector<16x326xbf16> to vector<16x288xbf16>
    %cst_9 = arith.constant dense<0.000000e+00> : vector<8x288xf32>
    %28 = tpu.matmul %26, %27, %cst_9 {dimension_numbers = #tpu.dot_dimension_numbers<[1], [0], [0], [1], [0, 0, 1, 1], [], []>} : vector<8x16xbf16>, vector<16x288xbf16>, vector<8x288xf32> -> vector<8x288xf32>
    %29 = arith.addf %25, %28 : vector<8x288xf32>
    %30 = vector.extract_strided_slice %2 {offsets = [0, 112], sizes = [8, 16], strides = [1, 1]} : vector<8x144xbf16> to vector<8x16xbf16>
    %31 = vector.extract_strided_slice %1 {offsets = [0, 37], sizes = [16, 288], strides = [1, 1]} : vector<16x326xbf16> to vector<16x288xbf16>
    %cst_10 = arith.constant dense<0.000000e+00> : vector<8x288xf32>
    %32 = tpu.matmul %30, %31, %cst_10 {dimension_numbers = #tpu.dot_dimension_numbers<[1], [0], [0], [1], [0, 0, 1, 1], [], []>} : vector<8x16xbf16>, vector<16x288xbf16>, vector<8x288xf32> -> vector<8x288xf32>
    %33 = arith.addf %29, %32 : vector<8x288xf32>
    %34 = vector.extract_strided_slice %2 {offsets = [0, 128], sizes = [8, 16], strides = [1, 1]} : vector<8x144xbf16> to vector<8x16xbf16>
    %35 = vector.extract_strided_slice %1 {offsets = [0, 38], sizes = [16, 288], strides = [1, 1]} : vector<16x326xbf16> to vector<16x288xbf16>
    %cst_11 = arith.constant dense<0.000000e+00> : vector<8x288xf32>
    %36 = tpu.matmul %34, %35, %cst_11 {dimension_numbers = #tpu.dot_dimension_numbers<[1], [0], [0], [1], [0, 0, 1, 1], [], []>} : vector<8x16xbf16>, vector<16x288xbf16>, vector<8x288xf32> -> vector<8x288xf32>
    %37 = arith.addf %33, %36 : vector<8x288xf32>
    %c0_12 = arith.constant 0 : index
    %c0_13 = arith.constant 0 : index
    %38 = vector.load %arg4[%c0_12, %c0_13] : memref<1x288xf32, #tpu.memory_space<vmem>>, vector<1x288xf32>
    %39 = vector.broadcast %38 : vector<1x288xf32> to vector<8x288xf32>
    %40 = arith.mulf %37, %39 : vector<8x288xf32>
    %cst_14 = arith.constant dense<0.000000e+00> : vector<8xf32>
    %41 = vector.multi_reduction <add>, %40, %cst_14 [1] : vector<8x288xf32> to vector<8xf32>
    %42 = vector.shape_cast %41 : vector<8xf32> to vector<8x1xf32>
    %cst_15 = arith.constant 3.906250e-03 : f32
    %43 = vector.broadcast %cst_15 : f32 to vector<8x1xf32>
    %44 = arith.mulf %42, %43 : vector<8x1xf32>
    %45 = vector.broadcast %44 : vector<8x1xf32> to vector<8x288xf32>
    %46 = arith.subf %37, %45 : vector<8x288xf32>
    %47 = arith.mulf %46, %46 : vector<8x288xf32>
    %48 = vector.broadcast %38 : vector<1x288xf32> to vector<8x288xf32>
    %49 = arith.mulf %47, %48 : vector<8x288xf32>
    %cst_16 = arith.constant dense<0.000000e+00> : vector<8xf32>
    %50 = vector.multi_reduction <add>, %49, %cst_16 [1] : vector<8x288xf32> to vector<8xf32>
    %51 = vector.shape_cast %50 : vector<8xf32> to vector<8x1xf32>
    %cst_17 = arith.constant 3.906250e-03 : f32
    %52 = vector.broadcast %cst_17 : f32 to vector<8x1xf32>
    %53 = arith.mulf %51, %52 : vector<8x1xf32>
    %cst_18 = arith.constant 9.99999974E-6 : f32
    %54 = vector.broadcast %cst_18 : f32 to vector<8x1xf32>
    %55 = arith.addf %53, %54 : vector<8x1xf32>
    %56 = math.rsqrt %55 : vector<8x1xf32>
    %57 = vector.broadcast %56 : vector<8x1xf32> to vector<8x288xf32>
    %58 = arith.mulf %46, %57 : vector<8x288xf32>
    %c0_19 = arith.constant 0 : index
    %c0_20 = arith.constant 0 : index
    %59 = vector.load %arg3[%c0_19, %c0_20] : memref<8x2xf32, #tpu.memory_space<vmem>>, vector<8x1xf32>
    %60 = vector.broadcast %59 : vector<8x1xf32> to vector<8x288xf32>
    %61 = arith.mulf %58, %60 : vector<8x288xf32>
    %c0_21 = arith.constant 0 : index
    %c1 = arith.constant 1 : index
    %62 = vector.load %arg3[%c0_21, %c1] : memref<8x2xf32, #tpu.memory_space<vmem>>, vector<8x1xf32>
    %63 = vector.broadcast %62 : vector<8x1xf32> to vector<8x288xf32>
    %64 = arith.addf %61, %63 : vector<8x288xf32>
    %cst_22 = arith.constant 0.000000e+00 : f32
    %65 = vector.broadcast %cst_22 : f32 to vector<8x288xf32>
    %66 = arith.cmpf oge, %64, %65 : vector<8x288xf32>
    %cst_23 = arith.constant 0.00999999977 : f32
    %67 = vector.broadcast %cst_23 : f32 to vector<8x288xf32>
    %68 = arith.mulf %64, %67 : vector<8x288xf32>
    %69 = arith.select %66, %64, %68 : vector<8x288xi1>, vector<8x288xf32>
    %70 = arith.truncf %69 : vector<8x288xf32> to vector<8x288xbf16>
    %c0_24 = arith.constant 0 : index
    %c0_25 = arith.constant 0 : index
    %c0_26 = arith.constant 0 : index
    %71 = vector.load %arg5[%c0_24, %c0_25, %c0_26] : memref<1x8x288xbf16, #tpu.memory_space<vmem>>, vector<1x8x288xbf16>
    %72 = vector.shape_cast %71 : vector<1x8x288xbf16> to vector<8x288xbf16>
    %73 = vector.shape_cast %70 : vector<8x288xbf16> to vector<1x8x288xbf16>
    tpu.vector_store %arg5[%c0_24, %c0_25, %c0_26], %73 {strides = array<i32>} : memref<1x8x288xbf16, #tpu.memory_space<vmem>>, vector<1x8x288xbf16>,
    return
  }
  func.func @transform_0(%arg0: i32) -> (i32, i32, i32) {
    %c0_i32 = arith.constant 0 : i32
    %c0_i32_0 = arith.constant 0 : i32
    %c0_i32_1 = arith.constant 0 : i32
    return %arg0, %c0_i32, %c0_i32_0 : i32, i32, i32
  }
  func.func @transform_1(%arg0: i32) -> (i32, i32) {
    %c0_i32 = arith.constant 0 : i32
    %c0_i32_0 = arith.constant 0 : i32
    %c0_i32_1 = arith.constant 0 : i32
    return %c0_i32, %c0_i32_0 : i32, i32
  }
  func.func @transform_2(%arg0: i32) -> (i32, i32) {
    %c0_i32 = arith.constant 0 : i32
    %c0_i32_0 = arith.constant 0 : i32
    %c0_i32_1 = arith.constant 0 : i32
    return %c0_i32, %c0_i32_0 : i32, i32
  }
  func.func @transform_3(%arg0: i32) -> (i32, i32) {
    %c0_i32 = arith.constant 0 : i32
    %c0_i32_0 = arith.constant 0 : i32
    %c0_i32_1 = arith.constant 0 : i32
    return %c0_i32, %c0_i32_0 : i32, i32
  }
  func.func @transform_4(%arg0: i32) -> (i32, i32, i32) {
    %c0_i32 = arith.constant 0 : i32
    %c0_i32_0 = arith.constant 0 : i32
    %c0_i32_1 = arith.constant 0 : i32
    return %arg0, %c0_i32, %c0_i32_0 : i32, i32, i32
  }
}

module attributes {stable_mosaic.version = 11 : i64} {
  func.func @kernel(%arg0: i32, %arg1: memref<1x8x256xbf16, #tpu.memory_space<vmem>>, %arg2: memref<2x8xbf16, #tpu.memory_space<vmem>>, %arg3: memref<2x1xf32, #tpu.memory_space<vmem>>, %arg4: memref<1x2x256xf32, #tpu.memory_space<vmem>>) attributes {dimension_semantics = [#tpu.dimension_semantics<parallel>], iteration_bounds = array<i64: 2>, scalar_prefetch = 0 : i64, scratch_operands = 0 : i64, tpu.core_type = #tpu.core_type<tc>, window_params = [{transform_indices = @transform_0, window_bounds = array<i64: 1, 8, 256>}, {pipeline_mode = #tpu.pipeline_mode<synchronous>, transform_indices = @transform_1, window_bounds = array<i64: 2, 8>}, {pipeline_mode = #tpu.pipeline_mode<synchronous>, transform_indices = @transform_2, window_bounds = array<i64: 2, 1>}, {transform_indices = @transform_3, window_bounds = array<i64: 1, 2, 256>}]} {
    %c0 = arith.constant 0 : index
    %c0_0 = arith.constant 0 : index
    %c0_1 = arith.constant 0 : index
    %0 = vector.load %arg1[%c0, %c0_0, %c0_1] : memref<1x8x256xbf16, #tpu.memory_space<vmem>>, vector<1x8x256xbf16>
    %1 = vector.shape_cast %0 : vector<1x8x256xbf16> to vector<8x256xbf16>
    %c0_2 = arith.constant 0 : index
    %c0_3 = arith.constant 0 : index
    %2 = vector.load %arg2[%c0_2, %c0_3] : memref<2x8xbf16, #tpu.memory_space<vmem>>, vector<2x8xbf16>
    %cst = arith.constant dense<0.000000e+00> : vector<2x256xf32>
    %3 = tpu.matmul %2, %1, %cst {dimension_numbers = #tpu.dot_dimension_numbers<[1], [0], [0], [1], [0, 0, 1, 1], [], []>} : vector<2x8xbf16>, vector<8x256xbf16>, vector<2x256xf32> -> vector<2x256xf32>
    %c0_4 = arith.constant 0 : index
    %c0_5 = arith.constant 0 : index
    %4 = vector.load %arg3[%c0_4, %c0_5] : memref<2x1xf32, #tpu.memory_space<vmem>>, vector<2x1xf32>
    %5 = vector.broadcast %4 : vector<2x1xf32> to vector<2x256xf32>
    %6 = arith.addf %3, %5 : vector<2x256xf32>
    %c0_6 = arith.constant 0 : index
    %c0_7 = arith.constant 0 : index
    %c0_8 = arith.constant 0 : index
    %7 = vector.load %arg4[%c0_6, %c0_7, %c0_8] : memref<1x2x256xf32, #tpu.memory_space<vmem>>, vector<1x2x256xf32>
    %8 = vector.shape_cast %7 : vector<1x2x256xf32> to vector<2x256xf32>
    %9 = vector.shape_cast %6 : vector<2x256xf32> to vector<1x2x256xf32>
    tpu.vector_store %arg4[%c0_6, %c0_7, %c0_8], %9 {strides = array<i32>} : memref<1x2x256xf32, #tpu.memory_space<vmem>>, vector<1x2x256xf32>,
    return
  }
  func.func @transform_0(%arg0: i32) -> (i32, i32, i32) {
    %c0_i32 = arith.constant 0 : i32
    %c0_i32_0 = arith.constant 0 : i32
    %c0_i32_1 = arith.constant 0 : i32
    return %arg0, %c0_i32, %c0_i32_0 : i32, i32, i32
  }
  func.func @transform_1(%arg0: i32) -> (i32, i32) {
    %c0_i32 = arith.constant 0 : i32
    %c0_i32_0 = arith.constant 0 : i32
    %c0_i32_1 = arith.constant 0 : i32
    return %c0_i32, %c0_i32_0 : i32, i32
  }
  func.func @transform_2(%arg0: i32) -> (i32, i32) {
    %c0_i32 = arith.constant 0 : i32
    %c0_i32_0 = arith.constant 0 : i32
    %c0_i32_1 = arith.constant 0 : i32
    return %c0_i32, %c0_i32_0 : i32, i32
  }
  func.func @transform_3(%arg0: i32) -> (i32, i32, i32) {
    %c0_i32 = arith.constant 0 : i32
    %c0_i32_0 = arith.constant 0 : i32
    %c0_i32_1 = arith.constant 0 : i32
    return %arg0, %c0_i32, %c0_i32_0 : i32, i32, i32
  }
}

</mosaic_0001>

<bundles_post_ra>
// kernel: residual_encoder_unet_forward.14
= control target key start
LH: loop header
LB: loop body
LE: loop exit
PB: predicated region body
PF: predicated region fallthrough
CT: control target
= control target key end

     0   :  { %s1082_s15 = smov 0   ;;  %s1210_s0 = inlined_call_operand.vmem [shape: bf16[2,4,326], index: 0, kind: input, shape index: {}]   ;;  %s1211_s1 = inlined_call_operand.vmem [shape: bf16[8,36], index: 1, kind: input, shape index: {}]   ;;  %s1212_s2 = inlined_call_operand.vmem [shape: f32[8,2], index: 2, kind: input, shape index: {}]   ;;  %s1213_s3 = inlined_call_operand.vmem [shape: f32[1,288], index: 3, kind: input, shape index: {}]   ;;  %s1214_s4 = inlined_call_operand.vmem [shape: bf16[2,8,288], index: 4, kind: output, shape index: {}]  }
   0x1 LB: > { %s964_s16 = sadd.s32 4294967295, %s1038_s15   ;;  %p968_p0 = scmp.ge.s32.totalorder %s1038_s15, 1  ;;  %s1038_s15 = sphi %s1082_s15, %s14_s15  }
   0x2   : > { %p162_p1 = scmp.lt.s32.totalorder %s1038_s15, 3 }
   0x4   : > { %p163_p2 = pnand %p968_p0, %p162_p1 }
   0x5   : > { %p188_p3 = scmp.lt.s32.totalorder (!%p163_p2), %s964_s16, 1  ;;  %s1040_s23 = smov (!%p163_p2), 127  }
   0x6   : > { %166 = sbr.rel (%p163_p2) target bundleno = 664 (0x298), region = 36  ;;  %s1041_s24 = smov (!%p163_p2), 124  }
   0x7   : > { %s1042_s25 = smov (!%p163_p2), 120   ;;  %s1043_s26 = smov (!%p163_p2), 126  }
   0x8   : > { %s1044_s27 = smov (!%p163_p2), 116   ;;  %s1045_s28 = smov (!%p163_p2), 110  }
   0x9   : > { %s1046_s29 = smov (!%p163_p2), 112   ;;  %s1047_s30 = smov (!%p163_p2), 109  }
   0xa   : > { %s1048_s5 = smov (!%p163_p2), 108   ;;  %s1049_s6 = smov (!%p163_p2), 92  }
   0xb   : > { %s1216_s16 = smov (!%p188_p3, %s964_s16), 1  ;;  %v1102_v1 = vld [vmem:[%s1211_s1] sm:$0xf]  ;;  %s1050_s7 = smov 104   ;;  %vm227_vm0 = vcmask 1041408   ;;  %vm223_vm1 = vcmask 31744  }
   0xc   : > { %s1000_s17 = smul.u32 6, %s1216_s16  ;;  %v202_v4 = vunpack.c.l.b16 %v1102_v1  ;;  %s1051_s8 = smov 91   ;;  %vm343_vm2 = vcmask 1031168   ;;  %vm220_vm3 = vcmask 1039360   ;;  %vm415_vm4 = vcmask 900096  }
   0xd   : > { %s1052_s9 = smov 90   ;;  %s1053_s10 = smov 100   ;;  %vm487_vm5 = vcmask 891904   ;;  %vm559_vm6 = vcmask 883712   ;;  %vm631_vm7 = vcmask 752640   ;;  %vm703_vm8 = vcmask 744448  }
   0xe   : > { %s192_s20 = scalar_lea.vmem %s1210_s0, %s1000_s17  ;;  %v1106_v6 = vpack.c.b16 %v202_v4, %v202_v4  ;;  %s1054_s11 = smov 96   ;;  %vm775_vm9 = vcmask 736256   ;;  %vm844_vm10 = vcmask 261120  }
   0xf   : > { %v1096_v0 = vld [vmem:[%s192_s20] sm:$0x3f]  ;;  %s1001_s18 = smul.u32 12, %s1216_s16 }
  0x10   : > { %207 = vst [vmem:[#allocation1] ss:$4 sm:$0xff] %v1096_v0 }
  0x11   : > { %s197_s21 = scalar_lea.vmem %s1214_s4, %s1001_s18 }
  0x17   : > { %v212_v2 = vld.sshfl [vmem:[#allocation1 + $0x10] sm:$0xff pattern:$0x73625140]  ;;  %v208_v3 = vld.sshfl [vmem:[#allocation1] sm:$0xff pattern:$0x73625140] }
  0x18   : > { %218 = vrot.lane.b32.xlu0 %v212_v2, %s1040_s23  ;;  %214 = vrot.lane.b32.xlu1 %v208_v3, %s1040_s23  ;;  %v210_v5 = vld.sshfl [vmem:[#allocation1 + $0x8] sm:$0xff pattern:$0x73625140] }
  0x19   : > { %276 = vst [vmem:[#allocation1] ss:$4 sm:$0xff] %v1096_v0 }
  0x20   : > { %204 = vrot.lane.b32.xlu0 %v1106_v6, %s1041_s24  ;;  %216 = vrot.lane.b32.xlu1 %v210_v5, %s1040_s23  ;;  %v1109_v7 = vld.sshfl [vmem:[#allocation1] sm:$0xff pattern:$0x73625140]  ;;  %v1111_v8 = vld.sshfl [vmem:[#allocation1 + $0x8] sm:$0xff pattern:$0x73625140] }
  0x21   : > { %v1113_v9 = vld.sshfl [vmem:[#allocation1 + $0x10] sm:$0xff pattern:$0x73625140]  ;;  %v283_v31 = vsel %vm227_vm0, %v1109_v7, 0  ;;  %v285_v43 = vsel %vm227_vm0, %v1111_v8, 0 }
  0x22   : > { %330 = vst [vmem:[#allocation1] ss:$4 sm:$0xff] %v1096_v0  ;;  %296 = vmatpush.bf16.msra.mxu3 %v283_v31  ;;  %v287_v44 = vsel %vm227_vm0, %v1113_v9, 0 }
  0x25   : > { %974 = vmatmul.msk.bf16.vlgmr.msra.gmra.mxu3 %vm223_vm1, %v1102_v1 }
  0x28   : > { %328 = vrot.lane.b32.xlu0 %v1106_v6, %s1042_s25 }
  0x29   : > { %v335_v10 = vld.sshfl [vmem:[#allocation1 + $0x10] sm:$0xff pattern:$0x73625140]  ;;  %v331_v11 = vld.sshfl [vmem:[#allocation1] sm:$0xff pattern:$0x73625140] }
  0x2a   : > { %341 = vrot.lane.b32.xlu1 %v335_v10, %s1043_s26  ;;  %337 = vrot.lane.b32.xlu2 %v331_v11, %s1043_s26  ;;  %v333_v12 = vld.sshfl [vmem:[#allocation1 + $0x8] sm:$0xff pattern:$0x73625140] }
  0x2b   : > { %402 = vst [vmem:[#allocation1] ss:$4 sm:$0xff] %v1096_v0 }
  0x32   : > { %339 = vrot.lane.b32.xlu2 %v333_v12, %s1043_s26  ;;  %v407_v13 = vld.sshfl [vmem:[#allocation1 + $0x10] sm:$0xff pattern:$0x73625140]  ;;  %v403_v14 = vld.sshfl [vmem:[#allocation1] sm:$0xff pattern:$0x73625140]  ;;  %400 = vrot.lane.b32.xlu1 %v1106_v6, %s1044_s27 }
  0x33   : > { %413 = vrot.lane.b32.xlu0 %v407_v13, %s1045_s28  ;;  %v405_v15 = vld.sshfl [vmem:[#allocation1 + $0x8] sm:$0xff pattern:$0x73625140] }
  0x34   : > { %474 = vst [vmem:[#allocation1] ss:$4 sm:$0xff] %v1096_v0 }
  0x3a   : > { %472 = vrot.lane.b32.xlu1 %v1106_v6, %s1046_s29  ;;  %411 = vrot.lane.b32.xlu2 %v405_v15, %s1045_s28 }
  0x3b   : > { %v479_v16 = vld.sshfl [vmem:[#allocation1 + $0x10] sm:$0xff pattern:$0x73625140]  ;;  %v475_v17 = vld.sshfl [vmem:[#allocation1] sm:$0xff pattern:$0x73625140] }
  0x3c   : > { %485 = vrot.lane.b32.xlu0 %v479_v16, %s1047_s30  ;;  %v477_v18 = vld.sshfl [vmem:[#allocation1 + $0x8] sm:$0xff pattern:$0x73625140] }
  0x3d   : > { %546 = vst [vmem:[#allocation1] ss:$4 sm:$0xff] %v1096_v0 }
  0x42   : > { %409 = vrot.lane.b32.xlu2 %v403_v14, %s1045_s28 }
  0x44   : > { %483 = vrot.lane.b32.xlu0 %v477_v18, %s1047_s30  ;;  %v547_v19 = vld.sshfl [vmem:[#allocation1] sm:$0xff pattern:$0x73625140]  ;;  %v549_v20 = vld.sshfl [vmem:[#allocation1 + $0x8] sm:$0xff pattern:$0x73625140] }
  0x45   : > { %v551_v21 = vld.sshfl [vmem:[#allocation1 + $0x10] sm:$0xff pattern:$0x73625140]  ;;  %553 = vrot.lane.b32.xlu1 %v547_v19, %s1048_s5 }
  0x46   : > { %618 = vst [vmem:[#allocation1] ss:$4 sm:$0xff] %v1096_v0 }
  0x4a   : > { %481 = vrot.lane.b32.xlu2 %v475_v17, %s1047_s30 }
  0x4d   : > { %v623_v22 = vld.sshfl [vmem:[#allocation1 + $0x10] sm:$0xff pattern:$0x73625140]  ;;  %v619_v23 = vld.sshfl [vmem:[#allocation1] sm:$0xff pattern:$0x73625140] }
  0x4e   : > { %625 = vrot.lane.b32.xlu0 %v619_v23, %s1049_s6  ;;  %v621_v24 = vld.sshfl [vmem:[#allocation1 + $0x8] sm:$0xff pattern:$0x73625140] }
  0x4f   : > { %627 = vrot.lane.b32.xlu1 %v621_v24, %s1049_s6  ;;  %690 = vst [vmem:[#allocation1] ss:$4 sm:$0xff] %v1096_v0 }
  0x52   : > { %555 = vrot.lane.b32.xlu2 %v549_v20, %s1048_s5 }
  0x56   : > { %557 = vrot.lane.b32.xlu0 %v551_v21, %s1048_s5  ;;  %v695_v25 = vld.sshfl [vmem:[#allocation1 + $0x10] sm:$0xff pattern:$0x73625140]  ;;  %v693_v26 = vld.sshfl [vmem:[#allocation1 + $0x8] sm:$0xff pattern:$0x73625140] }
  0x57   : > { %616 = vrot.lane.b32.xlu1 %v1106_v6, %s1050_s7  ;;  %v691_v27 = vld.sshfl [vmem:[#allocation1] sm:$0xff pattern:$0x73625140] }
  0x58   : > { %762 = vst [vmem:[#allocation1] ss:$4 sm:$0xff] %v1096_v0 }
  0x5a   : > { %544 = vrot.lane.b32.xlu2 %v1106_v6, %s1048_s5 }
  0x5e   : > { %699 = vrot.lane.b32.xlu0 %v693_v26, %s1051_s8 }
  0x5f   : > { %701 = vrot.lane.b32.xlu1 %v695_v25, %s1051_s8  ;;  %v767_v28 = vld.sshfl [vmem:[#allocation1 + $0x10] sm:$0xff pattern:$0x73625140]  ;;  %v763_v29 = vld.sshfl [vmem:[#allocation1] sm:$0xff pattern:$0x73625140] }
  0x60   : > { %v765_v30 = vld.sshfl [vmem:[#allocation1 + $0x8] sm:$0xff pattern:$0x73625140] }
  0x62   : > { %629 = vrot.lane.b32.xlu2 %v623_v22, %s1049_s6 }
  0x66   : > { %697 = vrot.lane.b32.xlu0 %v691_v27, %s1051_s8 }
  0x67   : > { %773 = vrot.lane.b32.xlu1 %v767_v28, %s1052_s9 }
  0x6a   : > { %688 = vrot.lane.b32.xlu2 %v1106_v6, %s1053_s10 }
  0x6e   : > { %769 = vrot.lane.b32.xlu0 %v763_v29, %s1052_s9 }
  0x6f   : > { %771 = vrot.lane.b32.xlu1 %v765_v30, %s1052_s9 }
  0x72   : > { %760 = vrot.lane.b32.xlu2 %v1106_v6, %s1054_s11 }
  0x84   : > { %v338_v32 = vpop.permute.xlu2 %337 }
  0x8a   : > { %v219_v33 = vpop.permute.xlu0 %218  ;;  %v215_v34 = vpop.permute.xlu1 %214 }
  0x8b   : > { %v235_v35 = vsel %vm227_vm0, %v219_v33, 0 }
  0x8c   : > { %v340_v36 = vpop.permute.xlu2 %339  ;;  %270 = vmatpush.bf16.msra.mxu2 %v235_v35 }
  0x8d   : > { %v344_v37 = vsel %vm343_vm2, %v338_v32, %v340_v36 }
  0x8e   : > { %v350_v38 = vsel %vm227_vm0, %v344_v37, 0 }
  0x90   : > { %365 = vmatpush.bf16.msrb.mxu2 %v350_v38 }
  0x92   : > { %v205_v39 = vpop.permute.xlu0 %204  ;;  %v217_v40 = vpop.permute.xlu1 %216 }
  0x93   : > { %973 = vmatmul.msk.bf16.vlgmr.msra.gmra.mxu2 %vm223_vm1, %v205_v39  ;;  %v221_v41 = vsel %vm220_vm3, %v215_v34, %v217_v40  ;;  %v222_v42 = vsel %vm220_vm3, %v217_v40, %v219_v33 }
  0x94   : > { %v229_v45 = vsel %vm227_vm0, %v221_v41, 0  ;;  %v232_v46 = vsel %vm227_vm0, %v222_v42, 0  ;;  %v412_v47 = vpop.permute.xlu2 %411 }
  0x95   : > { %244 = vmatpush.bf16.msra.mxu0 %v229_v45  ;;  %257 = vmatpush.bf16.msra.mxu1 %v232_v46 }
  0x98   : > { %971 = vmatmul.msk.bf16.vlgmr.msra.gmra.mxu0 %vm223_vm1, %v205_v39  ;;  %972 = vmatmul.msk.bf16.vlgmr.msra.gmra.mxu1 %vm223_vm1, %v205_v39 }
  0x99   : > { %309 = vmatpush.bf16.msrb.mxu0 %v285_v43  ;;  %322 = vmatpush.bf16.msrb.mxu1 %v287_v44 }
  0x9a   : > { %v329_v48 = vpop.permute.xlu0 %328 }
  0x9c   : > { %v342_v49 = vpop.permute.xlu1 %341  ;;  %v410_v50 = vpop.permute.xlu2 %409 }
  0x9d   : > { %v356_v51 = vsel %vm227_vm0, %v342_v49, 0  ;;  %v345_v52 = vsel %vm343_vm2, %v340_v36, %v342_v49  ;;  %v416_v53 = vsel %vm415_vm4, %v410_v50, %v412_v47 }
  0x9e   : > { %v353_v54 = vsel %vm227_vm0, %v345_v52, 0  ;;  %v422_v55 = vsel %vm227_vm0, %v416_v53, 0  ;;  %391 = vmatpush.bf16.msra.mxu0 %v356_v51 }
  0x9f   : > { %378 = vmatpush.bf16.msrb.mxu3 %v353_v54  ;;  %437 = vmatpush.bf16.msra.mxu1 %v422_v55 }
  0xa2   : > { %978 = vmatmul.msk.bf16.vlgmr.msrb.gmra.mxu3 %vm223_vm1, %v329_v48 }
  0xa3   : > { %977 = vmatmul.msk.bf16.vlgmr.msrb.gmra.mxu2 %vm223_vm1, %v329_v48 }
  0xa4   : > { %v401_v56 = vpop.permute.xlu1 %400  ;;  %v482_v57 = vpop.permute.xlu2 %481 }
  0xa5   : > { %v414_v58 = vpop.permute.xlu0 %413 }
  0xa6   : > { %v417_v59 = vsel %vm415_vm4, %v412_v47, %v414_v58  ;;  %v428_v60 = vsel %vm227_vm0, %v414_v58, 0 }
  0xa7   : > { %v425_v61 = vsel %vm227_vm0, %v417_v59, 0  ;;  %463 = vmatpush.bf16.msra.mxu3 %v428_v60 }
  0xa8   : > { %450 = vmatpush.bf16.msra.mxu2 %v425_v61  ;;  %975 = vmatmul.msk.bf16.vlgmr.msrb.gmra.mxu0 %vm223_vm1, %v1102_v1  ;;  %v298_v42 = vpop.f32.mrf.mxu3 }
  0xa9   : > { %976 = vmatmul.msk.bf16.vlgmr.msrb.gmra.mxu1 %vm223_vm1, %v1102_v1 }
  0xac   : > { %v473_v62 = vpop.permute.xlu1 %472  ;;  %v556_v63 = vpop.permute.xlu2 %555 }
  0xae   : > { %v486_v0 = vpop.permute.xlu0 %485 }
  0xaf   : > { %v500_v2 = vsel %vm227_vm0, %v486_v0, 0 }
  0xb0   : > { %535 = vmatpush.bf16.msrb.mxu2 %v500_v2  ;;  %v300_v43 = vpop.f32.mrf.mxu3 }
  0xb2   : > { %982 = vmatmul.msk.bf16.vlgmr.msra.gmra.mxu3 %vm223_vm1, %v401_v56 }
  0xb3   : > { %981 = vmatmul.msk.bf16.vlgmr.msra.gmra.mxu2 %vm223_vm1, %v401_v56 }
  0xb4   : > { %v545_v7 = vpop.permute.xlu2 %544 }
  0xb6   : > { %v484_v3 = vpop.permute.xlu0 %483 }
  0xb7   : > { %v488_v4 = vsel %vm487_vm5, %v482_v57, %v484_v3  ;;  %v489_v5 = vsel %vm487_vm5, %v484_v3, %v486_v0  ;;  %v554_v6 = vpop.permute.xlu1 %553 }
  0xb8   : > { %v494_v8 = vsel %vm227_vm0, %v488_v4, 0  ;;  %v497_v1 = vsel %vm227_vm0, %v489_v5, 0  ;;  %v560_v9 = vsel %vm559_vm6, %v554_v6, %v556_v63  ;;  %979 = vmatmul.msk.bf16.vlgmr.msra.gmra.mxu0 %vm223_vm1, %v329_v48 }
  0xb9   : > { %522 = vmatpush.bf16.msrb.mxu1 %v497_v1  ;;  %v566_v10 = vsel %vm227_vm0, %v560_v9, 0  ;;  %509 = vmatpush.bf16.msrb.mxu0 %v494_v8 }
  0xba   : > { %980 = vmatmul.msk.bf16.vlgmr.msra.gmra.mxu1 %vm223_vm1, %v401_v56  ;;  %581 = vmatpush.bf16.msrb.mxu3 %v566_v10 }
  0xbc   : > { %v630_v11 = vpop.permute.xlu2 %629 }
  0xbd   : > { %v644_v19 = vsel %vm227_vm0, %v630_v11, 0 }
  0xc0   : > { %v626_v12 = vpop.permute.xlu0 %625 }
  0xc1   : > { %v628_v13 = vpop.permute.xlu1 %627 }
  0xc2   : > { %v632_v14 = vsel %vm631_vm7, %v626_v12, %v628_v13  ;;  %986 = vmatmul.msk.bf16.vlgmr.msrb.gmra.mxu3 %vm223_vm1, %v545_v7  ;;  %v633_v15 = vsel %vm631_vm7, %v628_v13, %v630_v11 }
  0xc3   : > { %v638_v16 = vsel %vm227_vm0, %v632_v14, 0  ;;  %v641_v17 = vsel %vm227_vm0, %v633_v15, 0  ;;  %985 = vmatmul.msk.bf16.vlgmr.msrb.gmra.mxu2 %vm223_vm1, %v473_v62 }
  0xc4   : > { %653 = vmatpush.bf16.msra.mxu2 %v638_v16  ;;  %666 = vmatpush.bf16.msra.mxu3 %v641_v17  ;;  %v689_v34 = vpop.permute.xlu2 %688 }
  0xc8   : > { %v558_v18 = vpop.permute.xlu0 %557  ;;  %983 = vmatmul.msk.bf16.vlgmr.msrb.gmra.mxu0 %vm223_vm1, %v473_v62 }
  0xc9   : > { %v561_v20 = vsel %vm559_vm6, %v556_v63, %v558_v18  ;;  %v572_v21 = vsel %vm227_vm0, %v558_v18, 0  ;;  %v617_v22 = vpop.permute.xlu1 %616 }
  0xca   : > { %v569_v23 = vsel %vm227_vm0, %v561_v20, 0  ;;  %984 = vmatmul.msk.bf16.vlgmr.msrb.gmra.mxu1 %vm223_vm1, %v473_v62 }
  0xcb   : > { %594 = vmatpush.bf16.msra.mxu0 %v569_v23  ;;  %607 = vmatpush.bf16.msra.mxu1 %v572_v21 }
  0xcc   : > { %v761_v41 = vpop.permute.xlu2 %760 }
  0xcf   : > { %679 = vmatpush.bf16.msrb.mxu0 %v644_v19 }
  0xd0   : > { %v700_v24 = vpop.permute.xlu0 %699 }
  0xd1   : > { %v702_v25 = vpop.permute.xlu1 %701 }
  0xd2   : > { %v705_v26 = vsel %vm703_vm8, %v700_v24, %v702_v25  ;;  %v716_v27 = vsel %vm227_vm0, %v702_v25, 0  ;;  %990 = vmatmul.msk.bf16.vlgmr.msra.gmra.mxu3 %vm223_vm1, %v617_v22 }
  0xd3   : > { %v713_v28 = vsel %vm227_vm0, %v705_v26, 0  ;;  %989 = vmatmul.msk.bf16.vlgmr.msra.gmra.mxu2 %vm223_vm1, %v617_v22  ;;  %751 = vmatpush.bf16.msrb.mxu3 %v716_v27 }
  0xd4   : > { %738 = vmatpush.bf16.msrb.mxu2 %v713_v28 }
  0xd8   : > { %v698_v29 = vpop.permute.xlu0 %697  ;;  %987 = vmatmul.msk.bf16.vlgmr.msra.gmra.mxu0 %vm223_vm1, %v545_v7 }
  0xd9   : > { %v704_v30 = vsel %vm703_vm8, %v698_v29, %v700_v24  ;;  %v774_v31 = vpop.permute.xlu1 %773 }
  0xda   : > { %v710_v32 = vsel %vm227_vm0, %v704_v30, 0  ;;  %v788_v33 = vsel %vm227_vm0, %v774_v31, 0  ;;  %988 = vmatmul.msk.bf16.vlgmr.msra.gmra.mxu1 %vm223_vm1, %v545_v7 }
  0xdb   : > { %725 = vmatpush.bf16.msrb.mxu1 %v710_v32  ;;  %823 = vmatpush.bf16.msra.mxu2 %v788_v33 }
  0xe0   : > { %v770_v35 = vpop.permute.xlu0 %769 }
  0xe1   : > { %v772_v36 = vpop.permute.xlu1 %771 }
  0xe2   : > { %v777_v37 = vsel %vm775_vm9, %v772_v36, %v774_v31  ;;  %994 = vmatmul.msk.bf16.vlgmr.msrb.gmra.mxu3 %vm223_vm1, %v689_v34  ;;  %v776_v38 = vsel %vm775_vm9, %v770_v35, %v772_v36 }
  0xe3   : > { %v785_v39 = vsel %vm227_vm0, %v777_v37, 0  ;;  %993 = vmatmul.msk.bf16.vlgmr.msrb.gmra.mxu2 %vm223_vm1, %v689_v34  ;;  %v782_v40 = vsel %vm227_vm0, %v776_v38, 0 }
  0xe4   : > { %810 = vmatpush.bf16.msra.mxu1 %v785_v39  ;;  %797 = vmatpush.bf16.msra.mxu0 %v782_v40 }
  0xe8   : > { %991 = vmatmul.msk.bf16.vlgmr.msrb.gmra.mxu0 %vm223_vm1, %v617_v22 }
  0xea   : > { %992 = vmatmul.msk.bf16.vlgmr.msrb.gmra.mxu1 %vm223_vm1, %v689_v34 }
  0xf3   : > { %997 = vmatmul.msk.bf16.vlgmr.msra.gmra.mxu2 %vm223_vm1, %v761_v41 }
  0xf8   : > { %995 = vmatmul.msk.bf16.vlgmr.msra.gmra.mxu0 %vm223_vm1, %v761_v41 }
  0xfa   : > { %996 = vmatmul.msk.bf16.vlgmr.msra.gmra.mxu1 %vm223_vm1, %v761_v41  ;;  %vm907_vm1 = vcmask 257024  }
 0x115   : > { %v246_v44 = vpop.f32.mrf.mxu0  ;;  %v259_v45 = vpop.f32.mrf.mxu1 }
 0x116   : > { %v299_v46 = vadd.f32 %v298_v42, %v246_v44  ;;  %v272_v47 = vpop.f32.mrf.mxu2  ;;  %v832_v42 = vld [vmem:[%s1213_s3] sm:$0x7] }
 0x11d   : > { %v248_v48 = vpop.f32.mrf.mxu0  ;;  %v261_v49 = vpop.f32.mrf.mxu1 }
 0x11e   : > { %v274_v50 = vpop.f32.mrf.mxu2  ;;  %v836_v49 = vperm.slane %v832_v42, 2 }
 0x125   : > { %v380_v51 = vpop.f32.mrf.mxu3  ;;  %v311_v52 = vpop.f32.mrf.mxu0 }
 0x126   : > { %v312_v53 = vadd.f32 %v311_v52, %v259_v45  ;;  %v324_v54 = vpop.f32.mrf.mxu1  ;;  %v367_v55 = vpop.f32.mrf.mxu2  ;;  %v835_v52 = vperm.slane %v832_v42, 1 }
 0x127   : > { %v325_v56 = vadd.f32 %v324_v54, %v272_v47  ;;  %v397_v57 = vadd.f32 %v367_v55, %v299_v46  ;;  %v834_v46 = vperm.slane %v832_v42, 0 }
 0x128   : > { %v398_v58 = vadd.f32 %v380_v51, %v312_v53 }
 0x12d   : > { %v382_v59 = vpop.f32.mrf.mxu3  ;;  %v313_v60 = vpop.f32.mrf.mxu0 }
 0x12e   : > { %v326_v61 = vpop.f32.mrf.mxu1  ;;  %v369_v62 = vpop.f32.mrf.mxu2 }
 0x135   : > { %v465_v63 = vpop.f32.mrf.mxu3  ;;  %v393_v0 = vpop.f32.mrf.mxu0 }
 0x136   : > { %v452_v2 = vpop.f32.mrf.mxu2  ;;  %v399_v26 = vadd.f32 %v393_v0, %v325_v56 }
 0x137   : > { %v439_v3 = vpop.f32.mrf.mxu1  ;;  %v470_v30 = vadd.f32 %v452_v2, %v398_v58 }
 0x138   : > { %v469_v28 = vadd.f32 %v439_v3, %v397_v57  ;;  %v471_v29 = vadd.f32 %v465_v63, %v399_v26  ;;  %v879_v3 = vld [vmem:[%s1212_s2] sm:$0xff] }
 0x13d   : > { %v467_v4 = vpop.f32.mrf.mxu3  ;;  %v395_v5 = vpop.f32.mrf.mxu0 }
 0x13e   : > { %v454_v6 = vpop.f32.mrf.mxu2  ;;  %v1055_v4 = vmov 0   ;;  %v1056_v5 = vmov 1  }
 0x13f   : > { %v441_v7 = vpop.f32.mrf.mxu1  ;;  %1027 = vset.pattern.permute.xlu1 %v1055_v4  ;;  %1029 = vset.pattern.permute.xlu0 %v1056_v5 }
 0x140   : > { %882 = vperm.xlu1 %1027, %v879_v3  }
 0x145   : > { %v583_v8 = vpop.f32.mrf.mxu3  ;;  %v511_v1 = vpop.f32.mrf.mxu0 }
 0x146   : > { %v537_v9 = vpop.f32.mrf.mxu2  ;;  %v541_v31 = vadd.f32 %v511_v1, %v469_v28 }
 0x147   : > { %v524_v10 = vpop.f32.mrf.mxu1  ;;  %v543_v32 = vadd.f32 %v537_v9, %v471_v29 }
 0x148   : > { %v542_v35 = vadd.f32 %v524_v10, %v470_v30  ;;  %v613_v40 = vadd.f32 %v583_v8, %v541_v31  ;;  %1028 = vset.pattern.permute.xlu1 %v1056_v5 }
 0x149   : > { %889 = vperm.xlu1 %1028, %v879_v3  }
 0x14d   : > { %v585_v11 = vpop.f32.mrf.mxu3  ;;  %v513_v12 = vpop.f32.mrf.mxu0 }
 0x14e   : > { %v539_v13 = vpop.f32.mrf.mxu2 }
 0x14f   : > { %v526_v14 = vpop.f32.mrf.mxu1 }
 0x155   : > { %v668_v15 = vpop.f32.mrf.mxu3  ;;  %v596_v16 = vpop.f32.mrf.mxu0 }
 0x156   : > { %v655_v17 = vpop.f32.mrf.mxu2  ;;  %v614_v39 = vadd.f32 %v596_v16, %v542_v35 }
 0x157   : > { %v609_v18 = vpop.f32.mrf.mxu1  ;;  %v685_v43 = vadd.f32 %v655_v17, %v613_v40 }
 0x158   : > { %v615_v37 = vadd.f32 %v609_v18, %v543_v32  ;;  %v686_v45 = vadd.f32 %v668_v15, %v614_v39 }
 0x15d   : > { %v670_v19 = vpop.f32.mrf.mxu3  ;;  %v598_v20 = vpop.f32.mrf.mxu0 }
 0x15e   : > { %v657_v21 = vpop.f32.mrf.mxu2 }
 0x15f   : > { %v611_v22 = vpop.f32.mrf.mxu1 }
 0x165   : > { %v753_v23 = vpop.f32.mrf.mxu3  ;;  %v681_v24 = vpop.f32.mrf.mxu0 }
 0x166   : > { %v740_v25 = vpop.f32.mrf.mxu2  ;;  %v687_v41 = vadd.f32 %v681_v24, %v615_v37 }
 0x167   : > { %v727_v27 = vpop.f32.mrf.mxu1  ;;  %v758_v50 = vadd.f32 %v740_v25, %v686_v45 }
 0x168   : > { %v757_v44 = vadd.f32 %v727_v27, %v685_v43  ;;  %v759_v48 = vadd.f32 %v753_v23, %v687_v41 }
 0x16d   : > { %v755_v33 = vpop.f32.mrf.mxu3  ;;  %v683_v34 = vpop.f32.mrf.mxu0 }
 0x16e   : > { %v742_v36 = vpop.f32.mrf.mxu2 }
 0x16f   : > { %v729_v38 = vpop.f32.mrf.mxu1 }
 0x175   : > { %v799_v47 = vpop.f32.mrf.mxu0 }
 0x176   : > { %v829_v51 = vadd.f32 %v799_v47, %v757_v44  ;;  %v825_v53 = vpop.f32.mrf.mxu2 }
 0x177   : > { %v812_v54 = vpop.f32.mrf.mxu1  ;;  %v831_v55 = vadd.f32 %v825_v53, %v759_v48 }
 0x178   : > { %v840_v56 = vmul.f32 %v834_v46, %v829_v51  ;;  %v830_v57 = vadd.f32 %v812_v54, %v758_v50 }
 0x179   : > { %v842_v58 = vmul.f32 %v836_v49, %v831_v55 }
 0x17a   : > { %v841_v59 = vmul.f32 %v835_v52, %v830_v57 }
 0x17b   : > { %v845_v60 = vsel %vm844_vm10, %v842_v58, 0.0 }
 0x17c   : > { %v843_v61 = vadd.f32 %v841_v59, %v840_v56 }
 0x17d   : > { %v801_v62 = vpop.f32.mrf.mxu0 }
 0x17e   : > { %v827_v63 = vpop.f32.mrf.mxu2  ;;  %v846_v0 = vadd.f32 %v845_v60, %v843_v61 }
 0x17f   : > { %v814_v2 = vpop.f32.mrf.mxu1 }
 0x180   : > { %847 = vadd.xlane.f32.xlu2 %v846_v0 }
 0x1b2   : > { %v883_v25 = vpop.permute.xlu1 %882 }
 0x1bb   : > { %v890_v33 = vpop.permute.xlu1 %889 }
 0x1f3   : > { %v848_v6 = vpop.xlane.xlu2 %847 }
 0x1f4   : > { %v849_v7 = vmul.f32 0.00390625, %v848_v6 }
 0x1f6   : > { %v850_v8 = vsub.f32 %v829_v51, %v849_v7  ;;  %v851_v1 = vsub.f32 %v830_v57, %v849_v7  ;;  %v852_v9 = vsub.f32 %v831_v55, %v849_v7 }
 0x1f8   : > { %v853_v10 = vmul.f32 %v850_v8, %v850_v8  ;;  %v854_v11 = vmul.f32 %v851_v1, %v851_v1  ;;  %v855_v12 = vmul.f32 %v852_v9, %v852_v9 }
 0x1fa   : > { %v856_v13 = vmul.f32 %v853_v10, %v834_v46  ;;  %v857_v14 = vmul.f32 %v854_v11, %v835_v52  ;;  %v858_v15 = vmul.f32 %v855_v12, %v836_v49 }
 0x1fc   : > { %v859_v16 = vadd.f32 %v857_v14, %v856_v13  ;;  %v860_v17 = vsel %vm844_vm10, %v858_v15, 0.0 }
 0x1fe   : > { %v861_v18 = vadd.f32 %v860_v17, %v859_v16 }
 0x200   : > { %862 = vadd.xlane.f32.xlu0 %v861_v18 }
 0x273   : > { %v863_v19 = vpop.xlane.xlu0 %862 }
 0x274   : > { %v864_v20 = vmul.f32 0.00390625, %v863_v19 }
 0x276   : > { %v865_v21 = vadd.f32 1e-05, %v864_v20 }
 0x278   : > { %1030 = vrsqrt.f32 %v865_v21  ;;  %vm872_vm12 = vweird.f32 %v865_v21 }
 0x27e   : > { %v1031_v22 = vpop.eup %1030 }
 0x27f   : > { %v867_v23 = vmul.f32 %v1031_v22, %v865_v21  ;;  %vm873_vm11 = vweird.f32 %v1031_v22 }
 0x280   : > { %vm874_vm13 = vmor %vm872_vm12, %vm873_vm11 }
 0x281   : > { %v868_v24 = vmul.f32 %v1031_v22, %v867_v23 }
 0x283   : > { %v869_v26 = vmul.f32 0.5, %v868_v24 }
 0x285   : > { %v870_v27 = vsub.f32 1.5, %v869_v26 }
 0x287   : > { %v871_v28 = vmul.f32 %v1031_v22, %v870_v27 }
 0x289   : > { %v875_v29 = vsel %vm874_vm13, %v1031_v22, %v871_v28 }
 0x28a   : > { %v876_v30 = vmul.f32 %v875_v29, %v850_v8  ;;  %v877_v31 = vmul.f32 %v875_v29, %v851_v1  ;;  %v878_v32 = vmul.f32 %v875_v29, %v852_v9 }
 0x28c   : > { %v885_v34 = vmul.f32 %v883_v25, %v876_v30  ;;  %v886_v35 = vmul.f32 %v883_v25, %v877_v31  ;;  %v887_v36 = vmul.f32 %v883_v25, %v878_v32 }
 0x28e   : > { %v892_v37 = vadd.f32 %v890_v33, %v885_v34  ;;  %v893_v38 = vadd.f32 %v890_v33, %v886_v35  ;;  %v894_v39 = vadd.f32 %v890_v33, %v887_v36 }
 0x290   : > { %vm895_vm14 = vcmp.ge.f32.partialorder %v892_v37, 0.0  ;;  %vm896_vm15 = vcmp.ge.f32.partialorder %v893_v38, 0.0  ;;  %vm897_vm0 = vcmp.ge.f32.partialorder %v894_v39, 0.0  ;;  %v898_v40 = vmul.f32 0.01, %v892_v37 }
 0x291   : > { %v899_v41 = vmul.f32 0.01, %v893_v38  ;;  %v900_v42 = vmul.f32 0.01, %v894_v39 }
 0x292   : > { %v901_v43 = vsel %vm895_vm14, %v892_v37, %v898_v40 }
 0x293   : > { %v902_v44 = vsel %vm896_vm15, %v893_v38, %v899_v41  ;;  %v903_v45 = vsel %vm897_vm0, %v894_v39, %v900_v42 }
 0x294   : > { %v904_v46 = vpack.c.bf16 %v902_v44, %v901_v43  ;;  %v905_v47 = vpack.c.bf16 %v903_v45, %v903_v45 }
 0x296   : > { %906 = vst [vmem:[%s197_s21] sm:$0xff] %v904_v46 }
 0x297   : > { %908 = vst.msk [vmem:[%s197_s21 + $0x8] sm:$0xf] %vm907_vm1, %v905_v47 }
 0x298 PF: > { %s14_s15 = sadd.s32 1, %s1038_s15  }
 0x299   : > { %p11_p4 = scmp.ge.s32.totalorder %s14_s15, 4  }
 0x29b   :  { %13 = sbr.rel (!%p11_p4) target bundleno = 1 (0x1), region = 66 }

// kernel: residual_encoder_unet_forward.15
= control target key start
LH: loop header
LB: loop body
LE: loop exit
PB: predicated region body
PF: predicated region fallthrough
CT: control target
= control target key end

     0   :  { %s1034_s15 = smov 0   ;;  %s1157_s0 = inlined_call_operand.vmem [shape: bf16[2,8,326], index: 0, kind: input, shape index: {}]   ;;  %s1158_s1 = inlined_call_operand.vmem [shape: bf16[8,72], index: 1, kind: input, shape index: {}]   ;;  %s1159_s2 = inlined_call_operand.vmem [shape: f32[8,2], index: 2, kind: input, shape index: {}]   ;;  %s1160_s3 = inlined_call_operand.vmem [shape: f32[1,288], index: 3, kind: input, shape index: {}]   ;;  %s1161_s4 = inlined_call_operand.vmem [shape: bf16[2,8,288], index: 4, kind: output, shape index: {}]  }
   0x1 LB: > { %s915_s16 = sadd.s32 4294967295, %s989_s15   ;;  %p919_p0 = scmp.ge.s32.totalorder %s989_s15, 1  ;;  %s989_s15 = sphi %s1034_s15, %s14_s15  }
   0x2   : > { %p162_p1 = scmp.lt.s32.totalorder %s989_s15, 3 }
   0x4   : > { %p163_p2 = pnand %p919_p0, %p162_p1 }
   0x5   : > { %p188_p3 = scmp.lt.s32.totalorder (!%p163_p2), %s915_s16, 1  ;;  %s991_s23 = smov (!%p163_p2), 127  }
   0x6   : > { %166 = sbr.rel (%p163_p2) target bundleno = 658 (0x292), region = 36  ;;  %s992_s24 = smov (!%p163_p2), 126  }
   0x7   : > { %s993_s25 = smov (!%p163_p2), 120   ;;  %s994_s26 = smov (!%p163_p2), 112  }
   0x8   : > { %s995_s27 = smov (!%p163_p2), 110   ;;  %s996_s28 = smov (!%p163_p2), 104  }
   0x9   : > { %s997_s29 = smov (!%p163_p2), 109   ;;  %s998_s30 = smov (!%p163_p2), 96  }
   0xa   : > { %s999_s5 = smov (!%p163_p2), 108   ;;  %s1000_s6 = smov (!%p163_p2), 92  }
   0xb   : > { %s1163_s16 = smov (!%p188_p3, %s915_s16), 1  ;;  %v1053_v4 = vld [vmem:[%s1158_s1] sm:$0xf]  ;;  %s1001_s7 = smov 88   ;;  %vm228_vm0 = vcmask 1043456   ;;  %vm224_vm1 = vcmask 64512  }
   0xc   : > { %s951_s17 = smul.u32 12, %s1163_s16  ;;  %v203_v7 = vunpack.c.l.b16 %v1053_v4  ;;  %s1002_s8 = smov 80   ;;  %vm336_vm2 = vcmask 1031168   ;;  %vm221_vm3 = vcmask 1039360   ;;  %vm401_vm4 = vcmask 900096  }
   0xd   : > { %s1003_s9 = smov 91   ;;  %s1004_s10 = smov 72   ;;  %vm466_vm5 = vcmask 891904   ;;  %vm531_vm6 = vcmask 883712   ;;  %vm596_vm7 = vcmask 752640   ;;  %vm661_vm8 = vcmask 744448  }
   0xe   : > { %s192_s20 = scalar_lea.vmem %s1157_s0, %s951_s17  ;;  %v204_v9 = vpack.c.b16 %v203_v7, %v203_v7  ;;  %s1005_s11 = smov 90   ;;  %vm726_vm9 = vcmask 736256   ;;  %vm795_vm10 = vcmask 261120  }
   0xf   : > { %v200_v0 = vld [vmem:[%s192_s20 + $0x8] sm:$0xf]  ;;  %v199_v1 = vld [vmem:[%s192_s20] sm:$0xff]  ;;  %s1006_s12 = smov 64   ;;  %s197_s22 = scalar_lea.vmem %s1161_s4, %s951_s17 }
  0x10   : > { %v211_v2 = vunpack.c.l.b16 %v200_v0  ;;  %v209_v3 = vunpack.c.l.b16 %v199_v1  ;;  %v210_v8 = vunpack.c.h.b16 %v199_v1 }
  0x12   : > { %v1055_v5 = vpack.c.b16 %v211_v2, %v211_v2  ;;  %v212_v6 = vpack.c.b16 %v209_v3, %v209_v3  ;;  %v1059_v10 = vpack.c.b16 %v210_v8, %v210_v8 }
  0x14   : > { %219 = vrot.lane.b32.xlu0 %v1055_v5, %s991_s23  ;;  %215 = vrot.lane.b32.xlu1 %v212_v6, %s991_s23  ;;  %v281_v11 = vsel %vm228_vm0, %v212_v6, 0  ;;  %v284_v23 = vsel %vm228_vm0, %v1059_v10, 0  ;;  %v287_v26 = vsel %vm228_vm0, %v1055_v5, 0 }
  0x15   : > { %330 = vrot.lane.b32.xlu2 %v212_v6, %s992_s24  ;;  %296 = vmatpush.bf16.msra.mxu3 %v281_v11 }
  0x18   : > { %925 = vmatmul.msk.bf16.vlgmr.msra.gmra.mxu3 %vm224_vm1, %v1053_v4 }
  0x1c   : > { %205 = vrot.lane.b32.xlu0 %v204_v9, %s993_s25  ;;  %217 = vrot.lane.b32.xlu1 %v1059_v10, %s991_s23 }
  0x1d   : > { %332 = vrot.lane.b32.xlu2 %v1059_v10, %s992_s24 }
  0x24   : > { %328 = vrot.lane.b32.xlu0 %v204_v9, %s994_s26  ;;  %334 = vrot.lane.b32.xlu1 %v1055_v5, %s992_s24 }
  0x25   : > { %397 = vrot.lane.b32.xlu2 %v1059_v10, %s995_s27 }
  0x2c   : > { %399 = vrot.lane.b32.xlu0 %v1055_v5, %s995_s27  ;;  %393 = vrot.lane.b32.xlu1 %v204_v9, %s996_s28 }
  0x2d   : > { %395 = vrot.lane.b32.xlu2 %v212_v6, %s995_s27 }
  0x34   : > { %464 = vrot.lane.b32.xlu0 %v1055_v5, %s997_s29  ;;  %458 = vrot.lane.b32.xlu1 %v204_v9, %s998_s30 }
  0x35   : > { %460 = vrot.lane.b32.xlu2 %v212_v6, %s997_s29 }
  0x3c   : > { %462 = vrot.lane.b32.xlu0 %v1059_v10, %s997_s29  ;;  %525 = vrot.lane.b32.xlu1 %v212_v6, %s999_s5 }
  0x3d   : > { %527 = vrot.lane.b32.xlu2 %v1059_v10, %s999_s5 }
  0x44   : > { %590 = vrot.lane.b32.xlu0 %v212_v6, %s1000_s6  ;;  %592 = vrot.lane.b32.xlu1 %v1059_v10, %s1000_s6 }
  0x45   : > { %523 = vrot.lane.b32.xlu2 %v204_v9, %s1001_s7 }
  0x4c   : > { %529 = vrot.lane.b32.xlu0 %v1055_v5, %s999_s5  ;;  %588 = vrot.lane.b32.xlu1 %v204_v9, %s1002_s8 }
  0x4d   : > { %594 = vrot.lane.b32.xlu2 %v1055_v5, %s1000_s6 }
  0x54   : > { %657 = vrot.lane.b32.xlu0 %v1059_v10, %s1003_s9  ;;  %659 = vrot.lane.b32.xlu1 %v1055_v5, %s1003_s9 }
  0x55   : > { %653 = vrot.lane.b32.xlu2 %v204_v9, %s1004_s10 }
  0x5c   : > { %655 = vrot.lane.b32.xlu0 %v212_v6, %s1003_s9  ;;  %724 = vrot.lane.b32.xlu1 %v1055_v5, %s1005_s11 }
  0x5d   : > { %718 = vrot.lane.b32.xlu2 %v204_v9, %s1006_s12 }
  0x64   : > { %722 = vrot.lane.b32.xlu1 %v1059_v10, %s1005_s11  ;;  %720 = vrot.lane.b32.xlu0 %v212_v6, %s1005_s11 }
  0x6f   : > { %v331_v12 = vpop.permute.xlu2 %330 }
  0x77   : > { %v333_v13 = vpop.permute.xlu2 %332 }
  0x78   : > { %v337_v14 = vsel %vm336_vm2, %v331_v12, %v333_v13 }
  0x79   : > { %v343_v18 = vsel %vm228_vm0, %v337_v14, 0 }
  0x7f   : > { %v398_v15 = vpop.permute.xlu2 %397 }
  0x86   : > { %v220_v16 = vpop.permute.xlu0 %219  ;;  %v216_v17 = vpop.permute.xlu1 %215 }
  0x87   : > { %v236_v19 = vsel %vm228_vm0, %v220_v16, 0  ;;  %v396_v20 = vpop.permute.xlu2 %395 }
  0x88   : > { %271 = vmatpush.bf16.msra.mxu2 %v236_v19  ;;  %v402_v27 = vsel %vm401_vm4, %v396_v20, %v398_v15 }
  0x89   : > { %v408_v30 = vsel %vm228_vm0, %v402_v27, 0 }
  0x8c   : > { %358 = vmatpush.bf16.msrb.mxu2 %v343_v18 }
  0x8e   : > { %v206_v21 = vpop.permute.xlu0 %205  ;;  %v218_v22 = vpop.permute.xlu1 %217 }
  0x8f   : > { %924 = vmatmul.msk.bf16.vlgmr.msra.gmra.mxu2 %vm224_vm1, %v206_v21  ;;  %v222_v24 = vsel %vm221_vm3, %v216_v17, %v218_v22  ;;  %v223_v25 = vsel %vm221_vm3, %v218_v22, %v220_v16  ;;  %v461_v36 = vpop.permute.xlu2 %460 }
  0x90   : > { %v230_v28 = vsel %vm228_vm0, %v222_v24, 0  ;;  %v233_v29 = vsel %vm228_vm0, %v223_v25, 0 }
  0x91   : > { %245 = vmatpush.bf16.msra.mxu0 %v230_v28  ;;  %258 = vmatpush.bf16.msra.mxu1 %v233_v29 }
  0x94   : > { %922 = vmatmul.msk.bf16.vlgmr.msra.gmra.mxu0 %vm224_vm1, %v206_v21  ;;  %923 = vmatmul.msk.bf16.vlgmr.msra.gmra.mxu1 %vm224_vm1, %v206_v21 }
  0x95   : > { %309 = vmatpush.bf16.msrb.mxu0 %v284_v23  ;;  %322 = vmatpush.bf16.msrb.mxu1 %v287_v26 }
  0x96   : > { %v329_v31 = vpop.permute.xlu0 %328  ;;  %v335_v32 = vpop.permute.xlu1 %334 }
  0x97   : > { %v349_v33 = vsel %vm228_vm0, %v335_v32, 0  ;;  %v338_v34 = vsel %vm336_vm2, %v333_v13, %v335_v32  ;;  %v528_v42 = vpop.permute.xlu2 %527 }
  0x98   : > { %v346_v35 = vsel %vm228_vm0, %v338_v34, 0 }
  0x99   : > { %423 = vmatpush.bf16.msra.mxu1 %v408_v30  ;;  %384 = vmatpush.bf16.msra.mxu0 %v349_v33 }
  0x9a   : > { %371 = vmatpush.bf16.msrb.mxu3 %v346_v35 }
  0x9b   : > { %v298_v22 = vpop.f32.mrf.mxu3 }
  0x9d   : > { %929 = vmatmul.msk.bf16.vlgmr.msrb.gmra.mxu3 %vm224_vm1, %v329_v31 }
  0x9e   : > { %v400_v37 = vpop.permute.xlu0 %399  ;;  %v394_v38 = vpop.permute.xlu1 %393 }
  0x9f   : > { %v403_v39 = vsel %vm401_vm4, %v398_v15, %v400_v37  ;;  %v414_v40 = vsel %vm228_vm0, %v400_v37, 0  ;;  %928 = vmatmul.msk.bf16.vlgmr.msrb.gmra.mxu2 %vm224_vm1, %v329_v31  ;;  %v524_v46 = vpop.permute.xlu2 %523 }
  0xa0   : > { %v411_v41 = vsel %vm228_vm0, %v403_v39, 0  ;;  %449 = vmatpush.bf16.msra.mxu3 %v414_v40 }
  0xa1   : > { %436 = vmatpush.bf16.msra.mxu2 %v411_v41 }
  0xa3   : > { %v300_v23 = vpop.f32.mrf.mxu3 }
  0xa4   : > { %926 = vmatmul.msk.bf16.vlgmr.msrb.gmra.mxu0 %vm224_vm1, %v1053_v4  ;;  %927 = vmatmul.msk.bf16.vlgmr.msrb.gmra.mxu1 %vm224_vm1, %v1053_v4 }
  0xa6   : > { %v465_v43 = vpop.permute.xlu0 %464  ;;  %v459_v44 = vpop.permute.xlu1 %458 }
  0xa7   : > { %v479_v45 = vsel %vm228_vm0, %v465_v43, 0  ;;  %v595_v55 = vpop.permute.xlu2 %594 }
  0xa8   : > { %514 = vmatpush.bf16.msrb.mxu2 %v479_v45  ;;  %v609_v3 = vsel %vm228_vm0, %v595_v55, 0 }
  0xad   : > { %933 = vmatmul.msk.bf16.vlgmr.msra.gmra.mxu3 %vm224_vm1, %v394_v38 }
  0xae   : > { %v463_v47 = vpop.permute.xlu0 %462  ;;  %v526_v48 = vpop.permute.xlu1 %525 }
  0xaf   : > { %v467_v49 = vsel %vm466_vm5, %v461_v36, %v463_v47  ;;  %v468_v50 = vsel %vm466_vm5, %v463_v47, %v465_v43  ;;  %932 = vmatmul.msk.bf16.vlgmr.msra.gmra.mxu2 %vm224_vm1, %v394_v38  ;;  %v532_v51 = vsel %vm531_vm6, %v526_v48, %v528_v42  ;;  %v654_v20 = vpop.permute.xlu2 %653 }
  0xb0   : > { %v473_v52 = vsel %vm228_vm0, %v467_v49, 0  ;;  %v476_v53 = vsel %vm228_vm0, %v468_v50, 0  ;;  %v538_v54 = vsel %vm228_vm0, %v532_v51, 0 }
  0xb1   : > { %501 = vmatpush.bf16.msrb.mxu1 %v476_v53  ;;  %488 = vmatpush.bf16.msrb.mxu0 %v473_v52 }
  0xb2   : > { %553 = vmatpush.bf16.msrb.mxu3 %v538_v54 }
  0xb4   : > { %930 = vmatmul.msk.bf16.vlgmr.msra.gmra.mxu0 %vm224_vm1, %v329_v31  ;;  %931 = vmatmul.msk.bf16.vlgmr.msra.gmra.mxu1 %vm224_vm1, %v394_v38 }
  0xb6   : > { %v591_v56 = vpop.permute.xlu0 %590  ;;  %v593_v57 = vpop.permute.xlu1 %592 }
  0xb7   : > { %v597_v58 = vsel %vm596_vm7, %v591_v56, %v593_v57  ;;  %v598_v59 = vsel %vm596_vm7, %v593_v57, %v595_v55  ;;  %v719_v21 = vpop.permute.xlu2 %718 }
  0xb8   : > { %v603_v60 = vsel %vm228_vm0, %v597_v58, 0  ;;  %v606_v61 = vsel %vm228_vm0, %v598_v59, 0 }
  0xb9   : > { %618 = vmatpush.bf16.msra.mxu2 %v603_v60  ;;  %631 = vmatpush.bf16.msra.mxu3 %v606_v61 }
  0xbd   : > { %937 = vmatmul.msk.bf16.vlgmr.msrb.gmra.mxu3 %vm224_vm1, %v524_v46 }
  0xbe   : > { %v530_v62 = vpop.permute.xlu0 %529  ;;  %v589_v63 = vpop.permute.xlu1 %588 }
  0xbf   : > { %v533_v0 = vsel %vm531_vm6, %v528_v42, %v530_v62  ;;  %v544_v1 = vsel %vm228_vm0, %v530_v62, 0  ;;  %936 = vmatmul.msk.bf16.vlgmr.msrb.gmra.mxu2 %vm224_vm1, %v459_v44 }
  0xc0   : > { %v541_v2 = vsel %vm228_vm0, %v533_v0, 0  ;;  %579 = vmatpush.bf16.msra.mxu1 %v544_v1 }
  0xc1   : > { %566 = vmatpush.bf16.msra.mxu0 %v541_v2 }
  0xc4   : > { %934 = vmatmul.msk.bf16.vlgmr.msrb.gmra.mxu0 %vm224_vm1, %v459_v44  ;;  %935 = vmatmul.msk.bf16.vlgmr.msrb.gmra.mxu1 %vm224_vm1, %v459_v44 }
  0xc5   : > { %644 = vmatpush.bf16.msrb.mxu0 %v609_v3 }
  0xc6   : > { %v658_v4 = vpop.permute.xlu0 %657  ;;  %v660_v5 = vpop.permute.xlu1 %659 }
  0xc7   : > { %v663_v6 = vsel %vm661_vm8, %v658_v4, %v660_v5  ;;  %v674_v7 = vsel %vm228_vm0, %v660_v5, 0 }
  0xc8   : > { %v671_v8 = vsel %vm228_vm0, %v663_v6, 0  ;;  %709 = vmatpush.bf16.msrb.mxu3 %v674_v7 }
  0xc9   : > { %696 = vmatpush.bf16.msrb.mxu2 %v671_v8 }
  0xcd   : > { %941 = vmatmul.msk.bf16.vlgmr.msra.gmra.mxu3 %vm224_vm1, %v589_v63 }
  0xce   : > { %v656_v9 = vpop.permute.xlu0 %655  ;;  %v725_v10 = vpop.permute.xlu1 %724 }
  0xcf   : > { %v662_v11 = vsel %vm661_vm8, %v656_v9, %v658_v4  ;;  %940 = vmatmul.msk.bf16.vlgmr.msra.gmra.mxu2 %vm224_vm1, %v589_v63  ;;  %v739_v12 = vsel %vm228_vm0, %v725_v10, 0 }
  0xd0   : > { %v668_v13 = vsel %vm228_vm0, %v662_v11, 0  ;;  %774 = vmatpush.bf16.msra.mxu2 %v739_v12 }
  0xd1   : > { %683 = vmatpush.bf16.msrb.mxu1 %v668_v13 }
  0xd4   : > { %938 = vmatmul.msk.bf16.vlgmr.msra.gmra.mxu0 %vm224_vm1, %v524_v46  ;;  %939 = vmatmul.msk.bf16.vlgmr.msra.gmra.mxu1 %vm224_vm1, %v524_v46 }
  0xd6   : > { %v723_v14 = vpop.permute.xlu1 %722  ;;  %v721_v15 = vpop.permute.xlu0 %720 }
  0xd7   : > { %v728_v16 = vsel %vm726_vm9, %v723_v14, %v725_v10  ;;  %v727_v17 = vsel %vm726_vm9, %v721_v15, %v723_v14 }
  0xd8   : > { %v736_v18 = vsel %vm228_vm0, %v728_v16, 0  ;;  %v733_v19 = vsel %vm228_vm0, %v727_v17, 0 }
  0xd9   : > { %761 = vmatpush.bf16.msra.mxu1 %v736_v18  ;;  %748 = vmatpush.bf16.msra.mxu0 %v733_v19 }
  0xdd   : > { %945 = vmatmul.msk.bf16.vlgmr.msrb.gmra.mxu3 %vm224_vm1, %v654_v20 }
  0xdf   : > { %944 = vmatmul.msk.bf16.vlgmr.msrb.gmra.mxu2 %vm224_vm1, %v654_v20 }
  0xe4   : > { %942 = vmatmul.msk.bf16.vlgmr.msrb.gmra.mxu0 %vm224_vm1, %v589_v63  ;;  %943 = vmatmul.msk.bf16.vlgmr.msrb.gmra.mxu1 %vm224_vm1, %v654_v20 }
  0xef   : > { %948 = vmatmul.msk.bf16.vlgmr.msra.gmra.mxu2 %vm224_vm1, %v719_v21 }
  0xf4   : > { %946 = vmatmul.msk.bf16.vlgmr.msra.gmra.mxu0 %vm224_vm1, %v719_v21  ;;  %947 = vmatmul.msk.bf16.vlgmr.msra.gmra.mxu1 %vm224_vm1, %v719_v21  ;;  %vm858_vm1 = vcmask 257024  }
 0x111   : > { %v247_v24 = vpop.f32.mrf.mxu0  ;;  %v260_v25 = vpop.f32.mrf.mxu1 }
 0x112   : > { %v299_v26 = vadd.f32 %v298_v22, %v247_v24  ;;  %v273_v27 = vpop.f32.mrf.mxu2  ;;  %v783_v22 = vld [vmem:[%s1160_s3] sm:$0x7] }
 0x119   : > { %v249_v28 = vpop.f32.mrf.mxu0  ;;  %v262_v29 = vpop.f32.mrf.mxu1 }
 0x11a   : > { %v275_v30 = vpop.f32.mrf.mxu2  ;;  %v786_v28 = vperm.slane %v783_v22, 1 }
 0x120   : > { %v373_v31 = vpop.f32.mrf.mxu3 }
 0x121   : > { %v311_v32 = vpop.f32.mrf.mxu0  ;;  %v324_v33 = vpop.f32.mrf.mxu1 }
 0x122   : > { %v312_v34 = vadd.f32 %v311_v32, %v260_v25  ;;  %v325_v35 = vadd.f32 %v324_v33, %v273_v27  ;;  %v360_v36 = vpop.f32.mrf.mxu2  ;;  %v785_v27 = vperm.slane %v783_v22, 0  ;;  %v787_v32 = vperm.slane %v783_v22, 2 }
 0x123   : > { %v390_v37 = vadd.f32 %v360_v36, %v299_v26 }
 0x124   : > { %v391_v38 = vadd.f32 %v373_v31, %v312_v34 }
 0x128   : > { %v375_v39 = vpop.f32.mrf.mxu3 }
 0x129   : > { %v313_v40 = vpop.f32.mrf.mxu0  ;;  %v326_v41 = vpop.f32.mrf.mxu1 }
 0x12a   : > { %v362_v42 = vpop.f32.mrf.mxu2 }
 0x130   : > { %v451_v43 = vpop.f32.mrf.mxu3 }
 0x131   : > { %v386_v44 = vpop.f32.mrf.mxu0  ;;  %v425_v45 = vpop.f32.mrf.mxu1 }
 0x132   : > { %v438_v46 = vpop.f32.mrf.mxu2  ;;  %v392_v7 = vadd.f32 %v386_v44, %v325_v35  ;;  %v455_v8 = vadd.f32 %v425_v45, %v390_v37 }
 0x133   : > { %v456_v9 = vadd.f32 %v438_v46, %v391_v38  ;;  %v830_v46 = vld [vmem:[%s1159_s2] sm:$0xff] }
 0x134   : > { %v457_v10 = vadd.f32 %v451_v43, %v392_v7 }
 0x138   : > { %v453_v47 = vpop.f32.mrf.mxu3 }
 0x139   : > { %v388_v48 = vpop.f32.mrf.mxu0  ;;  %v427_v49 = vpop.f32.mrf.mxu1  ;;  %v1007_v47 = vmov 0  }
 0x13a   : > { %v440_v50 = vpop.f32.mrf.mxu2  ;;  %978 = vset.pattern.permute.xlu1 %v1007_v47  ;;  %v1008_v48 = vmov 1  }
 0x13b   : > { %980 = vset.pattern.permute.xlu0 %v1008_v48  ;;  %833 = vperm.xlu1 %978, %v830_v46  }
 0x140   : > { %v555_v51 = vpop.f32.mrf.mxu3 }
 0x141   : > { %v490_v52 = vpop.f32.mrf.mxu0  ;;  %v503_v53 = vpop.f32.mrf.mxu1 }
 0x142   : > { %v516_v54 = vpop.f32.mrf.mxu2  ;;  %v520_v12 = vadd.f32 %v490_v52, %v455_v8  ;;  %v521_v13 = vadd.f32 %v503_v53, %v456_v9 }
 0x143   : > { %v522_v14 = vadd.f32 %v516_v54, %v457_v10  ;;  %979 = vset.pattern.permute.xlu1 %v1008_v48 }
 0x144   : > { %v585_v20 = vadd.f32 %v555_v51, %v520_v12  ;;  %840 = vperm.xlu1 %979, %v830_v46  }
 0x148   : > { %v557_v55 = vpop.f32.mrf.mxu3 }
 0x149   : > { %v492_v56 = vpop.f32.mrf.mxu0  ;;  %v505_v57 = vpop.f32.mrf.mxu1 }
 0x14a   : > { %v518_v58 = vpop.f32.mrf.mxu2 }
 0x150   : > { %v633_v59 = vpop.f32.mrf.mxu3 }
 0x151   : > { %v568_v60 = vpop.f32.mrf.mxu0  ;;  %v581_v61 = vpop.f32.mrf.mxu1 }
 0x152   : > { %v620_v62 = vpop.f32.mrf.mxu2  ;;  %v586_v17 = vadd.f32 %v568_v60, %v521_v13  ;;  %v587_v19 = vadd.f32 %v581_v61, %v522_v14 }
 0x153   : > { %v650_v23 = vadd.f32 %v620_v62, %v585_v20 }
 0x154   : > { %v651_v24 = vadd.f32 %v633_v59, %v586_v17 }
 0x158   : > { %v635_v63 = vpop.f32.mrf.mxu3 }
 0x159   : > { %v570_v0 = vpop.f32.mrf.mxu0  ;;  %v583_v1 = vpop.f32.mrf.mxu1 }
 0x15a   : > { %v622_v2 = vpop.f32.mrf.mxu2 }
 0x160   : > { %v711_v3 = vpop.f32.mrf.mxu3 }
 0x161   : > { %v646_v4 = vpop.f32.mrf.mxu0  ;;  %v685_v5 = vpop.f32.mrf.mxu1 }
 0x162   : > { %v698_v6 = vpop.f32.mrf.mxu2  ;;  %v652_v21 = vadd.f32 %v646_v4, %v587_v19  ;;  %v715_v25 = vadd.f32 %v685_v5, %v650_v23 }
 0x163   : > { %v716_v26 = vadd.f32 %v698_v6, %v651_v24 }
 0x164   : > { %v717_v31 = vadd.f32 %v711_v3, %v652_v21 }
 0x168   : > { %v713_v11 = vpop.f32.mrf.mxu3 }
 0x169   : > { %v648_v15 = vpop.f32.mrf.mxu0  ;;  %v687_v16 = vpop.f32.mrf.mxu1 }
 0x16a   : > { %v700_v18 = vpop.f32.mrf.mxu2 }
 0x171   : > { %v750_v29 = vpop.f32.mrf.mxu0  ;;  %v763_v30 = vpop.f32.mrf.mxu1 }
 0x172   : > { %v780_v33 = vadd.f32 %v750_v29, %v715_v25  ;;  %v781_v34 = vadd.f32 %v763_v30, %v716_v26  ;;  %v776_v35 = vpop.f32.mrf.mxu2 }
 0x173   : > { %v782_v36 = vadd.f32 %v776_v35, %v717_v31 }
 0x174   : > { %v791_v37 = vmul.f32 %v785_v27, %v780_v33  ;;  %v792_v38 = vmul.f32 %v786_v28, %v781_v34 }
 0x175   : > { %v793_v39 = vmul.f32 %v787_v32, %v782_v36 }
 0x176   : > { %v794_v40 = vadd.f32 %v792_v38, %v791_v37 }
 0x177   : > { %v796_v41 = vsel %vm795_vm10, %v793_v39, 0.0 }
 0x178   : > { %v797_v42 = vadd.f32 %v796_v41, %v794_v40 }
 0x179   : > { %v752_v43 = vpop.f32.mrf.mxu0  ;;  %v765_v44 = vpop.f32.mrf.mxu1 }
 0x17a   : > { %v778_v45 = vpop.f32.mrf.mxu2  ;;  %798 = vadd.xlane.f32.xlu2 %v797_v42 }
 0x1ad   : > { %v834_v5 = vpop.permute.xlu1 %833 }
 0x1b6   : > { %v841_v13 = vpop.permute.xlu1 %840 }
 0x1ed   : > { %v799_v49 = vpop.xlane.xlu2 %798 }
 0x1ee   : > { %v800_v50 = vmul.f32 0.00390625, %v799_v49 }
 0x1f0   : > { %v801_v51 = vsub.f32 %v780_v33, %v800_v50  ;;  %v802_v52 = vsub.f32 %v781_v34, %v800_v50  ;;  %v803_v53 = vsub.f32 %v782_v36, %v800_v50 }
 0x1f2   : > { %v804_v54 = vmul.f32 %v801_v51, %v801_v51  ;;  %v805_v55 = vmul.f32 %v802_v52, %v802_v52  ;;  %v806_v56 = vmul.f32 %v803_v53, %v803_v53 }
 0x1f4   : > { %v807_v57 = vmul.f32 %v804_v54, %v785_v27  ;;  %v808_v58 = vmul.f32 %v805_v55, %v786_v28  ;;  %v809_v59 = vmul.f32 %v806_v56, %v787_v32 }
 0x1f6   : > { %v810_v60 = vadd.f32 %v808_v58, %v807_v57  ;;  %v811_v61 = vsel %vm795_vm10, %v809_v59, 0.0 }
 0x1f8   : > { %v812_v62 = vadd.f32 %v811_v61, %v810_v60 }
 0x1fa   : > { %813 = vadd.xlane.f32.xlu0 %v812_v62 }
 0x26d   : > { %v814_v63 = vpop.xlane.xlu0 %813 }
 0x26e   : > { %v815_v0 = vmul.f32 0.00390625, %v814_v63 }
 0x270   : > { %v816_v1 = vadd.f32 1e-05, %v815_v0 }
 0x272   : > { %981 = vrsqrt.f32 %v816_v1  ;;  %vm823_vm12 = vweird.f32 %v816_v1 }
 0x278   : > { %v982_v2 = vpop.eup %981 }
 0x279   : > { %v818_v3 = vmul.f32 %v982_v2, %v816_v1  ;;  %vm824_vm11 = vweird.f32 %v982_v2 }
 0x27a   : > { %vm825_vm13 = vmor %vm823_vm12, %vm824_vm11 }
 0x27b   : > { %v819_v4 = vmul.f32 %v982_v2, %v818_v3 }
 0x27d   : > { %v820_v6 = vmul.f32 0.5, %v819_v4 }
 0x27f   : > { %v821_v7 = vsub.f32 1.5, %v820_v6 }
 0x281   : > { %v822_v8 = vmul.f32 %v982_v2, %v821_v7 }
 0x283   : > { %v826_v9 = vsel %vm825_vm13, %v982_v2, %v822_v8 }
 0x284   : > { %v827_v10 = vmul.f32 %v826_v9, %v801_v51  ;;  %v828_v11 = vmul.f32 %v826_v9, %v802_v52  ;;  %v829_v12 = vmul.f32 %v826_v9, %v803_v53 }
 0x286   : > { %v836_v14 = vmul.f32 %v834_v5, %v827_v10  ;;  %v837_v15 = vmul.f32 %v834_v5, %v828_v11  ;;  %v838_v16 = vmul.f32 %v834_v5, %v829_v12 }
 0x288   : > { %v843_v17 = vadd.f32 %v841_v13, %v836_v14  ;;  %v844_v18 = vadd.f32 %v841_v13, %v837_v15  ;;  %v845_v19 = vadd.f32 %v841_v13, %v838_v16 }
 0x28a   : > { %vm846_vm14 = vcmp.ge.f32.partialorder %v843_v17, 0.0  ;;  %vm847_vm15 = vcmp.ge.f32.partialorder %v844_v18, 0.0  ;;  %vm848_vm0 = vcmp.ge.f32.partialorder %v845_v19, 0.0  ;;  %v849_v20 = vmul.f32 0.01, %v843_v17 }
 0x28b   : > { %v850_v21 = vmul.f32 0.01, %v844_v18  ;;  %v851_v22 = vmul.f32 0.01, %v845_v19 }
 0x28c   : > { %v852_v23 = vsel %vm846_vm14, %v843_v17, %v849_v20 }
 0x28d   : > { %v853_v24 = vsel %vm847_vm15, %v844_v18, %v850_v21  ;;  %v854_v25 = vsel %vm848_vm0, %v845_v19, %v851_v22 }
 0x28e   : > { %v855_v26 = vpack.c.bf16 %v853_v24, %v852_v23  ;;  %v856_v27 = vpack.c.bf16 %v854_v25, %v854_v25 }
 0x290   : > { %857 = vst [vmem:[%s197_s22] sm:$0xff] %v855_v26 }
 0x291   : > { %859 = vst.msk [vmem:[%s197_s22 + $0x8] sm:$0xf] %vm858_vm1, %v856_v27 }
 0x292 PF: > { %s14_s15 = sadd.s32 1, %s989_s15  }
 0x293   : > { %p11_p4 = scmp.ge.s32.totalorder %s14_s15, 4  }
 0x295   :  { %13 = sbr.rel (!%p11_p4) target bundleno = 1 (0x1), region = 66 }

// kernel: residual_encoder_unet_forward.16
= control target key start
LH: loop header
LB: loop body
LE: loop exit
PB: predicated region body
PF: predicated region fallthrough
CT: control target
= control target key end

     0   :  { %s1107_s18 = smov 0   ;;  %s1231_s0 = inlined_call_operand.vmem [shape: bf16[2,8,326], index: 0, kind: input, shape index: {}]   ;;  %s1232_s1 = inlined_call_operand.vmem [shape: bf16[8,72], index: 1, kind: input, shape index: {}]   ;;  %s1233_s2 = inlined_call_operand.vmem [shape: f32[8,2], index: 2, kind: input, shape index: {}]   ;;  %s1234_s3 = inlined_call_operand.vmem [shape: f32[1,288], index: 3, kind: input, shape index: {}]   ;;  %s1235_s4 = inlined_call_operand.vmem [shape: bf16[2,8,288], index: 4, kind: input, shape index: {}]   ;;  %s1236_s5 = inlined_call_operand.vmem [shape: bf16[2,8,288], index: 5, kind: output, shape index: {}]  }
   0x1 LB: > { %s982_s19 = sadd.s32 4294967295, %s1057_s18   ;;  %p986_p0 = scmp.ge.s32.totalorder %s1057_s18, 1  ;;  %s1057_s18 = sphi %s1107_s18, %s15_s18  }
   0x2   : > { %p197_p1 = scmp.lt.s32.totalorder %s1057_s18, 3 }
   0x4   : > { %p198_p2 = pnand %p986_p0, %p197_p1 }
   0x5   : > { %p230_p3 = scmp.lt.s32.totalorder (!%p198_p2), %s982_s19, 1  ;;  %s1059_s26 = smov (!%p198_p2), 127  }
   0x6   : > { %201 = sbr.rel (%p198_p2) target bundleno = 660 (0x294), region = 40  ;;  %s1060_s27 = smov (!%p198_p2), 126  }
   0x7   : > { %s1061_s28 = smov (!%p198_p2), 120   ;;  %s1062_s29 = smov (!%p198_p2), 112  }
   0x8   : > { %s1063_s30 = smov (!%p198_p2), 110   ;;  %s1064_s6 = smov (!%p198_p2), 104  }
   0x9   : > { %s1065_s7 = smov (!%p198_p2), 109   ;;  %s1066_s8 = smov (!%p198_p2), 96  }
   0xa   : > { %s1067_s9 = smov (!%p198_p2), 108   ;;  %s1068_s10 = smov (!%p198_p2), 92  }
   0xb   : > { %s1238_s19 = smov (!%p230_p3, %s982_s19), 1  ;;  %v1124_v4 = vld [vmem:[%s1232_s1] sm:$0xf]  ;;  %s1069_s11 = smov 88   ;;  %vm275_vm0 = vcmask 1043456   ;;  %vm271_vm1 = vcmask 64512  }
   0xc   : > { %s1115_s20 = smul.u32 12, %s1238_s19  ;;  %v250_v7 = vunpack.c.l.b16 %v1124_v4  ;;  %s1070_s12 = smov 80   ;;  %vm383_vm2 = vcmask 1031168   ;;  %vm268_vm3 = vcmask 1039360   ;;  %vm448_vm4 = vcmask 900096  }
   0xd   : > { %s1071_s13 = smov 91   ;;  %s1072_s14 = smov 72   ;;  %vm513_vm5 = vcmask 891904   ;;  %vm578_vm6 = vcmask 883712   ;;  %vm643_vm7 = vcmask 752640   ;;  %vm708_vm8 = vcmask 744448  }
   0xe   : > { %s234_s23 = scalar_lea.vmem %s1231_s0, %s1115_s20  ;;  %v251_v9 = vpack.c.b16 %v250_v7, %v250_v7  ;;  %s1073_s15 = smov 90   ;;  %vm773_vm9 = vcmask 736256   ;;  %vm842_vm10 = vcmask 261120  }
   0xf   : > { %v247_v0 = vld [vmem:[%s234_s23 + $0x8] sm:$0xf]  ;;  %v246_v1 = vld [vmem:[%s234_s23] sm:$0xff]  ;;  %s1074_s16 = smov 64   ;;  %s239_s25 = scalar_lea.vmem %s1235_s4, %s1115_s20 }
  0x10   : > { %v258_v2 = vunpack.c.l.b16 %v247_v0  ;;  %v256_v3 = vunpack.c.l.b16 %v246_v1  ;;  %v257_v8 = vunpack.c.h.b16 %v246_v1 }
  0x12   : > { %v1126_v5 = vpack.c.b16 %v258_v2, %v258_v2  ;;  %v259_v6 = vpack.c.b16 %v256_v3, %v256_v3  ;;  %v1130_v10 = vpack.c.b16 %v257_v8, %v257_v8 }
  0x14   : > { %266 = vrot.lane.b32.xlu0 %v1126_v5, %s1059_s26  ;;  %262 = vrot.lane.b32.xlu1 %v259_v6, %s1059_s26  ;;  %v328_v11 = vsel %vm275_vm0, %v259_v6, 0  ;;  %v331_v23 = vsel %vm275_vm0, %v1130_v10, 0  ;;  %v334_v26 = vsel %vm275_vm0, %v1126_v5, 0 }
  0x15   : > { %377 = vrot.lane.b32.xlu2 %v259_v6, %s1060_s27  ;;  %343 = vmatpush.bf16.msra.mxu3 %v328_v11 }
  0x18   : > { %993 = vmatmul.msk.bf16.vlgmr.msra.gmra.mxu3 %vm271_vm1, %v1124_v4 }
  0x1c   : > { %252 = vrot.lane.b32.xlu0 %v251_v9, %s1061_s28  ;;  %264 = vrot.lane.b32.xlu1 %v1130_v10, %s1059_s26  ;;  %s244_s28 = scalar_lea.vmem %s1236_s5, %s1115_s20 }
  0x1d   : > { %379 = vrot.lane.b32.xlu2 %v1130_v10, %s1060_s27 }
  0x24   : > { %375 = vrot.lane.b32.xlu0 %v251_v9, %s1062_s29  ;;  %381 = vrot.lane.b32.xlu1 %v1126_v5, %s1060_s27 }
  0x25   : > { %444 = vrot.lane.b32.xlu2 %v1130_v10, %s1063_s30 }
  0x2c   : > { %446 = vrot.lane.b32.xlu0 %v1126_v5, %s1063_s30  ;;  %440 = vrot.lane.b32.xlu1 %v251_v9, %s1064_s6 }
  0x2d   : > { %442 = vrot.lane.b32.xlu2 %v259_v6, %s1063_s30 }
  0x34   : > { %511 = vrot.lane.b32.xlu0 %v1126_v5, %s1065_s7  ;;  %505 = vrot.lane.b32.xlu1 %v251_v9, %s1066_s8 }
  0x35   : > { %507 = vrot.lane.b32.xlu2 %v259_v6, %s1065_s7 }
  0x3c   : > { %509 = vrot.lane.b32.xlu0 %v1130_v10, %s1065_s7  ;;  %572 = vrot.lane.b32.xlu1 %v259_v6, %s1067_s9 }
  0x3d   : > { %574 = vrot.lane.b32.xlu2 %v1130_v10, %s1067_s9 }
  0x44   : > { %637 = vrot.lane.b32.xlu0 %v259_v6, %s1068_s10  ;;  %639 = vrot.lane.b32.xlu1 %v1130_v10, %s1068_s10 }
  0x45   : > { %570 = vrot.lane.b32.xlu2 %v251_v9, %s1069_s11 }
  0x4c   : > { %576 = vrot.lane.b32.xlu0 %v1126_v5, %s1067_s9  ;;  %635 = vrot.lane.b32.xlu1 %v251_v9, %s1070_s12 }
  0x4d   : > { %641 = vrot.lane.b32.xlu2 %v1126_v5, %s1068_s10 }
  0x54   : > { %704 = vrot.lane.b32.xlu0 %v1130_v10, %s1071_s13  ;;  %706 = vrot.lane.b32.xlu1 %v1126_v5, %s1071_s13 }
  0x55   : > { %700 = vrot.lane.b32.xlu2 %v251_v9, %s1072_s14 }
  0x5c   : > { %702 = vrot.lane.b32.xlu0 %v259_v6, %s1071_s13  ;;  %771 = vrot.lane.b32.xlu1 %v1126_v5, %s1073_s15 }
  0x5d   : > { %765 = vrot.lane.b32.xlu2 %v251_v9, %s1074_s16 }
  0x64   : > { %769 = vrot.lane.b32.xlu1 %v1130_v10, %s1073_s15  ;;  %767 = vrot.lane.b32.xlu0 %v259_v6, %s1073_s15 }
  0x6f   : > { %v378_v12 = vpop.permute.xlu2 %377 }
  0x77   : > { %v380_v13 = vpop.permute.xlu2 %379 }
  0x78   : > { %v384_v14 = vsel %vm383_vm2, %v378_v12, %v380_v13 }
  0x79   : > { %v390_v18 = vsel %vm275_vm0, %v384_v14, 0 }
  0x7f   : > { %v445_v15 = vpop.permute.xlu2 %444 }
  0x86   : > { %v267_v16 = vpop.permute.xlu0 %266  ;;  %v263_v17 = vpop.permute.xlu1 %262 }
  0x87   : > { %v283_v19 = vsel %vm275_vm0, %v267_v16, 0  ;;  %v443_v20 = vpop.permute.xlu2 %442 }
  0x88   : > { %318 = vmatpush.bf16.msra.mxu2 %v283_v19  ;;  %v449_v27 = vsel %vm448_vm4, %v443_v20, %v445_v15 }
  0x89   : > { %v455_v30 = vsel %vm275_vm0, %v449_v27, 0 }
  0x8c   : > { %405 = vmatpush.bf16.msrb.mxu2 %v390_v18 }
  0x8e   : > { %v253_v21 = vpop.permute.xlu0 %252  ;;  %v265_v22 = vpop.permute.xlu1 %264 }
  0x8f   : > { %992 = vmatmul.msk.bf16.vlgmr.msra.gmra.mxu2 %vm271_vm1, %v253_v21  ;;  %v269_v24 = vsel %vm268_vm3, %v263_v17, %v265_v22  ;;  %v270_v25 = vsel %vm268_vm3, %v265_v22, %v267_v16  ;;  %v508_v36 = vpop.permute.xlu2 %507 }
  0x90   : > { %v277_v28 = vsel %vm275_vm0, %v269_v24, 0  ;;  %v280_v29 = vsel %vm275_vm0, %v270_v25, 0 }
  0x91   : > { %292 = vmatpush.bf16.msra.mxu0 %v277_v28  ;;  %305 = vmatpush.bf16.msra.mxu1 %v280_v29 }
  0x94   : > { %990 = vmatmul.msk.bf16.vlgmr.msra.gmra.mxu0 %vm271_vm1, %v253_v21  ;;  %991 = vmatmul.msk.bf16.vlgmr.msra.gmra.mxu1 %vm271_vm1, %v253_v21 }
  0x95   : > { %356 = vmatpush.bf16.msrb.mxu0 %v331_v23  ;;  %369 = vmatpush.bf16.msrb.mxu1 %v334_v26 }
  0x96   : > { %v376_v31 = vpop.permute.xlu0 %375  ;;  %v382_v32 = vpop.permute.xlu1 %381 }
  0x97   : > { %v396_v33 = vsel %vm275_vm0, %v382_v32, 0  ;;  %v385_v34 = vsel %vm383_vm2, %v380_v13, %v382_v32  ;;  %v575_v42 = vpop.permute.xlu2 %574 }
  0x98   : > { %v393_v35 = vsel %vm275_vm0, %v385_v34, 0 }
  0x99   : > { %470 = vmatpush.bf16.msra.mxu1 %v455_v30  ;;  %431 = vmatpush.bf16.msra.mxu0 %v396_v33 }
  0x9a   : > { %418 = vmatpush.bf16.msrb.mxu3 %v393_v35 }
  0x9b   : > { %v345_v22 = vpop.f32.mrf.mxu3 }
  0x9d   : > { %997 = vmatmul.msk.bf16.vlgmr.msrb.gmra.mxu3 %vm271_vm1, %v376_v31 }
  0x9e   : > { %v447_v37 = vpop.permute.xlu0 %446  ;;  %v441_v38 = vpop.permute.xlu1 %440 }
  0x9f   : > { %v450_v39 = vsel %vm448_vm4, %v445_v15, %v447_v37  ;;  %v461_v40 = vsel %vm275_vm0, %v447_v37, 0  ;;  %996 = vmatmul.msk.bf16.vlgmr.msrb.gmra.mxu2 %vm271_vm1, %v376_v31  ;;  %v571_v46 = vpop.permute.xlu2 %570 }
  0xa0   : > { %v458_v41 = vsel %vm275_vm0, %v450_v39, 0  ;;  %496 = vmatpush.bf16.msra.mxu3 %v461_v40 }
  0xa1   : > { %483 = vmatpush.bf16.msra.mxu2 %v458_v41 }
  0xa3   : > { %v347_v23 = vpop.f32.mrf.mxu3 }
  0xa4   : > { %994 = vmatmul.msk.bf16.vlgmr.msrb.gmra.mxu0 %vm271_vm1, %v1124_v4  ;;  %995 = vmatmul.msk.bf16.vlgmr.msrb.gmra.mxu1 %vm271_vm1, %v1124_v4 }
  0xa6   : > { %v512_v43 = vpop.permute.xlu0 %511  ;;  %v506_v44 = vpop.permute.xlu1 %505 }
  0xa7   : > { %v526_v45 = vsel %vm275_vm0, %v512_v43, 0  ;;  %v642_v55 = vpop.permute.xlu2 %641 }
  0xa8   : > { %561 = vmatpush.bf16.msrb.mxu2 %v526_v45  ;;  %v656_v3 = vsel %vm275_vm0, %v642_v55, 0 }
  0xad   : > { %1001 = vmatmul.msk.bf16.vlgmr.msra.gmra.mxu3 %vm271_vm1, %v441_v38 }
  0xae   : > { %v510_v47 = vpop.permute.xlu0 %509  ;;  %v573_v48 = vpop.permute.xlu1 %572 }
  0xaf   : > { %v514_v49 = vsel %vm513_vm5, %v508_v36, %v510_v47  ;;  %v515_v50 = vsel %vm513_vm5, %v510_v47, %v512_v43  ;;  %1000 = vmatmul.msk.bf16.vlgmr.msra.gmra.mxu2 %vm271_vm1, %v441_v38  ;;  %v579_v51 = vsel %vm578_vm6, %v573_v48, %v575_v42  ;;  %v701_v20 = vpop.permute.xlu2 %700 }
  0xb0   : > { %v520_v52 = vsel %vm275_vm0, %v514_v49, 0  ;;  %v523_v53 = vsel %vm275_vm0, %v515_v50, 0  ;;  %v585_v54 = vsel %vm275_vm0, %v579_v51, 0 }
  0xb1   : > { %548 = vmatpush.bf16.msrb.mxu1 %v523_v53  ;;  %535 = vmatpush.bf16.msrb.mxu0 %v520_v52 }
  0xb2   : > { %600 = vmatpush.bf16.msrb.mxu3 %v585_v54 }
  0xb4   : > { %998 = vmatmul.msk.bf16.vlgmr.msra.gmra.mxu0 %vm271_vm1, %v376_v31  ;;  %999 = vmatmul.msk.bf16.vlgmr.msra.gmra.mxu1 %vm271_vm1, %v441_v38 }
  0xb6   : > { %v638_v56 = vpop.permute.xlu0 %637  ;;  %v640_v57 = vpop.permute.xlu1 %639 }
  0xb7   : > { %v644_v58 = vsel %vm643_vm7, %v638_v56, %v640_v57  ;;  %v645_v59 = vsel %vm643_vm7, %v640_v57, %v642_v55  ;;  %v766_v21 = vpop.permute.xlu2 %765 }
  0xb8   : > { %v650_v60 = vsel %vm275_vm0, %v644_v58, 0  ;;  %v653_v61 = vsel %vm275_vm0, %v645_v59, 0 }
  0xb9   : > { %665 = vmatpush.bf16.msra.mxu2 %v650_v60  ;;  %678 = vmatpush.bf16.msra.mxu3 %v653_v61 }
  0xbd   : > { %1005 = vmatmul.msk.bf16.vlgmr.msrb.gmra.mxu3 %vm271_vm1, %v571_v46 }
  0xbe   : > { %v577_v62 = vpop.permute.xlu0 %576  ;;  %v636_v63 = vpop.permute.xlu1 %635 }
  0xbf   : > { %v580_v0 = vsel %vm578_vm6, %v575_v42, %v577_v62  ;;  %v591_v1 = vsel %vm275_vm0, %v577_v62, 0  ;;  %1004 = vmatmul.msk.bf16.vlgmr.msrb.gmra.mxu2 %vm271_vm1, %v506_v44 }
  0xc0   : > { %v588_v2 = vsel %vm275_vm0, %v580_v0, 0  ;;  %626 = vmatpush.bf16.msra.mxu1 %v591_v1 }
  0xc1   : > { %613 = vmatpush.bf16.msra.mxu0 %v588_v2 }
  0xc4   : > { %1002 = vmatmul.msk.bf16.vlgmr.msrb.gmra.mxu0 %vm271_vm1, %v506_v44  ;;  %1003 = vmatmul.msk.bf16.vlgmr.msrb.gmra.mxu1 %vm271_vm1, %v506_v44 }
  0xc5   : > { %691 = vmatpush.bf16.msrb.mxu0 %v656_v3 }
  0xc6   : > { %v705_v4 = vpop.permute.xlu0 %704  ;;  %v707_v5 = vpop.permute.xlu1 %706 }
  0xc7   : > { %v710_v6 = vsel %vm708_vm8, %v705_v4, %v707_v5  ;;  %v721_v7 = vsel %vm275_vm0, %v707_v5, 0 }
  0xc8   : > { %v718_v8 = vsel %vm275_vm0, %v710_v6, 0  ;;  %756 = vmatpush.bf16.msrb.mxu3 %v721_v7 }
  0xc9   : > { %743 = vmatpush.bf16.msrb.mxu2 %v718_v8 }
  0xcd   : > { %1009 = vmatmul.msk.bf16.vlgmr.msra.gmra.mxu3 %vm271_vm1, %v636_v63 }
  0xce   : > { %v703_v9 = vpop.permute.xlu0 %702  ;;  %v772_v10 = vpop.permute.xlu1 %771 }
  0xcf   : > { %v709_v11 = vsel %vm708_vm8, %v703_v9, %v705_v4  ;;  %1008 = vmatmul.msk.bf16.vlgmr.msra.gmra.mxu2 %vm271_vm1, %v636_v63  ;;  %v786_v12 = vsel %vm275_vm0, %v772_v10, 0 }
  0xd0   : > { %v715_v13 = vsel %vm275_vm0, %v709_v11, 0  ;;  %821 = vmatpush.bf16.msra.mxu2 %v786_v12 }
  0xd1   : > { %730 = vmatpush.bf16.msrb.mxu1 %v715_v13 }
  0xd4   : > { %1006 = vmatmul.msk.bf16.vlgmr.msra.gmra.mxu0 %vm271_vm1, %v571_v46  ;;  %1007 = vmatmul.msk.bf16.vlgmr.msra.gmra.mxu1 %vm271_vm1, %v571_v46 }
  0xd6   : > { %v770_v14 = vpop.permute.xlu1 %769  ;;  %v768_v15 = vpop.permute.xlu0 %767 }
  0xd7   : > { %v775_v16 = vsel %vm773_vm9, %v770_v14, %v772_v10  ;;  %v774_v17 = vsel %vm773_vm9, %v768_v15, %v770_v14 }
  0xd8   : > { %v783_v18 = vsel %vm275_vm0, %v775_v16, 0  ;;  %v780_v19 = vsel %vm275_vm0, %v774_v17, 0 }
  0xd9   : > { %808 = vmatpush.bf16.msra.mxu1 %v783_v18  ;;  %795 = vmatpush.bf16.msra.mxu0 %v780_v19 }
  0xdd   : > { %1013 = vmatmul.msk.bf16.vlgmr.msrb.gmra.mxu3 %vm271_vm1, %v701_v20 }
  0xdf   : > { %1012 = vmatmul.msk.bf16.vlgmr.msrb.gmra.mxu2 %vm271_vm1, %v701_v20 }
  0xe4   : > { %1010 = vmatmul.msk.bf16.vlgmr.msrb.gmra.mxu0 %vm271_vm1, %v636_v63  ;;  %1011 = vmatmul.msk.bf16.vlgmr.msrb.gmra.mxu1 %vm271_vm1, %v701_v20 }
  0xef   : > { %1016 = vmatmul.msk.bf16.vlgmr.msra.gmra.mxu2 %vm271_vm1, %v766_v21 }
  0xf4   : > { %1014 = vmatmul.msk.bf16.vlgmr.msra.gmra.mxu0 %vm271_vm1, %v766_v21  ;;  %1015 = vmatmul.msk.bf16.vlgmr.msra.gmra.mxu1 %vm271_vm1, %v766_v21  ;;  %vm913_vm1 = vcmask 257024  }
 0x111   : > { %v294_v24 = vpop.f32.mrf.mxu0  ;;  %v307_v25 = vpop.f32.mrf.mxu1 }
 0x112   : > { %v346_v26 = vadd.f32 %v345_v22, %v294_v24  ;;  %v320_v27 = vpop.f32.mrf.mxu2  ;;  %v830_v22 = vld [vmem:[%s1234_s3] sm:$0x7] }
 0x119   : > { %v296_v28 = vpop.f32.mrf.mxu0  ;;  %v309_v29 = vpop.f32.mrf.mxu1 }
 0x11a   : > { %v322_v30 = vpop.f32.mrf.mxu2  ;;  %v833_v28 = vperm.slane %v830_v22, 1 }
 0x120   : > { %v420_v31 = vpop.f32.mrf.mxu3 }
 0x121   : > { %v358_v32 = vpop.f32.mrf.mxu0  ;;  %v371_v33 = vpop.f32.mrf.mxu1 }
 0x122   : > { %v359_v34 = vadd.f32 %v358_v32, %v307_v25  ;;  %v372_v35 = vadd.f32 %v371_v33, %v320_v27  ;;  %v407_v36 = vpop.f32.mrf.mxu2  ;;  %v832_v27 = vperm.slane %v830_v22, 0  ;;  %v834_v32 = vperm.slane %v830_v22, 2 }
 0x123   : > { %v437_v37 = vadd.f32 %v407_v36, %v346_v26 }
 0x124   : > { %v438_v38 = vadd.f32 %v420_v31, %v359_v34 }
 0x128   : > { %v422_v39 = vpop.f32.mrf.mxu3 }
 0x129   : > { %v360_v40 = vpop.f32.mrf.mxu0  ;;  %v373_v41 = vpop.f32.mrf.mxu1 }
 0x12a   : > { %v409_v42 = vpop.f32.mrf.mxu2 }
 0x130   : > { %v498_v43 = vpop.f32.mrf.mxu3 }
 0x131   : > { %v433_v44 = vpop.f32.mrf.mxu0  ;;  %v472_v45 = vpop.f32.mrf.mxu1 }
 0x132   : > { %v485_v46 = vpop.f32.mrf.mxu2  ;;  %v439_v7 = vadd.f32 %v433_v44, %v372_v35  ;;  %v502_v8 = vadd.f32 %v472_v45, %v437_v37 }
 0x133   : > { %v503_v9 = vadd.f32 %v485_v46, %v438_v38  ;;  %v877_v46 = vld [vmem:[%s1233_s2] sm:$0xff] }
 0x134   : > { %v504_v10 = vadd.f32 %v498_v43, %v439_v7 }
 0x138   : > { %v500_v47 = vpop.f32.mrf.mxu3 }
 0x139   : > { %v435_v48 = vpop.f32.mrf.mxu0  ;;  %v474_v49 = vpop.f32.mrf.mxu1  ;;  %v1075_v47 = vmov 0  }
 0x13a   : > { %v487_v50 = vpop.f32.mrf.mxu2  ;;  %1046 = vset.pattern.permute.xlu1 %v1075_v47  ;;  %v1076_v48 = vmov 1  }
 0x13b   : > { %1048 = vset.pattern.permute.xlu0 %v1076_v48  ;;  %880 = vperm.xlu1 %1046, %v877_v46  }
 0x140   : > { %v602_v51 = vpop.f32.mrf.mxu3 }
 0x141   : > { %v537_v52 = vpop.f32.mrf.mxu0  ;;  %v550_v53 = vpop.f32.mrf.mxu1 }
 0x142   : > { %v563_v54 = vpop.f32.mrf.mxu2  ;;  %v567_v12 = vadd.f32 %v537_v52, %v502_v8  ;;  %v568_v13 = vadd.f32 %v550_v53, %v503_v9  ;;  %v893_v9 = vld [vmem:[%s239_s25] sm:$0xff] }
 0x143   : > { %v569_v14 = vadd.f32 %v563_v54, %v504_v10  ;;  %1047 = vset.pattern.permute.xlu1 %v1076_v48 }
 0x144   : > { %v632_v20 = vadd.f32 %v602_v51, %v567_v12  ;;  %887 = vperm.xlu1 %1047, %v877_v46  }
 0x148   : > { %v604_v55 = vpop.f32.mrf.mxu3 }
 0x149   : > { %v539_v56 = vpop.f32.mrf.mxu0  ;;  %v552_v57 = vpop.f32.mrf.mxu1 }
 0x14a   : > { %v565_v58 = vpop.f32.mrf.mxu2 }
 0x150   : > { %v680_v59 = vpop.f32.mrf.mxu3 }
 0x151   : > { %v615_v60 = vpop.f32.mrf.mxu0  ;;  %v628_v61 = vpop.f32.mrf.mxu1 }
 0x152   : > { %v667_v62 = vpop.f32.mrf.mxu2  ;;  %v633_v17 = vadd.f32 %v615_v60, %v568_v13  ;;  %v634_v19 = vadd.f32 %v628_v61, %v569_v14 }
 0x153   : > { %v697_v23 = vadd.f32 %v667_v62, %v632_v20 }
 0x154   : > { %v698_v24 = vadd.f32 %v680_v59, %v633_v17 }
 0x158   : > { %v682_v63 = vpop.f32.mrf.mxu3 }
 0x159   : > { %v617_v0 = vpop.f32.mrf.mxu0  ;;  %v630_v1 = vpop.f32.mrf.mxu1 }
 0x15a   : > { %v669_v2 = vpop.f32.mrf.mxu2 }
 0x160   : > { %v758_v3 = vpop.f32.mrf.mxu3 }
 0x161   : > { %v693_v4 = vpop.f32.mrf.mxu0  ;;  %v732_v5 = vpop.f32.mrf.mxu1 }
 0x162   : > { %v745_v6 = vpop.f32.mrf.mxu2  ;;  %v699_v21 = vadd.f32 %v693_v4, %v634_v19  ;;  %v762_v25 = vadd.f32 %v732_v5, %v697_v23 }
 0x163   : > { %v763_v26 = vadd.f32 %v745_v6, %v698_v24 }
 0x164   : > { %v764_v31 = vadd.f32 %v758_v3, %v699_v21 }
 0x168   : > { %v760_v11 = vpop.f32.mrf.mxu3 }
 0x169   : > { %v695_v15 = vpop.f32.mrf.mxu0  ;;  %v734_v16 = vpop.f32.mrf.mxu1  ;;  %v894_v11 = vld [vmem:[%s239_s25 + $0x8] sm:$0xf] }
 0x16a   : > { %v747_v18 = vpop.f32.mrf.mxu2  ;;  %v895_v15 = vunpack.c.l.bf16 %v893_v9  ;;  %v896_v16 = vunpack.c.h.bf16 %v893_v9  ;;  %v897_v21 = vunpack.c.l.bf16 %v894_v11 }
 0x171   : > { %v797_v29 = vpop.f32.mrf.mxu0  ;;  %v810_v30 = vpop.f32.mrf.mxu1 }
 0x172   : > { %v827_v33 = vadd.f32 %v797_v29, %v762_v25  ;;  %v828_v34 = vadd.f32 %v810_v30, %v763_v26  ;;  %v823_v35 = vpop.f32.mrf.mxu2 }
 0x173   : > { %v829_v36 = vadd.f32 %v823_v35, %v764_v31 }
 0x174   : > { %v838_v37 = vmul.f32 %v832_v27, %v827_v33  ;;  %v839_v38 = vmul.f32 %v833_v28, %v828_v34 }
 0x175   : > { %v840_v39 = vmul.f32 %v834_v32, %v829_v36 }
 0x176   : > { %v841_v40 = vadd.f32 %v839_v38, %v838_v37 }
 0x177   : > { %v843_v41 = vsel %vm842_vm10, %v840_v39, 0.0 }
 0x178   : > { %v844_v42 = vadd.f32 %v843_v41, %v841_v40 }
 0x179   : > { %v799_v43 = vpop.f32.mrf.mxu0  ;;  %v812_v44 = vpop.f32.mrf.mxu1 }
 0x17a   : > { %v825_v45 = vpop.f32.mrf.mxu2  ;;  %845 = vadd.xlane.f32.xlu2 %v844_v42 }
 0x1ad   : > { %v881_v5 = vpop.permute.xlu1 %880 }
 0x1b6   : > { %v888_v17 = vpop.permute.xlu1 %887 }
 0x1ed   : > { %v846_v49 = vpop.xlane.xlu2 %845 }
 0x1ee   : > { %v847_v50 = vmul.f32 0.00390625, %v846_v49 }
 0x1f0   : > { %v848_v51 = vsub.f32 %v827_v33, %v847_v50  ;;  %v849_v52 = vsub.f32 %v828_v34, %v847_v50  ;;  %v850_v53 = vsub.f32 %v829_v36, %v847_v50 }
 0x1f2   : > { %v851_v54 = vmul.f32 %v848_v51, %v848_v51  ;;  %v852_v55 = vmul.f32 %v849_v52, %v849_v52  ;;  %v853_v56 = vmul.f32 %v850_v53, %v850_v53 }
 0x1f4   : > { %v854_v57 = vmul.f32 %v851_v54, %v832_v27  ;;  %v855_v58 = vmul.f32 %v852_v55, %v833_v28  ;;  %v856_v59 = vmul.f32 %v853_v56, %v834_v32 }
 0x1f6   : > { %v857_v60 = vadd.f32 %v855_v58, %v854_v57  ;;  %v858_v61 = vsel %vm842_vm10, %v856_v59, 0.0 }
 0x1f8   : > { %v859_v62 = vadd.f32 %v858_v61, %v857_v60 }
 0x1fa   : > { %860 = vadd.xlane.f32.xlu0 %v859_v62 }
 0x26d   : > { %v861_v63 = vpop.xlane.xlu0 %860 }
 0x26e   : > { %v862_v0 = vmul.f32 0.00390625, %v861_v63 }
 0x270   : > { %v863_v1 = vadd.f32 1e-05, %v862_v0 }
 0x272   : > { %1049 = vrsqrt.f32 %v863_v1  ;;  %vm870_vm12 = vweird.f32 %v863_v1 }
 0x278   : > { %v1050_v2 = vpop.eup %1049 }
 0x279   : > { %v865_v3 = vmul.f32 %v1050_v2, %v863_v1  ;;  %vm871_vm11 = vweird.f32 %v1050_v2 }
 0x27a   : > { %vm872_vm13 = vmor %vm870_vm12, %vm871_vm11 }
 0x27b   : > { %v866_v4 = vmul.f32 %v1050_v2, %v865_v3 }
 0x27d   : > { %v867_v6 = vmul.f32 0.5, %v866_v4 }
 0x27f   : > { %v868_v7 = vsub.f32 1.5, %v867_v6 }
 0x281   : > { %v869_v8 = vmul.f32 %v1050_v2, %v868_v7 }
 0x283   : > { %v873_v10 = vsel %vm872_vm13, %v1050_v2, %v869_v8 }
 0x284   : > { %v874_v12 = vmul.f32 %v873_v10, %v848_v51  ;;  %v875_v13 = vmul.f32 %v873_v10, %v849_v52  ;;  %v876_v14 = vmul.f32 %v873_v10, %v850_v53 }
 0x286   : > { %v883_v18 = vmul.f32 %v881_v5, %v874_v12  ;;  %v884_v19 = vmul.f32 %v881_v5, %v875_v13  ;;  %v885_v20 = vmul.f32 %v881_v5, %v876_v14 }
 0x288   : > { %v890_v22 = vadd.f32 %v888_v17, %v883_v18  ;;  %v891_v23 = vadd.f32 %v888_v17, %v884_v19  ;;  %v892_v24 = vadd.f32 %v888_v17, %v885_v20 }
 0x28a   : > { %v898_v25 = vadd.f32 %v895_v15, %v890_v22  ;;  %v899_v26 = vadd.f32 %v896_v16, %v891_v23  ;;  %v900_v27 = vadd.f32 %v897_v21, %v892_v24 }
 0x28c   : > { %vm901_vm14 = vcmp.ge.f32.partialorder %v898_v25, 0.0  ;;  %vm902_vm15 = vcmp.ge.f32.partialorder %v899_v26, 0.0  ;;  %vm903_vm0 = vcmp.ge.f32.partialorder %v900_v27, 0.0  ;;  %v904_v28 = vmul.f32 0.01, %v898_v25 }
 0x28d   : > { %v905_v29 = vmul.f32 0.01, %v899_v26  ;;  %v906_v30 = vmul.f32 0.01, %v900_v27 }
 0x28e   : > { %v907_v31 = vsel %vm901_vm14, %v898_v25, %v904_v28 }
 0x28f   : > { %v908_v32 = vsel %vm902_vm15, %v899_v26, %v905_v29  ;;  %v909_v33 = vsel %vm903_vm0, %v900_v27, %v906_v30 }
 0x290   : > { %v910_v34 = vpack.c.bf16 %v908_v32, %v907_v31  ;;  %v911_v35 = vpack.c.bf16 %v909_v33, %v909_v33 }
 0x292   : > { %912 = vst [vmem:[%s244_s28] sm:$0xff] %v910_v34 }
 0x293   : > { %914 = vst.msk [vmem:[%s244_s28 + $0x8] sm:$0xf] %vm913_vm1, %v911_v35 }
 0x294 PF: > { %s15_s18 = sadd.s32 1, %s1057_s18  }
 0x295   : > { %p12_p4 = scmp.ge.s32.totalorder %s15_s18, 4  }
 0x297   :  { %14 = sbr.rel (!%p12_p4) target bundleno = 1 (0x1), region = 73 }

// kernel: residual_encoder_unet_forward.17
= control target key start
LH: loop header
LB: loop body
LE: loop exit
PB: predicated region body
PF: predicated region fallthrough
CT: control target
= control target key end

     0   :  { %s468_s12 = smov 0   ;;  %s502_s0 = inlined_call_operand.vmem [shape: bf16[2,72,64], index: 0, kind: input, shape index: {}]   ;;  %s503_s1 = inlined_call_operand.vmem [shape: bf16[16,72], index: 1, kind: input, shape index: {}]   ;;  %s504_s2 = inlined_call_operand.vmem [shape: f32[16,2], index: 2, kind: input, shape index: {}]   ;;  %s505_s3 = inlined_call_operand.vmem [shape: bf16[2,16,64], index: 3, kind: output, shape index: {}]  }
   0x1 LB: > { %s379_s13 = sadd.s32 4294967295, %s443_s12   ;;  %p383_p0 = scmp.ge.s32.totalorder %s443_s12, 1  ;;  %s443_s12 = sphi %s468_s12, %s13_s12  }
   0x2   : > { %p137_p1 = scmp.lt.s32.totalorder %s443_s12, 3 }
   0x4   : > { %p138_p2 = pnand %p383_p0, %p137_p1 }
   0x5   : > { %p161_p3 = scmp.lt.s32.totalorder (!%p138_p2), %s379_s13, 1 }
   0x6   : > { %141 = sbr.rel (%p138_p2) target bundleno = 448 (0x1c0), region = 32 }
   0xb   : > { %s507_s13 = smov (!%p161_p3, %s379_s13), 1  ;;  %vm219_vm0 = vcmask 1043456   ;;  %v415_v8 = vld [vmem:[%s503_s1] sm:$0xff]  ;;  %vm215_vm1 = vcmask 588800   ;;  %vm237_vm2 = vcmask 523264   ;;  %v445_v13 = vmov 64.0  }
   0xc   : > { %s416_s14 = smul.u32 36, %s507_s13  ;;  %431 = vrcp.f32 %v445_v13  ;;  %v289_v16 = vld [vmem:[%s504_s2] sm:$0xff]  ;;  %v446_v17 = vmov 1   ;;  %v447_v29 = vmov 0   ;;  %v290_v33 = vld [vmem:[%s504_s2 + $0x8] sm:$0xff]  ;;  %s410_s24 = sshll.u32 %s507_s13, 3 }
   0xd   : > { %429 = vset.pattern.permute.xlu0 %v446_v17  ;;  %430 = vset.pattern.permute.xlu1 %v446_v17  ;;  %s170_s27 = scalar_lea.vmem %s505_s3, %s410_s24  ;;  %vm321_vm11 = vcmask 519168  }
   0xe   : > { %s165_s17 = scalar_lea.vmem %s502_s0, %s416_s14  ;;  %428 = vset.pattern.permute.xlu2 %v447_v29 }
   0xf   : > { %v180_v0 = vld [vmem:[%s165_s17 + $0x20] sm:$0xf]  ;;  %v414_v4 = vld [vmem:[%s165_s17 + $0x18] sm:$0xff]  ;;  %v413_v5 = vld [vmem:[%s165_s17 + $0x10] sm:$0xff]  ;;  %293 = vperm.xlu2 %428, %v289_v16  }
  0x10   : > { %v205_v1 = vunpack.c.l.b16 %v180_v0  ;;  %v412_v6 = vld [vmem:[%s165_s17 + $0x8] sm:$0xff]  ;;  %v411_v7 = vld [vmem:[%s165_s17] sm:$0xff] }
  0x12   : > { %v210_v2 = vpack.c.b16 %v205_v1, %v205_v1  ;;  %v432_v14 = vpop.eup %431 }
  0x13   : > { %v245_v15 = vmul.f32 64.0, %v432_v14  ;;  %vm249_vm3 = vweird.f32 %v432_v14 }
  0x14   : > { %v221_v3 = vsel %vm219_vm0, %v210_v2, 0 }
  0x15   : > { %226 = vmatpush.bf16.msra.mxu0 %v221_v3  ;;  %v246_v18 = vsub.f32 1.0, %v245_v15 }
  0x17   : > { %v247_v19 = vmul.f32 %v432_v14, %v246_v18  ;;  %298 = vperm.xlu2 %428, %v290_v33  }
  0x19   : > { %227 = vmatpush.bf16.msra.mxu0 %v414_v4  ;;  %v248_v20 = vadd.f32 %v432_v14, %v247_v19 }
  0x1b   : > { %v250_v21 = vsel %vm249_vm3, %v432_v14, %v248_v20 }
  0x1d   : > { %228 = vmatpush.bf16.msra.mxu0 %v413_v5 }
  0x21   : > { %229 = vmatpush.bf16.msra.mxu0 %v412_v6 }
  0x25   : > { %230 = vmatpush.bf16.msra.mxu0 %v411_v7 }
  0x28   : > { %407 = vmatmul.msk.bf16.vlgmr.msra.gmra.mxu0 %vm215_vm1, %v415_v8 }
  0x69   : > { %v294_v49 = vpop.permute.xlu2 %293 }
  0x71   : > { %v299_v62 = vpop.permute.xlu2 %298 }
  0xa5   : > { %v232_v9 = vpop.f32.mrf.mxu0 }
  0xa6   : > { %v238_v10 = vsel %vm237_vm2, %v232_v9, 0.0 }
  0xa7   : > { %239 = vadd.xlane.f32.xlu0 %v238_v10 }
  0xad   : > { %v234_v11 = vpop.f32.mrf.mxu0 }
  0xae   : > { %v241_v12 = vsel %vm237_vm2, %v234_v11, 0.0 }
  0xaf   : > { %242 = vadd.xlane.f32.xlu0 %v241_v12 }
  0xc3   : > { %304 = vperm.xlu0 %429, %v289_v16  }
 0x11a   : > { %v240_v22 = vpop.xlane.xlu0 %239 }
 0x11b   : > { %v251_v23 = vmul.f32 %v250_v21, %v240_v22 }
 0x11d   : > { %v253_v24 = vsub.f32 %v232_v9, %v251_v23 }
 0x11f   : > { %v255_v25 = vmul.f32 %v253_v24, %v253_v24 }
 0x121   : > { %v257_v26 = vsel %vm237_vm2, %v255_v25, 0.0 }
 0x122   : > { %258 = vadd.xlane.f32.xlu1 %v257_v26  ;;  %v243_v27 = vpop.xlane.xlu0 %242 }
 0x123   : > { %v252_v28 = vmul.f32 %v250_v21, %v243_v27 }
 0x125   : > { %v254_v30 = vsub.f32 %v234_v11, %v252_v28 }
 0x127   : > { %v256_v31 = vmul.f32 %v254_v30, %v254_v30 }
 0x129   : > { %v260_v32 = vsel %vm237_vm2, %v256_v31, 0.0 }
 0x12a   : > { %261 = vadd.xlane.f32.xlu1 %v260_v32 }
 0x135   : > { %v305_v53 = vpop.permute.xlu0 %304 }
 0x143   : > { %308 = vperm.xlu1 %430, %v290_v33  }
 0x195   : > { %v259_v34 = vpop.xlane.xlu1 %258 }
 0x196   : > { %v263_v35 = vmul.f32 %v259_v34, %v250_v21 }
 0x198   : > { %v265_v36 = vadd.f32 1e-05, %v263_v35 }
 0x19a   : > { %433 = vrsqrt.f32 %v265_v36  ;;  %vm273_vm5 = vweird.f32 %v265_v36 }
 0x19d   : > { %v262_v37 = vpop.xlane.xlu1 %261 }
 0x19e   : > { %v264_v38 = vmul.f32 %v262_v37, %v250_v21 }
 0x1a0   : > { %v434_v39 = vpop.eup %433  ;;  %v266_v40 = vadd.f32 1e-05, %v264_v38 }
 0x1a1   : > { %v268_v41 = vmul.f32 %v434_v39, %v265_v36  ;;  %vm274_vm4 = vweird.f32 %v434_v39 }
 0x1a2   : > { %435 = vrsqrt.f32 %v266_v40  ;;  %vm275_vm6 = vmor %vm273_vm5, %vm274_vm4  ;;  %vm283_vm8 = vweird.f32 %v266_v40 }
 0x1a3   : > { %v269_v42 = vmul.f32 %v434_v39, %v268_v41 }
 0x1a5   : > { %v270_v43 = vmul.f32 0.5, %v269_v42 }
 0x1a7   : > { %v271_v44 = vsub.f32 1.5, %v270_v43 }
 0x1a8   : > { %v436_v45 = vpop.eup %435 }
 0x1a9   : > { %v278_v46 = vmul.f32 %v436_v45, %v266_v40  ;;  %v272_v47 = vmul.f32 %v434_v39, %v271_v44  ;;  %vm284_vm7 = vweird.f32 %v436_v45 }
 0x1aa   : > { %vm285_vm9 = vmor %vm283_vm8, %vm284_vm7 }
 0x1ab   : > { %v279_v48 = vmul.f32 %v436_v45, %v278_v46  ;;  %v276_v50 = vsel %vm275_vm6, %v434_v39, %v272_v47 }
 0x1ac   : > { %v287_v51 = vmul.f32 %v276_v50, %v253_v24 }
 0x1ad   : > { %v280_v52 = vmul.f32 0.5, %v279_v48 }
 0x1ae   : > { %v301_v54 = vmul.f32 %v294_v49, %v287_v51 }
 0x1af   : > { %v281_v55 = vsub.f32 1.5, %v280_v52 }
 0x1b0   : > { %v311_v56 = vadd.f32 %v305_v53, %v301_v54 }
 0x1b1   : > { %v282_v57 = vmul.f32 %v436_v45, %v281_v55 }
 0x1b2   : > { %vm313_vm10 = vcmp.ge.f32.partialorder %v311_v56, 0.0  ;;  %v315_v58 = vmul.f32 0.01, %v311_v56 }
 0x1b3   : > { %v286_v59 = vsel %vm285_vm9, %v436_v45, %v282_v57 }
 0x1b4   : > { %v288_v60 = vmul.f32 %v286_v59, %v254_v30  ;;  %v317_v61 = vsel %vm313_vm10, %v311_v56, %v315_v58 }
 0x1b5   : > { %v319_v63 = vpack.c.bf16 %v317_v61, %v317_v61  ;;  %v309_v0 = vpop.permute.xlu1 %308 }
 0x1b6   : > { %v302_v1 = vmul.f32 %v299_v62, %v288_v60 }
 0x1b7   : > { %322 = vst.msk [vmem:[%s170_s27] sm:$0xf] %vm321_vm11, %v319_v63 }
 0x1b8   : > { %v312_v2 = vadd.f32 %v309_v0, %v302_v1 }
 0x1ba   : > { %vm314_vm12 = vcmp.ge.f32.partialorder %v312_v2, 0.0  ;;  %v316_v3 = vmul.f32 0.01, %v312_v2 }
 0x1bc   : > { %v318_v4 = vsel %vm314_vm12, %v312_v2, %v316_v3 }
 0x1bd   : > { %v320_v5 = vpack.c.bf16 %v318_v4, %v318_v4 }
 0x1bf   : > { %323 = vst.msk [vmem:[%s170_s27 + $0x4] sm:$0xf] %vm321_vm11, %v320_v5 }
 0x1c0 PF: > { %s13_s12 = sadd.s32 1, %s443_s12  }
 0x1c1   : > { %p10_p4 = scmp.ge.s32.totalorder %s13_s12, 4  }
 0x1c3   :  { %12 = sbr.rel (!%p10_p4) target bundleno = 1 (0x1), region = 62 }

// kernel: residual_encoder_unet_forward.18
= control target key start
LH: loop header
LB: loop body
LE: loop exit
PB: predicated region body
PF: predicated region fallthrough
CT: control target
= control target key end

     0   :  { %s429_s12 = smov 0   ;;  %s463_s0 = inlined_call_operand.vmem [shape: bf16[2,32,64], index: 0, kind: input, shape index: {}]   ;;  %s464_s1 = inlined_call_operand.vmem [shape: bf16[16,32], index: 1, kind: input, shape index: {}]   ;;  %s465_s2 = inlined_call_operand.vmem [shape: f32[16,2], index: 2, kind: input, shape index: {}]   ;;  %s466_s3 = inlined_call_operand.vmem [shape: bf16[2,16,64], index: 3, kind: output, shape index: {}]  }
   0x1 LB: > { %s349_s13 = sadd.s32 4294967295, %s404_s12   ;;  %p353_p0 = scmp.ge.s32.totalorder %s404_s12, 1  ;;  %s404_s12 = sphi %s429_s12, %s13_s12  }
   0x2   : > { %p137_p1 = scmp.lt.s32.totalorder %s404_s12, 3 }
   0x4   : > { %p138_p2 = pnand %p353_p0, %p137_p1 }
   0x5   : > { %p161_p3 = scmp.lt.s32.totalorder (!%p138_p2), %s349_s13, 1 }
   0x6   : > { %141 = sbr.rel (%p138_p2) target bundleno = 427 (0x1ab), region = 32 }
   0xb   : > { %s468_s13 = smov (!%p161_p3, %s349_s13), 1  ;;  %v377_v2 = vld [vmem:[%s464_s1] sm:$0xff]  ;;  %vm195_vm0 = vcmask 261120   ;;  %vm213_vm1 = vcmask 523264   ;;  %v406_v7 = vmov 64.0   ;;  %v407_v11 = vmov 1  }
   0xc   : > { %s373_s14 = sshll.u32 %s468_s13, 4  ;;  %392 = vrcp.f32 %v406_v7  ;;  %v265_v10 = vld [vmem:[%s465_s2] sm:$0xff]  ;;  %390 = vset.pattern.permute.xlu0 %v407_v11  ;;  %391 = vset.pattern.permute.xlu1 %v407_v11  ;;  %v408_v23 = vmov 0   ;;  %v266_v27 = vld [vmem:[%s465_s2 + $0x8] sm:$0xff]  ;;  %s374_s24 = sshll.u32 %s468_s13, 3  ;;  %vm291_vm8 = vcmask 519168  }
   0xd   : > { %s165_s17 = scalar_lea.vmem %s463_s0, %s373_s14  ;;  %389 = vset.pattern.permute.xlu2 %v408_v23  ;;  %s170_s27 = scalar_lea.vmem %s466_s3, %s374_s24 }
   0xe   : > { %v376_v0 = vld [vmem:[%s165_s17 + $0x8] sm:$0xff]  ;;  %v375_v1 = vld [vmem:[%s165_s17] sm:$0xff]  ;;  %269 = vperm.xlu2 %389, %v265_v10  }
   0xf   : > { %205 = vmatpush.bf16.msra.mxu0 %v376_v0 }
  0x12   : > { %v393_v8 = vpop.eup %392 }
  0x13   : > { %206 = vmatpush.bf16.msra.mxu0 %v375_v1  ;;  %v221_v9 = vmul.f32 64.0, %v393_v8  ;;  %vm225_vm2 = vweird.f32 %v393_v8 }
  0x15   : > { %v222_v12 = vsub.f32 1.0, %v221_v9 }
  0x16   : > { %370 = vmatmul.msk.bf16.vlgmr.msra.gmra.mxu0 %vm195_vm0, %v377_v2  ;;  %274 = vperm.xlu2 %389, %v266_v27  }
  0x17   : > { %v223_v13 = vmul.f32 %v393_v8, %v222_v12 }
  0x19   : > { %v224_v14 = vadd.f32 %v393_v8, %v223_v13 }
  0x1b   : > { %v226_v15 = vsel %vm225_vm2, %v393_v8, %v224_v14 }
  0x68   : > { %v270_v43 = vpop.permute.xlu2 %269 }
  0x70   : > { %v275_v55 = vpop.permute.xlu2 %274 }
  0x93   : > { %v208_v3 = vpop.f32.mrf.mxu0 }
  0x94   : > { %v214_v4 = vsel %vm213_vm1, %v208_v3, 0.0 }
  0x95   : > { %215 = vadd.xlane.f32.xlu0 %v214_v4 }
  0x9b   : > { %v210_v5 = vpop.f32.mrf.mxu0 }
  0x9c   : > { %v217_v6 = vsel %vm213_vm1, %v210_v5, 0.0 }
  0x9d   : > { %218 = vadd.xlane.f32.xlu0 %v217_v6 }
  0xb1   : > { %280 = vperm.xlu0 %390, %v265_v10  }
 0x108   : > { %v216_v16 = vpop.xlane.xlu0 %215 }
 0x109   : > { %v227_v17 = vmul.f32 %v226_v15, %v216_v16 }
 0x10b   : > { %v229_v18 = vsub.f32 %v208_v3, %v227_v17 }
 0x10d   : > { %v231_v19 = vmul.f32 %v229_v18, %v229_v18 }
 0x10f   : > { %v233_v20 = vsel %vm213_vm1, %v231_v19, 0.0 }
 0x110   : > { %234 = vadd.xlane.f32.xlu1 %v233_v20  ;;  %v219_v21 = vpop.xlane.xlu0 %218 }
 0x111   : > { %v228_v22 = vmul.f32 %v226_v15, %v219_v21 }
 0x113   : > { %v230_v24 = vsub.f32 %v210_v5, %v228_v22 }
 0x115   : > { %v232_v25 = vmul.f32 %v230_v24, %v230_v24 }
 0x117   : > { %v236_v26 = vsel %vm213_vm1, %v232_v25, 0.0 }
 0x118   : > { %237 = vadd.xlane.f32.xlu1 %v236_v26 }
 0x123   : > { %v281_v47 = vpop.permute.xlu0 %280 }
 0x131   : > { %284 = vperm.xlu1 %391, %v266_v27  }
 0x183   : > { %v235_v28 = vpop.xlane.xlu1 %234 }
 0x184   : > { %v239_v29 = vmul.f32 %v235_v28, %v226_v15 }
 0x186   : > { %v241_v30 = vadd.f32 1e-05, %v239_v29 }
 0x188   : > { %394 = vrsqrt.f32 %v241_v30  ;;  %vm249_vm4 = vweird.f32 %v241_v30 }
 0x18b   : > { %v238_v31 = vpop.xlane.xlu1 %237 }
 0x18c   : > { %v240_v32 = vmul.f32 %v238_v31, %v226_v15 }
 0x18e   : > { %v395_v33 = vpop.eup %394  ;;  %v242_v34 = vadd.f32 1e-05, %v240_v32 }
 0x18f   : > { %v244_v35 = vmul.f32 %v395_v33, %v241_v30  ;;  %vm250_vm3 = vweird.f32 %v395_v33 }
 0x190   : > { %396 = vrsqrt.f32 %v242_v34  ;;  %vm251_vm5 = vmor %vm249_vm4, %vm250_vm3  ;;  %vm259_vm7 = vweird.f32 %v242_v34 }
 0x191   : > { %v245_v36 = vmul.f32 %v395_v33, %v244_v35 }
 0x193   : > { %v246_v37 = vmul.f32 0.5, %v245_v36 }
 0x195   : > { %v247_v38 = vsub.f32 1.5, %v246_v37 }
 0x196   : > { %v397_v39 = vpop.eup %396 }
 0x197   : > { %v254_v40 = vmul.f32 %v397_v39, %v242_v34  ;;  %v248_v41 = vmul.f32 %v395_v33, %v247_v38  ;;  %vm260_vm6 = vweird.f32 %v397_v39 }
 0x198   : > { %vm261_vm9 = vmor %vm259_vm7, %vm260_vm6 }
 0x199   : > { %v255_v42 = vmul.f32 %v397_v39, %v254_v40  ;;  %v252_v44 = vsel %vm251_vm5, %v395_v33, %v248_v41 }
 0x19a   : > { %v263_v45 = vmul.f32 %v252_v44, %v229_v18 }
 0x19b   : > { %v256_v46 = vmul.f32 0.5, %v255_v42 }
 0x19c   : > { %v277_v48 = vmul.f32 %v270_v43, %v263_v45 }
 0x19d   : > { %v257_v49 = vsub.f32 1.5, %v256_v46 }
 0x19e   : > { %v287_v50 = vadd.f32 %v281_v47, %v277_v48 }
 0x19f   : > { %v258_v51 = vmul.f32 %v397_v39, %v257_v49 }
 0x1a0   : > { %v289_v52 = vpack.c.bf16 %v287_v50, %v287_v50 }
 0x1a1   : > { %v262_v53 = vsel %vm261_vm9, %v397_v39, %v258_v51 }
 0x1a2   : > { %v264_v54 = vmul.f32 %v262_v53, %v230_v24  ;;  %292 = vst.msk [vmem:[%s170_s27] sm:$0xf] %vm291_vm8, %v289_v52 }
 0x1a3   : > { %v285_v56 = vpop.permute.xlu1 %284 }
 0x1a4   : > { %v278_v57 = vmul.f32 %v275_v55, %v264_v54 }
 0x1a6   : > { %v288_v58 = vadd.f32 %v285_v56, %v278_v57 }
 0x1a8   : > { %v290_v59 = vpack.c.bf16 %v288_v58, %v288_v58 }
 0x1aa   : > { %293 = vst.msk [vmem:[%s170_s27 + $0x4] sm:$0xf] %vm291_vm8, %v290_v59 }
 0x1ab PF: > { %s13_s12 = sadd.s32 1, %s404_s12  }
 0x1ac   : > { %p10_p4 = scmp.ge.s32.totalorder %s13_s12, 4  }
 0x1ae   :  { %12 = sbr.rel (!%p10_p4) target bundleno = 1 (0x1), region = 62 }

// kernel: residual_encoder_unet_forward.19
= control target key start
LH: loop header
LB: loop body
LE: loop exit
PB: predicated region body
PF: predicated region fallthrough
CT: control target
= control target key end

     0   :  { %s765_s18 = smov 0   ;;  %s824_s0 = inlined_call_operand.vmem [shape: bf16[2,16,102], index: 0, kind: input, shape index: {}]   ;;  %s825_s1 = inlined_call_operand.vmem [shape: bf16[16,144], index: 1, kind: input, shape index: {}]   ;;  %s826_s2 = inlined_call_operand.vmem [shape: f32[16,2], index: 2, kind: input, shape index: {}]   ;;  %s827_s3 = inlined_call_operand.vmem [shape: f32[1,80], index: 3, kind: input, shape index: {}]   ;;  %s828_s4 = inlined_call_operand.vmem [shape: bf16[2,16,80], index: 4, kind: input, shape index: {}]   ;;  %s829_s5 = inlined_call_operand.vmem [shape: bf16[2,16,80], index: 5, kind: output, shape index: {}]  }
   0x1 LB: > { %s631_s19 = sadd.s32 4294967295, %s716_s18   ;;  %p635_p0 = scmp.ge.s32.totalorder %s716_s18, 1  ;;  %s716_s18 = sphi %s765_s18, %s15_s18  }
   0x2   : > { %p197_p1 = scmp.lt.s32.totalorder %s716_s18, 3 }
   0x4   : > { %p198_p2 = pnand %p635_p0, %p197_p1 }
   0x5   : > { %p230_p3 = scmp.lt.s32.totalorder (!%p198_p2), %s631_s19, 1  ;;  %s718_s28 = smov (!%p198_p2), 96  }
   0x6   : > { %201 = sbr.rel (%p198_p2) target bundleno = 586 (0x24a), region = 40  ;;  %s719_s29 = smov (!%p198_p2), 126  }
   0x7   : > { %s720_s30 = smov (!%p198_p2), 127   ;;  %s721_s6 = smov (!%p198_p2), 80  }
   0x8   : > { %s722_s7 = smov (!%p198_p2), 118   ;;  %s723_s8 = smov (!%p198_p2), 112  }
   0x9   : > { %s724_s9 = smov (!%p198_p2), 108   ;;  %s725_s10 = smov (!%p198_p2), 64  }
   0xa   : > { %s726_s11 = smov (!%p198_p2), 117   ;;  %s727_s12 = smov (!%p198_p2), 116  }
   0xb   : > { %v644_v0 = vld [vmem:[%s825_s1] sm:$0xf]  ;;  %v670_v1 = vld [vmem:[%s825_s1 + $0x4] sm:$0xf0]  ;;  %s831_s19 = smov (!%p230_p3, %s631_s19), 1  ;;  %s728_s13 = smov 32  }
   0xc   : > { %s779_s24 = sshll.u32 %s831_s19, 3  ;;  %v645_v2 = vor.u32 %v670_v1, %v644_v0  ;;  %s729_s14 = smov 107   ;;  %vm265_vm0 = vcmask 130048   ;;  %v669_v19 = vld [vmem:[%s825_s1 + $0x4] sm:$0xf]  ;;  %vm476_vm1 = vcmask 654336  }
   0xd   : > { %s234_s27 = scalar_lea.vmem %s824_s0, %s779_s24  ;;  %s730_s15 = smov 106   ;;  %v658_v20 = vld [vmem:[%s825_s1 + $0x8] sm:$0xf0]  ;;  %v705_v46 = vld [vmem:[%s827_s3] ss:$0 sm:$0xff]  ;;  %v733_v63 = vmov 0  }
   0xe   : > { %v668_v3 = vld [vmem:[%s234_s27] sm:$0xff]  ;;  %301 = vrot.lane.b32.xlu2 %v645_v2, %s718_s28  ;;  %s731_s16 = smov 48   ;;  %s732_s17 = smov 16   ;;  %v661_v21 = vor.u32 %v669_v19, %v658_v20  ;;  %v524_v62 = vld [vmem:[%s826_s2 + $0x8] sm:$0xff]  ;;  %700 = vset.pattern.permute.xlu0 %v733_v63  ;;  %v734_v0 = vmov 1   ;;  %vm561_vm9 = vcmask 650240  }
   0xf   : > { %303 = vrot.lane.b32.xlu1 %v668_v3, %s719_s29  ;;  %262 = vrot.lane.b32.xlu0 %v668_v3, %s720_s30  ;;  %v523_v61 = vld [vmem:[%s826_s2] sm:$0xff] }
  0x10   : > { %294 = vmatpush.bf16.msra.mxu1 %v668_v3  ;;  %701 = vset.pattern.permute.xlu1 %v733_v63 }
  0x11   : > { %702 = vset.pattern.permute.xlu2 %v734_v0 }
  0x13   : > { %651 = vmatmul.msk.bf16.vlgmr.msra.gmra.mxu1 %vm265_vm0, %v645_v2 }
  0x16   : > { %325 = vrot.lane.b32.xlu2 %v645_v2, %s721_s6 }
  0x17   : > { %327 = vrot.lane.b32.xlu1 %v668_v3, %s722_s7  ;;  %255 = vrot.lane.b32.xlu0 %v645_v2, %s723_s8  ;;  %s239_s7 = scalar_lea.vmem %s828_s4, %s779_s24 }
  0x1e   : > { %399 = vrot.lane.b32.xlu2 %v668_v3, %s724_s9 }
  0x1f   : > { %349 = vrot.lane.b32.xlu1 %v645_v2, %s725_s10  ;;  %351 = vrot.lane.b32.xlu0 %v668_v3, %s726_s11  ;;  %s244_s10 = scalar_lea.vmem %s829_s5, %s779_s24 }
  0x26   : > { %375 = vrot.lane.b32.xlu2 %v668_v3, %s727_s12 }
  0x27   : > { %397 = vrot.lane.b32.xlu1 %v645_v2, %s728_s13  ;;  %423 = vrot.lane.b32.xlu0 %v668_v3, %s729_s14 }
  0x2e   : > { %448 = vrot.lane.b32.xlu2 %v668_v3, %s730_s15 }
  0x2f   : > { %373 = vrot.lane.b32.xlu1 %v645_v2, %s731_s16  ;;  %421 = vrot.lane.b32.xlu0 %v645_v2, %s732_s17 }
  0x68   : > { %v302_v4 = vpop.permute.xlu2 %301 }
  0x70   : > { %v326_v5 = vpop.permute.xlu2 %325 }
  0x78   : > { %v400_v6 = vpop.permute.xlu2 %399 }
  0x80   : > { %v376_v7 = vpop.permute.xlu2 %375 }
  0x81   : > { %388 = vmatpush.bf16.msrb.mxu1 %v376_v7  ;;  %v304_v8 = vpop.permute.xlu1 %303  ;;  %v263_v9 = vpop.permute.xlu0 %262 }
  0x82   : > { %276 = vmatpush.bf16.msra.mxu0 %v263_v9  ;;  %316 = vmatpush.bf16.msra.mxu2 %v304_v8 }
  0x85   : > { %652 = vmatmul.msk.bf16.vlgmr.msra.gmra.mxu2 %vm265_vm0, %v302_v4 }
  0x86   : > { %412 = vmatpush.bf16.msrb.mxu2 %v400_v6 }
  0x88   : > { %v449_v12 = vpop.permute.xlu2 %448 }
  0x89   : > { %v328_v10 = vpop.permute.xlu1 %327  ;;  %v256_v11 = vpop.permute.xlu0 %255 }
  0x8a   : > { %650 = vmatmul.msk.bf16.vlgmr.msra.gmra.mxu0 %vm265_vm0, %v256_v11  ;;  %340 = vmatpush.bf16.msra.mxu3 %v328_v10 }
  0x8d   : > { %653 = vmatmul.msk.bf16.vlgmr.msra.gmra.mxu3 %vm265_vm0, %v326_v5 }
  0x90   : > { %v296_v23 = vpop.f32.mrf.mxu1 }
  0x91   : > { %v350_v13 = vpop.permute.xlu1 %349  ;;  %v352_v14 = vpop.permute.xlu0 %351 }
  0x92   : > { %364 = vmatpush.bf16.msrb.mxu0 %v352_v14 }
  0x96   : > { %461 = vmatpush.bf16.msra.mxu0 %v449_v12 }
  0x98   : > { %v298_v28 = vpop.f32.mrf.mxu1 }
  0x99   : > { %v398_v15 = vpop.permute.xlu1 %397  ;;  %v424_v16 = vpop.permute.xlu0 %423 }
  0x9a   : > { %654 = vmatmul.msk.bf16.vlgmr.msrb.gmra.mxu0 %vm265_vm0, %v350_v13  ;;  %436 = vmatpush.bf16.msrb.mxu3 %v424_v16 }
  0x9b   : > { %656 = vmatmul.msk.bf16.vlgmr.msrb.gmra.mxu2 %vm265_vm0, %v398_v15 }
  0xa1   : > { %v374_v17 = vpop.permute.xlu1 %373  ;;  %v422_v18 = vpop.permute.xlu0 %421 }
  0xa2   : > { %655 = vmatmul.msk.bf16.vlgmr.msrb.gmra.mxu1 %vm265_vm0, %v374_v17  ;;  %657 = vmatmul.msk.bf16.vlgmr.msrb.gmra.mxu3 %vm265_vm0, %v422_v18 }
  0xaa   : > { %662 = vmatmul.msk.bf16.vlgmr.msra.gmra.mxu0 %vm265_vm0, %v661_v21 }
 0x107   : > { %v278_v22 = vpop.f32.mrf.mxu0 }
 0x108   : > { %v318_v24 = vpop.f32.mrf.mxu2  ;;  %v297_v27 = vadd.f32 %v296_v23, %v278_v22 }
 0x10a   : > { %v323_v31 = vadd.f32 %v318_v24, %v297_v27 }
 0x10f   : > { %v280_v25 = vpop.f32.mrf.mxu0 }
 0x110   : > { %v342_v26 = vpop.f32.mrf.mxu3  ;;  %v320_v30 = vpop.f32.mrf.mxu2  ;;  %v299_v34 = vadd.f32 %v298_v28, %v280_v25 }
 0x111   : > { %v347_v32 = vadd.f32 %v342_v26, %v323_v31  ;;  %v672_v31 = vld [vmem:[%s239_s7] sm:$0xff]  }
 0x112   : > { %v324_v40 = vadd.f32 %v320_v30, %v299_v34 }
 0x117   : > { %v366_v29 = vpop.f32.mrf.mxu0 }
 0x118   : > { %v344_v33 = vpop.f32.mrf.mxu3  ;;  %v371_v35 = vadd.f32 %v366_v29, %v347_v32 }
 0x119   : > { %v348_v41 = vadd.f32 %v344_v33, %v324_v40 }
 0x11e   : > { %v414_v39 = vpop.f32.mrf.mxu2 }
 0x11f   : > { %v368_v36 = vpop.f32.mrf.mxu0  ;;  %v390_v37 = vpop.f32.mrf.mxu1 }
 0x120   : > { %v395_v38 = vadd.f32 %v390_v37, %v371_v35  ;;  %v372_v44 = vadd.f32 %v368_v36, %v348_v41  ;;  %v673_v36 = vunpack.c.l.bf16 %v672_v31 }
 0x122   : > { %v419_v42 = vadd.f32 %v414_v39, %v395_v38 }
 0x125   : > { %v438_v43 = vpop.f32.mrf.mxu3 }
 0x126   : > { %v443_v45 = vadd.f32 %v438_v43, %v419_v42  ;;  %v416_v52 = vpop.f32.mrf.mxu2 }
 0x127   : > { %v392_v47 = vpop.f32.mrf.mxu1  ;;  %v463_v48 = vpop.f32.mrf.mxu0 }
 0x128   : > { %v396_v49 = vadd.f32 %v392_v47, %v372_v44  ;;  %v468_v50 = vadd.f32 %v463_v48, %v443_v45  ;;  %v674_v47 = vunpack.c.h.bf16 %v672_v31 }
 0x12a   : > { %v474_v51 = vmul.f32 %v705_v46, %v468_v50  ;;  %v420_v53 = vadd.f32 %v416_v52, %v396_v49 }
 0x12c   : > { %v477_v54 = vsel %vm476_vm1, %v474_v51, 0.0 }
 0x12d   : > { %v440_v55 = vpop.f32.mrf.mxu3  ;;  %478 = vadd.xlane.f32.xlu0 %v477_v54 }
 0x12e   : > { %v444_v56 = vadd.f32 %v440_v55, %v420_v53 }
 0x12f   : > { %v465_v57 = vpop.f32.mrf.mxu0 }
 0x130   : > { %v469_v58 = vadd.f32 %v465_v57, %v444_v56 }
 0x132   : > { %v475_v59 = vmul.f32 %v705_v46, %v469_v58 }
 0x134   : > { %v480_v60 = vsel %vm476_vm1, %v475_v59, 0.0 }
 0x135   : > { %481 = vadd.xlane.f32.xlu1 %v480_v60 }
 0x141   : > { %527 = vperm.xlu0 %700, %v523_v61  }
 0x149   : > { %704 = vset.pattern.permute.xlu0 %v734_v0 }
 0x14e   : > { %532 = vperm.xlu1 %701, %v524_v62  }
 0x156   : > { %703 = vset.pattern.permute.xlu1 %v734_v0 }
 0x157   : > { %542 = vperm.xlu1 %703, %v524_v62  }
 0x1a0   : > { %v479_v1 = vpop.xlane.xlu0 %478 }
 0x1a1   : > { %v483_v2 = vmul.f32 0.015625, %v479_v1 }
 0x1a3   : > { %v485_v3 = vsub.f32 %v468_v50, %v483_v2 }
 0x1a5   : > { %v487_v4 = vmul.f32 %v485_v3, %v485_v3 }
 0x1a7   : > { %v489_v5 = vmul.f32 %v705_v46, %v487_v4 }
 0x1a8   : > { %v482_v6 = vpop.xlane.xlu1 %481 }
 0x1a9   : > { %v484_v7 = vmul.f32 0.015625, %v482_v6  ;;  %v491_v8 = vsel %vm476_vm1, %v489_v5, 0.0 }
 0x1aa   : > { %492 = vadd.xlane.f32.xlu2 %v491_v8 }
 0x1ab   : > { %v486_v9 = vsub.f32 %v469_v58, %v484_v7 }
 0x1ad   : > { %v488_v10 = vmul.f32 %v486_v9, %v486_v9 }
 0x1af   : > { %v490_v11 = vmul.f32 %v705_v46, %v488_v10 }
 0x1b1   : > { %v494_v12 = vsel %vm476_vm1, %v490_v11, 0.0 }
 0x1b2   : > { %495 = vadd.xlane.f32.xlu2 %v494_v12 }
 0x1b3   : > { %v528_v29 = vpop.permute.xlu0 %527 }
 0x1c0   : > { %v533_v30 = vpop.permute.xlu1 %532 }
 0x1c9   : > { %v543_v44 = vpop.permute.xlu1 %542 }
 0x1ca   : > { %538 = vperm.xlu2 %702, %v523_v61  }
 0x21d   : > { %v493_v13 = vpop.xlane.xlu2 %492 }
 0x21e   : > { %v497_v14 = vmul.f32 0.015625, %v493_v13 }
 0x220   : > { %v499_v15 = vadd.f32 1e-05, %v497_v14 }
 0x222   : > { %706 = vrsqrt.f32 %v499_v15  ;;  %vm507_vm3 = vweird.f32 %v499_v15 }
 0x225   : > { %v496_v16 = vpop.xlane.xlu2 %495 }
 0x226   : > { %v498_v17 = vmul.f32 0.015625, %v496_v16 }
 0x228   : > { %v707_v18 = vpop.eup %706  ;;  %v500_v19 = vadd.f32 1e-05, %v498_v17 }
 0x229   : > { %v502_v20 = vmul.f32 %v707_v18, %v499_v15  ;;  %vm508_vm2 = vweird.f32 %v707_v18 }
 0x22a   : > { %708 = vrsqrt.f32 %v500_v19  ;;  %vm509_vm4 = vmor %vm507_vm3, %vm508_vm2  ;;  %vm517_vm6 = vweird.f32 %v500_v19 }
 0x22b   : > { %v503_v21 = vmul.f32 %v707_v18, %v502_v20 }
 0x22d   : > { %v504_v22 = vmul.f32 0.5, %v503_v21  ;;  %v539_v34 = vpop.permute.xlu2 %538 }
 0x22f   : > { %v505_v23 = vsub.f32 1.5, %v504_v22 }
 0x230   : > { %v709_v24 = vpop.eup %708 }
 0x231   : > { %v512_v25 = vmul.f32 %v709_v24, %v500_v19  ;;  %v506_v26 = vmul.f32 %v707_v18, %v505_v23  ;;  %vm518_vm5 = vweird.f32 %v709_v24 }
 0x232   : > { %vm519_vm7 = vmor %vm517_vm6, %vm518_vm5 }
 0x233   : > { %v513_v27 = vmul.f32 %v709_v24, %v512_v25  ;;  %v510_v28 = vsel %vm509_vm4, %v707_v18, %v506_v26 }
 0x234   : > { %v521_v32 = vmul.f32 %v510_v28, %v485_v3 }
 0x235   : > { %v514_v33 = vmul.f32 0.5, %v513_v27 }
 0x236   : > { %v535_v35 = vmul.f32 %v528_v29, %v521_v32 }
 0x237   : > { %v515_v37 = vsub.f32 1.5, %v514_v33 }
 0x238   : > { %v545_v38 = vadd.f32 %v539_v34, %v535_v35 }
 0x239   : > { %v516_v39 = vmul.f32 %v709_v24, %v515_v37 }
 0x23a   : > { %v551_v40 = vadd.f32 %v673_v36, %v545_v38 }
 0x23b   : > { %v520_v41 = vsel %vm519_vm7, %v709_v24, %v516_v39 }
 0x23c   : > { %v522_v42 = vmul.f32 %v520_v41, %v486_v9  ;;  %vm553_vm8 = vcmp.ge.f32.partialorder %v551_v40, 0.0  ;;  %v555_v43 = vmul.f32 0.01, %v551_v40 }
 0x23e   : > { %v536_v45 = vmul.f32 %v533_v30, %v522_v42  ;;  %v557_v46 = vsel %vm553_vm8, %v551_v40, %v555_v43 }
 0x23f   : > { %v559_v48 = vpack.c.bf16 %v557_v46, %v557_v46 }
 0x240   : > { %v546_v49 = vadd.f32 %v543_v44, %v536_v45 }
 0x241   : > { %562 = vst.msk [vmem:[%s244_s10] sm:$0xf] %vm561_vm9, %v559_v48 }
 0x242   : > { %v552_v50 = vadd.f32 %v674_v47, %v546_v49 }
 0x244   : > { %vm554_vm10 = vcmp.ge.f32.partialorder %v552_v50, 0.0  ;;  %v556_v51 = vmul.f32 0.01, %v552_v50 }
 0x246   : > { %v558_v52 = vsel %vm554_vm10, %v552_v50, %v556_v51 }
 0x247   : > { %v560_v53 = vpack.c.bf16 %v558_v52, %v558_v52 }
 0x249   : > { %563 = vst.msk [vmem:[%s244_s10 + $0x4] sm:$0xf] %vm561_vm9, %v560_v53 }
 0x24a PF: > { %s15_s18 = sadd.s32 1, %s716_s18  }
 0x24b   : > { %p12_p4 = scmp.ge.s32.totalorder %s15_s18, 4  }
 0x24d   :  { %14 = sbr.rel (!%p12_p4) target bundleno = 1 (0x1), region = 73 }

// kernel: residual_encoder_unet_forward.21
= control target key start
LH: loop header
LB: loop body
LE: loop exit
PB: predicated region body
PF: predicated region fallthrough
CT: control target
= control target key end

     0   :  { %s559_s12 = smov 0   ;;  %s642_s0 = inlined_call_operand.vmem [shape: bf16[2,64,16], index: 0, kind: input, shape index: {}]   ;;  %s643_s1 = inlined_call_operand.vmem [shape: bf16[32,64], index: 1, kind: input, shape index: {}]   ;;  %s644_s2 = inlined_call_operand.vmem [shape: f32[32,2], index: 2, kind: input, shape index: {}]   ;;  %s645_s3 = inlined_call_operand.vmem [shape: bf16[2,32,16], index: 3, kind: output, shape index: {}]  }
   0x1 LB: > { %s452_s13 = sadd.s32 4294967295, %s534_s12   ;;  %p456_p0 = scmp.ge.s32.totalorder %s534_s12, 1  ;;  %s534_s12 = sphi %s559_s12, %s13_s12  }
   0x2   : > { %p137_p1 = scmp.lt.s32.totalorder %s534_s12, 3 }
   0x4   : > { %p138_p2 = pnand %p456_p0, %p137_p1 }
   0x5   : > { %p161_p3 = scmp.lt.s32.totalorder (!%p138_p2), %s452_s13, 1 }
   0x6   : > { %141 = sbr.rel (%p138_p2) target bundleno = 501 (0x1f5), region = 32 }
   0xb   : > { %s647_s13 = smov (!%p161_p3, %s452_s13), 1  ;;  %v495_v4 = vld [vmem:[%s643_s1] sm:$0xff]  ;;  %v496_v5 = vld [vmem:[%s643_s1 + $0x8] sm:$0xff]  ;;  %vm218_vm0 = vcmask 523264   ;;  %v536_v6 = vmov 0   ;;  %vm244_vm1 = vcmask 130048  }
   0xc   : > { %s489_s14 = sshll.u32 %s647_s13, 5  ;;  %514 = vset.pattern.permute.xlu1 %v536_v6  ;;  %512 = vset.pattern.permute.xlu2 %v536_v6  ;;  %v340_v11 = vld [vmem:[%s644_s2] sm:$0xff]  ;;  %v342_v16 = vld [vmem:[%s644_s2 + $0x10] sm:$0xff]  ;;  %v341_v17 = vld [vmem:[%s644_s2 + $0x8] sm:$0xff]  ;;  %v537_v18 = vmov 1   ;;  %v538_v19 = vmov 16.0  }
   0xd   : > { %s165_s17 = scalar_lea.vmem %s642_s0, %s489_s14  ;;  %513 = vset.pattern.permute.xlu0 %v536_v6  ;;  %346 = vperm.xlu2 %512, %v340_v11   ;;  %518 = vrcp.f32 %v538_v19  ;;  %v343_v41 = vld [vmem:[%s644_s2 + $0x18] sm:$0xff]  ;;  %s490_s30 = sshll.u32 %s647_s13, 4  ;;  %vm392_vm8 = vcmask 125952  }
   0xe   : > { %v494_v0 = vld [vmem:[%s165_s17 + $0x18] sm:$0xff]  ;;  %v493_v1 = vld [vmem:[%s165_s17 + $0x10] sm:$0xff]  ;;  %v492_v2 = vld [vmem:[%s165_s17 + $0x8] sm:$0xff]  ;;  %s623_s6 = scalar_lea.vmem %s645_s3, %s490_s30 }
   0xf   : > { %229 = vmatpush.bf16.msra.mxu0 %v494_v0  ;;  %497 = vmatpush.bf16.msra.mxu1 %v494_v0  ;;  %v491_v3 = vld [vmem:[%s165_s17] sm:$0xff] }
  0x13   : > { %230 = vmatpush.bf16.msra.mxu0 %v493_v1  ;;  %498 = vmatpush.bf16.msra.mxu1 %v493_v1  ;;  %v519_v20 = vpop.eup %518 }
  0x14   : > { %v258_v21 = vmul.f32 16.0, %v519_v20  ;;  %vm262_vm2 = vweird.f32 %v519_v20 }
  0x16   : > { %v259_v22 = vsub.f32 1.0, %v258_v21 }
  0x17   : > { %231 = vmatpush.bf16.msra.mxu0 %v492_v2  ;;  %499 = vmatpush.bf16.msra.mxu1 %v492_v2 }
  0x18   : > { %v260_v23 = vmul.f32 %v519_v20, %v259_v22 }
  0x1a   : > { %v261_v24 = vadd.f32 %v519_v20, %v260_v23 }
  0x1b   : > { %232 = vmatpush.bf16.msra.mxu0 %v491_v3  ;;  %500 = vmatpush.bf16.msra.mxu1 %v491_v3 }
  0x1c   : > { %v592_v25 = vsel %vm262_vm2, %v519_v20, %v261_v24 }
  0x1e   : > { %485 = vmatmul.msk.bf16.vlgmr.msra.gmra.mxu0 %vm218_vm0, %v495_v4  ;;  %486 = vmatmul.msk.bf16.vlgmr.msra.gmra.mxu1 %vm218_vm0, %v496_v5 }
  0x67   : > { %v347_v48 = vpop.permute.xlu2 %346 }
  0x9b   : > { %v234_v7 = vpop.f32.mrf.mxu0  ;;  %v239_v8 = vpop.f32.mrf.mxu1 }
  0x9c   : > { %v251_v9 = vsel %vm244_vm1, %v239_v8, 0.0  ;;  %v245_v10 = vsel %vm244_vm1, %v234_v7, 0.0 }
  0x9d   : > { %252 = vadd.xlane.f32.xlu1 %v251_v9  ;;  %246 = vadd.xlane.f32.xlu0 %v245_v10 }
  0xa3   : > { %v236_v12 = vpop.f32.mrf.mxu0  ;;  %v241_v13 = vpop.f32.mrf.mxu1 }
  0xa4   : > { %v254_v14 = vsel %vm244_vm1, %v241_v13, 0.0  ;;  %v248_v15 = vsel %vm244_vm1, %v236_v12, 0.0 }
  0xa5   : > { %255 = vadd.xlane.f32.xlu1 %v254_v14  ;;  %249 = vadd.xlane.f32.xlu0 %v248_v15 }
  0xbe   : > { %356 = vperm.xlu1 %514, %v342_v16  }
  0xc6   : > { %516 = vset.pattern.permute.xlu1 %v537_v18 }
  0xc7   : > { %373 = vperm.xlu1 %516, %v341_v17  }
 0x110   : > { %v253_v26 = vpop.xlane.xlu1 %252  ;;  %v247_v27 = vpop.xlane.xlu0 %246 }
 0x111   : > { %v266_v28 = vmul.f32 %v592_v25, %v253_v26  ;;  %v264_v29 = vmul.f32 %v592_v25, %v247_v27 }
 0x113   : > { %v596_v30 = vsub.f32 %v239_v8, %v266_v28  ;;  %v268_v31 = vsub.f32 %v234_v7, %v264_v29 }
 0x115   : > { %v272_v32 = vmul.f32 %v268_v31, %v268_v31  ;;  %v274_v33 = vmul.f32 %v596_v30, %v596_v30 }
 0x117   : > { %v276_v34 = vsel %vm244_vm1, %v272_v32, 0.0  ;;  %v282_v35 = vsel %vm244_vm1, %v274_v33, 0.0 }
 0x118   : > { %v256_v36 = vpop.xlane.xlu1 %255  ;;  %277 = vadd.xlane.f32.xlu2 %v276_v34  ;;  %283 = vadd.xlane.f32.xlu0 %v282_v35  ;;  %v250_v42 = vpop.xlane.xlu0 %249 }
 0x119   : > { %v267_v37 = vmul.f32 %v592_v25, %v256_v36  ;;  %v265_v43 = vmul.f32 %v592_v25, %v250_v42 }
 0x11b   : > { %v271_v38 = vsub.f32 %v241_v13, %v267_v37  ;;  %v608_v44 = vsub.f32 %v236_v12, %v265_v43 }
 0x11d   : > { %v275_v39 = vmul.f32 %v271_v38, %v271_v38  ;;  %v273_v45 = vmul.f32 %v608_v44, %v608_v44 }
 0x11f   : > { %v285_v40 = vsel %vm244_vm1, %v275_v39, 0.0  ;;  %v279_v46 = vsel %vm244_vm1, %v273_v45, 0.0 }
 0x120   : > { %286 = vadd.xlane.f32.xlu1 %v285_v40 }
 0x12c   : > { %351 = vperm.xlu0 %513, %v341_v17  }
 0x130   : > { %361 = vperm.xlu2 %512, %v343_v41   ;;  %v613_v47 = vpop.permute.xlu1 %356 }
 0x134   : > { %517 = vset.pattern.permute.xlu0 %v537_v18 }
 0x138   : > { %515 = vset.pattern.permute.xlu2 %v537_v18 }
 0x139   : > { %381 = vperm.xlu1 %516, %v343_v41   ;;  %369 = vperm.xlu2 %515, %v340_v11   ;;  %v615_v49 = vpop.permute.xlu1 %373 }
 0x162   : > { %280 = vadd.xlane.f32.xlu2 %v279_v46 }
 0x17a   : > { %377 = vperm.xlu2 %515, %v342_v16  }
 0x18b   : > { %v278_v50 = vpop.xlane.xlu2 %277  ;;  %v284_v14 = vpop.xlane.xlu0 %283 }
 0x18c   : > { %v288_v51 = vmul.f32 %v278_v50, %v592_v25  ;;  %v290_v17 = vmul.f32 %v284_v14, %v592_v25 }
 0x18e   : > { %v292_v52 = vadd.f32 1e-05, %v288_v51  ;;  %v294_v19 = vadd.f32 1e-05, %v290_v17 }
 0x190   : > { %520 = vrsqrt.f32 %v292_v52  ;;  %vm302_vm4 = vweird.f32 %v292_v52  ;;  %vm322_vm11 = vweird.f32 %v294_v19 }
 0x193   : > { %v287_v53 = vpop.xlane.xlu1 %286  ;;  %v362_v60 = vpop.permute.xlu2 %361 }
 0x194   : > { %v291_v54 = vmul.f32 %v287_v53, %v592_v25 }
 0x196   : > { %v521_v55 = vpop.eup %520  ;;  %v295_v56 = vadd.f32 1e-05, %v291_v54 }
 0x197   : > { %v297_v57 = vmul.f32 %v521_v55, %v292_v52  ;;  %vm303_vm3 = vweird.f32 %v521_v55 }
 0x198   : > { %522 = vrsqrt.f32 %v295_v56  ;;  %vm304_vm5 = vmor %vm302_vm4, %vm303_vm3  ;;  %vm332_vm7 = vweird.f32 %v295_v56 }
 0x199   : > { %v298_v58 = vmul.f32 %v521_v55, %v297_v57  ;;  %524 = vrsqrt.f32 %v294_v19 }
 0x19b   : > { %v299_v59 = vmul.f32 0.5, %v298_v58  ;;  %v370_v7 = vpop.permute.xlu2 %369 }
 0x19d   : > { %v300_v61 = vsub.f32 1.5, %v299_v59 }
 0x19e   : > { %v523_v62 = vpop.eup %522 }
 0x19f   : > { %v327_v63 = vmul.f32 %v523_v62, %v295_v56  ;;  %v301_v0 = vmul.f32 %v521_v55, %v300_v61  ;;  %vm333_vm6 = vweird.f32 %v523_v62  ;;  %v525_v20 = vpop.eup %524 }
 0x1a0   : > { %vm334_vm9 = vmor %vm332_vm7, %vm333_vm6  ;;  %v317_v21 = vmul.f32 %v525_v20, %v294_v19  ;;  %vm323_vm10 = vweird.f32 %v525_v20 }
 0x1a1   : > { %v328_v1 = vmul.f32 %v523_v62, %v327_v63  ;;  %v305_v2 = vsel %vm304_vm5, %v521_v55, %v301_v0  ;;  %vm324_vm12 = vmor %vm322_vm11, %vm323_vm10 }
 0x1a2   : > { %v336_v3 = vmul.f32 %v305_v2, %v268_v31  ;;  %v318_v22 = vmul.f32 %v525_v20, %v317_v21 }
 0x1a3   : > { %v329_v4 = vmul.f32 0.5, %v328_v1 }
 0x1a4   : > { %v364_v5 = vmul.f32 %v347_v48, %v336_v3  ;;  %v319_v23 = vmul.f32 0.5, %v318_v22 }
 0x1a5   : > { %v330_v6 = vsub.f32 1.5, %v329_v4 }
 0x1a6   : > { %v384_v8 = vadd.f32 %v370_v7, %v364_v5  ;;  %v320_v24 = vsub.f32 1.5, %v319_v23 }
 0x1a7   : > { %v331_v9 = vmul.f32 %v523_v62, %v330_v6 }
 0x1a8   : > { %v388_v10 = vpack.c.bf16 %v384_v8, %v384_v8  ;;  %v321_v26 = vmul.f32 %v525_v20, %v320_v24 }
 0x1a9   : > { %v335_v11 = vsel %vm334_vm9, %v523_v62, %v331_v9 }
 0x1aa   : > { %v339_v12 = vmul.f32 %v335_v11, %v271_v38  ;;  %393 = vst.msk [vmem:[%s623_s6] sm:$0xf] %vm392_vm8, %v388_v10  ;;  %v325_v28 = vsel %vm324_vm12, %v525_v20, %v321_v26 }
 0x1ab   : > { %v382_v15 = vpop.permute.xlu1 %381  ;;  %v338_v32 = vmul.f32 %v325_v28, %v596_v30  ;;  %v352_v30 = vpop.permute.xlu0 %351 }
 0x1ac   : > { %v367_v13 = vmul.f32 %v362_v60, %v339_v12 }
 0x1ad   : > { %v366_v33 = vmul.f32 %v613_v47, %v338_v32 }
 0x1ae   : > { %v387_v16 = vadd.f32 %v382_v15, %v367_v13 }
 0x1b0   : > { %v391_v18 = vpack.c.bf16 %v387_v16, %v387_v16 }
 0x1b2   : > { %396 = vst.msk [vmem:[%s623_s6 + $0xc] sm:$0xf] %vm392_vm8, %v391_v18 }
 0x1d5   : > { %v281_v27 = vpop.xlane.xlu2 %280 }
 0x1d6   : > { %v289_v29 = vmul.f32 %v281_v27, %v592_v25 }
 0x1d8   : > { %v293_v31 = vadd.f32 1e-05, %v289_v29 }
 0x1da   : > { %526 = vrsqrt.f32 %v293_v31  ;;  %vm312_vm14 = vweird.f32 %v293_v31 }
 0x1dd   : > { %v378_v34 = vpop.permute.xlu2 %377 }
 0x1de   : > { %v386_v35 = vadd.f32 %v378_v34, %v366_v33 }
 0x1e0   : > { %v527_v36 = vpop.eup %526  ;;  %v390_v37 = vpack.c.bf16 %v386_v35, %v386_v35 }
 0x1e1   : > { %v307_v38 = vmul.f32 %v527_v36, %v293_v31  ;;  %vm313_vm13 = vweird.f32 %v527_v36 }
 0x1e2   : > { %395 = vst.msk [vmem:[%s623_s6 + $0x8] sm:$0xf] %vm392_vm8, %v390_v37  ;;  %vm314_vm15 = vmor %vm312_vm14, %vm313_vm13 }
 0x1e3   : > { %v308_v39 = vmul.f32 %v527_v36, %v307_v38 }
 0x1e5   : > { %v309_v40 = vmul.f32 0.5, %v308_v39 }
 0x1e7   : > { %v310_v41 = vsub.f32 1.5, %v309_v40 }
 0x1e9   : > { %v311_v25 = vmul.f32 %v527_v36, %v310_v41 }
 0x1eb   : > { %v315_v42 = vsel %vm314_vm15, %v527_v36, %v311_v25 }
 0x1ec   : > { %v337_v43 = vmul.f32 %v315_v42, %v608_v44 }
 0x1ee   : > { %v365_v45 = vmul.f32 %v352_v30, %v337_v43 }
 0x1f0   : > { %v385_v46 = vadd.f32 %v615_v49, %v365_v45 }
 0x1f2   : > { %v389_v47 = vpack.c.bf16 %v385_v46, %v385_v46 }
 0x1f4   : > { %394 = vst.msk [vmem:[%s623_s6 + $0x4] sm:$0xf] %vm392_vm8, %v389_v47 }
 0x1f5 PF: > { %s13_s12 = sadd.s32 1, %s534_s12  }
 0x1f6   : > { %p10_p4 = scmp.ge.s32.totalorder %s13_s12, 4  }
 0x1f8   :  { %12 = sbr.rel (!%p10_p4) target bundleno = 1 (0x1), region = 62 }

// kernel: residual_encoder_unet_forward.20
= control target key start
LH: loop header
LB: loop body
LE: loop exit
PB: predicated region body
PF: predicated region fallthrough
CT: control target
= control target key end

     0   :  { %s675_s12 = smov 0   ;;  %s794_s0 = inlined_call_operand.vmem [shape: bf16[2,144,16], index: 0, kind: input, shape index: {}]   ;;  %s795_s1 = inlined_call_operand.vmem [shape: bf16[32,144], index: 1, kind: input, shape index: {}]   ;;  %s796_s2 = inlined_call_operand.vmem [shape: f32[32,2], index: 2, kind: input, shape index: {}]   ;;  %s797_s3 = inlined_call_operand.vmem [shape: bf16[2,32,16], index: 3, kind: output, shape index: {}]  }
   0x1 LB: > { %s530_s13 = sadd.s32 4294967295, %s650_s12   ;;  %p534_p0 = scmp.ge.s32.totalorder %s650_s12, 1  ;;  %s650_s12 = sphi %s675_s12, %s13_s12  }
   0x2   : > { %p137_p1 = scmp.lt.s32.totalorder %s650_s12, 3 }
   0x4   : > { %p138_p2 = pnand %p534_p0, %p137_p1 }
   0x5   : > { %p161_p3 = scmp.lt.s32.totalorder (!%p138_p2), %s530_s13, 1 }
   0x6   : > { %141 = sbr.rel (%p138_p2) target bundleno = 523 (0x20b), region = 32 }
   0xb   : > { %s799_s13 = smov (!%p161_p3, %s530_s13), 1  ;;  %v604_v1 = vld [vmem:[%s795_s1 + $0x4] sm:$0xf]  ;;  %v542_v2 = vld [vmem:[%s795_s1 + $0x8] sm:$0xf0]  ;;  %vm266_vm0 = vcmask 130048  }
   0xc   : > { %s616_s14 = smul.u32 72, %s799_s13  ;;  %v545_v5 = vor.u32 %v604_v1, %v542_v2  ;;  %v606_v9 = vld [vmem:[%s795_s1 + $0x14] sm:$0xf]  ;;  %v550_v10 = vld [vmem:[%s795_s1 + $0x18] sm:$0xf0]  ;;  %v406_v22 = vld [vmem:[%s796_s2] sm:$0xff] }
   0xd   : > { %v553_v12 = vor.u32 %v606_v9, %v550_v10  ;;  %v540_v14 = vld [vmem:[%s795_s1] sm:$0xf]  ;;  %v605_v15 = vld [vmem:[%s795_s1 + $0x4] sm:$0xf0]  ;;  %v548_v17 = vld [vmem:[%s795_s1 + $0x10] sm:$0xf] }
   0xe   : > { %s689_s17 = scalar_lea.vmem %s794_s0, %s616_s14  ;;  %v607_v18 = vld [vmem:[%s795_s1 + $0x14] sm:$0xf0]  ;;  %v541_v19 = vor.u32 %v605_v15, %v540_v14  ;;  %v652_v23 = vmov 0   ;;  %v408_v39 = vld [vmem:[%s796_s2 + $0x10] sm:$0xff]  ;;  %v407_v40 = vld [vmem:[%s796_s2 + $0x8] sm:$0xff]  ;;  %v653_v41 = vmov 1  }
   0xf   : > { %v602_v0 = vld [vmem:[%s689_s17 + $0x38] sm:$0xff]  ;;  %v603_v3 = vld [vmem:[%s689_s17 + $0x40] sm:$0xff]  ;;  %v601_v4 = vld [vmem:[%s689_s17 + $0x30] sm:$0xff]  ;;  %v549_v20 = vor.u32 %v607_v18, %v548_v17  ;;  %628 = vset.pattern.permute.xlu2 %v652_v23  ;;  %630 = vset.pattern.permute.xlu1 %v652_v23  ;;  %v654_v42 = vmov 16.0   ;;  %vm470_vm6 = vcmask 125952  }
  0x10   : > { %273 = vmatpush.bf16.msra.mxu0 %v602_v0  ;;  %608 = vmatpush.bf16.msra.mxu2 %v602_v0  ;;  %v600_v6 = vld [vmem:[%s689_s17 + $0x28] sm:$0xff]  ;;  %v599_v7 = vld [vmem:[%s689_s17 + $0x20] sm:$0xff]  ;;  %v598_v8 = vld [vmem:[%s689_s17 + $0x18] sm:$0xff]  ;;  %634 = vrcp.f32 %v654_v42 }
  0x11   : > { %299 = vmatpush.bf16.msra.mxu1 %v603_v3  ;;  %v597_v11 = vld [vmem:[%s689_s17 + $0x10] sm:$0xff]  ;;  %v596_v13 = vld [vmem:[%s689_s17 + $0x8] sm:$0xff]  ;;  %v595_v16 = vld [vmem:[%s689_s17] sm:$0xff]  ;;  %412 = vperm.xlu2 %628, %v406_v22   ;;  %s594_s17 = sshll.u32 %s799_s13, 4 }
  0x12   : > { %629 = vset.pattern.permute.xlu0 %v652_v23  ;;  %v409_v0 = vld [vmem:[%s796_s2 + $0x18] sm:$0xff]  ;;  %s774_s20 = scalar_lea.vmem %s797_s3, %s594_s17 }
  0x14   : > { %274 = vmatpush.bf16.msra.mxu0 %v601_v4  ;;  %609 = vmatpush.bf16.msra.mxu2 %v601_v4 }
  0x15   : > { %590 = vmatmul.msk.bf16.vlgmr.msra.gmra.mxu1 %vm266_vm0, %v545_v5 }
  0x16   : > { %v635_v43 = vpop.eup %634 }
  0x17   : > { %v324_v44 = vmul.f32 16.0, %v635_v43  ;;  %vm328_vm1 = vweird.f32 %v635_v43 }
  0x18   : > { %275 = vmatpush.bf16.msra.mxu0 %v600_v6  ;;  %610 = vmatpush.bf16.msra.mxu2 %v600_v6 }
  0x19   : > { %v325_v45 = vsub.f32 1.0, %v324_v44 }
  0x1b   : > { %v326_v46 = vmul.f32 %v635_v43, %v325_v45 }
  0x1c   : > { %276 = vmatpush.bf16.msra.mxu0 %v599_v7  ;;  %611 = vmatpush.bf16.msra.mxu2 %v599_v7 }
  0x1d   : > { %v327_v47 = vadd.f32 %v635_v43, %v326_v46 }
  0x1f   : > { %v739_v48 = vsel %vm328_vm1, %v635_v43, %v327_v47 }
  0x20   : > { %277 = vmatpush.bf16.msra.mxu0 %v598_v8  ;;  %612 = vmatpush.bf16.msra.mxu2 %v598_v8 }
  0x24   : > { %278 = vmatpush.bf16.msra.mxu0 %v597_v11  ;;  %613 = vmatpush.bf16.msra.mxu2 %v597_v11 }
  0x25   : > { %591 = vmatmul.msk.bf16.gmra.mxu1 %vm266_vm0, %v553_v12 }
  0x28   : > { %279 = vmatpush.bf16.msra.mxu0 %v596_v13  ;;  %614 = vmatpush.bf16.msra.mxu2 %v596_v13 }
  0x2c   : > { %280 = vmatpush.bf16.msra.mxu0 %v595_v16  ;;  %615 = vmatpush.bf16.msra.mxu2 %v595_v16 }
  0x2f   : > { %281 = vmatmul.bf16.vlgmr.msra.gmra.mxu0 %v541_v19  ;;  %286 = vmatmul.bf16.vlgmr.msra.gmra.mxu2 %v549_v20 }
  0x6b   : > { %v413_v6 = vpop.permute.xlu2 %412 }
  0x92   : > { %v301_v21 = vpop.f32.mrf.mxu1 }
  0x9a   : > { %v303_v24 = vpop.f32.mrf.mxu1 }
  0xa2   : > { %v306_v27 = vpop.f32.mrf.mxu1 }
  0xaa   : > { %v308_v35 = vpop.f32.mrf.mxu1 }
  0xac   : > { %v282_v25 = vpop.f32.mrf.mxu0 }
  0xad   : > { %v302_v26 = vadd.f32 %v301_v21, %v282_v25 }
  0xaf   : > { %v311_v28 = vsel %vm266_vm0, %v302_v26, 0.0 }
  0xb0   : > { %312 = vadd.xlane.f32.xlu0 %v311_v28 }
  0xb2   : > { %v287_v29 = vpop.f32.mrf.mxu2 }
  0xb3   : > { %v307_v30 = vadd.f32 %v306_v27, %v287_v29 }
  0xb4   : > { %v284_v31 = vpop.f32.mrf.mxu0 }
  0xb5   : > { %v304_v32 = vadd.f32 %v303_v24, %v284_v31  ;;  %v317_v33 = vsel %vm266_vm0, %v307_v30, 0.0 }
  0xb6   : > { %318 = vadd.xlane.f32.xlu1 %v317_v33 }
  0xb7   : > { %v314_v34 = vsel %vm266_vm0, %v304_v32, 0.0 }
  0xb8   : > { %315 = vadd.xlane.f32.xlu0 %v314_v34 }
  0xba   : > { %v289_v36 = vpop.f32.mrf.mxu2 }
  0xbb   : > { %v309_v37 = vadd.f32 %v308_v35, %v289_v36 }
  0xbd   : > { %v320_v38 = vsel %vm266_vm0, %v309_v37, 0.0 }
  0xbe   : > { %321 = vadd.xlane.f32.xlu1 %v320_v38 }
  0xd7   : > { %422 = vperm.xlu1 %630, %v408_v39  }
  0xdf   : > { %632 = vset.pattern.permute.xlu1 %v653_v41 }
  0xe0   : > { %439 = vperm.xlu1 %632, %v407_v40  }
 0x123   : > { %v313_v49 = vpop.xlane.xlu0 %312 }
 0x124   : > { %v330_v50 = vmul.f32 %v739_v48, %v313_v49 }
 0x126   : > { %v334_v51 = vsub.f32 %v302_v26, %v330_v50 }
 0x128   : > { %v338_v52 = vmul.f32 %v334_v51, %v334_v51 }
 0x129   : > { %v319_v53 = vpop.xlane.xlu1 %318 }
 0x12a   : > { %v332_v54 = vmul.f32 %v739_v48, %v319_v53  ;;  %v342_v55 = vsel %vm266_vm0, %v338_v52, 0.0 }
 0x12b   : > { %343 = vadd.xlane.f32.xlu2 %v342_v55  ;;  %v316_v1 = vpop.xlane.xlu0 %315 }
 0x12c   : > { %v744_v56 = vsub.f32 %v307_v30, %v332_v54  ;;  %v331_v2 = vmul.f32 %v739_v48, %v316_v1 }
 0x12e   : > { %v340_v57 = vmul.f32 %v744_v56, %v744_v56  ;;  %v759_v3 = vsub.f32 %v304_v32, %v331_v2 }
 0x130   : > { %v348_v58 = vsel %vm266_vm0, %v340_v57, 0.0  ;;  %v339_v4 = vmul.f32 %v759_v3, %v759_v3 }
 0x131   : > { %v322_v59 = vpop.xlane.xlu1 %321  ;;  %349 = vadd.xlane.f32.xlu0 %v348_v58 }
 0x132   : > { %v333_v60 = vmul.f32 %v739_v48, %v322_v59  ;;  %v345_v5 = vsel %vm266_vm0, %v339_v4, 0.0 }
 0x134   : > { %v750_v61 = vsub.f32 %v309_v37, %v333_v60 }
 0x136   : > { %v341_v62 = vmul.f32 %v750_v61, %v750_v61 }
 0x138   : > { %v351_v63 = vsel %vm266_vm0, %v341_v62, 0.0 }
 0x139   : > { %352 = vadd.xlane.f32.xlu1 %v351_v63 }
 0x143   : > { %427 = vperm.xlu2 %628, %v409_v0  }
 0x145   : > { %417 = vperm.xlu0 %629, %v407_v40  }
 0x149   : > { %v764_v7 = vpop.permute.xlu1 %422 }
 0x14b   : > { %631 = vset.pattern.permute.xlu2 %v653_v41 }
 0x14c   : > { %435 = vperm.xlu2 %631, %v406_v22  }
 0x14d   : > { %633 = vset.pattern.permute.xlu0 %v653_v41 }
 0x152   : > { %447 = vperm.xlu1 %632, %v409_v0   ;;  %v767_v11 = vpop.permute.xlu1 %439 }
 0x175   : > { %346 = vadd.xlane.f32.xlu2 %v345_v5 }
 0x18d   : > { %443 = vperm.xlu2 %631, %v408_v39  }
 0x19e   : > { %v344_v8 = vpop.xlane.xlu2 %343 }
 0x19f   : > { %v354_v9 = vmul.f32 %v344_v8, %v739_v48 }
 0x1a1   : > { %v358_v10 = vadd.f32 1e-05, %v354_v9 }
 0x1a3   : > { %636 = vrsqrt.f32 %v358_v10  ;;  %vm368_vm3 = vweird.f32 %v358_v10 }
 0x1a4   : > { %v350_v35 = vpop.xlane.xlu0 %349 }
 0x1a5   : > { %v356_v38 = vmul.f32 %v350_v35, %v739_v48 }
 0x1a6   : > { %v428_v18 = vpop.permute.xlu2 %427 }
 0x1a7   : > { %v360_v42 = vadd.f32 1e-05, %v356_v38 }
 0x1a9   : > { %v637_v12 = vpop.eup %636  ;;  %vm388_vm12 = vweird.f32 %v360_v42 }
 0x1aa   : > { %v363_v13 = vmul.f32 %v637_v12, %v358_v10  ;;  %vm369_vm2 = vweird.f32 %v637_v12 }
 0x1ab   : > { %vm370_vm4 = vmor %vm368_vm3, %vm369_vm2 }
 0x1ac   : > { %v364_v14 = vmul.f32 %v637_v12, %v363_v13  ;;  %v353_v15 = vpop.xlane.xlu1 %352 }
 0x1ad   : > { %v357_v16 = vmul.f32 %v353_v15, %v739_v48 }
 0x1ae   : > { %v365_v17 = vmul.f32 0.5, %v364_v14  ;;  %v436_v27 = vpop.permute.xlu2 %435 }
 0x1af   : > { %v361_v19 = vadd.f32 1e-05, %v357_v16 }
 0x1b0   : > { %v366_v20 = vsub.f32 1.5, %v365_v17 }
 0x1b1   : > { %638 = vrsqrt.f32 %v361_v19  ;;  %vm398_vm8 = vweird.f32 %v361_v19 }
 0x1b2   : > { %v367_v21 = vmul.f32 %v637_v12, %v366_v20  ;;  %640 = vrsqrt.f32 %v360_v42 }
 0x1b4   : > { %v371_v22 = vsel %vm370_vm4, %v637_v12, %v367_v21 }
 0x1b5   : > { %v402_v23 = vmul.f32 %v371_v22, %v334_v51 }
 0x1b7   : > { %v639_v24 = vpop.eup %638  ;;  %v430_v25 = vmul.f32 %v413_v6, %v402_v23 }
 0x1b8   : > { %v393_v26 = vmul.f32 %v639_v24, %v361_v19  ;;  %vm399_vm7 = vweird.f32 %v639_v24  ;;  %v641_v47 = vpop.eup %640 }
 0x1b9   : > { %v450_v28 = vadd.f32 %v436_v27, %v430_v25  ;;  %vm400_vm9 = vmor %vm398_vm8, %vm399_vm7  ;;  %v383_v49 = vmul.f32 %v641_v47, %v360_v42  ;;  %vm389_vm11 = vweird.f32 %v641_v47 }
 0x1ba   : > { %v394_v29 = vmul.f32 %v639_v24, %v393_v26  ;;  %vm390_vm13 = vmor %vm388_vm12, %vm389_vm11 }
 0x1bb   : > { %vm454_vm5 = vcmp.ge.f32.partialorder %v450_v28, 0.0  ;;  %v458_v30 = vmul.f32 0.01, %v450_v28  ;;  %v384_v50 = vmul.f32 %v641_v47, %v383_v49 }
 0x1bc   : > { %v395_v31 = vmul.f32 0.5, %v394_v29 }
 0x1bd   : > { %v462_v32 = vsel %vm454_vm5, %v450_v28, %v458_v30  ;;  %v385_v51 = vmul.f32 0.5, %v384_v50 }
 0x1be   : > { %v396_v33 = vsub.f32 1.5, %v395_v31  ;;  %v466_v34 = vpack.c.bf16 %v462_v32, %v462_v32 }
 0x1bf   : > { %v386_v52 = vsub.f32 1.5, %v385_v51 }
 0x1c0   : > { %471 = vst.msk [vmem:[%s774_s20] sm:$0xf] %vm470_vm6, %v466_v34  ;;  %v397_v36 = vmul.f32 %v639_v24, %v396_v33 }
 0x1c1   : > { %v387_v53 = vmul.f32 %v641_v47, %v386_v52 }
 0x1c2   : > { %v401_v37 = vsel %vm400_vm9, %v639_v24, %v397_v36 }
 0x1c3   : > { %v405_v39 = vmul.f32 %v401_v37, %v750_v61  ;;  %v391_v55 = vsel %vm390_vm13, %v641_v47, %v387_v53 }
 0x1c4   : > { %v448_v41 = vpop.permute.xlu1 %447  ;;  %v404_v59 = vmul.f32 %v391_v55, %v744_v56 }
 0x1c5   : > { %v433_v40 = vmul.f32 %v428_v18, %v405_v39 }
 0x1c6   : > { %v432_v60 = vmul.f32 %v764_v7, %v404_v59  ;;  %v418_v7 = vpop.permute.xlu0 %417 }
 0x1c7   : > { %v453_v43 = vadd.f32 %v448_v41, %v433_v40 }
 0x1c9   : > { %vm457_vm10 = vcmp.ge.f32.partialorder %v453_v43, 0.0  ;;  %v461_v44 = vmul.f32 0.01, %v453_v43 }
 0x1cb   : > { %v465_v45 = vsel %vm457_vm10, %v453_v43, %v461_v44 }
 0x1cc   : > { %v469_v46 = vpack.c.bf16 %v465_v45, %v465_v45 }
 0x1ce   : > { %474 = vst.msk [vmem:[%s774_s20 + $0xc] sm:$0xf] %vm470_vm6, %v469_v46 }
 0x1e8   : > { %v347_v54 = vpop.xlane.xlu2 %346 }
 0x1e9   : > { %v355_v57 = vmul.f32 %v347_v54, %v739_v48 }
 0x1eb   : > { %v359_v58 = vadd.f32 1e-05, %v355_v57 }
 0x1ed   : > { %642 = vrsqrt.f32 %v359_v58  ;;  %vm378_vm0 = vweird.f32 %v359_v58 }
 0x1f0   : > { %v444_v61 = vpop.permute.xlu2 %443 }
 0x1f1   : > { %v452_v62 = vadd.f32 %v444_v61, %v432_v60 }
 0x1f3   : > { %v643_v63 = vpop.eup %642  ;;  %vm456_vm14 = vcmp.ge.f32.partialorder %v452_v62, 0.0  ;;  %v460_v0 = vmul.f32 0.01, %v452_v62 }
 0x1f4   : > { %v373_v1 = vmul.f32 %v643_v63, %v359_v58  ;;  %vm379_vm15 = vweird.f32 %v643_v63 }
 0x1f5   : > { %v464_v2 = vsel %vm456_vm14, %v452_v62, %v460_v0  ;;  %vm380_vm1 = vmor %vm378_vm0, %vm379_vm15 }
 0x1f6   : > { %v374_v4 = vmul.f32 %v643_v63, %v373_v1  ;;  %v468_v5 = vpack.c.bf16 %v464_v2, %v464_v2 }
 0x1f8   : > { %v375_v6 = vmul.f32 0.5, %v374_v4  ;;  %473 = vst.msk [vmem:[%s774_s20 + $0x8] sm:$0xf] %vm470_vm6, %v468_v5 }
 0x1fa   : > { %v376_v48 = vsub.f32 1.5, %v375_v6 }
 0x1fc   : > { %v377_v56 = vmul.f32 %v643_v63, %v376_v48 }
 0x1fe   : > { %v381_v8 = vsel %vm380_vm1, %v643_v63, %v377_v56 }
 0x1ff   : > { %v403_v9 = vmul.f32 %v381_v8, %v759_v3 }
 0x201   : > { %v431_v10 = vmul.f32 %v418_v7, %v403_v9 }
 0x203   : > { %v451_v12 = vadd.f32 %v767_v11, %v431_v10 }
 0x205   : > { %vm455_vm2 = vcmp.ge.f32.partialorder %v451_v12, 0.0  ;;  %v459_v13 = vmul.f32 0.01, %v451_v12 }
 0x207   : > { %v463_v14 = vsel %vm455_vm2, %v451_v12, %v459_v13 }
 0x208   : > { %v467_v15 = vpack.c.bf16 %v463_v14, %v463_v14 }
 0x20a   : > { %472 = vst.msk [vmem:[%s774_s20 + $0x4] sm:$0xf] %vm470_vm6, %v467_v15 }
 0x20b PF: > { %s13_s12 = sadd.s32 1, %s650_s12  }
 0x20c   : > { %p10_p4 = scmp.ge.s32.totalorder %s13_s12, 4  }
 0x20e   :  { %12 = sbr.rel (!%p10_p4) target bundleno = 1 (0x1), region = 62 }

// kernel: residual_encoder_unet_forward.23
= control target key start
LH: loop header
LB: loop body
LE: loop exit
PB: predicated region body
PF: predicated region fallthrough
CT: control target
= control target key end

     0   :  { %s387_s9 = smov 0   ;;  %s424_s0 = inlined_call_operand.vmem [shape: bf16[2,32,16], index: 0, kind: input, shape index: {}]   ;;  %s425_s1 = inlined_call_operand.vmem [shape: bf16[64,32], index: 1, kind: input, shape index: {}]   ;;  %s426_s2 = inlined_call_operand.vmem [shape: bf16[2,64,16], index: 2, kind: output, shape index: {}]  }
   0x1 LB: > { %s303_s10 = sadd.s32 4294967295, %s370_s9   ;;  %p307_p0 = scmp.ge.s32.totalorder %s370_s9, 1  ;;  %s370_s9 = sphi %s387_s9, %s12_s9  }
   0x2   : > { %p112_p1 = scmp.lt.s32.totalorder %s370_s9, 3 }
   0x4   : > { %p113_p2 = pnand %p307_p0, %p112_p1 }
   0x5   : > { %p134_p3 = scmp.lt.s32.totalorder (!%p113_p2), %s303_s10, 1 }
   0x6   : > { %116 = sbr.rel (%p113_p2) target bundleno = 167 (0xa7), region = 28 }
   0xb   : > { %s428_s10 = smov (!%p134_p3, %s303_s10), 1  ;;  %v346_v2 = vld [vmem:[%s425_s1] sm:$0xff]  ;;  %v347_v3 = vld [vmem:[%s425_s1 + $0x8] sm:$0xff]  ;;  %vm189_vm0 = vcmask 261120   ;;  %v348_v4 = vld [vmem:[%s425_s1 + $0x10] sm:$0xff]  ;;  %vm239_vm1 = vcmask 125952  }
   0xc   : > { %s342_s11 = sshll.u32 %s428_s10, 4  ;;  %v349_v5 = vld [vmem:[%s425_s1 + $0x18] sm:$0xff]  ;;  %s343_s23 = sshll.u32 %s428_s10, 5 }
   0xd   : > { %s138_s14 = scalar_lea.vmem %s424_s0, %s342_s11  ;;  %s143_s26 = scalar_lea.vmem %s426_s2, %s343_s23 }
   0xe   : > { %v345_v0 = vld [vmem:[%s138_s14 + $0x8] sm:$0xff]  ;;  %v344_v1 = vld [vmem:[%s138_s14] sm:$0xff] }
   0xf   : > { %208 = vmatpush.bf16.msra.mxu0 %v345_v0  ;;  %350 = vmatpush.bf16.msra.mxu1 %v345_v0 }
  0x10   : > { %351 = vmatpush.bf16.msra.mxu2 %v345_v0  ;;  %352 = vmatpush.bf16.msra.mxu3 %v345_v0 }
  0x13   : > { %209 = vmatpush.bf16.msra.mxu0 %v344_v1  ;;  %353 = vmatpush.bf16.msra.mxu1 %v344_v1 }
  0x14   : > { %354 = vmatpush.bf16.msra.mxu2 %v344_v1  ;;  %355 = vmatpush.bf16.msra.mxu3 %v344_v1 }
  0x16   : > { %336 = vmatmul.msk.bf16.vlgmr.msra.gmra.mxu0 %vm189_vm0, %v346_v2  ;;  %337 = vmatmul.msk.bf16.vlgmr.msra.gmra.mxu1 %vm189_vm0, %v347_v3 }
  0x17   : > { %338 = vmatmul.msk.bf16.vlgmr.msra.gmra.mxu2 %vm189_vm0, %v348_v4  ;;  %339 = vmatmul.msk.bf16.vlgmr.msra.gmra.mxu3 %vm189_vm0, %v349_v5 }
  0x93   : > { %v211_v6 = vpop.f32.mrf.mxu0  ;;  %v216_v7 = vpop.f32.mrf.mxu1 }
  0x94   : > { %v231_v8 = vpack.c.bf16 %v211_v6, %v211_v6  ;;  %v233_v9 = vpack.c.bf16 %v216_v7, %v216_v7 }
  0x96   : > { %240 = vst.msk [vmem:[%s143_s26] sm:$0xf] %vm239_vm1, %v231_v8 }
  0x97   : > { %242 = vst.msk [vmem:[%s143_s26 + $0x8] sm:$0xf] %vm239_vm1, %v233_v9 }
  0x9a   : > { %v221_v10 = vpop.f32.mrf.mxu2  ;;  %v226_v11 = vpop.f32.mrf.mxu3 }
  0x9b   : > { %v235_v12 = vpack.c.bf16 %v221_v10, %v221_v10  ;;  %v237_v13 = vpack.c.bf16 %v226_v11, %v226_v11  ;;  %v213_v14 = vpop.f32.mrf.mxu0  ;;  %v218_v15 = vpop.f32.mrf.mxu1 }
  0x9c   : > { %v232_v16 = vpack.c.bf16 %v213_v14, %v213_v14  ;;  %v234_v17 = vpack.c.bf16 %v218_v15, %v218_v15 }
  0x9d   : > { %244 = vst.msk [vmem:[%s143_s26 + $0x10] sm:$0xf] %vm239_vm1, %v235_v12 }
  0x9e   : > { %246 = vst.msk [vmem:[%s143_s26 + $0x18] sm:$0xf] %vm239_vm1, %v237_v13 }
  0x9f   : > { %241 = vst.msk [vmem:[%s143_s26 + $0x4] sm:$0xf] %vm239_vm1, %v232_v16 }
  0xa0   : > { %243 = vst.msk [vmem:[%s143_s26 + $0xc] sm:$0xf] %vm239_vm1, %v234_v17 }
  0xa2   : > { %v223_v18 = vpop.f32.mrf.mxu2  ;;  %v228_v19 = vpop.f32.mrf.mxu3 }
  0xa3   : > { %v236_v20 = vpack.c.bf16 %v223_v18, %v223_v18  ;;  %v238_v21 = vpack.c.bf16 %v228_v19, %v228_v19 }
  0xa5   : > { %245 = vst.msk [vmem:[%s143_s26 + $0x14] sm:$0xf] %vm239_vm1, %v236_v20 }
  0xa6   : > { %247 = vst.msk [vmem:[%s143_s26 + $0x1c] sm:$0xf] %vm239_vm1, %v238_v21 }
  0xa7 PF: > { %s12_s9 = sadd.s32 1, %s370_s9  }
  0xa8   : > { %p9_p4 = scmp.ge.s32.totalorder %s12_s9, 4  }
  0xaa   :  { %11 = sbr.rel (!%p9_p4) target bundleno = 1 (0x1), region = 58 }

// kernel: residual_encoder_unet_forward.22
= control target key start
LH: loop header
LB: loop body
LE: loop exit
PB: predicated region body
PF: predicated region fallthrough
CT: control target
= control target key end

     0   :  { %s1043_s18 = smov 0   ;;  %s1215_s0 = inlined_call_operand.vmem [shape: bf16[2,32,38], index: 0, kind: input, shape index: {}]   ;;  %s1216_s1 = inlined_call_operand.vmem [shape: bf16[32,288], index: 1, kind: input, shape index: {}]   ;;  %s1217_s2 = inlined_call_operand.vmem [shape: f32[32,2], index: 2, kind: input, shape index: {}]   ;;  %s1218_s3 = inlined_call_operand.vmem [shape: f32[1,24], index: 3, kind: input, shape index: {}]   ;;  %s1219_s4 = inlined_call_operand.vmem [shape: bf16[2,32,24], index: 4, kind: input, shape index: {}]   ;;  %s1220_s5 = inlined_call_operand.vmem [shape: bf16[2,32,24], index: 5, kind: output, shape index: {}]  }
   0x1 LB: > { %s871_s19 = sadd.s32 4294967295, %s998_s18   ;;  %p875_p0 = scmp.ge.s32.totalorder %s998_s18, 1  ;;  %s998_s18 = sphi %s1043_s18, %s15_s18  }
   0x2   : > { %p197_p1 = scmp.lt.s32.totalorder %s998_s18, 3 }
   0x4   : > { %p198_p2 = pnand %p875_p0, %p197_p1 }
   0x5   : > { %p230_p3 = scmp.lt.s32.totalorder (!%p198_p2), %s871_s19, 1  ;;  %s1000_s28 = smov (!%p198_p2), 96  }
   0x6   : > { %201 = sbr.rel (%p198_p2) target bundleno = 682 (0x2aa), region = 40  ;;  %s1001_s8 = smov (!%p198_p2), 127  }
   0x7   : > { %s1002_s9 = smov (!%p198_p2), 126   ;;  %s1003_s10 = smov (!%p198_p2), 122  }
   0x8   : > { %s1004_s11 = smov (!%p198_p2), 64   ;;  %s1005_s12 = smov (!%p198_p2), 121  }
   0x9   : > { %s1006_s13 = smov (!%p198_p2), 32   ;;  %s1007_s14 = smov (!%p198_p2), 116  }
   0xa   : > { %s1008_s15 = smov (!%p198_p2), 120   ;;  %s1009_s21 = smov (!%p198_p2), 115  }
   0xb   : > { %v888_v0 = vld [vmem:[%s1216_s1 + $0x18] sm:$0xf]  ;;  %v943_v1 = vld [vmem:[%s1216_s1 + $0x20] sm:$0xf0]  ;;  %v884_v3 = vld [vmem:[%s1216_s1] sm:$0xf] }
   0xc   : > { %v1057_v2 = vor.u32 %v943_v1, %v888_v0  ;;  %v940_v4 = vld [vmem:[%s1216_s1 + $0x8] sm:$0xf0]  ;;  %s1222_s19 = smov (!%p230_p3, %s871_s19), 1  ;;  %v939_v8 = vld [vmem:[%s1216_s1 + $0x4] sm:$0xf]  ;;  %s1010_s22 = smov 114  }
   0xd   : > { %v1065_v5 = vor.u32 %v940_v4, %v884_v3  ;;  %s1069_s29 = sshll.u32 %s1222_s19, 4  ;;  %v906_v9 = vld [vmem:[%s1216_s1 + $0xc] sm:$0xf0]  ;;  %v942_v11 = vld [vmem:[%s1216_s1 + $0x1c] sm:$0xf]  ;;  %vm288_vm0 = vcmask 261120  }
   0xe   : > { %270 = vrot.lane.b32.xlu1 %v1057_v2, %s1000_s28  ;;  %s234_s7 = scalar_lea.vmem %s1215_s0, %s1069_s29  ;;  %v909_v10 = vor.u32 %v939_v8, %v906_v9  ;;  %v910_v12 = vld [vmem:[%s1216_s1 + $0x24] sm:$0xf0]  ;;  %v941_v39 = vld [vmem:[%s1216_s1 + $0x10] sm:$0xf0]  ;;  %v928_v45 = vld [vmem:[%s1216_s1 + $0x20] sm:$0xf]  ;;  %s1186_s24 = scalar_lea.vmem %s1219_s4, %s1069_s29 }
   0xf   : > { %268 = vrot.lane.b32.xlu2 %v1065_v5, %s1000_s28  ;;  %v938_v6 = vld [vmem:[%s234_s7 + $0x8] sm:$0xff]  ;;  %v937_v7 = vld [vmem:[%s234_s7] sm:$0xff]  ;;  %v913_v13 = vor.u32 %v942_v11, %v910_v12  ;;  %vm630_vm1 = vcmask 195584   ;;  %s1197_s27 = scalar_lea.vmem %s1220_s5, %s1069_s29  ;;  %vm799_vm9 = vcmask 191488  }
  0x10   : > { %284 = vrot.lane.b32.xlu0 %v938_v6, %s1001_s8  ;;  %v924_v38 = vld [vmem:[%s1216_s1 + $0x8] sm:$0xf]  ;;  %v944_v46 = vld [vmem:[%s1216_s1 + $0x28] sm:$0xf0] }
  0x11   : > { %v925_v41 = vor.u32 %v941_v39, %v924_v38  ;;  %v929_v47 = vor.u32 %v944_v46, %v928_v45 }
  0x16   : > { %347 = vrot.lane.b32.xlu1 %v938_v6, %s1002_s9 }
  0x17   : > { %386 = vrot.lane.b32.xlu2 %v938_v6, %s1003_s10 }
  0x18   : > { %282 = vrot.lane.b32.xlu0 %v937_v7, %s1001_s8 }
  0x1e   : > { %384 = vrot.lane.b32.xlu1 %v937_v7, %s1003_s10 }
  0x1f   : > { %341 = vrot.lane.b32.xlu2 %v1065_v5, %s1004_s11 }
  0x20   : > { %345 = vrot.lane.b32.xlu0 %v937_v7, %s1002_s9 }
  0x26   : > { %427 = vrot.lane.b32.xlu1 %v938_v6, %s1005_s12 }
  0x27   : > { %425 = vrot.lane.b32.xlu2 %v937_v7, %s1005_s12 }
  0x28   : > { %380 = vrot.lane.b32.xlu0 %v1065_v5, %s1006_s13 }
  0x2e   : > { %382 = vrot.lane.b32.xlu1 %v1057_v2, %s1006_s13 }
  0x2f   : > { %505 = vrot.lane.b32.xlu2 %v938_v6, %s1007_s14 }
  0x30   : > { %343 = vrot.lane.b32.xlu0 %v1057_v2, %s1004_s11 }
  0x36   : > { %466 = vrot.lane.b32.xlu1 %v938_v6, %s1008_s15 }
  0x37   : > { %503 = vrot.lane.b32.xlu2 %v937_v7, %s1007_s14 }
  0x38   : > { %544 = vrot.lane.b32.xlu0 %v938_v6, %s1009_s21 }
  0x3e   : > { %499 = vrot.lane.b32.xlu1 %v909_v10, %s1004_s11 }
  0x3f   : > { %464 = vrot.lane.b32.xlu2 %v937_v7, %s1008_s15 }
  0x40   : > { %542 = vrot.lane.b32.xlu0 %v937_v7, %s1009_s21 }
  0x46   : > { %589 = vrot.lane.b32.xlu1 %v938_v6, %s1010_s22 }
  0x47   : > { %460 = vrot.lane.b32.xlu2 %v909_v10, %s1000_s28 }
  0x48   : > { %538 = vrot.lane.b32.xlu0 %v909_v10, %s1006_s13 }
  0x4e   : > { %501 = vrot.lane.b32.xlu1 %v913_v13, %s1004_s11 }
  0x4f   : > { %540 = vrot.lane.b32.xlu2 %v913_v13, %s1006_s13 }
  0x50   : > { %587 = vrot.lane.b32.xlu0 %v937_v7, %s1010_s22 }
  0x58   : > { %462 = vrot.lane.b32.xlu0 %v913_v13, %s1000_s28 }
  0x69   : > { %v269_v14 = vpop.permute.xlu2 %268 }
  0x71   : > { %v387_v15 = vpop.permute.xlu2 %386 }
  0x72   : > { %402 = vmatpush.bf16.msra.mxu3 %v387_v15 }
  0x79   : > { %v342_v16 = vpop.permute.xlu2 %341 }
  0x80   : > { %v271_v17 = vpop.permute.xlu1 %270 }
  0x81   : > { %v426_v20 = vpop.permute.xlu2 %425 }
  0x82   : > { %v285_v18 = vpop.permute.xlu0 %284 }
  0x83   : > { %301 = vmatpush.bf16.msra.mxu0 %v285_v18  ;;  %954 = vmatpush.bf16.msra.mxu1 %v285_v18 }
  0x88   : > { %v348_v19 = vpop.permute.xlu1 %347 }
  0x89   : > { %363 = vmatpush.bf16.msra.mxu2 %v348_v19  ;;  %v506_v23 = vpop.permute.xlu2 %505  ;;  %v1134_v19 = vld [vmem:[%s1218_s3] ss:$0 sm:$0xff] }
  0x8a   : > { %v283_v21 = vpop.permute.xlu0 %282 }
  0x8b   : > { %302 = vmatpush.bf16.msra.mxu0 %v283_v21  ;;  %955 = vmatpush.bf16.msra.mxu1 %v283_v21 }
  0x8e   : > { %898 = vmatmul.msk.bf16.vlgmr.msra.gmra.mxu0 %vm288_vm0, %v269_v14  ;;  %899 = vmatmul.msk.bf16.vlgmr.msra.gmra.mxu1 %vm288_vm0, %v271_v17 }
  0x8f   : > { %328 = vmatpush.bf16.msrb.mxu1 %v938_v6 }
  0x90   : > { %v385_v22 = vpop.permute.xlu1 %384 }
  0x91   : > { %403 = vmatpush.bf16.msra.mxu3 %v385_v22  ;;  %v504_v26 = vpop.permute.xlu2 %503 }
  0x92   : > { %v346_v24 = vpop.permute.xlu0 %345 }
  0x93   : > { %329 = vmatpush.bf16.msrb.mxu1 %v937_v7  ;;  %364 = vmatpush.bf16.msra.mxu2 %v346_v24 }
  0x96   : > { %902 = vmatmul.msk.bf16.vlgmr.msra.gmra.mxu2 %vm288_vm0, %v342_v16 }
  0x97   : > { %521 = vmatpush.bf16.msrb.mxu2 %v506_v23 }
  0x98   : > { %v428_v25 = vpop.permute.xlu1 %427 }
  0x99   : > { %443 = vmatpush.bf16.msrb.mxu0 %v428_v25  ;;  %v465_v31 = vpop.permute.xlu2 %464 }
  0x9a   : > { %v381_v27 = vpop.permute.xlu0 %380 }
  0x9b   : > { %522 = vmatpush.bf16.msrb.mxu2 %v504_v26  ;;  %904 = vmatmul.msk.bf16.vlgmr.msra.gmra.mxu3 %vm288_vm0, %v381_v27 }
  0x9d   : > { %444 = vmatpush.bf16.msrb.mxu0 %v426_v20  ;;  %v1011_v20 = vmov 0  }
  0x9e   : > { %900 = vmatmul.msk.bf16.vlgmr.msrb.gmra.mxu1 %vm288_vm0, %v1065_v5  ;;  %977 = vset.pattern.permute.xlu2 %v1011_v20 }
  0x9f   : > { %979 = vset.pattern.permute.xlu1 %v1011_v20  ;;  %978 = vset.pattern.permute.xlu0 %v1011_v20  ;;  %v1012_v20 = vmov 1  }
  0xa0   : > { %v383_v28 = vpop.permute.xlu1 %382  ;;  %914 = vmatmul.msk.bf16.vlgmr.msrb.gmra.mxu0 %vm288_vm0, %v909_v10 }
  0xa1   : > { %v461_v37 = vpop.permute.xlu2 %460 }
  0xa2   : > { %v344_v29 = vpop.permute.xlu0 %343 }
  0xa6   : > { %903 = vmatmul.msk.bf16.gmra.mxu2 %vm288_vm0, %v344_v29 }
  0xa8   : > { %v467_v30 = vpop.permute.xlu1 %466 }
  0xa9   : > { %482 = vmatpush.bf16.msra.mxu1 %v467_v30  ;;  %v541_v43 = vpop.permute.xlu2 %540 }
  0xaa   : > { %v545_v32 = vpop.permute.xlu0 %544 }
  0xab   : > { %905 = vmatmul.msk.bf16.gmra.mxu3 %vm288_vm0, %v383_v28 }
  0xac   : > { %560 = vmatpush.bf16.msrb.mxu3 %v545_v32 }
  0xad   : > { %483 = vmatpush.bf16.msra.mxu1 %v465_v31 }
  0xae   : > { %901 = vmatmul.msk.bf16.gmra.mxu1 %vm288_vm0, %v1057_v2 }
  0xb0   : > { %v500_v33 = vpop.permute.xlu1 %499  ;;  %915 = vmatmul.msk.bf16.gmra.mxu0 %vm288_vm0, %v913_v13 }
  0xb2   : > { %v543_v34 = vpop.permute.xlu0 %542 }
  0xb3   : > { %561 = vmatpush.bf16.msrb.mxu3 %v543_v34 }
  0xb6   : > { %918 = vmatmul.msk.bf16.vlgmr.msrb.gmra.mxu2 %vm288_vm0, %v500_v33 }
  0xb8   : > { %v590_v35 = vpop.permute.xlu1 %589 }
  0xb9   : > { %605 = vmatpush.bf16.msra.mxu0 %v590_v35 }
  0xba   : > { %v539_v36 = vpop.permute.xlu0 %538 }
  0xbb   : > { %920 = vmatmul.msk.bf16.vlgmr.msrb.gmra.mxu3 %vm288_vm0, %v539_v36 }
  0xbe   : > { %916 = vmatmul.msk.bf16.vlgmr.msra.gmra.mxu1 %vm288_vm0, %v461_v37 }
  0xc0   : > { %v502_v42 = vpop.permute.xlu1 %501 }
  0xc2   : > { %v588_v40 = vpop.permute.xlu0 %587 }
  0xc3   : > { %606 = vmatpush.bf16.msra.mxu0 %v588_v40 }
  0xc6   : > { %930 = vmatmul.msk.bf16.vlgmr.msra.gmra.mxu0 %vm288_vm0, %v925_v41  ;;  %919 = vmatmul.msk.bf16.gmra.mxu2 %vm288_vm0, %v502_v42 }
  0xca   : > { %v463_v44 = vpop.permute.xlu0 %462 }
  0xcb   : > { %921 = vmatmul.msk.bf16.gmra.mxu3 %vm288_vm0, %v541_v43 }
  0xce   : > { %917 = vmatmul.msk.bf16.gmra.mxu1 %vm288_vm0, %v463_v44 }
  0xd6   : > { %931 = vmatmul.msk.bf16.gmra.mxu0 %vm288_vm0, %v929_v47 }
 0x10b   : > { %v304_v48 = vpop.f32.mrf.mxu0  ;;  %v309_v49 = vpop.f32.mrf.mxu1 }
 0x113   : > { %v306_v50 = vpop.f32.mrf.mxu0  ;;  %v311_v51 = vpop.f32.mrf.mxu1 }
 0x119   : > { %v366_v52 = vpop.f32.mrf.mxu2 }
 0x11b   : > { %v331_v53 = vpop.f32.mrf.mxu1 }
 0x11c   : > { %v332_v63 = vadd.f32 %v331_v53, %v304_v48 }
 0x11d   : > { %v446_v54 = vpop.f32.mrf.mxu0 }
 0x11e   : > { %v405_v55 = vpop.f32.mrf.mxu3  ;;  %v376_v2 = vadd.f32 %v366_v52, %v332_v63 }
 0x120   : > { %v415_v5 = vadd.f32 %v405_v55, %v376_v2 }
 0x121   : > { %v368_v56 = vpop.f32.mrf.mxu2 }
 0x122   : > { %v456_v8 = vadd.f32 %v446_v54, %v415_v5 }
 0x123   : > { %v333_v57 = vpop.f32.mrf.mxu1 }
 0x124   : > { %v334_v6 = vadd.f32 %v333_v57, %v306_v50 }
 0x125   : > { %v448_v59 = vpop.f32.mrf.mxu0 }
 0x126   : > { %v407_v58 = vpop.f32.mrf.mxu3  ;;  %v377_v9 = vadd.f32 %v368_v56, %v334_v6 }
 0x128   : > { %v416_v14 = vadd.f32 %v407_v58, %v377_v9 }
 0x129   : > { %v371_v60 = vpop.f32.mrf.mxu2 }
 0x12a   : > { %v457_v21 = vadd.f32 %v448_v59, %v416_v14 }
 0x12b   : > { %v336_v61 = vpop.f32.mrf.mxu1 }
 0x12c   : > { %v337_v15 = vadd.f32 %v336_v61, %v309_v49 }
 0x12d   : > { %v451_v1 = vpop.f32.mrf.mxu0 }
 0x12e   : > { %v410_v62 = vpop.f32.mrf.mxu3  ;;  %v378_v22 = vadd.f32 %v371_v60, %v337_v15 }
 0x130   : > { %v417_v29 = vadd.f32 %v410_v62, %v378_v22  ;;  %v723_v62 = vld [vmem:[%s1217_s2] sm:$0xff] }
 0x131   : > { %v373_v0 = vpop.f32.mrf.mxu2 }
 0x132   : > { %v458_v35 = vadd.f32 %v451_v1, %v417_v29 }
 0x133   : > { %v338_v3 = vpop.f32.mrf.mxu1 }
 0x134   : > { %v339_v30 = vadd.f32 %v338_v3, %v311_v51 }
 0x135   : > { %v453_v10 = vpop.f32.mrf.mxu0 }
 0x136   : > { %v412_v4 = vpop.f32.mrf.mxu3  ;;  %v379_v36 = vadd.f32 %v373_v0, %v339_v30 }
 0x138   : > { %v418_v43 = vadd.f32 %v412_v4, %v379_v36 }
 0x139   : > { %v524_v7 = vpop.f32.mrf.mxu2 }
 0x13a   : > { %v459_v47 = vadd.f32 %v453_v10, %v418_v43 }
 0x13b   : > { %v485_v11 = vpop.f32.mrf.mxu1 }
 0x13c   : > { %v495_v12 = vadd.f32 %v485_v11, %v456_v8 }
 0x13e   : > { %v563_v13 = vpop.f32.mrf.mxu3  ;;  %v534_v16 = vadd.f32 %v524_v7, %v495_v12 }
 0x140   : > { %v573_v17 = vadd.f32 %v563_v13, %v534_v16 }
 0x141   : > { %v526_v18 = vpop.f32.mrf.mxu2 }
 0x143   : > { %v608_v23 = vpop.f32.mrf.mxu0  ;;  %v487_v24 = vpop.f32.mrf.mxu1 }
 0x144   : > { %v618_v25 = vadd.f32 %v608_v23, %v573_v17  ;;  %v496_v26 = vadd.f32 %v487_v24, %v457_v21  ;;  %v725_v17 = vld [vmem:[%s1217_s2 + $0x10] sm:$0xff]  ;;  %v724_v21 = vld [vmem:[%s1217_s2 + $0x8] sm:$0xff] }
 0x146   : > { %v565_v27 = vpop.f32.mrf.mxu3  ;;  %v626_v28 = vmul.f32 %v1134_v19, %v618_v25  ;;  %v535_v31 = vadd.f32 %v526_v18, %v496_v26  ;;  %v726_v18 = vld [vmem:[%s1217_s2 + $0x18] sm:$0xff] }
 0x148   : > { %v631_v32 = vsel %vm630_vm1, %v626_v28, 0.0  ;;  %v574_v33 = vadd.f32 %v565_v27, %v535_v31 }
 0x149   : > { %632 = vadd.xlane.f32.xlu1 %v631_v32  ;;  %v529_v34 = vpop.f32.mrf.mxu2 }
 0x14b   : > { %v610_v37 = vpop.f32.mrf.mxu0  ;;  %v490_v38 = vpop.f32.mrf.mxu1 }
 0x14c   : > { %v619_v39 = vadd.f32 %v610_v37, %v574_v33  ;;  %v497_v40 = vadd.f32 %v490_v38, %v458_v35 }
 0x14e   : > { %v568_v41 = vpop.f32.mrf.mxu3  ;;  %v627_v42 = vmul.f32 %v1134_v19, %v619_v39  ;;  %v536_v44 = vadd.f32 %v529_v34, %v497_v40 }
 0x150   : > { %v634_v45 = vsel %vm630_vm1, %v627_v42, 0.0  ;;  %v575_v46 = vadd.f32 %v568_v41, %v536_v44 }
 0x151   : > { %635 = vadd.xlane.f32.xlu2 %v634_v45  ;;  %v531_v51 = vpop.f32.mrf.mxu2 }
 0x153   : > { %v613_v48 = vpop.f32.mrf.mxu0  ;;  %v492_v49 = vpop.f32.mrf.mxu1 }
 0x154   : > { %v620_v50 = vadd.f32 %v613_v48, %v575_v46  ;;  %v498_v52 = vadd.f32 %v492_v49, %v459_v47 }
 0x156   : > { %v628_v53 = vmul.f32 %v1134_v19, %v620_v50  ;;  %v537_v54 = vadd.f32 %v531_v51, %v498_v52  ;;  %v570_v55 = vpop.f32.mrf.mxu3  ;;  %v946_v51 = vld [vmem:[%s1186_s24] sm:$0xff]  }
 0x158   : > { %v637_v56 = vsel %vm630_vm1, %v628_v53, 0.0  ;;  %v576_v57 = vadd.f32 %v570_v55, %v537_v54  ;;  %v947_v54 = vunpack.c.l.bf16 %v946_v51 }
 0x159   : > { %638 = vadd.xlane.f32.xlu0 %v637_v56 }
 0x15b   : > { %v615_v58 = vpop.f32.mrf.mxu0 }
 0x15c   : > { %v621_v59 = vadd.f32 %v615_v58, %v576_v57 }
 0x15e   : > { %v629_v60 = vmul.f32 %v1134_v19, %v621_v59 }
 0x160   : > { %v640_v61 = vsel %vm630_vm1, %v629_v60, 0.0 }
 0x161   : > { %641 = vadd.xlane.f32.xlu2 %v640_v61 }
 0x179   : > { %729 = vperm.xlu2 %977, %v723_v62  }
 0x1bc   : > { %v633_v63 = vpop.xlane.xlu1 %632 }
 0x1bd   : > { %v643_v0 = vmul.f32 0.0625, %v633_v63 }
 0x1bf   : > { %v1147_v1 = vsub.f32 %v618_v25, %v643_v0 }
 0x1c1   : > { %v651_v2 = vmul.f32 %v1147_v1, %v1147_v1 }
 0x1c3   : > { %v655_v3 = vmul.f32 %v1134_v19, %v651_v2 }
 0x1c4   : > { %v636_v4 = vpop.xlane.xlu2 %635 }
 0x1c5   : > { %v644_v5 = vmul.f32 0.0625, %v636_v4  ;;  %v659_v6 = vsel %vm630_vm1, %v655_v3, 0.0 }
 0x1c6   : > { %660 = vadd.xlane.f32.xlu1 %v659_v6 }
 0x1c7   : > { %v1153_v7 = vsub.f32 %v619_v39, %v644_v5 }
 0x1c9   : > { %v652_v8 = vmul.f32 %v1153_v7, %v1153_v7 }
 0x1cb   : > { %v656_v9 = vmul.f32 %v1134_v19, %v652_v8 }
 0x1cc   : > { %v639_v10 = vpop.xlane.xlu0 %638 }
 0x1cd   : > { %v645_v11 = vmul.f32 0.0625, %v639_v10  ;;  %v662_v12 = vsel %vm630_vm1, %v656_v9, 0.0 }
 0x1ce   : > { %663 = vadd.xlane.f32.xlu2 %v662_v12 }
 0x1cf   : > { %v1159_v13 = vsub.f32 %v620_v50, %v645_v11 }
 0x1d1   : > { %v653_v14 = vmul.f32 %v1159_v13, %v1159_v13 }
 0x1d3   : > { %v657_v15 = vmul.f32 %v1134_v19, %v653_v14 }
 0x1d4   : > { %v642_v22 = vpop.xlane.xlu2 %641 }
 0x1d5   : > { %v665_v16 = vsel %vm630_vm1, %v657_v15, 0.0  ;;  %v646_v23 = vmul.f32 0.0625, %v642_v22 }
 0x1d6   : > { %666 = vadd.xlane.f32.xlu0 %v665_v16 }
 0x1d7   : > { %v1174_v24 = vsub.f32 %v621_v59, %v646_v23 }
 0x1d9   : > { %v654_v25 = vmul.f32 %v1174_v24, %v1174_v24 }
 0x1db   : > { %v658_v26 = vmul.f32 %v1134_v19, %v654_v25 }
 0x1dc   : > { %v730_v28 = vpop.permute.xlu2 %729 }
 0x1dd   : > { %v668_v27 = vsel %vm630_vm1, %v658_v26, 0.0 }
 0x1df   : > { %739 = vperm.xlu1 %979, %v725_v17  }
 0x1e6   : > { %744 = vperm.xlu2 %977, %v726_v18  }
 0x1e7   : > { %980 = vset.pattern.permute.xlu1 %v1012_v20 }
 0x1e8   : > { %752 = vperm.xlu1 %980, %v723_v62   ;;  %v948_v62 = vunpack.c.h.bf16 %v946_v51 }
 0x1ea   : > { %734 = vperm.xlu0 %978, %v724_v21  }
 0x1ee   : > { %981 = vset.pattern.permute.xlu2 %v1012_v20 }
 0x1ef   : > { %756 = vperm.xlu2 %981, %v724_v21  }
 0x1f2   : > { %982 = vset.pattern.permute.xlu0 %v1012_v20 }
 0x1f7   : > { %764 = vperm.xlu2 %981, %v726_v18  }
 0x212   : > { %669 = vadd.xlane.f32.xlu1 %v668_v27 }
 0x22b   : > { %760 = vperm.xlu1 %980, %v725_v17  }
 0x239   : > { %v661_v29 = vpop.xlane.xlu1 %660 }
 0x23a   : > { %v671_v30 = vmul.f32 0.0625, %v661_v29 }
 0x23c   : > { %v675_v31 = vadd.f32 1e-05, %v671_v30 }
 0x23e   : > { %984 = vrsqrt.f32 %v675_v31  ;;  %vm685_vm3 = vweird.f32 %v675_v31 }
 0x241   : > { %v664_v32 = vpop.xlane.xlu2 %663 }
 0x242   : > { %v672_v33 = vmul.f32 0.0625, %v664_v32 }
 0x244   : > { %v985_v34 = vpop.eup %984  ;;  %v676_v35 = vadd.f32 1e-05, %v672_v33 }
 0x245   : > { %v680_v36 = vmul.f32 %v985_v34, %v675_v31  ;;  %vm686_vm2 = vweird.f32 %v985_v34 }
 0x246   : > { %986 = vrsqrt.f32 %v676_v35  ;;  %vm687_vm4 = vmor %vm685_vm3, %vm686_vm2  ;;  %vm695_vm6 = vweird.f32 %v676_v35 }
 0x247   : > { %v681_v37 = vmul.f32 %v985_v34, %v680_v36 }
 0x249   : > { %v682_v38 = vmul.f32 0.5, %v681_v37  ;;  %v667_v47 = vpop.xlane.xlu0 %666  ;;  %v1188_v48 = vpop.permute.xlu2 %744 }
 0x24b   : > { %v683_v39 = vsub.f32 1.5, %v682_v38 }
 0x24c   : > { %v987_v19 = vpop.eup %986 }
 0x24d   : > { %v690_v40 = vmul.f32 %v987_v19, %v676_v35  ;;  %v684_v41 = vmul.f32 %v985_v34, %v683_v39  ;;  %vm696_vm5 = vweird.f32 %v987_v19 }
 0x24e   : > { %vm697_vm7 = vmor %vm695_vm6, %vm696_vm5 }
 0x24f   : > { %v691_v42 = vmul.f32 %v987_v19, %v690_v40  ;;  %v688_v45 = vsel %vm687_vm4, %v985_v34, %v684_v41 }
 0x250   : > { %v719_v49 = vmul.f32 %v688_v45, %v1147_v1 }
 0x251   : > { %v692_v43 = vmul.f32 0.5, %v691_v42  ;;  %v1180_v44 = vpop.permute.xlu1 %739  ;;  %v757_v59 = vpop.permute.xlu2 %756 }
 0x252   : > { %v747_v53 = vmul.f32 %v730_v28, %v719_v49  ;;  %v953_v28 = vld [vmem:[%s1186_s24 + $0x8] sm:$0xff]  }
 0x253   : > { %v693_v46 = vsub.f32 1.5, %v692_v43  ;;  %v951_v32 = vunpack.c.l.bf16 %v953_v28  ;;  %v952_v37 = vunpack.c.h.bf16 %v953_v28 }
 0x255   : > { %v694_v50 = vmul.f32 %v987_v19, %v693_v46 }
 0x257   : > { %v698_v52 = vsel %vm697_vm7, %v987_v19, %v694_v50 }
 0x258   : > { %v720_v57 = vmul.f32 %v698_v52, %v1153_v7  ;;  %v673_v7 = vmul.f32 0.0625, %v667_v47 }
 0x259   : > { %v765_v38 = vpop.permute.xlu2 %764 }
 0x25a   : > { %v753_v55 = vpop.permute.xlu1 %752  ;;  %v677_v8 = vadd.f32 1e-05, %v673_v7 }
 0x25b   : > { %v767_v56 = vadd.f32 %v753_v55, %v747_v53 }
 0x25c   : > { %v735_v58 = vpop.permute.xlu0 %734  ;;  %988 = vrsqrt.f32 %v677_v8  ;;  %vm705_vm12 = vweird.f32 %v677_v8 }
 0x25d   : > { %v779_v60 = vadd.f32 %v947_v54, %v767_v56  ;;  %v748_v61 = vmul.f32 %v735_v58, %v720_v57 }
 0x25f   : > { %vm783_vm8 = vcmp.ge.f32.partialorder %v779_v60, 0.0  ;;  %v787_v63 = vmul.f32 0.01, %v779_v60  ;;  %v768_v0 = vadd.f32 %v757_v59, %v748_v61 }
 0x261   : > { %v791_v1 = vsel %vm783_vm8, %v779_v60, %v787_v63  ;;  %v780_v2 = vadd.f32 %v948_v62, %v768_v0 }
 0x262   : > { %v795_v3 = vpack.c.bf16 %v791_v1, %v791_v1  ;;  %v989_v9 = vpop.eup %988 }
 0x263   : > { %vm784_vm10 = vcmp.ge.f32.partialorder %v780_v2, 0.0  ;;  %v788_v4 = vmul.f32 0.01, %v780_v2  ;;  %v700_v10 = vmul.f32 %v989_v9, %v677_v8  ;;  %vm706_vm11 = vweird.f32 %v989_v9 }
 0x264   : > { %800 = vst.msk [vmem:[%s1197_s27] sm:$0xf] %vm799_vm9, %v795_v3  ;;  %vm707_vm13 = vmor %vm705_vm12, %vm706_vm11 }
 0x265   : > { %v792_v5 = vsel %vm784_vm10, %v780_v2, %v788_v4  ;;  %v701_v11 = vmul.f32 %v989_v9, %v700_v10 }
 0x266   : > { %v796_v6 = vpack.c.bf16 %v792_v5, %v792_v5 }
 0x267   : > { %v702_v16 = vmul.f32 0.5, %v701_v11 }
 0x268   : > { %801 = vst.msk [vmem:[%s1197_s27 + $0x4] sm:$0xf] %vm799_vm9, %v796_v6 }
 0x269   : > { %v703_v17 = vsub.f32 1.5, %v702_v16 }
 0x26b   : > { %v704_v20 = vmul.f32 %v989_v9, %v703_v17 }
 0x26d   : > { %v708_v23 = vsel %vm707_vm13, %v989_v9, %v704_v20 }
 0x26e   : > { %v721_v27 = vmul.f32 %v708_v23, %v1159_v13 }
 0x270   : > { %v749_v31 = vmul.f32 %v1180_v44, %v721_v27 }
 0x285   : > { %v670_v12 = vpop.xlane.xlu1 %669 }
 0x286   : > { %v674_v14 = vmul.f32 0.0625, %v670_v12 }
 0x288   : > { %v678_v15 = vadd.f32 1e-05, %v674_v14 }
 0x28a   : > { %990 = vrsqrt.f32 %v678_v15  ;;  %vm715_vm15 = vweird.f32 %v678_v15 }
 0x290   : > { %v991_v18 = vpop.eup %990 }
 0x291   : > { %v710_v21 = vmul.f32 %v991_v18, %v678_v15  ;;  %vm716_vm14 = vweird.f32 %v991_v18 }
 0x292   : > { %vm717_vm0 = vmor %vm715_vm15, %vm716_vm14 }
 0x293   : > { %v711_v22 = vmul.f32 %v991_v18, %v710_v21 }
 0x295   : > { %v712_v25 = vmul.f32 0.5, %v711_v22 }
 0x297   : > { %v713_v26 = vsub.f32 1.5, %v712_v25 }
 0x299   : > { %v714_v29 = vmul.f32 %v991_v18, %v713_v26 }
 0x29b   : > { %v718_v30 = vsel %vm717_vm0, %v991_v18, %v714_v29 }
 0x29c   : > { %v722_v33 = vmul.f32 %v718_v30, %v1174_v24 }
 0x29d   : > { %v761_v34 = vpop.permute.xlu1 %760 }
 0x29e   : > { %v769_v35 = vadd.f32 %v761_v34, %v749_v31  ;;  %v750_v36 = vmul.f32 %v1188_v48, %v722_v33 }
 0x2a0   : > { %v781_v39 = vadd.f32 %v951_v32, %v769_v35  ;;  %v770_v13 = vadd.f32 %v765_v38, %v750_v36 }
 0x2a2   : > { %vm785_vm1 = vcmp.ge.f32.partialorder %v781_v39, 0.0  ;;  %v789_v19 = vmul.f32 0.01, %v781_v39  ;;  %v782_v40 = vadd.f32 %v952_v37, %v770_v13 }
 0x2a4   : > { %v793_v41 = vsel %vm785_vm1, %v781_v39, %v789_v19  ;;  %vm786_vm2 = vcmp.ge.f32.partialorder %v782_v40, 0.0  ;;  %v790_v42 = vmul.f32 0.01, %v782_v40 }
 0x2a5   : > { %v797_v43 = vpack.c.bf16 %v793_v41, %v793_v41 }
 0x2a6   : > { %v794_v44 = vsel %vm786_vm2, %v782_v40, %v790_v42 }
 0x2a7   : > { %802 = vst.msk [vmem:[%s1197_s27 + $0x8] sm:$0xf] %vm799_vm9, %v797_v43  ;;  %v798_v24 = vpack.c.bf16 %v794_v44, %v794_v44 }
 0x2a9   : > { %803 = vst.msk [vmem:[%s1197_s27 + $0xc] sm:$0xf] %vm799_vm9, %v798_v24 }
 0x2aa PF: > { %s15_s18 = sadd.s32 1, %s998_s18  }
 0x2ab   : > { %p12_p4 = scmp.ge.s32.totalorder %s15_s18, 4  }
 0x2ad   :  { %14 = sbr.rel (!%p12_p4) target bundleno = 1 (0x1), region = 73 }

// kernel: residual_encoder_unet_forward.25
= control target key start
LH: loop header
LB: loop body
LE: loop exit
PB: predicated region body
PF: predicated region fallthrough
CT: control target
= control target key end

     0   :  { %s319_s9 = smov 0   ;;  %s342_s0 = inlined_call_operand.vmem [shape: bf16[2,16,64], index: 0, kind: input, shape index: {}]   ;;  %s343_s1 = inlined_call_operand.vmem [shape: bf16[32,16], index: 1, kind: input, shape index: {}]   ;;  %s344_s2 = inlined_call_operand.vmem [shape: bf16[2,32,64], index: 2, kind: output, shape index: {}]  }
   0x1 LB: > { %s257_s10 = sadd.s32 4294967295, %s302_s9   ;;  %p261_p0 = scmp.ge.s32.totalorder %s302_s9, 1  ;;  %s302_s9 = sphi %s319_s9, %s12_s9  }
   0x2   : > { %p112_p1 = scmp.lt.s32.totalorder %s302_s9, 3 }
   0x4   : > { %p113_p2 = pnand %p261_p0, %p112_p1 }
   0x5   : > { %p134_p3 = scmp.lt.s32.totalorder (!%p113_p2), %s257_s10, 1 }
   0x6   : > { %116 = sbr.rel (%p113_p2) target bundleno = 156 (0x9c), region = 28 }
   0xb   : > { %s346_s10 = smov (!%p134_p3, %s257_s10), 1  ;;  %v285_v1 = vld [vmem:[%s343_s1] sm:$0xff]  ;;  %v286_v2 = vld [vmem:[%s343_s1 + $0x8] sm:$0xff]  ;;  %vm167_vm0 = vcmask 130048   ;;  %vm197_vm1 = vcmask 519168  }
   0xc   : > { %s282_s11 = sshll.u32 %s346_s10, 3  ;;  %s283_s19 = sshll.u32 %s346_s10, 4 }
   0xd   : > { %s138_s14 = scalar_lea.vmem %s342_s0, %s282_s11  ;;  %s143_s22 = scalar_lea.vmem %s344_s2, %s283_s19 }
   0xe   : > { %v284_v0 = vld [vmem:[%s138_s14] sm:$0xff] }
   0xf   : > { %181 = vmatpush.bf16.msra.mxu0 %v284_v0  ;;  %287 = vmatpush.bf16.msra.mxu1 %v284_v0 }
  0x12   : > { %278 = vmatmul.msk.bf16.vlgmr.msra.gmra.mxu0 %vm167_vm0, %v285_v1  ;;  %279 = vmatmul.msk.bf16.vlgmr.msra.gmra.mxu1 %vm167_vm0, %v286_v2 }
  0x8f   : > { %v183_v3 = vpop.f32.mrf.mxu0  ;;  %v188_v4 = vpop.f32.mrf.mxu1 }
  0x90   : > { %v193_v5 = vpack.c.bf16 %v183_v3, %v183_v3  ;;  %v195_v6 = vpack.c.bf16 %v188_v4, %v188_v4 }
  0x92   : > { %198 = vst.msk [vmem:[%s143_s22] sm:$0xf] %vm197_vm1, %v193_v5 }
  0x93   : > { %200 = vst.msk [vmem:[%s143_s22 + $0x8] sm:$0xf] %vm197_vm1, %v195_v6 }
  0x97   : > { %v185_v7 = vpop.f32.mrf.mxu0  ;;  %v190_v8 = vpop.f32.mrf.mxu1 }
  0x98   : > { %v194_v9 = vpack.c.bf16 %v185_v7, %v185_v7  ;;  %v196_v10 = vpack.c.bf16 %v190_v8, %v190_v8 }
  0x9a   : > { %199 = vst.msk [vmem:[%s143_s22 + $0x4] sm:$0xf] %vm197_vm1, %v194_v9 }
  0x9b   : > { %201 = vst.msk [vmem:[%s143_s22 + $0xc] sm:$0xf] %vm197_vm1, %v196_v10 }
  0x9c PF: > { %s12_s9 = sadd.s32 1, %s302_s9  }
  0x9d   : > { %p9_p4 = scmp.ge.s32.totalorder %s12_s9, 4  }
  0x9f   :  { %11 = sbr.rel (!%p9_p4) target bundleno = 1 (0x1), region = 58 }

// kernel: residual_encoder_unet_forward.24
= control target key start
LH: loop header
LB: loop body
LE: loop exit
PB: predicated region body
PF: predicated region fallthrough
CT: control target
= control target key end

     0   :  { %s726_s15 = smov 0   ;;  %s789_s0 = inlined_call_operand.vmem [shape: bf16[2,32,102], index: 0, kind: input, shape index: {}]   ;;  %s790_s1 = inlined_call_operand.vmem [shape: bf16[16,288], index: 1, kind: input, shape index: {}]   ;;  %s791_s2 = inlined_call_operand.vmem [shape: f32[16,2], index: 2, kind: input, shape index: {}]   ;;  %s792_s3 = inlined_call_operand.vmem [shape: f32[1,80], index: 3, kind: input, shape index: {}]   ;;  %s793_s4 = inlined_call_operand.vmem [shape: bf16[2,16,80], index: 4, kind: output, shape index: {}]  }
   0x1 LB: > { %s603_s16 = sadd.s32 4294967295, %s686_s15   ;;  %p607_p0 = scmp.ge.s32.totalorder %s686_s15, 1  ;;  %s686_s15 = sphi %s726_s15, %s14_s15  }
   0x2   : > { %p162_p1 = scmp.lt.s32.totalorder %s686_s15, 3 }
   0x4   : > { %p163_p2 = pnand %p607_p0, %p162_p1 }
   0x5   : > { %p188_p3 = scmp.lt.s32.totalorder (!%p163_p2), %s603_s16, 1  ;;  %s688_s21 = smov (!%p163_p2), 96  }
   0x6   : > { %166 = sbr.rel (%p163_p2) target bundleno = 603 (0x25b), region = 36  ;;  %s689_s26 = smov (!%p163_p2), 127  }
   0x7   : > { %s690_s27 = smov (!%p163_p2), 118   ;;  %s691_s28 = smov (!%p163_p2), 126  }
   0x8   : > { %s692_s29 = smov (!%p163_p2), 64   ;;  %s693_s30 = smov (!%p163_p2), 32  }
   0x9   : > { %s694_s5 = smov (!%p163_p2), 117   ;;  %s695_s6 = smov (!%p163_p2), 108  }
   0xa   : > { %s696_s7 = smov (!%p163_p2), 116   ;;  %s697_s12 = smov (!%p163_p2), 107  }
   0xb   : > { %v614_v0 = vld [vmem:[%s790_s1] sm:$0xf]  ;;  %v648_v1 = vld [vmem:[%s790_s1 + $0x8] sm:$0xf0]  ;;  %s795_s16 = smov (!%p188_p3, %s603_s16), 1  ;;  %s698_s13 = smov 106  }
   0xc   : > { %v615_v2 = vor.u32 %v648_v1, %v614_v0  ;;  %s643_s22 = sshll.u32 %s795_s16, 4  ;;  %v647_v5 = vld [vmem:[%s790_s1 + $0x4] sm:$0xf]  ;;  %v628_v6 = vld [vmem:[%s790_s1 + $0xc] sm:$0xf0]  ;;  %vm230_vm0 = vcmask 261120  }
   0xd   : > { %s192_s25 = scalar_lea.vmem %s789_s0, %s643_s22  ;;  %v631_v7 = vor.u32 %v647_v5, %v628_v6  ;;  %v638_v29 = vld [vmem:[%s790_s1 + $0x8] sm:$0xf]  ;;  %v649_v30 = vld [vmem:[%s790_s1 + $0x10] sm:$0xf0]  ;;  %v675_v57 = vld [vmem:[%s792_s3] ss:$0 sm:$0xff] }
   0xe   : > { %212 = vrot.lane.b32.xlu1 %v615_v2, %s688_s21  ;;  %v646_v3 = vld [vmem:[%s192_s25 + $0x8] sm:$0xff]  ;;  %v645_v4 = vld [vmem:[%s192_s25] sm:$0xff]  ;;  %v639_v32 = vor.u32 %v649_v30, %v638_v29  ;;  %vm466_vm1 = vcmask 654336   ;;  %vm545_vm9 = vcmask 650240  }
   0xf   : > { %226 = vrot.lane.b32.xlu0 %v646_v3, %s689_s26  ;;  %298 = vrot.lane.b32.xlu2 %v646_v3, %s690_s27 }
  0x10   : > { %259 = vmatpush.bf16.msra.mxu1 %v646_v3 }
  0x14   : > { %260 = vmatpush.bf16.msra.mxu1 %v645_v4 }
  0x16   : > { %271 = vrot.lane.b32.xlu1 %v646_v3, %s691_s28 }
  0x17   : > { %224 = vrot.lane.b32.xlu0 %v645_v4, %s689_s26  ;;  %269 = vrot.lane.b32.xlu2 %v645_v4, %s691_s28  ;;  %s644_s26 = sshll.u32 %s795_s16, 3 }
  0x18   : > { %625 = vmatmul.msk.bf16.vlgmr.msra.gmra.mxu1 %vm230_vm0, %v615_v2 }
  0x1e   : > { %267 = vrot.lane.b32.xlu1 %v615_v2, %s692_s29 }
  0x1f   : > { %296 = vrot.lane.b32.xlu0 %v645_v4, %s690_s27  ;;  %294 = vrot.lane.b32.xlu2 %v615_v2, %s693_s30 }
  0x26   : > { %324 = vrot.lane.b32.xlu1 %v645_v4, %s694_s5 }
  0x27   : > { %326 = vrot.lane.b32.xlu0 %v646_v3, %s694_s5  ;;  %380 = vrot.lane.b32.xlu2 %v646_v3, %s695_s6 }
  0x2e   : > { %353 = vrot.lane.b32.xlu1 %v646_v3, %s696_s7 }
  0x2f   : > { %407 = vrot.lane.b32.xlu0 %v646_v3, %s697_s12  ;;  %378 = vrot.lane.b32.xlu2 %v645_v4, %s695_s6 }
  0x36   : > { %376 = vrot.lane.b32.xlu1 %v631_v7, %s692_s29  ;;  %s197_s29 = scalar_lea.vmem %s793_s4, %s644_s26 }
  0x37   : > { %405 = vrot.lane.b32.xlu0 %v645_v4, %s697_s12  ;;  %351 = vrot.lane.b32.xlu2 %v645_v4, %s696_s7 }
  0x3e   : > { %437 = vrot.lane.b32.xlu1 %v646_v3, %s698_s13 }
  0x3f   : > { %403 = vrot.lane.b32.xlu0 %v631_v7, %s693_s30  ;;  %349 = vrot.lane.b32.xlu2 %v631_v7, %s688_s21 }
  0x47   : > { %435 = vrot.lane.b32.xlu0 %v645_v4, %s698_s13 }
  0x69   : > { %v299_v8 = vpop.permute.xlu2 %298 }
  0x6a   : > { %311 = vmatpush.bf16.msra.mxu3 %v299_v8  ;;  %v513_v8 = vld [vmem:[%s791_s2] sm:$0xff] }
  0x71   : > { %v270_v9 = vpop.permute.xlu2 %269 }
  0x79   : > { %v295_v10 = vpop.permute.xlu2 %294 }
  0x80   : > { %v213_v11 = vpop.permute.xlu1 %212 }
  0x81   : > { %v227_v12 = vpop.permute.xlu0 %226  ;;  %v381_v13 = vpop.permute.xlu2 %380 }
  0x82   : > { %240 = vmatpush.bf16.msra.mxu0 %v227_v12 }
  0x88   : > { %v272_v14 = vpop.permute.xlu1 %271 }
  0x89   : > { %284 = vmatpush.bf16.msra.mxu2 %v272_v14  ;;  %v225_v15 = vpop.permute.xlu0 %224  ;;  %v379_v17 = vpop.permute.xlu2 %378 }
  0x8a   : > { %241 = vmatpush.bf16.msra.mxu0 %v225_v15 }
  0x8d   : > { %285 = vmatpush.bf16.msra.mxu2 %v270_v9  ;;  %624 = vmatmul.msk.bf16.vlgmr.msra.gmra.mxu0 %vm230_vm0, %v213_v11  ;;  %v699_v9 = vmov 0   ;;  %v514_v11 = vld [vmem:[%s791_s2 + $0x8] sm:$0xff] }
  0x8e   : > { %671 = vset.pattern.permute.xlu1 %v699_v9  ;;  %672 = vset.pattern.permute.xlu2 %v699_v9 }
  0x90   : > { %v268_v16 = vpop.permute.xlu1 %267 }
  0x91   : > { %393 = vmatpush.bf16.msrb.mxu2 %v381_v13  ;;  %v297_v18 = vpop.permute.xlu0 %296  ;;  %v352_v20 = vpop.permute.xlu2 %351 }
  0x92   : > { %626 = vmatmul.msk.bf16.vlgmr.msra.gmra.mxu2 %vm230_vm0, %v268_v16  ;;  %312 = vmatpush.bf16.msra.mxu3 %v297_v18 }
  0x95   : > { %394 = vmatpush.bf16.msrb.mxu2 %v379_v17  ;;  %627 = vmatmul.msk.bf16.vlgmr.msra.gmra.mxu3 %vm230_vm0, %v295_v10  ;;  %v262_v34 = vpop.f32.mrf.mxu1  ;;  %v700_v10 = vmov 1  }
  0x96   : > { %673 = vset.pattern.permute.xlu0 %v700_v10 }
  0x98   : > { %v325_v19 = vpop.permute.xlu1 %324 }
  0x99   : > { %v327_v21 = vpop.permute.xlu0 %326  ;;  %v350_v24 = vpop.permute.xlu2 %349 }
  0x9a   : > { %339 = vmatpush.bf16.msrb.mxu0 %v327_v21 }
  0x9d   : > { %v264_v38 = vpop.f32.mrf.mxu1 }
  0x9e   : > { %340 = vmatpush.bf16.msrb.mxu0 %v325_v19 }
  0xa0   : > { %v354_v22 = vpop.permute.xlu1 %353 }
  0xa1   : > { %366 = vmatpush.bf16.msrb.mxu1 %v354_v22  ;;  %632 = vmatmul.msk.bf16.vlgmr.msrb.gmra.mxu0 %vm230_vm0, %v631_v7  ;;  %v408_v23 = vpop.permute.xlu0 %407 }
  0xa2   : > { %420 = vmatpush.bf16.msrb.mxu3 %v408_v23 }
  0xa5   : > { %367 = vmatpush.bf16.msrb.mxu1 %v352_v20 }
  0xa8   : > { %v377_v25 = vpop.permute.xlu1 %376  ;;  %633 = vmatmul.msk.bf16.vlgmr.msrb.gmra.mxu1 %vm230_vm0, %v350_v24 }
  0xa9   : > { %634 = vmatmul.msk.bf16.vlgmr.msrb.gmra.mxu2 %vm230_vm0, %v377_v25  ;;  %v406_v26 = vpop.permute.xlu0 %405 }
  0xaa   : > { %421 = vmatpush.bf16.msrb.mxu3 %v406_v26 }
  0xb0   : > { %v438_v27 = vpop.permute.xlu1 %437 }
  0xb1   : > { %450 = vmatpush.bf16.msra.mxu0 %v438_v27  ;;  %v404_v28 = vpop.permute.xlu0 %403 }
  0xb2   : > { %635 = vmatmul.msk.bf16.vlgmr.msrb.gmra.mxu3 %vm230_vm0, %v404_v28 }
  0xb9   : > { %v436_v31 = vpop.permute.xlu0 %435 }
  0xba   : > { %451 = vmatpush.bf16.msra.mxu0 %v436_v31 }
  0xbd   : > { %640 = vmatmul.msk.bf16.vlgmr.msra.gmra.mxu0 %vm230_vm0, %v639_v32 }
 0x10a   : > { %v243_v33 = vpop.f32.mrf.mxu0 }
 0x10b   : > { %v263_v41 = vadd.f32 %v262_v34, %v243_v33 }
 0x112   : > { %v245_v36 = vpop.f32.mrf.mxu0 }
 0x113   : > { %v265_v49 = vadd.f32 %v264_v38, %v245_v36 }
 0x115   : > { %v287_v35 = vpop.f32.mrf.mxu2 }
 0x116   : > { %v292_v42 = vadd.f32 %v287_v35, %v263_v41 }
 0x118   : > { %v314_v37 = vpop.f32.mrf.mxu3 }
 0x119   : > { %v319_v44 = vadd.f32 %v314_v37, %v292_v42 }
 0x11d   : > { %v289_v40 = vpop.f32.mrf.mxu2 }
 0x11e   : > { %v342_v39 = vpop.f32.mrf.mxu0  ;;  %v293_v50 = vadd.f32 %v289_v40, %v265_v49 }
 0x11f   : > { %v347_v46 = vadd.f32 %v342_v39, %v319_v44 }
 0x120   : > { %v316_v43 = vpop.f32.mrf.mxu3 }
 0x121   : > { %v320_v53 = vadd.f32 %v316_v43, %v293_v50 }
 0x125   : > { %v369_v45 = vpop.f32.mrf.mxu1 }
 0x126   : > { %v344_v47 = vpop.f32.mrf.mxu0  ;;  %v374_v51 = vadd.f32 %v369_v45, %v347_v46 }
 0x127   : > { %v348_v55 = vadd.f32 %v344_v47, %v320_v53 }
 0x12c   : > { %v396_v48 = vpop.f32.mrf.mxu2 }
 0x12d   : > { %v401_v54 = vadd.f32 %v396_v48, %v374_v51  ;;  %v371_v58 = vpop.f32.mrf.mxu1 }
 0x12e   : > { %v375_v62 = vadd.f32 %v371_v58, %v348_v55 }
 0x134   : > { %v398_v61 = vpop.f32.mrf.mxu2 }
 0x135   : > { %v423_v52 = vpop.f32.mrf.mxu3  ;;  %v402_v1 = vadd.f32 %v398_v61, %v375_v62 }
 0x136   : > { %v428_v56 = vadd.f32 %v423_v52, %v401_v54 }
 0x13a   : > { %v453_v59 = vpop.f32.mrf.mxu0 }
 0x13b   : > { %v458_v60 = vadd.f32 %v453_v59, %v428_v56 }
 0x13d   : > { %v464_v63 = vmul.f32 %v675_v57, %v458_v60  ;;  %v425_v0 = vpop.f32.mrf.mxu3 }
 0x13e   : > { %v429_v3 = vadd.f32 %v425_v0, %v402_v1 }
 0x13f   : > { %v467_v2 = vsel %vm466_vm1, %v464_v63, 0.0 }
 0x140   : > { %468 = vadd.xlane.f32.xlu1 %v467_v2 }
 0x142   : > { %v455_v4 = vpop.f32.mrf.mxu0 }
 0x143   : > { %v459_v5 = vadd.f32 %v455_v4, %v429_v3 }
 0x145   : > { %v465_v6 = vmul.f32 %v675_v57, %v459_v5 }
 0x147   : > { %v470_v7 = vsel %vm466_vm1, %v465_v6, 0.0 }
 0x148   : > { %471 = vadd.xlane.f32.xlu2 %v470_v7 }
 0x159   : > { %517 = vperm.xlu1 %671, %v513_v8  }
 0x161   : > { %674 = vset.pattern.permute.xlu1 %v700_v10 }
 0x162   : > { %532 = vperm.xlu1 %674, %v514_v11  }
 0x1b3   : > { %v469_v12 = vpop.xlane.xlu1 %468 }
 0x1b4   : > { %v473_v13 = vmul.f32 0.015625, %v469_v12 }
 0x1b6   : > { %v475_v14 = vsub.f32 %v458_v60, %v473_v13 }
 0x1b8   : > { %v477_v15 = vmul.f32 %v475_v14, %v475_v14 }
 0x1ba   : > { %v479_v16 = vmul.f32 %v675_v57, %v477_v15 }
 0x1bb   : > { %v472_v17 = vpop.xlane.xlu2 %471 }
 0x1bc   : > { %v474_v18 = vmul.f32 0.015625, %v472_v17  ;;  %v481_v19 = vsel %vm466_vm1, %v479_v16, 0.0 }
 0x1bd   : > { %482 = vadd.xlane.f32.xlu0 %v481_v19 }
 0x1be   : > { %v476_v20 = vsub.f32 %v459_v5, %v474_v18 }
 0x1c0   : > { %v478_v21 = vmul.f32 %v476_v20, %v476_v20 }
 0x1c2   : > { %v480_v22 = vmul.f32 %v675_v57, %v478_v21 }
 0x1c4   : > { %v484_v23 = vsel %vm466_vm1, %v480_v22, 0.0 }
 0x1c5   : > { %485 = vadd.xlane.f32.xlu2 %v484_v23 }
 0x1cb   : > { %v518_v40 = vpop.permute.xlu1 %517 }
 0x1d1   : > { %528 = vperm.xlu0 %673, %v513_v8  }
 0x1d4   : > { %v533_v54 = vpop.permute.xlu1 %532 }
 0x1dd   : > { %522 = vperm.xlu2 %672, %v514_v11  }
 0x230   : > { %v483_v24 = vpop.xlane.xlu0 %482 }
 0x231   : > { %v487_v25 = vmul.f32 0.015625, %v483_v24 }
 0x233   : > { %v489_v26 = vadd.f32 1e-05, %v487_v25 }
 0x235   : > { %676 = vrsqrt.f32 %v489_v26  ;;  %vm497_vm3 = vweird.f32 %v489_v26 }
 0x238   : > { %v486_v27 = vpop.xlane.xlu2 %485 }
 0x239   : > { %v488_v28 = vmul.f32 0.015625, %v486_v27 }
 0x23b   : > { %v677_v29 = vpop.eup %676  ;;  %v490_v30 = vadd.f32 1e-05, %v488_v28 }
 0x23c   : > { %v492_v31 = vmul.f32 %v677_v29, %v489_v26  ;;  %vm498_vm2 = vweird.f32 %v677_v29 }
 0x23d   : > { %678 = vrsqrt.f32 %v490_v30  ;;  %vm499_vm4 = vmor %vm497_vm3, %vm498_vm2  ;;  %vm507_vm6 = vweird.f32 %v490_v30 }
 0x23e   : > { %v493_v32 = vmul.f32 %v677_v29, %v492_v31 }
 0x240   : > { %v494_v33 = vmul.f32 0.5, %v493_v32  ;;  %v523_v50 = vpop.permute.xlu2 %522 }
 0x242   : > { %v495_v34 = vsub.f32 1.5, %v494_v33 }
 0x243   : > { %v679_v35 = vpop.eup %678  ;;  %v529_v43 = vpop.permute.xlu0 %528 }
 0x244   : > { %v502_v36 = vmul.f32 %v679_v35, %v490_v30  ;;  %v496_v37 = vmul.f32 %v677_v29, %v495_v34  ;;  %vm508_vm5 = vweird.f32 %v679_v35 }
 0x245   : > { %vm509_vm8 = vmor %vm507_vm6, %vm508_vm5 }
 0x246   : > { %v503_v38 = vmul.f32 %v679_v35, %v502_v36  ;;  %v500_v39 = vsel %vm499_vm4, %v677_v29, %v496_v37 }
 0x247   : > { %v511_v41 = vmul.f32 %v500_v39, %v475_v14 }
 0x248   : > { %v504_v42 = vmul.f32 0.5, %v503_v38 }
 0x249   : > { %v525_v44 = vmul.f32 %v518_v40, %v511_v41 }
 0x24a   : > { %v505_v45 = vsub.f32 1.5, %v504_v42 }
 0x24b   : > { %v535_v46 = vadd.f32 %v529_v43, %v525_v44 }
 0x24c   : > { %v506_v47 = vmul.f32 %v679_v35, %v505_v45 }
 0x24d   : > { %vm537_vm7 = vcmp.ge.f32.partialorder %v535_v46, 0.0  ;;  %v539_v48 = vmul.f32 0.01, %v535_v46 }
 0x24e   : > { %v510_v49 = vsel %vm509_vm8, %v679_v35, %v506_v47 }
 0x24f   : > { %v541_v51 = vsel %vm537_vm7, %v535_v46, %v539_v48  ;;  %v512_v52 = vmul.f32 %v510_v49, %v476_v20 }
 0x250   : > { %v543_v53 = vpack.c.bf16 %v541_v51, %v541_v51 }
 0x251   : > { %v526_v55 = vmul.f32 %v523_v50, %v512_v52 }
 0x252   : > { %546 = vst.msk [vmem:[%s197_s29] sm:$0xf] %vm545_vm9, %v543_v53 }
 0x253   : > { %v536_v56 = vadd.f32 %v533_v54, %v526_v55 }
 0x255   : > { %vm538_vm10 = vcmp.ge.f32.partialorder %v536_v56, 0.0  ;;  %v540_v57 = vmul.f32 0.01, %v536_v56 }
 0x257   : > { %v542_v58 = vsel %vm538_vm10, %v536_v56, %v540_v57 }
 0x258   : > { %v544_v59 = vpack.c.bf16 %v542_v58, %v542_v58 }
 0x25a   : > { %547 = vst.msk [vmem:[%s197_s29 + $0x4] sm:$0xf] %vm545_vm9, %v544_v59 }
 0x25b PF: > { %s14_s15 = sadd.s32 1, %s686_s15  }
 0x25c   : > { %p11_p4 = scmp.ge.s32.totalorder %s14_s15, 4  }
 0x25e   :  { %13 = sbr.rel (!%p11_p4) target bundleno = 1 (0x1), region = 66 }

// kernel: residual_encoder_unet_forward.26
= control target key start
LH: loop header
LB: loop body
LE: loop exit
PB: predicated region body
PF: predicated region fallthrough
CT: control target
= control target key end

     0   :  { %s999_s15 = smov 0   ;;  %s1082_s0 = inlined_call_operand.vmem [shape: bf16[2,16,326], index: 0, kind: input, shape index: {}]   ;;  %s1083_s1 = inlined_call_operand.vmem [shape: bf16[8,144], index: 1, kind: input, shape index: {}]   ;;  %s1084_s2 = inlined_call_operand.vmem [shape: f32[8,2], index: 2, kind: input, shape index: {}]   ;;  %s1085_s3 = inlined_call_operand.vmem [shape: f32[1,288], index: 3, kind: input, shape index: {}]   ;;  %s1086_s4 = inlined_call_operand.vmem [shape: bf16[2,8,288], index: 4, kind: output, shape index: {}]  }
   0x1 LB: > { %s867_s16 = sadd.s32 4294967295, %s955_s15   ;;  %p871_p0 = scmp.ge.s32.totalorder %s955_s15, 1  ;;  %s955_s15 = sphi %s999_s15, %s14_s15  }
   0x2   : > { %p162_p1 = scmp.lt.s32.totalorder %s955_s15, 3 }
   0x4   : > { %p163_p2 = pnand %p871_p0, %p162_p1 }
   0x5   : > { %p188_p3 = scmp.lt.s32.totalorder (!%p163_p2), %s867_s16, 1  ;;  %s957_s23 = smov (!%p163_p2), 127  }
   0x6   : > { %166 = sbr.rel (%p163_p2) target bundleno = 656 (0x290), region = 36  ;;  %s958_s24 = smov (!%p163_p2), 126  }
   0x7   : > { %s959_s25 = smov (!%p163_p2), 112   ;;  %s960_s26 = smov (!%p163_p2), 96  }
   0x8   : > { %s961_s27 = smov (!%p163_p2), 110   ;;  %s962_s28 = smov (!%p163_p2), 80  }
   0x9   : > { %s963_s29 = smov (!%p163_p2), 109   ;;  %s964_s30 = smov (!%p163_p2), 64  }
   0xa   : > { %s965_s5 = smov (!%p163_p2), 108   ;;  %s966_s6 = smov (!%p163_p2), 92  }
   0xb   : > { %s1088_s16 = smov (!%p188_p3, %s867_s16), 1  ;;  %v1016_v0 = vld [vmem:[%s1083_s1] sm:$0xff]  ;;  %s967_s7 = smov 48   ;;  %vm234_vm0 = vcmask 130048   ;;  %vm330_vm1 = vcmask 1031168   ;;  %vm228_vm2 = vcmask 1039360  }
   0xc   : > { %s918_s17 = smul.u32 24, %s1088_s16  ;;  %v205_v7 = vunpack.c.l.b16 %v1016_v0  ;;  %s968_s8 = smov 32   ;;  %vm389_vm3 = vcmask 900096   ;;  %vm448_vm4 = vcmask 891904   ;;  %vm507_vm5 = vcmask 883712  }
   0xd   : > { %s969_s9 = smov 91   ;;  %s970_s10 = smov 16   ;;  %vm566_vm6 = vcmask 752640   ;;  %vm625_vm7 = vcmask 744448   ;;  %vm684_vm8 = vcmask 736256   ;;  %v676_v59 = vunpack.c.h.b16 %v1016_v0 }
   0xe   : > { %s192_s20 = scalar_lea.vmem %s1082_s0, %s918_s17  ;;  %v206_v10 = vpack.c.b16 %v205_v7, %v205_v7  ;;  %s971_s11 = smov 90   ;;  %vm747_vm9 = vcmask 261120  }
   0xf   : > { %v884_v1 = vld [vmem:[%s192_s20 + $0x8] sm:$0xf]  ;;  %v917_v2 = vld [vmem:[%s192_s20 + $0x10] sm:$0xf0]  ;;  %v876_v3 = vld [vmem:[%s192_s20] sm:$0xf]  ;;  %v677_v60 = vpack.c.b16 %v676_v59, %v676_v59 }
  0x10   : > { %v1018_v4 = vor.u32 %v917_v2, %v884_v1  ;;  %v916_v5 = vld [vmem:[%s192_s20 + $0x8] sm:$0xf0]  ;;  %v915_v8 = vld [vmem:[%s192_s20 + $0x4] sm:$0xf]  ;;  %v878_v9 = vld [vmem:[%s192_s20 + $0xc] sm:$0xf0] }
  0x11   : > { %v877_v6 = vor.u32 %v916_v5, %v876_v3  ;;  %v881_v11 = vor.u32 %v915_v8, %v878_v9  ;;  %s919_s18 = smul.u32 12, %s1088_s16 }
  0x12   : > { %226 = vrot.lane.b32.xlu0 %v1018_v4, %s957_s23 }
  0x13   : > { %222 = vrot.lane.b32.xlu1 %v877_v6, %s957_s23  ;;  %324 = vrot.lane.b32.xlu2 %v877_v6, %s958_s24  ;;  %s197_s21 = scalar_lea.vmem %s1086_s4, %s919_s18 }
  0x14   : > { %290 = vmatpush.bf16.msra.mxu3 %v877_v6 }
  0x17   : > { %889 = vmatmul.msk.bf16.vlgmr.msra.gmra.mxu3 %vm234_vm0, %v1016_v0 }
  0x1a   : > { %207 = vrot.lane.b32.xlu0 %v206_v10, %s959_s25 }
  0x1b   : > { %224 = vrot.lane.b32.xlu1 %v881_v11, %s957_s23  ;;  %326 = vrot.lane.b32.xlu2 %v881_v11, %s958_s24 }
  0x22   : > { %322 = vrot.lane.b32.xlu0 %v206_v10, %s960_s26 }
  0x23   : > { %328 = vrot.lane.b32.xlu1 %v1018_v4, %s958_s24  ;;  %385 = vrot.lane.b32.xlu2 %v881_v11, %s961_s27 }
  0x2a   : > { %387 = vrot.lane.b32.xlu0 %v1018_v4, %s961_s27 }
  0x2b   : > { %381 = vrot.lane.b32.xlu1 %v206_v10, %s962_s28  ;;  %383 = vrot.lane.b32.xlu2 %v877_v6, %s961_s27 }
  0x32   : > { %446 = vrot.lane.b32.xlu0 %v1018_v4, %s963_s29 }
  0x33   : > { %440 = vrot.lane.b32.xlu1 %v206_v10, %s964_s30  ;;  %442 = vrot.lane.b32.xlu2 %v877_v6, %s963_s29 }
  0x3a   : > { %444 = vrot.lane.b32.xlu0 %v881_v11, %s963_s29 }
  0x3b   : > { %501 = vrot.lane.b32.xlu1 %v877_v6, %s965_s5  ;;  %503 = vrot.lane.b32.xlu2 %v881_v11, %s965_s5 }
  0x42   : > { %560 = vrot.lane.b32.xlu0 %v877_v6, %s966_s6 }
  0x43   : > { %562 = vrot.lane.b32.xlu1 %v881_v11, %s966_s6  ;;  %499 = vrot.lane.b32.xlu2 %v206_v10, %s967_s7 }
  0x4a   : > { %558 = vrot.lane.b32.xlu0 %v206_v10, %s968_s8 }
  0x4b   : > { %505 = vrot.lane.b32.xlu1 %v1018_v4, %s965_s5  ;;  %564 = vrot.lane.b32.xlu2 %v1018_v4, %s966_s6 }
  0x52   : > { %621 = vrot.lane.b32.xlu0 %v881_v11, %s969_s9 }
  0x53   : > { %623 = vrot.lane.b32.xlu1 %v1018_v4, %s969_s9  ;;  %617 = vrot.lane.b32.xlu2 %v206_v10, %s970_s10 }
  0x5a   : > { %619 = vrot.lane.b32.xlu0 %v877_v6, %s969_s9 }
  0x5b   : > { %682 = vrot.lane.b32.xlu1 %v1018_v4, %s971_s11  ;;  %678 = vrot.lane.b32.xlu2 %v877_v6, %s971_s11 }
  0x62   : > { %680 = vrot.lane.b32.xlu0 %v881_v11, %s971_s11 }
  0x6d   : > { %v325_v12 = vpop.permute.xlu2 %324 }
  0x75   : > { %v327_v13 = vpop.permute.xlu2 %326 }
  0x76   : > { %v331_v14 = vsel %vm330_vm1, %v325_v12, %v327_v13 }
  0x7d   : > { %v386_v15 = vpop.permute.xlu2 %385 }
  0x84   : > { %v227_v16 = vpop.permute.xlu0 %226 }
  0x85   : > { %v223_v17 = vpop.permute.xlu1 %222  ;;  %271 = vmatpush.bf16.msra.mxu2 %v227_v16  ;;  %v384_v20 = vpop.permute.xlu2 %383 }
  0x86   : > { %v390_v23 = vsel %vm389_vm3, %v384_v20, %v386_v15 }
  0x89   : > { %346 = vmatpush.bf16.msrb.mxu2 %v331_v14 }
  0x8c   : > { %v208_v18 = vpop.permute.xlu0 %207 }
  0x8d   : > { %v225_v19 = vpop.permute.xlu1 %224  ;;  %888 = vmatmul.msk.bf16.vlgmr.msra.gmra.mxu2 %vm234_vm0, %v208_v18  ;;  %v443_v27 = vpop.permute.xlu2 %442 }
  0x8e   : > { %v229_v21 = vsel %vm228_vm2, %v223_v17, %v225_v19  ;;  %v230_v22 = vsel %vm228_vm2, %v225_v19, %v227_v16 }
  0x8f   : > { %245 = vmatpush.bf16.msra.mxu0 %v229_v21  ;;  %258 = vmatpush.bf16.msra.mxu1 %v230_v22 }
  0x92   : > { %886 = vmatmul.msk.bf16.vlgmr.msra.gmra.mxu0 %vm234_vm0, %v208_v18  ;;  %887 = vmatmul.msk.bf16.vlgmr.msra.gmra.mxu1 %vm234_vm0, %v208_v18 }
  0x93   : > { %303 = vmatpush.bf16.msrb.mxu0 %v881_v11  ;;  %316 = vmatpush.bf16.msrb.mxu1 %v1018_v4 }
  0x94   : > { %v323_v24 = vpop.permute.xlu0 %322 }
  0x95   : > { %v329_v25 = vpop.permute.xlu1 %328  ;;  %v504_v31 = vpop.permute.xlu2 %503 }
  0x96   : > { %v332_v26 = vsel %vm330_vm1, %v327_v13, %v329_v25 }
  0x97   : > { %405 = vmatpush.bf16.msra.mxu1 %v390_v23  ;;  %372 = vmatpush.bf16.msra.mxu0 %v329_v25 }
  0x98   : > { %359 = vmatpush.bf16.msrb.mxu3 %v332_v26 }
  0x9a   : > { %v292_v61 = vpop.f32.mrf.mxu3 }
  0x9b   : > { %893 = vmatmul.msk.bf16.vlgmr.msrb.gmra.mxu3 %vm234_vm0, %v323_v24 }
  0x9c   : > { %v388_v28 = vpop.permute.xlu0 %387 }
  0x9d   : > { %v391_v29 = vsel %vm389_vm3, %v386_v15, %v388_v28  ;;  %v382_v30 = vpop.permute.xlu1 %381  ;;  %892 = vmatmul.msk.bf16.vlgmr.msrb.gmra.mxu2 %vm234_vm0, %v323_v24  ;;  %431 = vmatpush.bf16.msra.mxu3 %v388_v28  ;;  %v500_v34 = vpop.permute.xlu2 %499 }
  0x9e   : > { %418 = vmatpush.bf16.msra.mxu2 %v391_v29 }
  0xa2   : > { %890 = vmatmul.msk.bf16.vlgmr.msrb.gmra.mxu0 %vm234_vm0, %v1016_v0  ;;  %891 = vmatmul.msk.bf16.vlgmr.msrb.gmra.mxu1 %vm234_vm0, %v1016_v0  ;;  %v294_v62 = vpop.f32.mrf.mxu3 }
  0xa4   : > { %v447_v32 = vpop.permute.xlu0 %446 }
  0xa5   : > { %v441_v33 = vpop.permute.xlu1 %440  ;;  %490 = vmatpush.bf16.msrb.mxu2 %v447_v32  ;;  %v565_v40 = vpop.permute.xlu2 %564 }
  0xab   : > { %897 = vmatmul.msk.bf16.vlgmr.msra.gmra.mxu3 %vm234_vm0, %v382_v30 }
  0xac   : > { %v445_v35 = vpop.permute.xlu0 %444 }
  0xad   : > { %v449_v36 = vsel %vm448_vm4, %v443_v27, %v445_v35  ;;  %v450_v37 = vsel %vm448_vm4, %v445_v35, %v447_v32  ;;  %v502_v38 = vpop.permute.xlu1 %501  ;;  %896 = vmatmul.msk.bf16.vlgmr.msra.gmra.mxu2 %vm234_vm0, %v382_v30  ;;  %v618_v51 = vpop.permute.xlu2 %617 }
  0xae   : > { %v508_v39 = vsel %vm507_vm5, %v502_v38, %v504_v31  ;;  %477 = vmatpush.bf16.msrb.mxu1 %v450_v37  ;;  %464 = vmatpush.bf16.msrb.mxu0 %v449_v36 }
  0xaf   : > { %523 = vmatpush.bf16.msrb.mxu3 %v508_v39 }
  0xb2   : > { %894 = vmatmul.msk.bf16.vlgmr.msra.gmra.mxu0 %vm234_vm0, %v323_v24  ;;  %895 = vmatmul.msk.bf16.vlgmr.msra.gmra.mxu1 %vm234_vm0, %v382_v30 }
  0xb4   : > { %v561_v41 = vpop.permute.xlu0 %560 }
  0xb5   : > { %v563_v42 = vpop.permute.xlu1 %562  ;;  %v679_v55 = vpop.permute.xlu2 %678 }
  0xb6   : > { %v567_v43 = vsel %vm566_vm6, %v561_v41, %v563_v42  ;;  %v568_v44 = vsel %vm566_vm6, %v563_v42, %v565_v40 }
  0xb7   : > { %582 = vmatpush.bf16.msra.mxu2 %v567_v43  ;;  %595 = vmatpush.bf16.msra.mxu3 %v568_v44 }
  0xbb   : > { %901 = vmatmul.msk.bf16.vlgmr.msrb.gmra.mxu3 %vm234_vm0, %v500_v34 }
  0xbc   : > { %v559_v45 = vpop.permute.xlu0 %558 }
  0xbd   : > { %v506_v46 = vpop.permute.xlu1 %505  ;;  %900 = vmatmul.msk.bf16.vlgmr.msrb.gmra.mxu2 %vm234_vm0, %v441_v33 }
  0xbe   : > { %v509_v47 = vsel %vm507_vm5, %v504_v31, %v506_v46  ;;  %549 = vmatpush.bf16.msra.mxu1 %v506_v46 }
  0xbf   : > { %536 = vmatpush.bf16.msra.mxu0 %v509_v47 }
  0xc2   : > { %898 = vmatmul.msk.bf16.vlgmr.msrb.gmra.mxu0 %vm234_vm0, %v441_v33  ;;  %899 = vmatmul.msk.bf16.vlgmr.msrb.gmra.mxu1 %vm234_vm0, %v441_v33 }
  0xc3   : > { %608 = vmatpush.bf16.msrb.mxu0 %v565_v40 }
  0xc4   : > { %v622_v48 = vpop.permute.xlu0 %621 }
  0xc5   : > { %v624_v49 = vpop.permute.xlu1 %623 }
  0xc6   : > { %v627_v50 = vsel %vm625_vm7, %v622_v48, %v624_v49  ;;  %667 = vmatpush.bf16.msrb.mxu3 %v624_v49 }
  0xc7   : > { %654 = vmatpush.bf16.msrb.mxu2 %v627_v50 }
  0xcb   : > { %905 = vmatmul.msk.bf16.vlgmr.msra.gmra.mxu3 %vm234_vm0, %v559_v45 }
  0xcc   : > { %v620_v52 = vpop.permute.xlu0 %619 }
  0xcd   : > { %v626_v53 = vsel %vm625_vm7, %v620_v52, %v622_v48  ;;  %904 = vmatmul.msk.bf16.vlgmr.msra.gmra.mxu2 %vm234_vm0, %v559_v45  ;;  %v683_v54 = vpop.permute.xlu1 %682 }
  0xce   : > { %641 = vmatpush.bf16.msrb.mxu1 %v626_v53  ;;  %726 = vmatpush.bf16.msra.mxu2 %v683_v54 }
  0xd2   : > { %902 = vmatmul.msk.bf16.vlgmr.msra.gmra.mxu0 %vm234_vm0, %v500_v34  ;;  %903 = vmatmul.msk.bf16.vlgmr.msra.gmra.mxu1 %vm234_vm0, %v500_v34 }
  0xd4   : > { %v681_v56 = vpop.permute.xlu0 %680 }
  0xd5   : > { %v686_v57 = vsel %vm684_vm8, %v681_v56, %v683_v54  ;;  %v685_v58 = vsel %vm684_vm8, %v679_v55, %v681_v56 }
  0xd6   : > { %713 = vmatpush.bf16.msra.mxu1 %v686_v57  ;;  %700 = vmatpush.bf16.msra.mxu0 %v685_v58 }
  0xdb   : > { %909 = vmatmul.msk.bf16.vlgmr.msrb.gmra.mxu3 %vm234_vm0, %v618_v51 }
  0xdd   : > { %908 = vmatmul.msk.bf16.vlgmr.msrb.gmra.mxu2 %vm234_vm0, %v618_v51 }
  0xe2   : > { %906 = vmatmul.msk.bf16.vlgmr.msrb.gmra.mxu0 %vm234_vm0, %v559_v45  ;;  %907 = vmatmul.msk.bf16.vlgmr.msrb.gmra.mxu1 %vm234_vm0, %v618_v51 }
  0xed   : > { %912 = vmatmul.msk.bf16.vlgmr.msra.gmra.mxu2 %vm234_vm0, %v677_v60 }
  0xf2   : > { %910 = vmatmul.msk.bf16.vlgmr.msra.gmra.mxu0 %vm234_vm0, %v677_v60  ;;  %911 = vmatmul.msk.bf16.vlgmr.msra.gmra.mxu1 %vm234_vm0, %v677_v60  ;;  %vm810_vm0 = vcmask 257024  }
 0x10f   : > { %v247_v63 = vpop.f32.mrf.mxu0  ;;  %v260_v1 = vpop.f32.mrf.mxu1 }
 0x110   : > { %v293_v2 = vadd.f32 %v292_v61, %v247_v63  ;;  %v273_v3 = vpop.f32.mrf.mxu2  ;;  %v735_v61 = vld [vmem:[%s1085_s3] sm:$0x7] }
 0x117   : > { %v249_v4 = vpop.f32.mrf.mxu0  ;;  %v262_v5 = vpop.f32.mrf.mxu1 }
 0x118   : > { %v275_v6 = vpop.f32.mrf.mxu2  ;;  %v738_v4 = vperm.slane %v735_v61, 1 }
 0x11e   : > { %v361_v7 = vpop.f32.mrf.mxu3 }
 0x11f   : > { %v305_v8 = vpop.f32.mrf.mxu0  ;;  %v318_v9 = vpop.f32.mrf.mxu1 }
 0x120   : > { %v306_v0 = vadd.f32 %v305_v8, %v260_v1  ;;  %v319_v10 = vadd.f32 %v318_v9, %v273_v3  ;;  %v348_v11 = vpop.f32.mrf.mxu2  ;;  %v737_v3 = vperm.slane %v735_v61, 0  ;;  %v739_v8 = vperm.slane %v735_v61, 2 }
 0x121   : > { %v378_v12 = vadd.f32 %v348_v11, %v293_v2 }
 0x122   : > { %v379_v13 = vadd.f32 %v361_v7, %v306_v0 }
 0x126   : > { %v363_v14 = vpop.f32.mrf.mxu3 }
 0x127   : > { %v307_v15 = vpop.f32.mrf.mxu0  ;;  %v320_v16 = vpop.f32.mrf.mxu1 }
 0x128   : > { %v350_v17 = vpop.f32.mrf.mxu2 }
 0x12e   : > { %v433_v18 = vpop.f32.mrf.mxu3 }
 0x12f   : > { %v374_v19 = vpop.f32.mrf.mxu0  ;;  %v407_v20 = vpop.f32.mrf.mxu1 }
 0x130   : > { %v420_v21 = vpop.f32.mrf.mxu2  ;;  %v380_v46 = vadd.f32 %v374_v19, %v319_v10  ;;  %v437_v47 = vadd.f32 %v407_v20, %v378_v12 }
 0x131   : > { %v438_v48 = vadd.f32 %v420_v21, %v379_v13  ;;  %v782_v21 = vld [vmem:[%s1084_s2] sm:$0xff] }
 0x132   : > { %v439_v49 = vadd.f32 %v433_v18, %v380_v46 }
 0x136   : > { %v435_v22 = vpop.f32.mrf.mxu3 }
 0x137   : > { %v376_v23 = vpop.f32.mrf.mxu0  ;;  %v409_v24 = vpop.f32.mrf.mxu1  ;;  %v972_v22 = vmov 0  }
 0x138   : > { %v422_v25 = vpop.f32.mrf.mxu2  ;;  %945 = vset.pattern.permute.xlu0 %v972_v22  ;;  %v973_v23 = vmov 1  }
 0x139   : > { %785 = vperm.xlu0 %945, %v782_v21  }
 0x13e   : > { %v525_v26 = vpop.f32.mrf.mxu3 }
 0x13f   : > { %v466_v27 = vpop.f32.mrf.mxu0  ;;  %v479_v28 = vpop.f32.mrf.mxu1 }
 0x140   : > { %v492_v29 = vpop.f32.mrf.mxu2  ;;  %v496_v51 = vadd.f32 %v466_v27, %v437_v47  ;;  %v497_v52 = vadd.f32 %v479_v28, %v438_v48 }
 0x141   : > { %v498_v53 = vadd.f32 %v492_v29, %v439_v49  ;;  %946 = vset.pattern.permute.xlu0 %v973_v23 }
 0x142   : > { %v555_v59 = vadd.f32 %v525_v26, %v496_v51  ;;  %792 = vperm.xlu0 %946, %v782_v21  }
 0x146   : > { %v527_v30 = vpop.f32.mrf.mxu3 }
 0x147   : > { %v468_v31 = vpop.f32.mrf.mxu0  ;;  %v481_v32 = vpop.f32.mrf.mxu1 }
 0x148   : > { %v494_v33 = vpop.f32.mrf.mxu2 }
 0x14e   : > { %v597_v34 = vpop.f32.mrf.mxu3 }
 0x14f   : > { %v538_v35 = vpop.f32.mrf.mxu0  ;;  %v551_v36 = vpop.f32.mrf.mxu1 }
 0x150   : > { %v584_v37 = vpop.f32.mrf.mxu2  ;;  %v556_v56 = vadd.f32 %v538_v35, %v497_v52  ;;  %v557_v58 = vadd.f32 %v551_v36, %v498_v53 }
 0x151   : > { %v614_v62 = vadd.f32 %v584_v37, %v555_v59 }
 0x152   : > { %v615_v63 = vadd.f32 %v597_v34, %v556_v56 }
 0x156   : > { %v599_v38 = vpop.f32.mrf.mxu3 }
 0x157   : > { %v540_v39 = vpop.f32.mrf.mxu0  ;;  %v553_v40 = vpop.f32.mrf.mxu1 }
 0x158   : > { %v586_v41 = vpop.f32.mrf.mxu2 }
 0x15e   : > { %v669_v42 = vpop.f32.mrf.mxu3 }
 0x15f   : > { %v610_v43 = vpop.f32.mrf.mxu0  ;;  %v643_v44 = vpop.f32.mrf.mxu1 }
 0x160   : > { %v656_v45 = vpop.f32.mrf.mxu2  ;;  %v616_v60 = vadd.f32 %v610_v43, %v557_v58  ;;  %v673_v1 = vadd.f32 %v643_v44, %v614_v62 }
 0x161   : > { %v674_v2 = vadd.f32 %v656_v45, %v615_v63 }
 0x162   : > { %v675_v7 = vadd.f32 %v669_v42, %v616_v60 }
 0x166   : > { %v671_v50 = vpop.f32.mrf.mxu3 }
 0x167   : > { %v612_v54 = vpop.f32.mrf.mxu0  ;;  %v645_v55 = vpop.f32.mrf.mxu1 }
 0x168   : > { %v658_v57 = vpop.f32.mrf.mxu2 }
 0x16f   : > { %v702_v5 = vpop.f32.mrf.mxu0  ;;  %v715_v6 = vpop.f32.mrf.mxu1 }
 0x170   : > { %v732_v9 = vadd.f32 %v702_v5, %v673_v1  ;;  %v733_v0 = vadd.f32 %v715_v6, %v674_v2  ;;  %v728_v10 = vpop.f32.mrf.mxu2 }
 0x171   : > { %v734_v11 = vadd.f32 %v728_v10, %v675_v7 }
 0x172   : > { %v743_v12 = vmul.f32 %v737_v3, %v732_v9  ;;  %v744_v13 = vmul.f32 %v738_v4, %v733_v0 }
 0x173   : > { %v745_v14 = vmul.f32 %v739_v8, %v734_v11 }
 0x174   : > { %v746_v15 = vadd.f32 %v744_v13, %v743_v12 }
 0x175   : > { %v748_v16 = vsel %vm747_vm9, %v745_v14, 0.0 }
 0x176   : > { %v749_v17 = vadd.f32 %v748_v16, %v746_v15 }
 0x177   : > { %v704_v18 = vpop.f32.mrf.mxu0  ;;  %v717_v19 = vpop.f32.mrf.mxu1 }
 0x178   : > { %v730_v20 = vpop.f32.mrf.mxu2  ;;  %750 = vadd.xlane.f32.xlu1 %v749_v17 }
 0x1ab   : > { %v786_v44 = vpop.permute.xlu0 %785 }
 0x1b4   : > { %v793_v52 = vpop.permute.xlu0 %792 }
 0x1eb   : > { %v751_v24 = vpop.xlane.xlu1 %750 }
 0x1ec   : > { %v752_v25 = vmul.f32 0.00390625, %v751_v24 }
 0x1ee   : > { %v753_v26 = vsub.f32 %v732_v9, %v752_v25  ;;  %v754_v27 = vsub.f32 %v733_v0, %v752_v25  ;;  %v755_v28 = vsub.f32 %v734_v11, %v752_v25 }
 0x1f0   : > { %v756_v29 = vmul.f32 %v753_v26, %v753_v26  ;;  %v757_v30 = vmul.f32 %v754_v27, %v754_v27  ;;  %v758_v31 = vmul.f32 %v755_v28, %v755_v28 }
 0x1f2   : > { %v759_v32 = vmul.f32 %v756_v29, %v737_v3  ;;  %v760_v33 = vmul.f32 %v757_v30, %v738_v4  ;;  %v761_v34 = vmul.f32 %v758_v31, %v739_v8 }
 0x1f4   : > { %v762_v35 = vadd.f32 %v760_v33, %v759_v32  ;;  %v763_v36 = vsel %vm747_vm9, %v761_v34, 0.0 }
 0x1f6   : > { %v764_v37 = vadd.f32 %v763_v36, %v762_v35 }
 0x1f8   : > { %765 = vadd.xlane.f32.xlu2 %v764_v37 }
 0x26b   : > { %v766_v38 = vpop.xlane.xlu2 %765 }
 0x26c   : > { %v767_v39 = vmul.f32 0.00390625, %v766_v38 }
 0x26e   : > { %v768_v40 = vadd.f32 1e-05, %v767_v39 }
 0x270   : > { %947 = vrsqrt.f32 %v768_v40  ;;  %vm775_vm11 = vweird.f32 %v768_v40 }
 0x276   : > { %v948_v41 = vpop.eup %947 }
 0x277   : > { %v770_v42 = vmul.f32 %v948_v41, %v768_v40  ;;  %vm776_vm10 = vweird.f32 %v948_v41 }
 0x278   : > { %vm777_vm12 = vmor %vm775_vm11, %vm776_vm10 }
 0x279   : > { %v771_v43 = vmul.f32 %v948_v41, %v770_v42 }
 0x27b   : > { %v772_v45 = vmul.f32 0.5, %v771_v43 }
 0x27d   : > { %v773_v46 = vsub.f32 1.5, %v772_v45 }
 0x27f   : > { %v774_v47 = vmul.f32 %v948_v41, %v773_v46 }
 0x281   : > { %v778_v48 = vsel %vm777_vm12, %v948_v41, %v774_v47 }
 0x282   : > { %v779_v49 = vmul.f32 %v778_v48, %v753_v26  ;;  %v780_v50 = vmul.f32 %v778_v48, %v754_v27  ;;  %v781_v51 = vmul.f32 %v778_v48, %v755_v28 }
 0x284   : > { %v788_v53 = vmul.f32 %v786_v44, %v779_v49  ;;  %v789_v54 = vmul.f32 %v786_v44, %v780_v50  ;;  %v790_v55 = vmul.f32 %v786_v44, %v781_v51 }
 0x286   : > { %v795_v56 = vadd.f32 %v793_v52, %v788_v53  ;;  %v796_v57 = vadd.f32 %v793_v52, %v789_v54  ;;  %v797_v58 = vadd.f32 %v793_v52, %v790_v55 }
 0x288   : > { %vm798_vm13 = vcmp.ge.f32.partialorder %v795_v56, 0.0  ;;  %vm799_vm14 = vcmp.ge.f32.partialorder %v796_v57, 0.0  ;;  %vm800_vm15 = vcmp.ge.f32.partialorder %v797_v58, 0.0  ;;  %v801_v59 = vmul.f32 0.01, %v795_v56 }
 0x289   : > { %v802_v60 = vmul.f32 0.01, %v796_v57  ;;  %v803_v61 = vmul.f32 0.01, %v797_v58 }
 0x28a   : > { %v804_v62 = vsel %vm798_vm13, %v795_v56, %v801_v59 }
 0x28b   : > { %v805_v63 = vsel %vm799_vm14, %v796_v57, %v802_v60  ;;  %v806_v1 = vsel %vm800_vm15, %v797_v58, %v803_v61 }
 0x28c   : > { %v807_v2 = vpack.c.bf16 %v805_v63, %v804_v62  ;;  %v808_v3 = vpack.c.bf16 %v806_v1, %v806_v1 }
 0x28e   : > { %809 = vst [vmem:[%s197_s21] sm:$0xff] %v807_v2 }
 0x28f   : > { %811 = vst.msk [vmem:[%s197_s21 + $0x8] sm:$0xf] %vm810_vm0, %v808_v3 }
 0x290 PF: > { %s14_s15 = sadd.s32 1, %s955_s15  }
 0x291   : > { %p11_p4 = scmp.ge.s32.totalorder %s14_s15, 4  }
 0x293   :  { %13 = sbr.rel (!%p11_p4) target bundleno = 1 (0x1), region = 66 }

// kernel: residual_encoder_unet_forward.27
= control target key start
LH: loop header
LB: loop body
LE: loop exit
PB: predicated region body
PF: predicated region fallthrough
CT: control target
= control target key end

     0   :  { %s338_s12 = smov 0   ;;  %s361_s0 = inlined_call_operand.vmem [shape: bf16[2,8,256], index: 0, kind: input, shape index: {}]   ;;  %s362_s1 = inlined_call_operand.vmem [shape: bf16[2,8], index: 1, kind: input, shape index: {}]   ;;  %s363_s2 = inlined_call_operand.vmem [shape: f32[2,1], index: 2, kind: input, shape index: {}]   ;;  %s364_s3 = inlined_call_operand.vmem [shape: f32[2,2,256], index: 3, kind: output, shape index: {}]  }
   0x1 LB: > { %s284_s13 = sadd.s32 4294967295, %s315_s12   ;;  %p288_p0 = scmp.ge.s32.totalorder %s315_s12, 1  ;;  %s315_s12 = sphi %s338_s12, %s13_s12  }
   0x2   : > { %p137_p1 = scmp.lt.s32.totalorder %s315_s12, 3 }
   0x4   : > { %p138_p2 = pnand %p288_p0, %p137_p1 }
   0x5   : > { %p161_p3 = scmp.lt.s32.totalorder (!%p138_p2), %s284_s13, 1 }
   0x6   : > { %141 = sbr.rel (%p138_p2) target bundleno = 157 (0x9d), region = 32 }
   0xb   : > { %v317_v0 = vmov 0   ;;  %v174_v1 = vld [vmem:[%s363_s2] sm:$0x3]  ;;  %s366_s13 = smov (!%p161_p3, %s284_s13), 1  ;;  %vm189_vm0 = vcmask 1043456   ;;  %vm185_vm1 = vcmask 64512  }
   0xc   : > { %308 = vset.pattern.permute.xlu0 %v317_v0  ;;  %s297_s16 = sshll.u32 %s366_s13, 3  ;;  %v173_v9 = vld [vmem:[%s362_s1] sm:$0x1]  ;;  %s298_s22 = sshll.u32 %s366_s13, 2  ;;  %vm225_vm2 = vcmask 1041408  }
   0xd   : > { %177 = vperm.xlu0 %308, %v174_v1   ;;  %s165_s19 = scalar_lea.vmem %s361_s0, %s297_s16  ;;  %s170_s25 = scalar_lea.vmem %s364_s3, %s298_s22 }
   0xe   : > { %v172_v2 = vld [vmem:[%s165_s19] sm:$0xff] }
   0xf   : > { %v181_v3 = vunpack.c.l.b16 %v172_v2  ;;  %v182_v4 = vunpack.c.h.b16 %v172_v2 }
  0x11   : > { %v183_v5 = vpack.c.b16 %v181_v3, %v181_v3  ;;  %v184_v6 = vpack.c.b16 %v182_v4, %v182_v4 }
  0x13   : > { %v191_v7 = vsel %vm189_vm0, %v183_v5, 0  ;;  %v194_v8 = vsel %vm189_vm0, %v184_v6, 0 }
  0x14   : > { %203 = vmatpush.bf16.msra.mxu0 %v191_v7  ;;  %216 = vmatpush.bf16.msra.mxu1 %v194_v8 }
  0x17   : > { %293 = vmatmul.msk.bf16.vlgmr.msra.gmra.mxu0 %vm185_vm1, %v173_v9  ;;  %294 = vmatmul.msk.bf16.vlgmr.msra.gmra.mxu1 %vm185_vm1, %v173_v9 }
  0x7f   : > { %v178_v10 = vpop.permute.xlu0 %177 }
  0x94   : > { %v205_v11 = vpop.f32.mrf.mxu0  ;;  %v218_v12 = vpop.f32.mrf.mxu1 }
  0x95   : > { %v219_v13 = vadd.f32 %v218_v12, %v178_v10  ;;  %v206_v14 = vadd.f32 %v205_v11, %v178_v10 }
  0x97   : > { %v224_v15 = vrot.slane %v219_v13, 6 }
  0x99   : > { %v226_v16 = vsel %vm225_vm2, %v206_v14, %v224_v15 }
  0x9a   : > { %228 = vst [vmem:[%s170_s25] sm:$0xf] %v226_v16 }
  0x9c   : > { %v207_v17 = vpop.f32.mrf.mxu0  ;;  %v220_v18 = vpop.f32.mrf.mxu1 }
  0x9d PF: > { %s13_s12 = sadd.s32 1, %s315_s12  }
  0x9e   : > { %p10_p4 = scmp.ge.s32.totalorder %s13_s12, 4  }
  0xa0   :  { %12 = sbr.rel (!%p10_p4) target bundleno = 1 (0x1), region = 62 }

</bundles_post_ra>
